<compile_context>
chip_gen: v7x
topology: tpu7x:2x2x1
jax: 0.10.0
libtpu: 0.0.40
codegen_flags: <defaults>
</compile_context>

<pallas_src>
import functools

import jax
import jax.numpy as jnp
from jax.experimental import pallas as pl
from jax.experimental.pallas import tpu as pltpu


# ----------------------------------------------------------------------------
# Row-tile selection: largest divisor of H whose per-step working set fits a
# VMEM budget.  The lane-dense final output block has Ht as its second-minor
# dim, so restrict to Ht % 8 == 0 or Ht == H.
# ----------------------------------------------------------------------------
def _choose_row_tile(H, W, cin, cout, last, budget_bytes=16 * 1024 * 1024):
    wp = W + 2

    def est(ht):
        b = 2 * (ht * wp * cin * 2 + 2 * wp * cin * 2)   # double-buffered body + halo rows
        b += (ht + 2) * wp * cin * 2                     # in-kernel slab
        if last:
            b += 2 * ht * wp * cin * 4                   # f32 upcast + product temporaries
            b += 3 * ht * W * 4                          # acc + double-buffered f32 output
        else:
            b += ht * wp * 3 * cin * 2                   # ky-folded (K = 3*Cin) operand
            b += ht * wp * cout * 4 + ht * W * cout * 4  # matmul result + f32 accumulator
            b += 2 * ht * W * cout * 2                   # double-buffered bf16 output
        return b

    cands = [ht for ht in range(1, H + 1)
             if H % ht == 0 and (ht % 8 == 0 or ht == H)]
    fitting = [ht for ht in cands if est(ht) <= budget_bytes]
    if fitting:
        multi = [ht for ht in fitting if H // ht >= 2]   # prefer >1 block => pipelining
        return max(multi) if multi else max(fitting)
    return min(cands)


# ----------------------------------------------------------------------------
# Kernel: 3x3 conv on one (Ht+2, W+2, Cin) padded row slab + bias + ReLU.
# ----------------------------------------------------------------------------
def _conv3x3_kernel(body_ref, halo0_ref, halo1_ref, w_ref, b_ref, o_ref, *,
                    Ht, W, Cin, Cout, apply_relu):
    # body_ref : (Ht, W+2, Cin)  bf16  rows [i*Ht, i*Ht+Ht) of the padded input
    # halo*_ref: (1,  W+2, Cin)  bf16  the 2 rows below the body block
    # w_ref    : (3, 3*Cin, Cout) bf16 taps folded as [kx, ky*Cin + c, o]
    # b_ref    : (1, Cout)        f32
    # o_ref    : (Ht, W, Cout)    bf16
    Wp = W + 2
    K = 3 * Cin
    slab = jnp.concatenate([body_ref[...], halo0_ref[...], halo1_ref[...]],
                           axis=0)                                  # (Ht+2, Wp, Cin)
    acc = jnp.zeros((Ht, W, Cout), jnp.float32)

    if K >= 16:
        # MXU path: fold the 3 ky taps into the contraction (K = 3*Cin) using
        # cheap major-dim row views concatenated on the lane axis; the kx taps
        # become 3 shifted adds of the full-width result (no patch copies).
        xcat = jnp.concatenate([slab[0:Ht], slab[1:Ht + 1], slab[2:Ht + 2]],
                               axis=-1)                             # (Ht, Wp, K)
        x2d = xcat.reshape(Ht * Wp, K)
        for kx in range(3):
            p = jnp.dot(x2d, w_ref[kx], preferred_element_type=jnp.float32)
            acc = acc + p.reshape(Ht, Wp, Cout)[:, kx:kx + W, :]
    else:
        # Tiny-Cin path (first layer, Cin == 1): K = 3 would underfill the MXU;
        # run the 9 taps as VPU multiply-accumulates on full-width rows.
        for ky in range(3):
            xk = slab[ky:ky + Ht].astype(jnp.float32)               # (Ht, Wp, Cin)
            for kx in range(3):
                wk = w_ref[kx, ky * Cin:(ky + 1) * Cin, :].astype(jnp.float32)
                p3 = jnp.zeros((Ht, Wp, Cout), jnp.float32)
                for c in range(Cin):
                    p3 = p3 + xk[:, :, c:c + 1] * wk[c]
                acc = acc + p3[:, kx:kx + W, :]

    acc = acc + b_ref[...].reshape(1, 1, Cout)
    if apply_relu:
        acc = jnp.maximum(acc, 0.0)
    o_ref[...] = acc.astype(o_ref.dtype)


# ----------------------------------------------------------------------------
# Kernel: final 3x3 conv (Cout = 1) + sigmoid, lane-dense (Ht, W) output.
# ----------------------------------------------------------------------------
def _conv3x3_sigmoid_to1_kernel(body_ref, halo0_ref, halo1_ref, w_ref, b_ref,
                                o_ref, *, Ht, W, Cin):
    # w_ref: (9, Cin) f32, row index = ky*3 + kx ; b_ref: (1, 1) f32
    # o_ref: (Ht, W) f32  (W on the lane axis -> unmasked, lane-dense stores)
    Wp = W + 2
    slab = jnp.concatenate([body_ref[...], halo0_ref[...], halo1_ref[...]],
                           axis=0)                                  # (Ht+2, Wp, Cin)
    acc = jnp.zeros((Ht, W), jnp.float32)
    for ky in range(3):
        xk = slab[ky:ky + Ht].astype(jnp.float32)                   # (Ht, Wp, Cin)
        for kx in range(3):
            t = ky * 3 + kx
            wk = w_ref[t:t + 1, :].reshape(1, 1, Cin)               # (1, 1, Cin)
            s = jnp.sum(xk * wk, axis=-1)                           # (Ht, Wp) lane reduce
            acc = acc + s[:, kx:kx + W]
    acc = acc + b_ref[...]                                          # (1, 1) broadcasts
    o_ref[...] = jax.nn.sigmoid(acc)


# ----------------------------------------------------------------------------
# One ReflectionPad2d(1) + Conv2d(3x3) + activation, NHWC.
# ----------------------------------------------------------------------------
def conv3x3_reflect(x_nhwc, w_hwio, b, *, last):
    N, H, W, Cin = x_nhwc.shape
    Cout = w_hwio.shape[-1]
    Wp = W + 2

    x_pad = jnp.pad(x_nhwc, ((0, 0), (1, 1), (1, 1), (0, 0)), mode="reflect")

    Ht = _choose_row_tile(H, W, Cin, Cout, last)
    GH = H // Ht

    # Body rows [i*Ht, i*Ht+Ht) of the padded input plus two 1-row halo fetches
    # right below -> the (Ht+2, W+2, Cin) slab this output row-block needs.
    # All plain Blocked specs => automatic double-buffered pipelining.
    body_spec = pl.BlockSpec((None, Ht, Wp, Cin), lambda n, i: (n, i, 0, 0))
    halo0_spec = pl.BlockSpec((None, 1, Wp, Cin),
                              lambda n, i: (n, (i + 1) * Ht, 0, 0))
    halo1_spec = pl.BlockSpec((None, 1, Wp, Cin),
                              lambda n, i: (n, (i + 1) * Ht + 1, 0, 0))

    cparams = pltpu.CompilerParams(
        dimension_semantics=("parallel", "parallel"),
        vmem_limit_bytes=48 * 1024 * 1024,   # headroom below v7x's 64 MiB physical VMEM
    )

    if not last:
        # Weights folded to [kx, ky*Cin + c, o] so each matmul has K = 3*Cin.
        wcat = jnp.transpose(w_hwio, (1, 0, 2, 3)).reshape(3, 3 * Cin, Cout)
        wcat = wcat.astype(jnp.bfloat16)
        b2 = b.reshape(1, Cout).astype(jnp.float32)
        kernel = functools.partial(_conv3x3_kernel, Ht=Ht, W=W, Cin=Cin,
                                   Cout=Cout, apply_relu=True)
        return pl.pallas_call(
            kernel,
            grid=(N, GH),
            in_specs=[
                body_spec, halo0_spec, halo1_spec,
                pl.BlockSpec((3, 3 * Cin, Cout), lambda n, i: (0, 0, 0)),
                pl.BlockSpec((1, Cout), lambda n, i: (0, 0)),
            ],
            out_specs=pl.BlockSpec((None, Ht, W, Cout), lambda n, i: (n, i, 0, 0)),
            out_shape=jax.ShapeDtypeStruct((N, H, W, Cout), jnp.bfloat16),
            compiler_params=cparams,
        )(x_pad, x_pad, x_pad, wcat, b2)

    # Final layer: Cout == 1.  f32 weights, VPU weighted-sum + lane reduction,
    # lane-dense (N, H, W) f32 output.
    w9 = w_hwio[:, :, :, 0].reshape(9, Cin).astype(jnp.float32)     # row = ky*3 + kx
    b2 = b.reshape(1, 1).astype(jnp.float32)
    kernel = functools.partial(_conv3x3_sigmoid_to1_kernel, Ht=Ht, W=W, Cin=Cin)
    return pl.pallas_call(
        kernel,
        grid=(N, GH),
        in_specs=[
            body_spec, halo0_spec, halo1_spec,
            pl.BlockSpec((9, Cin), lambda n, i: (0, 0)),
            pl.BlockSpec((1, 1), lambda n, i: (0, 0)),
        ],
        out_specs=pl.BlockSpec((None, Ht, W), lambda n, i: (n, i, 0)),
        out_shape=jax.ShapeDtypeStruct((N, H, W), jnp.float32),
        compiler_params=cparams,
    )(x_pad, x_pad, x_pad, w9, b2)


# ----------------------------------------------------------------------------
# L_net forward (NCHW in / NCHW out, like the PyTorch module)
# ----------------------------------------------------------------------------
def l_net_forward(x_nchw, params):
    x = jnp.transpose(x_nchw, (0, 2, 3, 1)).astype(jnp.bfloat16)    # NHWC, bf16
    for w, b in params[:-1]:
        x = conv3x3_reflect(x, w, b, last=False)                    # bf16 out
    w, b = params[-1]
    y = conv3x3_reflect(x, w, b, last=True)                         # (N, H, W) f32
    return y[:, None, :, :]                                         # (N, 1, H, W)


def init_params(num=64, key=None):
    """Deterministic synthetic weights, HWIO layout (3, 3, Cin, Cout)."""
    if key is None:
        key = jax.random.PRNGKey(42)
    chans = [(1, num), (num, num), (num, num), (num, num), (num, 1)]
    params = []
    for cin, cout in chans:
        key, wk, bk = jax.random.split(key, 3)
        fan_in = 3 * 3 * cin
        w = jax.random.normal(wk, (3, 3, cin, cout), jnp.float32) * (2.0 / fan_in) ** 0.5
        b = jax.random.normal(bk, (cout,), jnp.float32) * 0.01
        params.append((w, b))
    return params


# Pure-JAX reference (lax.conv).  bf16=True mirrors the kernel's precision
# (bf16 matmul inputs, f32 accumulation, f32 final layer); bf16=False is the
# full-f32 network used as a looser sanity bound.
def l_net_reference(x_nchw, params, *, bf16):
    x = x_nchw.astype(jnp.bfloat16) if bf16 else x_nchw
    n_layers = len(params)
    for i, (w, b) in enumerate(params):
        last = i == n_layers - 1
        xp = jnp.pad(x, ((0, 0), (0, 0), (1, 1), (1, 1)), mode="reflect")
        if bf16 and not last:
            lhs, rhs = xp, w.astype(jnp.bfloat16)
        else:
            lhs, rhs = xp.astype(jnp.float32), w
        y = jax.lax.conv_general_dilated(
            lhs, rhs, window_strides=(1, 1), padding="VALID",
            dimension_numbers=("NCHW", "HWIO", "NCHW"),
            preferred_element_type=jnp.float32)
        y = y + b.reshape(1, -1, 1, 1)
        if last:
            return jax.nn.sigmoid(y)
        x = jnp.maximum(y, 0.0)
        if bf16:
            x = x.astype(jnp.bfloat16)


if __name__ == "__main__":
    num = 64
    key = jax.random.PRNGKey(0)
    # PyTorch-style input: NCHW, 1 input channel.
    x = jax.random.uniform(key, (2, 1, 16, 16), dtype=jnp.float32)
    params = init_params(num=num)

    fwd = jax.jit(l_net_forward)
    out = jax.block_until_ready(fwd(x, params))

    ref_matched = jax.block_until_ready(l_net_reference(x, params, bf16=True))
    ref_f32 = jax.block_until_ready(l_net_reference(x, params, bf16=False))

    assert out.shape == (2, 1, 16, 16), out.shape
    err = float(jnp.max(jnp.abs(out - ref_matched)))
    err32 = float(jnp.max(jnp.abs(out - ref_f32)))
    assert err < 5e-3, f"mismatch vs precision-matched reference: {err}"
    assert err32 < 5e-2, f"mismatch vs full-f32 reference: {err32}"

    print("KERNEL_OK")
</pallas_src>

<mosaic_0001>
module attributes {stable_mosaic.version = 11 : i64} {
  func.func @_conv3x3_kernel(%arg0: i32, %arg1: i32, %arg2: memref<1x8x18x1xbf16, #tpu.memory_space<vmem>>, %arg3: memref<1x1x18x1xbf16, #tpu.memory_space<vmem>>, %arg4: memref<1x1x18x1xbf16, #tpu.memory_space<vmem>>, %arg5: memref<3x3x64xbf16, #tpu.memory_space<vmem>>, %arg6: memref<1x64xf32, #tpu.memory_space<vmem>>, %arg7: memref<1x8x16x64xbf16, #tpu.memory_space<vmem>>) attributes {dimension_semantics = [#tpu.dimension_semantics<parallel>, #tpu.dimension_semantics<parallel>], iteration_bounds = array<i64: 2, 2>, scalar_prefetch = 0 : i64, scratch_operands = 0 : i64, tpu.core_type = #tpu.core_type<tc>, window_params = [{transform_indices = @transform_0, window_bounds = array<i64: 1, 8, 18, 1>}, {transform_indices = @transform_1, window_bounds = array<i64: 1, 1, 18, 1>}, {transform_indices = @transform_2, window_bounds = array<i64: 1, 1, 18, 1>}, {pipeline_mode = #tpu.pipeline_mode<synchronous>, transform_indices = @transform_3, window_bounds = array<i64: 3, 3, 64>}, {pipeline_mode = #tpu.pipeline_mode<synchronous>, transform_indices = @transform_4, window_bounds = array<i64: 1, 64>}, {transform_indices = @transform_5, window_bounds = array<i64: 1, 8, 16, 64>}]} {
    %c0 = arith.constant 0 : index
    %c0_0 = arith.constant 0 : index
    %c0_1 = arith.constant 0 : index
    %c0_2 = arith.constant 0 : index
    %0 = vector.load %arg2[%c0, %c0_0, %c0_1, %c0_2] : memref<1x8x18x1xbf16, #tpu.memory_space<vmem>>, vector<1x8x18x1xbf16>
    %1 = vector.shape_cast %0 : vector<1x8x18x1xbf16> to vector<8x18x1xbf16>
    %c0_3 = arith.constant 0 : index
    %c0_4 = arith.constant 0 : index
    %c0_5 = arith.constant 0 : index
    %c0_6 = arith.constant 0 : index
    %2 = vector.load %arg3[%c0_3, %c0_4, %c0_5, %c0_6] : memref<1x1x18x1xbf16, #tpu.memory_space<vmem>>, vector<1x1x18x1xbf16>
    %3 = vector.shape_cast %2 : vector<1x1x18x1xbf16> to vector<1x18x1xbf16>
    %c0_7 = arith.constant 0 : index
    %c0_8 = arith.constant 0 : index
    %c0_9 = arith.constant 0 : index
    %c0_10 = arith.constant 0 : index
    %4 = vector.load %arg4[%c0_7, %c0_8, %c0_9, %c0_10] : memref<1x1x18x1xbf16, #tpu.memory_space<vmem>>, vector<1x1x18x1xbf16>
    %5 = vector.shape_cast %4 : vector<1x1x18x1xbf16> to vector<1x18x1xbf16>
    %6 = tpu.concatenate %1, %3, %5 in 0 : vector<8x18x1xbf16>, vector<1x18x1xbf16>, vector<1x18x1xbf16> -> vector<10x18x1xbf16>
    %cst = arith.constant 0.000000e+00 : f32
    %7 = vector.broadcast %cst : f32 to vector<8x16x64xf32>
    %8 = vector.extract_strided_slice %6 {offsets = [0, 0, 0], sizes = [8, 18, 1], strides = [1, 1, 1]} : vector<10x18x1xbf16> to vector<8x18x1xbf16>
    %9 = arith.extf %8 : vector<8x18x1xbf16> to vector<8x18x1xf32>
    %c0_11 = arith.constant 0 : index
    %c0_12 = arith.constant 0 : index
    %c0_13 = arith.constant 0 : index
    %10 = vector.load %arg5[%c0_11, %c0_12, %c0_13] : memref<3x3x64xbf16, #tpu.memory_space<vmem>>, vector<1x1x64xbf16>
    %11 = vector.shape_cast %10 : vector<1x1x64xbf16> to vector<1x64xbf16>
    %12 = arith.extf %11 : vector<1x64xbf16> to vector<1x64xf32>
    %cst_14 = arith.constant 0.000000e+00 : f32
    %13 = vector.broadcast %cst_14 : f32 to vector<8x18x64xf32>
    %14 = vector.shape_cast %12 : vector<1x64xf32> to vector<64xf32>
    %15 = vector.shape_cast %14 : vector<64xf32> to vector<1x1x64xf32>
    %16 = vector.broadcast %9 : vector<8x18x1xf32> to vector<8x18x64xf32>
    %17 = vector.broadcast %15 : vector<1x1x64xf32> to vector<8x18x64xf32>
    %18 = arith.mulf %16, %17 : vector<8x18x64xf32>
    %19 = arith.addf %13, %18 : vector<8x18x64xf32>
    %20 = vector.extract_strided_slice %19 {offsets = [0, 0, 0], sizes = [8, 16, 64], strides = [1, 1, 1]} : vector<8x18x64xf32> to vector<8x16x64xf32>
    %21 = arith.addf %7, %20 : vector<8x16x64xf32>
    %c1 = arith.constant 1 : index
    %c0_15 = arith.constant 0 : index
    %c0_16 = arith.constant 0 : index
    %22 = vector.load %arg5[%c1, %c0_15, %c0_16] : memref<3x3x64xbf16, #tpu.memory_space<vmem>>, vector<1x1x64xbf16>
    %23 = vector.shape_cast %22 : vector<1x1x64xbf16> to vector<1x64xbf16>
    %24 = arith.extf %23 : vector<1x64xbf16> to vector<1x64xf32>
    %cst_17 = arith.constant 0.000000e+00 : f32
    %25 = vector.broadcast %cst_17 : f32 to vector<8x18x64xf32>
    %26 = vector.shape_cast %24 : vector<1x64xf32> to vector<64xf32>
    %27 = vector.shape_cast %26 : vector<64xf32> to vector<1x1x64xf32>
    %28 = vector.broadcast %9 : vector<8x18x1xf32> to vector<8x18x64xf32>
    %29 = vector.broadcast %27 : vector<1x1x64xf32> to vector<8x18x64xf32>
    %30 = arith.mulf %28, %29 : vector<8x18x64xf32>
    %31 = arith.addf %25, %30 : vector<8x18x64xf32>
    %32 = vector.extract_strided_slice %31 {offsets = [0, 1, 0], sizes = [8, 16, 64], strides = [1, 1, 1]} : vector<8x18x64xf32> to vector<8x16x64xf32>
    %33 = arith.addf %21, %32 : vector<8x16x64xf32>
    %c2 = arith.constant 2 : index
    %c0_18 = arith.constant 0 : index
    %c0_19 = arith.constant 0 : index
    %34 = vector.load %arg5[%c2, %c0_18, %c0_19] : memref<3x3x64xbf16, #tpu.memory_space<vmem>>, vector<1x1x64xbf16>
    %35 = vector.shape_cast %34 : vector<1x1x64xbf16> to vector<1x64xbf16>
    %36 = arith.extf %35 : vector<1x64xbf16> to vector<1x64xf32>
    %cst_20 = arith.constant 0.000000e+00 : f32
    %37 = vector.broadcast %cst_20 : f32 to vector<8x18x64xf32>
    %38 = vector.shape_cast %36 : vector<1x64xf32> to vector<64xf32>
    %39 = vector.shape_cast %38 : vector<64xf32> to vector<1x1x64xf32>
    %40 = vector.broadcast %9 : vector<8x18x1xf32> to vector<8x18x64xf32>
    %41 = vector.broadcast %39 : vector<1x1x64xf32> to vector<8x18x64xf32>
    %42 = arith.mulf %40, %41 : vector<8x18x64xf32>
    %43 = arith.addf %37, %42 : vector<8x18x64xf32>
    %44 = vector.extract_strided_slice %43 {offsets = [0, 2, 0], sizes = [8, 16, 64], strides = [1, 1, 1]} : vector<8x18x64xf32> to vector<8x16x64xf32>
    %45 = arith.addf %33, %44 : vector<8x16x64xf32>
    %46 = vector.extract_strided_slice %6 {offsets = [1, 0, 0], sizes = [8, 18, 1], strides = [1, 1, 1]} : vector<10x18x1xbf16> to vector<8x18x1xbf16>
    %47 = arith.extf %46 : vector<8x18x1xbf16> to vector<8x18x1xf32>
    %c0_21 = arith.constant 0 : index
    %c1_22 = arith.constant 1 : index
    %c0_23 = arith.constant 0 : index
    %48 = vector.load %arg5[%c0_21, %c1_22, %c0_23] : memref<3x3x64xbf16, #tpu.memory_space<vmem>>, vector<1x1x64xbf16>
    %49 = vector.shape_cast %48 : vector<1x1x64xbf16> to vector<1x64xbf16>
    %50 = arith.extf %49 : vector<1x64xbf16> to vector<1x64xf32>
    %cst_24 = arith.constant 0.000000e+00 : f32
    %51 = vector.broadcast %cst_24 : f32 to vector<8x18x64xf32>
    %52 = vector.shape_cast %50 : vector<1x64xf32> to vector<64xf32>
    %53 = vector.shape_cast %52 : vector<64xf32> to vector<1x1x64xf32>
    %54 = vector.broadcast %47 : vector<8x18x1xf32> to vector<8x18x64xf32>
    %55 = vector.broadcast %53 : vector<1x1x64xf32> to vector<8x18x64xf32>
    %56 = arith.mulf %54, %55 : vector<8x18x64xf32>
    %57 = arith.addf %51, %56 : vector<8x18x64xf32>
    %58 = vector.extract_strided_slice %57 {offsets = [0, 0, 0], sizes = [8, 16, 64], strides = [1, 1, 1]} : vector<8x18x64xf32> to vector<8x16x64xf32>
    %59 = arith.addf %45, %58 : vector<8x16x64xf32>
    %c1_25 = arith.constant 1 : index
    %c1_26 = arith.constant 1 : index
    %c0_27 = arith.constant 0 : index
    %60 = vector.load %arg5[%c1_25, %c1_26, %c0_27] : memref<3x3x64xbf16, #tpu.memory_space<vmem>>, vector<1x1x64xbf16>
    %61 = vector.shape_cast %60 : vector<1x1x64xbf16> to vector<1x64xbf16>
    %62 = arith.extf %61 : vector<1x64xbf16> to vector<1x64xf32>
    %cst_28 = arith.constant 0.000000e+00 : f32
    %63 = vector.broadcast %cst_28 : f32 to vector<8x18x64xf32>
    %64 = vector.shape_cast %62 : vector<1x64xf32> to vector<64xf32>
    %65 = vector.shape_cast %64 : vector<64xf32> to vector<1x1x64xf32>
    %66 = vector.broadcast %47 : vector<8x18x1xf32> to vector<8x18x64xf32>
    %67 = vector.broadcast %65 : vector<1x1x64xf32> to vector<8x18x64xf32>
    %68 = arith.mulf %66, %67 : vector<8x18x64xf32>
    %69 = arith.addf %63, %68 : vector<8x18x64xf32>
    %70 = vector.extract_strided_slice %69 {offsets = [0, 1, 0], sizes = [8, 16, 64], strides = [1, 1, 1]} : vector<8x18x64xf32> to vector<8x16x64xf32>
    %71 = arith.addf %59, %70 : vector<8x16x64xf32>
    %c2_29 = arith.constant 2 : index
    %c1_30 = arith.constant 1 : index
    %c0_31 = arith.constant 0 : index
    %72 = vector.load %arg5[%c2_29, %c1_30, %c0_31] : memref<3x3x64xbf16, #tpu.memory_space<vmem>>, vector<1x1x64xbf16>
    %73 = vector.shape_cast %72 : vector<1x1x64xbf16> to vector<1x64xbf16>
    %74 = arith.extf %73 : vector<1x64xbf16> to vector<1x64xf32>
    %cst_32 = arith.constant 0.000000e+00 : f32
    %75 = vector.broadcast %cst_32 : f32 to vector<8x18x64xf32>
    %76 = vector.shape_cast %74 : vector<1x64xf32> to vector<64xf32>
    %77 = vector.shape_cast %76 : vector<64xf32> to vector<1x1x64xf32>
    %78 = vector.broadcast %47 : vector<8x18x1xf32> to vector<8x18x64xf32>
    %79 = vector.broadcast %77 : vector<1x1x64xf32> to vector<8x18x64xf32>
    %80 = arith.mulf %78, %79 : vector<8x18x64xf32>
    %81 = arith.addf %75, %80 : vector<8x18x64xf32>
    %82 = vector.extract_strided_slice %81 {offsets = [0, 2, 0], sizes = [8, 16, 64], strides = [1, 1, 1]} : vector<8x18x64xf32> to vector<8x16x64xf32>
    %83 = arith.addf %71, %82 : vector<8x16x64xf32>
    %84 = vector.extract_strided_slice %6 {offsets = [2, 0, 0], sizes = [8, 18, 1], strides = [1, 1, 1]} : vector<10x18x1xbf16> to vector<8x18x1xbf16>
    %85 = arith.extf %84 : vector<8x18x1xbf16> to vector<8x18x1xf32>
    %c0_33 = arith.constant 0 : index
    %c2_34 = arith.constant 2 : index
    %c0_35 = arith.constant 0 : index
    %86 = vector.load %arg5[%c0_33, %c2_34, %c0_35] : memref<3x3x64xbf16, #tpu.memory_space<vmem>>, vector<1x1x64xbf16>
    %87 = vector.shape_cast %86 : vector<1x1x64xbf16> to vector<1x64xbf16>
    %88 = arith.extf %87 : vector<1x64xbf16> to vector<1x64xf32>
    %cst_36 = arith.constant 0.000000e+00 : f32
    %89 = vector.broadcast %cst_36 : f32 to vector<8x18x64xf32>
    %90 = vector.shape_cast %88 : vector<1x64xf32> to vector<64xf32>
    %91 = vector.shape_cast %90 : vector<64xf32> to vector<1x1x64xf32>
    %92 = vector.broadcast %85 : vector<8x18x1xf32> to vector<8x18x64xf32>
    %93 = vector.broadcast %91 : vector<1x1x64xf32> to vector<8x18x64xf32>
    %94 = arith.mulf %92, %93 : vector<8x18x64xf32>
    %95 = arith.addf %89, %94 : vector<8x18x64xf32>
    %96 = vector.extract_strided_slice %95 {offsets = [0, 0, 0], sizes = [8, 16, 64], strides = [1, 1, 1]} : vector<8x18x64xf32> to vector<8x16x64xf32>
    %97 = arith.addf %83, %96 : vector<8x16x64xf32>
    %c1_37 = arith.constant 1 : index
    %c2_38 = arith.constant 2 : index
    %c0_39 = arith.constant 0 : index
    %98 = vector.load %arg5[%c1_37, %c2_38, %c0_39] : memref<3x3x64xbf16, #tpu.memory_space<vmem>>, vector<1x1x64xbf16>
    %99 = vector.shape_cast %98 : vector<1x1x64xbf16> to vector<1x64xbf16>
    %100 = arith.extf %99 : vector<1x64xbf16> to vector<1x64xf32>
    %cst_40 = arith.constant 0.000000e+00 : f32
    %101 = vector.broadcast %cst_40 : f32 to vector<8x18x64xf32>
    %102 = vector.shape_cast %100 : vector<1x64xf32> to vector<64xf32>
    %103 = vector.shape_cast %102 : vector<64xf32> to vector<1x1x64xf32>
    %104 = vector.broadcast %85 : vector<8x18x1xf32> to vector<8x18x64xf32>
    %105 = vector.broadcast %103 : vector<1x1x64xf32> to vector<8x18x64xf32>
    %106 = arith.mulf %104, %105 : vector<8x18x64xf32>
    %107 = arith.addf %101, %106 : vector<8x18x64xf32>
    %108 = vector.extract_strided_slice %107 {offsets = [0, 1, 0], sizes = [8, 16, 64], strides = [1, 1, 1]} : vector<8x18x64xf32> to vector<8x16x64xf32>
    %109 = arith.addf %97, %108 : vector<8x16x64xf32>
    %c2_41 = arith.constant 2 : index
    %c2_42 = arith.constant 2 : index
    %c0_43 = arith.constant 0 : index
    %110 = vector.load %arg5[%c2_41, %c2_42, %c0_43] : memref<3x3x64xbf16, #tpu.memory_space<vmem>>, vector<1x1x64xbf16>
    %111 = vector.shape_cast %110 : vector<1x1x64xbf16> to vector<1x64xbf16>
    %112 = arith.extf %111 : vector<1x64xbf16> to vector<1x64xf32>
    %cst_44 = arith.constant 0.000000e+00 : f32
    %113 = vector.broadcast %cst_44 : f32 to vector<8x18x64xf32>
    %114 = vector.shape_cast %112 : vector<1x64xf32> to vector<64xf32>
    %115 = vector.shape_cast %114 : vector<64xf32> to vector<1x1x64xf32>
    %116 = vector.broadcast %85 : vector<8x18x1xf32> to vector<8x18x64xf32>
    %117 = vector.broadcast %115 : vector<1x1x64xf32> to vector<8x18x64xf32>
    %118 = arith.mulf %116, %117 : vector<8x18x64xf32>
    %119 = arith.addf %113, %118 : vector<8x18x64xf32>
    %120 = vector.extract_strided_slice %119 {offsets = [0, 2, 0], sizes = [8, 16, 64], strides = [1, 1, 1]} : vector<8x18x64xf32> to vector<8x16x64xf32>
    %121 = arith.addf %109, %120 : vector<8x16x64xf32>
    %c0_45 = arith.constant 0 : index
    %c0_46 = arith.constant 0 : index
    %122 = vector.load %arg6[%c0_45, %c0_46] : memref<1x64xf32, #tpu.memory_space<vmem>>, vector<1x64xf32>
    %123 = vector.shape_cast %122 : vector<1x64xf32> to vector<1x1x64xf32>
    %124 = vector.broadcast %123 : vector<1x1x64xf32> to vector<8x16x64xf32>
    %125 = arith.addf %121, %124 : vector<8x16x64xf32>
    %cst_47 = arith.constant 0.000000e+00 : f32
    %126 = vector.broadcast %cst_47 : f32 to vector<8x16x64xf32>
    %127 = arith.maximumf %125, %126 : vector<8x16x64xf32>
    %128 = arith.truncf %127 : vector<8x16x64xf32> to vector<8x16x64xbf16>
    %c0_48 = arith.constant 0 : index
    %c0_49 = arith.constant 0 : index
    %c0_50 = arith.constant 0 : index
    %c0_51 = arith.constant 0 : index
    %129 = vector.load %arg7[%c0_48, %c0_49, %c0_50, %c0_51] : memref<1x8x16x64xbf16, #tpu.memory_space<vmem>>, vector<1x8x16x64xbf16>
    %130 = vector.shape_cast %129 : vector<1x8x16x64xbf16> to vector<8x16x64xbf16>
    %131 = vector.shape_cast %128 : vector<8x16x64xbf16> to vector<1x8x16x64xbf16>
    tpu.vector_store %arg7[%c0_48, %c0_49, %c0_50, %c0_51], %131 {strides = array<i32>} : memref<1x8x16x64xbf16, #tpu.memory_space<vmem>>, vector<1x8x16x64xbf16>,
    return
  }
  func.func @transform_0(%arg0: i32, %arg1: i32) -> (i32, i32, i32, i32) {
    %c0_i32 = arith.constant 0 : i32
    %c0_i32_0 = arith.constant 0 : i32
    %c0_i32_1 = arith.constant 0 : i32
    return %arg0, %arg1, %c0_i32, %c0_i32_0 : i32, i32, i32, i32
  }
  func.func @transform_1(%arg0: i32, %arg1: i32) -> (i32, i32, i32, i32) {
    %c1_i32 = arith.constant 1 : i32
    %0 = arith.addi %arg1, %c1_i32 : i32
    %c8_i32 = arith.constant 8 : i32
    %1 = arith.muli %0, %c8_i32 : i32
    %c0_i32 = arith.constant 0 : i32
    %c0_i32_0 = arith.constant 0 : i32
    %c0_i32_1 = arith.constant 0 : i32
    return %arg0, %1, %c0_i32, %c0_i32_0 : i32, i32, i32, i32
  }
  func.func @transform_2(%arg0: i32, %arg1: i32) -> (i32, i32, i32, i32) {
    %c1_i32 = arith.constant 1 : i32
    %0 = arith.addi %arg1, %c1_i32 : i32
    %c8_i32 = arith.constant 8 : i32
    %1 = arith.muli %0, %c8_i32 : i32
    %c1_i32_0 = arith.constant 1 : i32
    %2 = arith.addi %1, %c1_i32_0 : i32
    %c0_i32 = arith.constant 0 : i32
    %c0_i32_1 = arith.constant 0 : i32
    %c0_i32_2 = arith.constant 0 : i32
    return %arg0, %2, %c0_i32, %c0_i32_1 : i32, i32, i32, i32
  }
  func.func @transform_3(%arg0: i32, %arg1: i32) -> (i32, i32, i32) {
    %c0_i32 = arith.constant 0 : i32
    %c0_i32_0 = arith.constant 0 : i32
    %c0_i32_1 = arith.constant 0 : i32
    %c0_i32_2 = arith.constant 0 : i32
    return %c0_i32, %c0_i32_0, %c0_i32_1 : i32, i32, i32
  }
  func.func @transform_4(%arg0: i32, %arg1: i32) -> (i32, i32) {
    %c0_i32 = arith.constant 0 : i32
    %c0_i32_0 = arith.constant 0 : i32
    %c0_i32_1 = arith.constant 0 : i32
    return %c0_i32, %c0_i32_0 : i32, i32
  }
  func.func @transform_5(%arg0: i32, %arg1: i32) -> (i32, i32, i32, i32) {
    %c0_i32 = arith.constant 0 : i32
    %c0_i32_0 = arith.constant 0 : i32
    %c0_i32_1 = arith.constant 0 : i32
    return %arg0, %arg1, %c0_i32, %c0_i32_0 : i32, i32, i32, i32
  }
}

module attributes {stable_mosaic.version = 11 : i64} {
  func.func @_conv3x3_kernel(%arg0: i32, %arg1: i32, %arg2: memref<1x8x18x64xbf16, #tpu.memory_space<vmem>>, %arg3: memref<1x1x18x64xbf16, #tpu.memory_space<vmem>>, %arg4: memref<1x1x18x64xbf16, #tpu.memory_space<vmem>>, %arg5: memref<3x192x64xbf16, #tpu.memory_space<vmem>>, %arg6: memref<1x64xf32, #tpu.memory_space<vmem>>, %arg7: memref<1x8x16x64xbf16, #tpu.memory_space<vmem>>) attributes {dimension_semantics = [#tpu.dimension_semantics<parallel>, #tpu.dimension_semantics<parallel>], iteration_bounds = array<i64: 2, 2>, scalar_prefetch = 0 : i64, scratch_operands = 0 : i64, tpu.core_type = #tpu.core_type<tc>, window_params = [{transform_indices = @transform_0, window_bounds = array<i64: 1, 8, 18, 64>}, {transform_indices = @transform_1, window_bounds = array<i64: 1, 1, 18, 64>}, {transform_indices = @transform_2, window_bounds = array<i64: 1, 1, 18, 64>}, {pipeline_mode = #tpu.pipeline_mode<synchronous>, transform_indices = @transform_3, window_bounds = array<i64: 3, 192, 64>}, {pipeline_mode = #tpu.pipeline_mode<synchronous>, transform_indices = @transform_4, window_bounds = array<i64: 1, 64>}, {transform_indices = @transform_5, window_bounds = array<i64: 1, 8, 16, 64>}]} {
    %c0 = arith.constant 0 : index
    %c0_0 = arith.constant 0 : index
    %c0_1 = arith.constant 0 : index
    %c0_2 = arith.constant 0 : index
    %0 = vector.load %arg2[%c0, %c0_0, %c0_1, %c0_2] : memref<1x8x18x64xbf16, #tpu.memory_space<vmem>>, vector<1x8x18x64xbf16>
    %1 = vector.shape_cast %0 : vector<1x8x18x64xbf16> to vector<8x18x64xbf16>
    %c0_3 = arith.constant 0 : index
    %c0_4 = arith.constant 0 : index
    %c0_5 = arith.constant 0 : index
    %c0_6 = arith.constant 0 : index
    %2 = vector.load %arg3[%c0_3, %c0_4, %c0_5, %c0_6] : memref<1x1x18x64xbf16, #tpu.memory_space<vmem>>, vector<1x1x18x64xbf16>
    %3 = vector.shape_cast %2 : vector<1x1x18x64xbf16> to vector<1x18x64xbf16>
    %c0_7 = arith.constant 0 : index
    %c0_8 = arith.constant 0 : index
    %c0_9 = arith.constant 0 : index
    %c0_10 = arith.constant 0 : index
    %4 = vector.load %arg4[%c0_7, %c0_8, %c0_9, %c0_10] : memref<1x1x18x64xbf16, #tpu.memory_space<vmem>>, vector<1x1x18x64xbf16>
    %5 = vector.shape_cast %4 : vector<1x1x18x64xbf16> to vector<1x18x64xbf16>
    %6 = tpu.concatenate %1, %3, %5 in 0 : vector<8x18x64xbf16>, vector<1x18x64xbf16>, vector<1x18x64xbf16> -> vector<10x18x64xbf16>
    %cst = arith.constant 0.000000e+00 : f32
    %7 = vector.broadcast %cst : f32 to vector<8x16x64xf32>
    %8 = vector.extract_strided_slice %6 {offsets = [0, 0, 0], sizes = [8, 18, 64], strides = [1, 1, 1]} : vector<10x18x64xbf16> to vector<8x18x64xbf16>
    %9 = vector.extract_strided_slice %6 {offsets = [1, 0, 0], sizes = [8, 18, 64], strides = [1, 1, 1]} : vector<10x18x64xbf16> to vector<8x18x64xbf16>
    %10 = vector.extract_strided_slice %6 {offsets = [2, 0, 0], sizes = [8, 18, 64], strides = [1, 1, 1]} : vector<10x18x64xbf16> to vector<8x18x64xbf16>
    %11 = tpu.concatenate %8, %9, %10 in 2 : vector<8x18x64xbf16>, vector<8x18x64xbf16>, vector<8x18x64xbf16> -> vector<8x18x192xbf16>
    %12 = vector.shape_cast %11 : vector<8x18x192xbf16> to vector<144x192xbf16>
    %c0_11 = arith.constant 0 : index
    %c0_12 = arith.constant 0 : index
    %c0_13 = arith.constant 0 : index
    %13 = vector.load %arg5[%c0_11, %c0_12, %c0_13] : memref<3x192x64xbf16, #tpu.memory_space<vmem>>, vector<1x192x64xbf16>
    %14 = vector.shape_cast %13 : vector<1x192x64xbf16> to vector<192x64xbf16>
    %cst_14 = arith.constant dense<0.000000e+00> : vector<144x64xf32>
    %15 = tpu.matmul %12, %14, %cst_14 {dimension_numbers = #tpu.dot_dimension_numbers<[1], [0], [0], [1], [0, 0, 1, 1], [], []>} : vector<144x192xbf16>, vector<192x64xbf16>, vector<144x64xf32> -> vector<144x64xf32>
    %16 = vector.shape_cast %15 : vector<144x64xf32> to vector<8x18x64xf32>
    %17 = vector.extract_strided_slice %16 {offsets = [0, 0, 0], sizes = [8, 16, 64], strides = [1, 1, 1]} : vector<8x18x64xf32> to vector<8x16x64xf32>
    %18 = arith.addf %7, %17 : vector<8x16x64xf32>
    %c1 = arith.constant 1 : index
    %c0_15 = arith.constant 0 : index
    %c0_16 = arith.constant 0 : index
    %19 = vector.load %arg5[%c1, %c0_15, %c0_16] : memref<3x192x64xbf16, #tpu.memory_space<vmem>>, vector<1x192x64xbf16>
    %20 = vector.shape_cast %19 : vector<1x192x64xbf16> to vector<192x64xbf16>
    %cst_17 = arith.constant dense<0.000000e+00> : vector<144x64xf32>
    %21 = tpu.matmul %12, %20, %cst_17 {dimension_numbers = #tpu.dot_dimension_numbers<[1], [0], [0], [1], [0, 0, 1, 1], [], []>} : vector<144x192xbf16>, vector<192x64xbf16>, vector<144x64xf32> -> vector<144x64xf32>
    %22 = vector.shape_cast %21 : vector<144x64xf32> to vector<8x18x64xf32>
    %23 = vector.extract_strided_slice %22 {offsets = [0, 1, 0], sizes = [8, 16, 64], strides = [1, 1, 1]} : vector<8x18x64xf32> to vector<8x16x64xf32>
    %24 = arith.addf %18, %23 : vector<8x16x64xf32>
    %c2 = arith.constant 2 : index
    %c0_18 = arith.constant 0 : index
    %c0_19 = arith.constant 0 : index
    %25 = vector.load %arg5[%c2, %c0_18, %c0_19] : memref<3x192x64xbf16, #tpu.memory_space<vmem>>, vector<1x192x64xbf16>
    %26 = vector.shape_cast %25 : vector<1x192x64xbf16> to vector<192x64xbf16>
    %cst_20 = arith.constant dense<0.000000e+00> : vector<144x64xf32>
    %27 = tpu.matmul %12, %26, %cst_20 {dimension_numbers = #tpu.dot_dimension_numbers<[1], [0], [0], [1], [0, 0, 1, 1], [], []>} : vector<144x192xbf16>, vector<192x64xbf16>, vector<144x64xf32> -> vector<144x64xf32>
    %28 = vector.shape_cast %27 : vector<144x64xf32> to vector<8x18x64xf32>
    %29 = vector.extract_strided_slice %28 {offsets = [0, 2, 0], sizes = [8, 16, 64], strides = [1, 1, 1]} : vector<8x18x64xf32> to vector<8x16x64xf32>
    %30 = arith.addf %24, %29 : vector<8x16x64xf32>
    %c0_21 = arith.constant 0 : index
    %c0_22 = arith.constant 0 : index
    %31 = vector.load %arg6[%c0_21, %c0_22] : memref<1x64xf32, #tpu.memory_space<vmem>>, vector<1x64xf32>
    %32 = vector.shape_cast %31 : vector<1x64xf32> to vector<1x1x64xf32>
    %33 = vector.broadcast %32 : vector<1x1x64xf32> to vector<8x16x64xf32>
    %34 = arith.addf %30, %33 : vector<8x16x64xf32>
    %cst_23 = arith.constant 0.000000e+00 : f32
    %35 = vector.broadcast %cst_23 : f32 to vector<8x16x64xf32>
    %36 = arith.maximumf %34, %35 : vector<8x16x64xf32>
    %37 = arith.truncf %36 : vector<8x16x64xf32> to vector<8x16x64xbf16>
    %c0_24 = arith.constant 0 : index
    %c0_25 = arith.constant 0 : index
    %c0_26 = arith.constant 0 : index
    %c0_27 = arith.constant 0 : index
    %38 = vector.load %arg7[%c0_24, %c0_25, %c0_26, %c0_27] : memref<1x8x16x64xbf16, #tpu.memory_space<vmem>>, vector<1x8x16x64xbf16>
    %39 = vector.shape_cast %38 : vector<1x8x16x64xbf16> to vector<8x16x64xbf16>
    %40 = vector.shape_cast %37 : vector<8x16x64xbf16> to vector<1x8x16x64xbf16>
    tpu.vector_store %arg7[%c0_24, %c0_25, %c0_26, %c0_27], %40 {strides = array<i32>} : memref<1x8x16x64xbf16, #tpu.memory_space<vmem>>, vector<1x8x16x64xbf16>,
    return
  }
  func.func @transform_0(%arg0: i32, %arg1: i32) -> (i32, i32, i32, i32) {
    %c0_i32 = arith.constant 0 : i32
    %c0_i32_0 = arith.constant 0 : i32
    %c0_i32_1 = arith.constant 0 : i32
    return %arg0, %arg1, %c0_i32, %c0_i32_0 : i32, i32, i32, i32
  }
  func.func @transform_1(%arg0: i32, %arg1: i32) -> (i32, i32, i32, i32) {
    %c1_i32 = arith.constant 1 : i32
    %0 = arith.addi %arg1, %c1_i32 : i32
    %c8_i32 = arith.constant 8 : i32
    %1 = arith.muli %0, %c8_i32 : i32
    %c0_i32 = arith.constant 0 : i32
    %c0_i32_0 = arith.constant 0 : i32
    %c0_i32_1 = arith.constant 0 : i32
    return %arg0, %1, %c0_i32, %c0_i32_0 : i32, i32, i32, i32
  }
  func.func @transform_2(%arg0: i32, %arg1: i32) -> (i32, i32, i32, i32) {
    %c1_i32 = arith.constant 1 : i32
    %0 = arith.addi %arg1, %c1_i32 : i32
    %c8_i32 = arith.constant 8 : i32
    %1 = arith.muli %0, %c8_i32 : i32
    %c1_i32_0 = arith.constant 1 : i32
    %2 = arith.addi %1, %c1_i32_0 : i32
    %c0_i32 = arith.constant 0 : i32
    %c0_i32_1 = arith.constant 0 : i32
    %c0_i32_2 = arith.constant 0 : i32
    return %arg0, %2, %c0_i32, %c0_i32_1 : i32, i32, i32, i32
  }
  func.func @transform_3(%arg0: i32, %arg1: i32) -> (i32, i32, i32) {
    %c0_i32 = arith.constant 0 : i32
    %c0_i32_0 = arith.constant 0 : i32
    %c0_i32_1 = arith.constant 0 : i32
    %c0_i32_2 = arith.constant 0 : i32
    return %c0_i32, %c0_i32_0, %c0_i32_1 : i32, i32, i32
  }
  func.func @transform_4(%arg0: i32, %arg1: i32) -> (i32, i32) {
    %c0_i32 = arith.constant 0 : i32
    %c0_i32_0 = arith.constant 0 : i32
    %c0_i32_1 = arith.constant 0 : i32
    return %c0_i32, %c0_i32_0 : i32, i32
  }
  func.func @transform_5(%arg0: i32, %arg1: i32) -> (i32, i32, i32, i32) {
    %c0_i32 = arith.constant 0 : i32
    %c0_i32_0 = arith.constant 0 : i32
    %c0_i32_1 = arith.constant 0 : i32
    return %arg0, %arg1, %c0_i32, %c0_i32_0 : i32, i32, i32, i32
  }
}

module attributes {stable_mosaic.version = 11 : i64} {
  func.func @_conv3x3_sigmoid_to1_kernel(%arg0: i32, %arg1: i32, %arg2: memref<1x8x18x64xbf16, #tpu.memory_space<vmem>>, %arg3: memref<1x1x18x64xbf16, #tpu.memory_space<vmem>>, %arg4: memref<1x1x18x64xbf16, #tpu.memory_space<vmem>>, %arg5: memref<9x64xf32, #tpu.memory_space<vmem>>, %arg6: memref<1x1xf32, #tpu.memory_space<vmem>>, %arg7: memref<1x8x16xf32, #tpu.memory_space<vmem>>) attributes {dimension_semantics = [#tpu.dimension_semantics<parallel>, #tpu.dimension_semantics<parallel>], iteration_bounds = array<i64: 2, 2>, scalar_prefetch = 0 : i64, scratch_operands = 0 : i64, tpu.core_type = #tpu.core_type<tc>, window_params = [{transform_indices = @transform_0, window_bounds = array<i64: 1, 8, 18, 64>}, {transform_indices = @transform_1, window_bounds = array<i64: 1, 1, 18, 64>}, {transform_indices = @transform_2, window_bounds = array<i64: 1, 1, 18, 64>}, {pipeline_mode = #tpu.pipeline_mode<synchronous>, transform_indices = @transform_3, window_bounds = array<i64: 9, 64>}, {pipeline_mode = #tpu.pipeline_mode<synchronous>, transform_indices = @transform_4, window_bounds = array<i64: 1, 1>}, {transform_indices = @transform_5, window_bounds = array<i64: 1, 8, 16>}]} {
    %c0 = arith.constant 0 : index
    %c0_0 = arith.constant 0 : index
    %c0_1 = arith.constant 0 : index
    %c0_2 = arith.constant 0 : index
    %0 = vector.load %arg2[%c0, %c0_0, %c0_1, %c0_2] : memref<1x8x18x64xbf16, #tpu.memory_space<vmem>>, vector<1x8x18x64xbf16>
    %1 = vector.shape_cast %0 : vector<1x8x18x64xbf16> to vector<8x18x64xbf16>
    %c0_3 = arith.constant 0 : index
    %c0_4 = arith.constant 0 : index
    %c0_5 = arith.constant 0 : index
    %c0_6 = arith.constant 0 : index
    %2 = vector.load %arg3[%c0_3, %c0_4, %c0_5, %c0_6] : memref<1x1x18x64xbf16, #tpu.memory_space<vmem>>, vector<1x1x18x64xbf16>
    %3 = vector.shape_cast %2 : vector<1x1x18x64xbf16> to vector<1x18x64xbf16>
    %c0_7 = arith.constant 0 : index
    %c0_8 = arith.constant 0 : index
    %c0_9 = arith.constant 0 : index
    %c0_10 = arith.constant 0 : index
    %4 = vector.load %arg4[%c0_7, %c0_8, %c0_9, %c0_10] : memref<1x1x18x64xbf16, #tpu.memory_space<vmem>>, vector<1x1x18x64xbf16>
    %5 = vector.shape_cast %4 : vector<1x1x18x64xbf16> to vector<1x18x64xbf16>
    %6 = tpu.concatenate %1, %3, %5 in 0 : vector<8x18x64xbf16>, vector<1x18x64xbf16>, vector<1x18x64xbf16> -> vector<10x18x64xbf16>
    %cst = arith.constant 0.000000e+00 : f32
    %7 = vector.broadcast %cst : f32 to vector<8x16xf32>
    %8 = vector.extract_strided_slice %6 {offsets = [0, 0, 0], sizes = [8, 18, 64], strides = [1, 1, 1]} : vector<10x18x64xbf16> to vector<8x18x64xbf16>
    %9 = arith.extf %8 : vector<8x18x64xbf16> to vector<8x18x64xf32>
    %c0_11 = arith.constant 0 : index
    %c0_12 = arith.constant 0 : index
    %10 = vector.load %arg5[%c0_11, %c0_12] : memref<9x64xf32, #tpu.memory_space<vmem>>, vector<1x64xf32>
    %11 = vector.shape_cast %10 : vector<1x64xf32> to vector<1x1x64xf32>
    %12 = vector.broadcast %11 : vector<1x1x64xf32> to vector<8x18x64xf32>
    %13 = arith.mulf %9, %12 : vector<8x18x64xf32>
    %cst_13 = arith.constant dense<0.000000e+00> : vector<8x18xf32>
    %14 = vector.multi_reduction <add>, %13, %cst_13 [2] : vector<8x18x64xf32> to vector<8x18xf32>
    %15 = vector.extract_strided_slice %14 {offsets = [0, 0], sizes = [8, 16], strides = [1, 1]} : vector<8x18xf32> to vector<8x16xf32>
    %16 = arith.addf %7, %15 : vector<8x16xf32>
    %c1 = arith.constant 1 : index
    %c0_14 = arith.constant 0 : index
    %17 = vector.load %arg5[%c1, %c0_14] : memref<9x64xf32, #tpu.memory_space<vmem>>, vector<1x64xf32>
    %18 = vector.shape_cast %17 : vector<1x64xf32> to vector<1x1x64xf32>
    %19 = vector.broadcast %18 : vector<1x1x64xf32> to vector<8x18x64xf32>
    %20 = arith.mulf %9, %19 : vector<8x18x64xf32>
    %cst_15 = arith.constant dense<0.000000e+00> : vector<8x18xf32>
    %21 = vector.multi_reduction <add>, %20, %cst_15 [2] : vector<8x18x64xf32> to vector<8x18xf32>
    %22 = vector.extract_strided_slice %21 {offsets = [0, 1], sizes = [8, 16], strides = [1, 1]} : vector<8x18xf32> to vector<8x16xf32>
    %23 = arith.addf %16, %22 : vector<8x16xf32>
    %c2 = arith.constant 2 : index
    %c0_16 = arith.constant 0 : index
    %24 = vector.load %arg5[%c2, %c0_16] : memref<9x64xf32, #tpu.memory_space<vmem>>, vector<1x64xf32>
    %25 = vector.shape_cast %24 : vector<1x64xf32> to vector<1x1x64xf32>
    %26 = vector.broadcast %25 : vector<1x1x64xf32> to vector<8x18x64xf32>
    %27 = arith.mulf %9, %26 : vector<8x18x64xf32>
    %cst_17 = arith.constant dense<0.000000e+00> : vector<8x18xf32>
    %28 = vector.multi_reduction <add>, %27, %cst_17 [2] : vector<8x18x64xf32> to vector<8x18xf32>
    %29 = vector.extract_strided_slice %28 {offsets = [0, 2], sizes = [8, 16], strides = [1, 1]} : vector<8x18xf32> to vector<8x16xf32>
    %30 = arith.addf %23, %29 : vector<8x16xf32>
    %31 = vector.extract_strided_slice %6 {offsets = [1, 0, 0], sizes = [8, 18, 64], strides = [1, 1, 1]} : vector<10x18x64xbf16> to vector<8x18x64xbf16>
    %32 = arith.extf %31 : vector<8x18x64xbf16> to vector<8x18x64xf32>
    %c3 = arith.constant 3 : index
    %c0_18 = arith.constant 0 : index
    %33 = vector.load %arg5[%c3, %c0_18] : memref<9x64xf32, #tpu.memory_space<vmem>>, vector<1x64xf32>
    %34 = vector.shape_cast %33 : vector<1x64xf32> to vector<1x1x64xf32>
    %35 = vector.broadcast %34 : vector<1x1x64xf32> to vector<8x18x64xf32>
    %36 = arith.mulf %32, %35 : vector<8x18x64xf32>
    %cst_19 = arith.constant dense<0.000000e+00> : vector<8x18xf32>
    %37 = vector.multi_reduction <add>, %36, %cst_19 [2] : vector<8x18x64xf32> to vector<8x18xf32>
    %38 = vector.extract_strided_slice %37 {offsets = [0, 0], sizes = [8, 16], strides = [1, 1]} : vector<8x18xf32> to vector<8x16xf32>
    %39 = arith.addf %30, %38 : vector<8x16xf32>
    %c4 = arith.constant 4 : index
    %c0_20 = arith.constant 0 : index
    %40 = vector.load %arg5[%c4, %c0_20] : memref<9x64xf32, #tpu.memory_space<vmem>>, vector<1x64xf32>
    %41 = vector.shape_cast %40 : vector<1x64xf32> to vector<1x1x64xf32>
    %42 = vector.broadcast %41 : vector<1x1x64xf32> to vector<8x18x64xf32>
    %43 = arith.mulf %32, %42 : vector<8x18x64xf32>
    %cst_21 = arith.constant dense<0.000000e+00> : vector<8x18xf32>
    %44 = vector.multi_reduction <add>, %43, %cst_21 [2] : vector<8x18x64xf32> to vector<8x18xf32>
    %45 = vector.extract_strided_slice %44 {offsets = [0, 1], sizes = [8, 16], strides = [1, 1]} : vector<8x18xf32> to vector<8x16xf32>
    %46 = arith.addf %39, %45 : vector<8x16xf32>
    %c5 = arith.constant 5 : index
    %c0_22 = arith.constant 0 : index
    %47 = vector.load %arg5[%c5, %c0_22] : memref<9x64xf32, #tpu.memory_space<vmem>>, vector<1x64xf32>
    %48 = vector.shape_cast %47 : vector<1x64xf32> to vector<1x1x64xf32>
    %49 = vector.broadcast %48 : vector<1x1x64xf32> to vector<8x18x64xf32>
    %50 = arith.mulf %32, %49 : vector<8x18x64xf32>
    %cst_23 = arith.constant dense<0.000000e+00> : vector<8x18xf32>
    %51 = vector.multi_reduction <add>, %50, %cst_23 [2] : vector<8x18x64xf32> to vector<8x18xf32>
    %52 = vector.extract_strided_slice %51 {offsets = [0, 2], sizes = [8, 16], strides = [1, 1]} : vector<8x18xf32> to vector<8x16xf32>
    %53 = arith.addf %46, %52 : vector<8x16xf32>
    %54 = vector.extract_strided_slice %6 {offsets = [2, 0, 0], sizes = [8, 18, 64], strides = [1, 1, 1]} : vector<10x18x64xbf16> to vector<8x18x64xbf16>
    %55 = arith.extf %54 : vector<8x18x64xbf16> to vector<8x18x64xf32>
    %c6 = arith.constant 6 : index
    %c0_24 = arith.constant 0 : index
    %56 = vector.load %arg5[%c6, %c0_24] : memref<9x64xf32, #tpu.memory_space<vmem>>, vector<1x64xf32>
    %57 = vector.shape_cast %56 : vector<1x64xf32> to vector<1x1x64xf32>
    %58 = vector.broadcast %57 : vector<1x1x64xf32> to vector<8x18x64xf32>
    %59 = arith.mulf %55, %58 : vector<8x18x64xf32>
    %cst_25 = arith.constant dense<0.000000e+00> : vector<8x18xf32>
    %60 = vector.multi_reduction <add>, %59, %cst_25 [2] : vector<8x18x64xf32> to vector<8x18xf32>
    %61 = vector.extract_strided_slice %60 {offsets = [0, 0], sizes = [8, 16], strides = [1, 1]} : vector<8x18xf32> to vector<8x16xf32>
    %62 = arith.addf %53, %61 : vector<8x16xf32>
    %c7 = arith.constant 7 : index
    %c0_26 = arith.constant 0 : index
    %63 = vector.load %arg5[%c7, %c0_26] : memref<9x64xf32, #tpu.memory_space<vmem>>, vector<1x64xf32>
    %64 = vector.shape_cast %63 : vector<1x64xf32> to vector<1x1x64xf32>
    %65 = vector.broadcast %64 : vector<1x1x64xf32> to vector<8x18x64xf32>
    %66 = arith.mulf %55, %65 : vector<8x18x64xf32>
    %cst_27 = arith.constant dense<0.000000e+00> : vector<8x18xf32>
    %67 = vector.multi_reduction <add>, %66, %cst_27 [2] : vector<8x18x64xf32> to vector<8x18xf32>
    %68 = vector.extract_strided_slice %67 {offsets = [0, 1], sizes = [8, 16], strides = [1, 1]} : vector<8x18xf32> to vector<8x16xf32>
    %69 = arith.addf %62, %68 : vector<8x16xf32>
    %c8 = arith.constant 8 : index
    %c0_28 = arith.constant 0 : index
    %70 = vector.load %arg5[%c8, %c0_28] : memref<9x64xf32, #tpu.memory_space<vmem>>, vector<1x64xf32>
    %71 = vector.shape_cast %70 : vector<1x64xf32> to vector<1x1x64xf32>
    %72 = vector.broadcast %71 : vector<1x1x64xf32> to vector<8x18x64xf32>
    %73 = arith.mulf %55, %72 : vector<8x18x64xf32>
    %cst_29 = arith.constant dense<0.000000e+00> : vector<8x18xf32>
    %74 = vector.multi_reduction <add>, %73, %cst_29 [2] : vector<8x18x64xf32> to vector<8x18xf32>
    %75 = vector.extract_strided_slice %74 {offsets = [0, 2], sizes = [8, 16], strides = [1, 1]} : vector<8x18xf32> to vector<8x16xf32>
    %76 = arith.addf %69, %75 : vector<8x16xf32>
    %c0_30 = arith.constant 0 : index
    %c0_31 = arith.constant 0 : index
    %77 = vector.load %arg6[%c0_30, %c0_31] : memref<1x1xf32, #tpu.memory_space<vmem>>, vector<1x1xf32>
    %78 = vector.broadcast %77 : vector<1x1xf32> to vector<8x16xf32>
    %79 = arith.addf %76, %78 : vector<8x16xf32>
    %80 = arith.negf %79 : vector<8x16xf32>
    %81 = math.exp %80 : vector<8x16xf32>
    %cst_32 = arith.constant 1.000000e+00 : f32
    %82 = vector.broadcast %cst_32 : f32 to vector<8x16xf32>
    %83 = arith.addf %82, %81 : vector<8x16xf32>
    %84 = arith.divf %82, %83 : vector<8x16xf32>
    %c0_33 = arith.constant 0 : index
    %c0_34 = arith.constant 0 : index
    %c0_35 = arith.constant 0 : index
    %85 = vector.load %arg7[%c0_33, %c0_34, %c0_35] : memref<1x8x16xf32, #tpu.memory_space<vmem>>, vector<1x8x16xf32>
    %86 = vector.shape_cast %85 : vector<1x8x16xf32> to vector<8x16xf32>
    %87 = vector.shape_cast %84 : vector<8x16xf32> to vector<1x8x16xf32>
    tpu.vector_store %arg7[%c0_33, %c0_34, %c0_35], %87 {strides = array<i32>} : memref<1x8x16xf32, #tpu.memory_space<vmem>>, vector<1x8x16xf32>,
    return
  }
  func.func @transform_0(%arg0: i32, %arg1: i32) -> (i32, i32, i32, i32) {
    %c0_i32 = arith.constant 0 : i32
    %c0_i32_0 = arith.constant 0 : i32
    %c0_i32_1 = arith.constant 0 : i32
    return %arg0, %arg1, %c0_i32, %c0_i32_0 : i32, i32, i32, i32
  }
  func.func @transform_1(%arg0: i32, %arg1: i32) -> (i32, i32, i32, i32) {
    %c1_i32 = arith.constant 1 : i32
    %0 = arith.addi %arg1, %c1_i32 : i32
    %c8_i32 = arith.constant 8 : i32
    %1 = arith.muli %0, %c8_i32 : i32
    %c0_i32 = arith.constant 0 : i32
    %c0_i32_0 = arith.constant 0 : i32
    %c0_i32_1 = arith.constant 0 : i32
    return %arg0, %1, %c0_i32, %c0_i32_0 : i32, i32, i32, i32
  }
  func.func @transform_2(%arg0: i32, %arg1: i32) -> (i32, i32, i32, i32) {
    %c1_i32 = arith.constant 1 : i32
    %0 = arith.addi %arg1, %c1_i32 : i32
    %c8_i32 = arith.constant 8 : i32
    %1 = arith.muli %0, %c8_i32 : i32
    %c1_i32_0 = arith.constant 1 : i32
    %2 = arith.addi %1, %c1_i32_0 : i32
    %c0_i32 = arith.constant 0 : i32
    %c0_i32_1 = arith.constant 0 : i32
    %c0_i32_2 = arith.constant 0 : i32
    return %arg0, %2, %c0_i32, %c0_i32_1 : i32, i32, i32, i32
  }
  func.func @transform_3(%arg0: i32, %arg1: i32) -> (i32, i32) {
    %c0_i32 = arith.constant 0 : i32
    %c0_i32_0 = arith.constant 0 : i32
    %c0_i32_1 = arith.constant 0 : i32
    return %c0_i32, %c0_i32_0 : i32, i32
  }
  func.func @transform_4(%arg0: i32, %arg1: i32) -> (i32, i32) {
    %c0_i32 = arith.constant 0 : i32
    %c0_i32_0 = arith.constant 0 : i32
    %c0_i32_1 = arith.constant 0 : i32
    return %c0_i32, %c0_i32_0 : i32, i32
  }
  func.func @transform_5(%arg0: i32, %arg1: i32) -> (i32, i32, i32) {
    %c0_i32 = arith.constant 0 : i32
    %c0_i32_0 = arith.constant 0 : i32
    return %arg0, %arg1, %c0_i32 : i32, i32, i32
  }
}

</mosaic_0001>

<bundles_post_ra>
// kernel: l_net_forward.5
= control target key start
LH: loop header
LB: loop body
LE: loop exit
PB: predicated region body
PF: predicated region fallthrough
CT: control target
= control target key end

     0   :  { %s2213_s18 = smov 0   ;;  %s2215_s19 = smov 0   ;;  %s3116_s0 = inlined_call_operand.vmem [shape: bf16[2,18,18,1], index: 0, kind: input, shape index: {}, may-alias: {0,1,2}]   ;;  %s3117_s1 = inlined_call_operand.vmem [shape: bf16[2,18,18,1], index: 1, kind: input, shape index: {}, may-alias: {0,1,2}]   ;;  %s3118_s2 = inlined_call_operand.vmem [shape: bf16[2,18,18,1], index: 2, kind: input, shape index: {}, may-alias: {0,1,2}]   ;;  %s3119_s3 = inlined_call_operand.vmem [shape: bf16[3,3,64], index: 3, kind: input, shape index: {}]   ;;  %s3120_s4 = inlined_call_operand.vmem [shape: f32[1,64], index: 4, kind: input, shape index: {}]   ;;  %s3121_s5 = inlined_call_operand.vmem [shape: bf16[2,16,16,64], index: 5, kind: output, shape index: {}]  }
   0x1   :  { %s2217_s20 = smov 0   ;;  %s2219_s21 = smov 0  }
   0x2   :  { %s2221_s22 = smov 0  }
   0x3 LB: > { %s24_s23 = sadd.s32 1, %s2172_s20  ;;  %s27_s24 = sadd.s32 1, %s2176_s21  ;;  %s2180_s22 = sphi %s2221_s22, %s15_s22   ;;  %s2176_s21 = sphi %s2219_s21, %s3149_s21   ;;  %s2172_s20 = sphi %s2217_s20, %s3148_s20   ;;  %s2168_s19 = sphi %s2215_s19, %s3147_s19   ;;  %s2164_s18 = sphi %s2213_s18, %s3146_s18  }
   0x4   : > { %p25_p0 = scmp.ge.s32.totalorder %s24_s23, 2  ;;  %p1936_p1 = scmp.ge.s32.totalorder %s2180_s22, 1 }
   0x5   : > { %p271_p2 = scmp.lt.s32.totalorder %s2180_s22, 5 }
   0x6   : > { %s3151_s23 = smov (%p25_p0, %s24_s23), 0  ;;  %s3153_s24 = smov (!%p25_p0, %s27_s24), %s2176_s21 }
   0x7   : > { %p272_p3 = pnand %p1936_p1, %p271_p2  ;;  %p29_p4 = scmp.ge.s32.totalorder %s3153_s24, 2 }
   0x8   : > { %s2243_s25 = sshll.u32 (!%p272_p3), %s2164_s18, 3  ;;  %p343_p5 = scmp.lt.s32.totalorder (!%p272_p3), %s2168_s19, 1  ;;  %v2182_v0 = vmov (!%p272_p3), 0   ;;  %vm704_vm0 = vcmask (!%p272_p3), 1046528   ;;  %vm856_vm1 = vcmask (!%p272_p3), 1045504   ;;  %vm1770_vm2 = vcmask (!%p272_p3), 519168  }
   0x9   : > { %s3155_s24 = smov (%p29_p4, %s3153_s24), 0  ;;  %275 = sbr.rel (%p272_p3) target bundleno = 328 (0x148), region = 40 }
   0xa   : > { %2081 = vset.pattern.permute.xlu1 (!%p272_p3), %v2182_v0  ;;  %2070 = vset.pattern.permute.xlu0 (!%p272_p3), %v2182_v0  ;;  %p345_p6 = scmp.lt.s32.totalorder (!%p272_p3), %s2243_s25, 17  ;;  %s2247_s26 = sadd.s32 (!%p272_p3), 8, %s2243_s25 }
   0xb   : > { %p362_p7 = scmp.lt.s32.totalorder (!%p272_p3), %s2247_s26, 17  ;;  %s373_s7 = sadd.s32 (!%p272_p3), 1, %s2247_s26 }
   0xc   : > { %p2274_p8 = scmp.lt.s32.totalorder (!%p272_p3), %s373_s7, 17  ;;  %p389_p9 = scmp.lt.s32.totalorder (!%p272_p3), %s2243_s25, 15 }
  0x10   : > { %s3157_s19 = smov (!%p343_p5, %s2168_s19), 1  ;;  %s3159_s7 = smov (!%p2274_p8, %s373_s7), 17 }
  0x11   : > { %s346_s27 = scalar_select %p345_p6, %s2243_s25, 17 }
  0x12   : > { %s2253_s28 = smul.u32 54, %s3157_s19  ;;  %s3161_s25 = smov (!%p389_p9, %s2243_s25), 15 }
  0x13   : > { %s2025_s29 = smul.u32 3, %s346_s27  ;;  %s1944_s8 = sshll.u32 %s3161_s25, 1 }
  0x14   : > { %s2267_s11 = scalar_select %p362_p7, %s2247_s26, 17 }
  0x15   : > { %s349_s30 = sadd.s32 %s2253_s28, %s2025_s29  ;;  %s2028_s15 = smul.u32 3, %s3159_s7 }
  0x16   : > { %s1938_s6 = sshll.u32 %s349_s30, 2  ;;  %s2027_s13 = smul.u32 3, %s2267_s11 }
  0x17   : > { %s2261_s10 = scalar_lea.vmem %s3116_s0, %s1938_s6  ;;  %s380_s17 = sadd.s32 %s2028_s15, %s2253_s28 }
  0x18   : > { %v401_v1 = vld [vmem:[%s2261_s10 + $0xc] sm:$0xff]   ;;  %v402_v2 = vld [vmem:[%s2261_s10 + $0x14] sm:$0x1]  ;;  %v1999_v3 = vld [vmem:[%s2261_s10] sm:$0xff]   ;;  %s366_s14 = sadd.s32 %s2027_s13, %s2253_s28  ;;  %s1942_s29 = sshll.u32 %s380_s17, 2 }
  0x19   : > { %v431_v4 = vunpack.c.h.bf16 %v401_v1  ;;  %v432_v5 = vunpack.c.l.bf16 %v402_v2  ;;  %v2000_v6 = vunpack.c.l.bf16 %v1999_v3  ;;  %v2001_v7 = vunpack.c.h.bf16 %v1999_v3  ;;  %v2022_v8 = vld [vmem:[%s2261_s10 + $0x18] sm:$0xff]   ;;  %v399_v9 = vld [vmem:[%s2261_s10 + $0x8] sm:$0x1]  ;;  %v408_v15 = vld [vmem:[%s2261_s10 + $0x2c] sm:$0x1]  ;;  %s1940_s16 = sshll.u32 %s366_s14, 2  ;;  %s382_s28 = scalar_lea.vmem %s3118_s2, %s1942_s29 }
  0x1a   : > { %v407_v10 = vld [vmem:[%s2261_s10 + $0x24] sm:$0xff]   ;;  %v2004_v11 = vunpack.c.l.bf16 %v2022_v8  ;;  %v2005_v12 = vunpack.c.h.bf16 %v2022_v8  ;;  %v429_v13 = vunpack.c.l.bf16 %v399_v9  ;;  %v430_v14 = vunpack.c.l.bf16 %v401_v1  ;;  %v405_v16 = vld [vmem:[%s2261_s10 + $0x20] sm:$0x1]  ;;  %v411_v25 = vld [vmem:[%s2261_s10 + $0x38] sm:$0x1]  ;;  %s368_s27 = scalar_lea.vmem %s3117_s1, %s1940_s16  ;;  %s1945_s7 = sshll.u32 %s3157_s19, 5 }
  0x1b   : > { %v2082_v17 = vpack.i.bf16 %v432_v5, %v431_v4  ;;  %v2071_v18 = vpack.i.bf16 %v2001_v7, %v2000_v6  ;;  %v437_v19 = vunpack.c.h.bf16 %v407_v10  ;;  %v438_v20 = vunpack.c.l.bf16 %v408_v15  ;;  %v412_v26 = vld [vmem:[%s2261_s10 + $0x3c] sm:$0xff]   ;;  %v2023_v27 = vld [vmem:[%s2261_s10 + $0x30] sm:$0xff]   ;;  %v2024_v34 = vld [vmem:[%s2261_s10 + $0x48] sm:$0xff]   ;;  %s2304_s9 = sadd.s32 %s1945_s7, %s1944_s8 }
  0x1c   : > { %v2087_v21 = vpack.i.bf16 %v2005_v12, %v2004_v11  ;;  %v2076_v22 = vpack.i.bf16 %v430_v14, %v429_v13  ;;  %v435_v23 = vunpack.c.l.bf16 %v405_v16  ;;  %v436_v24 = vunpack.c.l.bf16 %v407_v10  ;;  %v414_v35 = vld [vmem:[%s2261_s10 + $0x44] sm:$0x1]  ;;  %v419_v42 = vld [vmem:[%s2261_s10 + $0x54] sm:$0xff]   ;;  %v420_v43 = vld [vmem:[%s2261_s10 + $0x5c] sm:$0x1]  ;;  %s1946_s30 = sshll.u32 %s2304_s9, 2 }
  0x1d   : > { %2083 = vperm.xlu1 %2081, %v2082_v17   ;;  %2072 = vperm.xlu0 %2070, %v2071_v18   ;;  %v2097_v28 = vpack.i.bf16 %v438_v20, %v437_v19  ;;  %v441_v29 = vunpack.c.l.bf16 %v411_v25  ;;  %v442_v31 = vunpack.c.l.bf16 %v412_v26  ;;  %v2008_v32 = vunpack.c.l.bf16 %v2023_v27  ;;  %v417_v44 = vld [vmem:[%s2261_s10 + $0x50] sm:$0x1]  ;;  %v2015_v51 = vld [vmem:[%s368_s27] sm:$0xff]   ;;  %v423_v56 = vld [vmem:[%s368_s27 + $0x8] sm:$0x1]  ;;  %s2607_s7 = scalar_lea.vmem %s3121_s5, %s1946_s30 }
  0x1e   : > { %v2092_v30 = vpack.i.bf16 %v436_v24, %v435_v23  ;;  %v2009_v33 = vunpack.c.h.bf16 %v2023_v27  ;;  %v2012_v36 = vunpack.c.l.bf16 %v2024_v34  ;;  %v2013_v37 = vunpack.c.h.bf16 %v2024_v34  ;;  %v2019_v57 = vld [vmem:[%s382_s28] sm:$0xff]   ;;  %v426_v62 = vld [vmem:[%s382_s28 + $0x8] sm:$0x1] }
  0x1f   : > { %v2107_v38 = vpack.i.bf16 %v442_v31, %v441_v29  ;;  %v443_v40 = vunpack.c.h.bf16 %v412_v26  ;;  %v444_v41 = vunpack.c.l.bf16 %v414_v35  ;;  %v449_v46 = vunpack.c.h.bf16 %v419_v42  ;;  %v1947_v3 = vld [vmem:[%s3119_s3 + $0x2] sm:$0x1]  ;;  %v1948_v4 = vld [vmem:[%s3119_s3 + $0x4] sm:$0x1]  ;;  %v451_v8 = vld [vmem:[%s3119_s3] sm:$0x1] }
  0x20   : > { %v2102_v39 = vpack.i.bf16 %v2009_v33, %v2008_v32  ;;  %v2117_v45 = vpack.i.bf16 %v2013_v37, %v2012_v36  ;;  %v450_v48 = vunpack.c.l.bf16 %v420_v43  ;;  %v447_v49 = vunpack.c.l.bf16 %v417_v44  ;;  %v1298_v11 = vld [vmem:[%s3119_s3] sm:$0x2]  ;;  %v1949_v18 = vld [vmem:[%s3119_s3 + $0x2] sm:$0x2] }
  0x21   : > { %2088 = vperm.xlu1 %2081, %v2087_v21   ;;  %2077 = vperm.xlu0 %2070, %v2076_v22   ;;  %v2112_v47 = vpack.i.bf16 %v444_v41, %v443_v40  ;;  %v448_v50 = vunpack.c.l.bf16 %v419_v42  ;;  %v2016_v54 = vunpack.c.l.bf16 %v2015_v51  ;;  %v2017_v55 = vunpack.c.h.bf16 %v2015_v51  ;;  %v1950_v22 = vld [vmem:[%s3119_s3 + $0x4] sm:$0x2] }
  0x22   : > { %v2127_v52 = vpack.i.bf16 %v450_v48, %v449_v46  ;;  %v931_v58 = vunpack.c.l.bf16 %v423_v56  ;;  %v2020_v60 = vunpack.c.l.bf16 %v2019_v57  ;;  %v2021_v61 = vunpack.c.h.bf16 %v2019_v57 }
  0x23   : > { %v2122_v53 = vpack.i.bf16 %v448_v50, %v447_v49  ;;  %v2132_v59 = vpack.i.bf16 %v2017_v55, %v2016_v54  ;;  %v1297_v63 = vunpack.c.l.bf16 %v426_v62  ;;  %v573_v1 = vlaneseq }
  0x24   : > { %v2137_v0 = vpack.i.bf16 %v2021_v61, %v2020_v60  ;;  %v627_v6 = vunpack.c.l.bf16 %v1947_v3  ;;  %v779_v7 = vunpack.c.l.bf16 %v1948_v4  ;;  %v452_v15 = vunpack.c.l.bf16 %v451_v8 }
  0x25   : > { %2098 = vperm.xlu1 %2081, %v2097_v28   ;;  %2093 = vperm.xlu0 %2070, %v2092_v30   ;;  %v574_v2 = vshrl.u32 %v573_v1, 7  ;;  %v1299_v20 = vunpack.c.l.bf16 %v1298_v11  ;;  %v1368_v29 = vunpack.c.l.bf16 %v1949_v18  ;;  %v1518_v33 = vunpack.c.l.bf16 %v1950_v22 }
  0x27   : > { %v575_v5 = vsub.s32 0, %v574_v2  ;;  %v949_v9 = vsub.s32 1, %v574_v2  ;;  %v1317_v21 = vsub.s32 2, %v574_v2 }
  0x29   : > { %2108 = vperm.xlu1 %2081, %v2107_v38   ;;  %2103 = vperm.xlu0 %2070, %v2102_v39   ;;  %v2315_v10 = vrot.slane %v627_v6, %v575_v5  ;;  %v2320_v12 = vrot.slane %v779_v7, %v575_v5  ;;  %v2325_v19 = vrot.slane %v779_v7, %v949_v9 }
  0x2a   : > { %v2331_v26 = vrot.slane %v627_v6, %v949_v9  ;;  %v2335_v30 = vrot.slane %v452_v15, %v575_v5  ;;  %v2340_v32 = vrot.slane %v452_v15, %v949_v9  ;;  %v2346_v37 = vrot.slane %v1299_v20, %v1317_v21 }
  0x2b   : > { %v2359_v46 = vrot.slane %v1368_v29, %v1317_v21 }
  0x2d   : > { %2118 = vperm.xlu1 %2081, %v2117_v45   ;;  %2113 = vperm.xlu0 %2070, %v2112_v47  }
  0x31   : > { %2128 = vperm.xlu1 %2081, %v2127_v52   ;;  %2123 = vperm.xlu0 %2070, %v2122_v53  }
  0x35   : > { %944 = vperm.xlu1 %2081, %v931_v58   ;;  %2133 = vperm.xlu0 %2070, %v2132_v59  }
  0x39   : > { %1312 = vperm.xlu1 %2081, %v1297_v63   ;;  %2138 = vperm.xlu0 %2070, %v2137_v0   ;;  %v2372_v63 = vrot.slane %v1518_v33, %v1317_v21 }
  0x9c   : > { %v2084_v13 = vpop.permute.xlu1 %2083  ;;  %v2073_v14 = vpop.permute.xlu0 %2072 }
  0x9d   : > { %v2086_v16 = vunpack.i.h.bf16 %v2084_v13  ;;  %v2085_v17 = vunpack.i.l.bf16 %v2084_v13  ;;  %v2075_v24 = vunpack.i.h.bf16 %v2073_v14  ;;  %v2074_v25 = vunpack.i.l.bf16 %v2073_v14 }
  0x9f   : > { %v637_v23 = vmul.f32 %v2086_v16, %v2315_v10  ;;  %v789_v27 = vmul.f32 %v2086_v16, %v2320_v12  ;;  %v636_v28 = vmul.f32 %v2085_v17, %v2315_v10  ;;  %v2338_v31 = vmul.f32 %v2085_v17, %v2320_v12 }
  0xa0   : > { %v1153_v35 = vmul.f32 %v2086_v16, %v2325_v19  ;;  %v2344_v36 = vmul.f32 %v2085_v17, %v2325_v19  ;;  %v2349_v39 = vmul.f32 %v2075_v24, %v2315_v10  ;;  %v2352_v40 = vmul.f32 %v2075_v24, %v2320_v12  ;;  %v2089_v45 = vpop.permute.xlu1 %2088  ;;  %v2078_v47 = vpop.permute.xlu0 %2077 }
  0xa1   : > { %v713_v34 = vrot.slane %v637_v23, 1  ;;  %v711_v38 = vrot.slane %v636_v28, 1  ;;  %v632_v41 = vmul.f32 %v2074_v25, %v2315_v10  ;;  %v865_v42 = vrot.slane %v789_v27, 2 }
  0xa2   : > { %v2356_v43 = vmul.f32 %v2086_v16, %v2331_v26  ;;  %v784_v44 = vmul.f32 %v2074_v25, %v2320_v12  ;;  %v863_v48 = vrot.slane %v2338_v31, 2  ;;  %v706_v49 = vrot.slane %v2349_v39, 1 }
  0xa3   : > { %v858_v50 = vrot.slane %v2352_v40, 2  ;;  %v705_v51 = vrot.slane %v632_v41, 1  ;;  %v1226_v52 = vrot.slane %v1153_v35, 2  ;;  %v1224_v53 = vrot.slane %v2344_v36, 2 }
  0xa4   : > { %v577_v54 = vmul.f32 %v2074_v25, %v2335_v30  ;;  %v857_v55 = vrot.slane %v784_v44, 2  ;;  %v714_v56 = vsel %vm704_vm0, %v711_v38, %v713_v34  ;;  %v2368_v58 = vunpack.i.l.bf16 %v2089_v45  ;;  %v2099_v20 = vpop.permute.xlu1 %2098 }
  0xa5   : > { %v707_v57 = vsel %vm704_vm0, %v705_v51, %v706_v49  ;;  %v2080_v59 = vunpack.i.h.bf16 %v2078_v47  ;;  %v1078_v60 = vrot.slane %v2356_v43, 1  ;;  %v580_v61 = vmul.f32 %v2085_v17, %v2335_v30 }
  0xa6   : > { %v761_v62 = vadd.f32 %v707_v57, %v577_v54  ;;  %v866_v0 = vsel %vm856_vm1, %v863_v48, %v865_v42  ;;  %v578_v1 = vmul.f32 %v2075_v24, %v2335_v30  ;;  %v859_v2 = vsel %vm856_vm1, %v857_v55, %v858_v50 }
  0xa7   : > { %v2377_v3 = vunpack.i.h.bf16 %v2089_v45  ;;  %v764_v4 = vadd.f32 %v714_v56, %v580_v61  ;;  %v2380_v5 = vsel %vm856_vm1, %v1224_v53, %v1226_v52  ;;  %v635_v7 = vmul.f32 %v2080_v59, %v2315_v10 }
  0xa8   : > { %v913_v6 = vadd.f32 %v859_v2, %v761_v62  ;;  %v952_v8 = vmul.f32 %v2085_v17, %v2340_v32  ;;  %v1004_v9 = vmul.f32 %v2085_v17, %v2331_v26  ;;  %v1006_v11 = vmul.f32 %v2368_v58, %v2331_v26 }
  0xa9   : > { %v787_v13 = vmul.f32 %v2080_v59, %v2320_v12  ;;  %v710_v14 = vrot.slane %v635_v7, 1  ;;  %v951_v15 = vmul.f32 %v2080_v59, %v2340_v32  ;;  %v1003_v16 = vmul.f32 %v2080_v59, %v2331_v26 }
  0xaa   : > { %v2079_v18 = vunpack.i.l.bf16 %v2078_v47  ;;  %v2392_v21 = vmul.f32 %v2377_v3, %v2331_v26  ;;  %v579_v22 = vmul.f32 %v2080_v59, %v2335_v30  ;;  %v1151_v17 = vmul.f32 %v2080_v59, %v2325_v19 }
  0xab   : > { %v862_v23 = vrot.slane %v787_v13, 2  ;;  %v712_v24 = vsel %vm704_vm0, %v710_v14, %v711_v38  ;;  %v1075_v25 = vrot.slane %v1003_v16, 1  ;;  %v983_v28 = vadd.f32 %v951_v15, %v913_v6 }
  0xac   : > { %v634_v27 = vmul.f32 %v2079_v18, %v2315_v10  ;;  %v1076_v29 = vrot.slane %v1004_v9, 1  ;;  %v763_v31 = vadd.f32 %v712_v24, %v579_v22  ;;  %v786_v33 = vmul.f32 %v2079_v18, %v2320_v12 }
  0xad   : > { %v2101_v34 = vunpack.i.h.bf16 %v2099_v20  ;;  %v2399_v35 = vadd.f32 %v866_v0, %v764_v4  ;;  %v953_v36 = vmul.f32 %v2368_v58, %v2340_v32  ;;  %v1080_v39 = vrot.slane %v1006_v11, 1 }
  0xae   : > { %v708_v40 = vrot.slane %v634_v27, 1  ;;  %v864_v41 = vsel %vm856_vm1, %v862_v23, %v863_v48  ;;  %v1077_v38 = vsel %vm704_vm0, %v1075_v25, %v1076_v29  ;;  %v1223_v42 = vrot.slane %v1151_v17, 2 }
  0xaf   : > { %v860_v43 = vrot.slane %v786_v33, 2  ;;  %v1081_v44 = vrot.slane %v2392_v21, 1  ;;  %v915_v45 = vadd.f32 %v864_v41, %v763_v31  ;;  %v1131_v51 = vadd.f32 %v1077_v38, %v983_v28 }
  0xb0   : > { %v709_v47 = vsel %vm704_vm0, %v706_v49, %v708_v40  ;;  %v1319_v52 = vmul.f32 %v2368_v58, %v2346_v37  ;;  %v2411_v54 = vmul.f32 %v2377_v3, %v2346_v37  ;;  %v643_v48 = vmul.f32 %v2101_v34, %v2315_v10 }
  0xb1   : > { %v762_v55 = vadd.f32 %v709_v47, %v578_v1  ;;  %v1079_v56 = vsel %vm704_vm0, %v1076_v29, %v1078_v60  ;;  %v861_v57 = vsel %vm856_vm1, %v858_v50, %v860_v43  ;;  %v795_v59 = vmul.f32 %v2101_v34, %v2320_v12 }
  0xb2   : > { %v1011_v61 = vmul.f32 %v2101_v34, %v2331_v26  ;;  %v1225_v49 = vsel %vm856_vm1, %v1223_v42, %v1224_v53  ;;  %v1159_v0 = vmul.f32 %v2101_v34, %v2325_v19  ;;  %v2420_v2 = vunpack.i.l.bf16 %v2099_v20 }
  0xb3   : > { %v914_v62 = vadd.f32 %v861_v57, %v762_v55  ;;  %v1082_v1 = vsel %vm704_vm0, %v1080_v39, %v1081_v44  ;;  %v985_v4 = vadd.f32 %v953_v36, %v915_v45  ;;  %v1279_v6 = vadd.f32 %v1225_v49, %v1131_v51 }
  0xb4   : > { %v1378_v60 = vmul.f32 %v2101_v34, %v2359_v46  ;;  %v723_v7 = vrot.slane %v643_v48, 1  ;;  %v1528_v9 = vmul.f32 %v2101_v34, %v2372_v63  ;;  %v2429_v53 = vmul.f32 %v2420_v2, %v2315_v10 }
  0xb5   : > { %v984_v50 = vadd.f32 %v952_v8, %v914_v62  ;;  %v875_v11 = vrot.slane %v795_v59, 2  ;;  %v1088_v13 = vrot.slane %v1011_v61, 1  ;;  %v2433_v14 = vmul.f32 %v2420_v2, %v2320_v12  ;;  %v2094_v61 = vpop.permute.xlu0 %2093 }
  0xb6   : > { %v2437_v15 = vmul.f32 %v2420_v2, %v2331_v26  ;;  %v1236_v16 = vrot.slane %v1159_v0, 2  ;;  %v3125_v8 = vrot.slane %v2429_v53, 1  ;;  %v2442_v18 = vmul.f32 %v2420_v2, %v2325_v19 }
  0xb7   : > { %v638_v20 = vmul.f32 %v2368_v58, %v2315_v10  ;;  %v2446_v22 = vadd.f32 %v1082_v1, %v985_v4  ;;  %v2448_v23 = vadd.f32 %v1319_v52, %v1279_v6  ;;  %v1453_v17 = vrot.slane %v1378_v60, 1 }
  0xb8   : > { %v2452_v24 = vmul.f32 %v2420_v2, %v2359_v46  ;;  %v1132_v25 = vadd.f32 %v1079_v56, %v984_v50  ;;  %v1603_v27 = vrot.slane %v1528_v9, 2  ;;  %v2456_v28 = vmul.f32 %v2420_v2, %v2372_v63 }
  0xb9   : > { %v2460_v29 = vmul.f32 %v2377_v3, %v2315_v10  ;;  %v3122_v31 = vrot.slane %v2433_v14, 2  ;;  %v3124_v33 = vrot.slane %v2437_v15, 1  ;;  %v581_v34 = vmul.f32 %v2368_v58, %v2335_v30 }
  0xba   : > { %v2468_v36 = vmul.f32 %v2377_v3, %v2335_v30  ;;  %v724_v39 = vsel %vm704_vm0, %v3125_v8, %v723_v7  ;;  %v3123_v40 = vrot.slane %v2442_v18, 2  ;;  %v715_v41 = vrot.slane %v638_v20, 1 }
  0xbb   : > { %v716_v38 = vrot.slane %v2460_v29, 1  ;;  %v584_v42 = vmul.f32 %v2420_v2, %v2335_v30  ;;  %v1451_v43 = vrot.slane %v2452_v24, 1  ;;  %v790_v45 = vmul.f32 %v2368_v58, %v2320_v12 }
  0xbc   : > { %v2482_v47 = vmul.f32 %v2377_v3, %v2320_v12  ;;  %v1280_v51 = vadd.f32 %v2380_v5, %v1132_v25  ;;  %v3126_v52 = vrot.slane %v2456_v28, 2  ;;  %v1154_v55 = vmul.f32 %v2368_v58, %v2325_v19 }
  0xbd   : > { %v2490_v48 = vmul.f32 %v2377_v3, %v2325_v19  ;;  %v768_v56 = vadd.f32 %v724_v39, %v584_v42  ;;  %v876_v57 = vsel %vm856_vm1, %v3122_v31, %v875_v11  ;;  %v2498_v59 = vsel %vm704_vm0, %v3124_v33, %v1088_v13 }
  0xbe   : > { %v717_v5 = vsel %vm704_vm0, %v715_v41, %v716_v38  ;;  %v2506_v49 = vsel %vm856_vm1, %v3123_v40, %v1236_v16  ;;  %v867_v62 = vrot.slane %v790_v45, 2  ;;  %v868_v0 = vrot.slane %v2482_v47, 2 }
  0xbf   : > { %v954_v1 = vmul.f32 %v2377_v3, %v2340_v32  ;;  %v1373_v4 = vmul.f32 %v2368_v58, %v2359_v46  ;;  %v2515_v6 = vmul.f32 %v2377_v3, %v2359_v46  ;;  %v1523_v60 = vmul.f32 %v2368_v58, %v2372_v63 }
  0xc0   : > { %v2521_v50 = vmul.f32 %v2377_v3, %v2372_v63  ;;  %v765_v7 = vadd.f32 %v717_v5, %v581_v34  ;;  %v1228_v9 = vrot.slane %v1154_v55, 2  ;;  %v1229_v11 = vrot.slane %v2490_v48, 2 }
  0xc1   : > { %v2096_v13 = vunpack.i.h.bf16 %v2094_v61  ;;  %v2525_v16 = vadd.f32 %v2411_v54, %v1280_v51  ;;  %v2527_v20 = vadd.f32 %v876_v57, %v768_v56  ;;  %v2530_v24 = vsel %vm704_vm0, %v1451_v43, %v1453_v17 }
  0xc2   : > { %v2535_v58 = vsel %vm856_vm1, %v3126_v52, %v1603_v27  ;;  %v869_v3 = vsel %vm856_vm1, %v867_v62, %v868_v0  ;;  %v956_v25 = vmul.f32 %v2420_v2, %v2340_v32  ;;  %v986_v34 = vadd.f32 %v954_v1, %v2399_v35 }
  0xc3   : > { %v2095_v39 = vunpack.i.l.bf16 %v2094_v61  ;;  %v1445_v54 = vrot.slane %v1373_v4, 1  ;;  %v1446_v41 = vrot.slane %v2515_v6, 1  ;;  %v1595_v42 = vrot.slane %v1523_v60, 2 }
  0xc4   : > { %v1596_v17 = vrot.slane %v2521_v50, 2  ;;  %v917_v45 = vadd.f32 %v869_v3, %v765_v7  ;;  %v1230_v47 = vsel %vm856_vm1, %v1228_v9, %v1229_v11  ;;  %v1322_v27 = vmul.f32 %v2420_v2, %v2346_v37 }
  0xc5   : > { %v2547_v51 = vmul.f32 %v2096_v13, %v2335_v30  ;;  %v2550_v55 = vmul.f32 %v2096_v13, %v2315_v10  ;;  %v2553_v35 = vmul.f32 %v2096_v13, %v2320_v12  ;;  %v1376_v48 = vmul.f32 %v2096_v13, %v2359_v46 }
  0xc6   : > { %v1526_v56 = vmul.f32 %v2096_v13, %v2372_v63  ;;  %v955_v57 = vmul.f32 %v2096_v13, %v2340_v32  ;;  %v640_v5 = vmul.f32 %v2095_v39, %v2315_v10  ;;  %v792_v61 = vmul.f32 %v2095_v39, %v2320_v12 }
  0xc7   : > { %v1008_v2 = vmul.f32 %v2095_v39, %v2331_v26  ;;  %v1447_v62 = vsel %vm704_vm0, %v1445_v54, %v1446_v41  ;;  %v1597_v1 = vsel %vm856_vm1, %v1595_v42, %v1596_v17  ;;  %v1009_v4 = vmul.f32 %v2096_v13, %v2331_v26 }
  0xc8   : > { %v1450_v6 = vrot.slane %v1376_v48, 1  ;;  %v1157_v60 = vmul.f32 %v2096_v13, %v2325_v19  ;;  %v1321_v7 = vmul.f32 %v2096_v13, %v2346_v37  ;;  %v718_v9 = vrot.slane %v640_v5, 1 }
  0xc9   : > { %v870_v3 = vrot.slane %v792_v61, 2  ;;  %v1600_v31 = vrot.slane %v1526_v56, 2  ;;  %v1083_v40 = vrot.slane %v1008_v2, 1  ;;  %v1156_v33 = vmul.f32 %v2095_v39, %v2325_v19 }
  0xca   : > { %v1281_v8 = vadd.f32 %v1230_v47, %v2446_v22  ;;  %v720_v54 = vrot.slane %v2550_v55, 1  ;;  %v1452_v52 = vsel %vm704_vm0, %v1450_v6, %v1451_v43  ;;  %v719_v42 = vsel %vm704_vm0, %v716_v38, %v718_v9  ;;  %v2586_v38 = vld [vmem:[%s3120_s4] ss:$0 sm:$0xff]  ;;  %v2109_v55 = vpop.permute.xlu1 %2108 }
  0xcb   : > { %v871_v48 = vsel %vm856_vm1, %v868_v0, %v870_v3  ;;  %v766_v13 = vadd.f32 %v719_v42, %v2468_v36  ;;  %v1084_v56 = vsel %vm704_vm0, %v1081_v44, %v1083_v40  ;;  %v1231_v5 = vrot.slane %v1156_v33, 2 }
  0xcc   : > { %v1353_v61 = vadd.f32 %v1321_v7, %v1281_v8  ;;  %v1134_v22 = vadd.f32 %v1084_v56, %v986_v34  ;;  %v1375_v47 = vmul.f32 %v2095_v39, %v2359_v46  ;;  %v1501_v43 = vadd.f32 %v1447_v62, %v2448_v23  ;;  %v2104_v7 = vpop.permute.xlu0 %2103 }
  0xcd   : > { %v1525_v29 = vmul.f32 %v2095_v39, %v2372_v63  ;;  %v3128_v36 = vrot.slane %v2456_v28, 2  ;;  %v918_v44 = vadd.f32 %v871_v48, %v766_v13  ;;  %v1232_v8 = vsel %vm856_vm1, %v1229_v11, %v1231_v5 }
  0xce   : > { %v1503_v33 = vadd.f32 %v1452_v52, %v1353_v61  ;;  %v1282_v40 = vadd.f32 %v1232_v8, %v1134_v22  ;;  %v1448_v0 = vrot.slane %v1375_v47, 1  ;;  %v1651_v23 = vadd.f32 %v1597_v1, %v1501_v43 }
  0xcf   : > { %v1602_v21 = vsel %vm856_vm1, %v1600_v31, %v3128_v36  ;;  %v1598_v34 = vrot.slane %v1525_v29, 2  ;;  %v987_v39 = vadd.f32 %v955_v57, %v917_v45  ;;  %v1085_v2 = vrot.slane %v1009_v4, 1 }
  0xd0   : > { %v988_v62 = vadd.f32 %v956_v25, %v918_v44  ;;  %v1653_v6 = vadd.f32 %v1602_v21, %v1503_v33  ;;  %v1233_v9 = vrot.slane %v1157_v60, 2  ;;  %v1354_v3 = vadd.f32 %v1322_v27, %v1282_v40 }
  0xd1   : > { %v1449_v28 = vsel %vm704_vm0, %v1446_v41, %v1448_v0  ;;  %v1674_v31 = vadd.f32 %v2586_v38, %v1651_v23  ;;  %v2110_v1 = vunpack.i.l.bf16 %v2109_v55  ;;  %v1599_v25 = vsel %vm856_vm1, %v1596_v17, %v1598_v34 }
  0xd2   : > { %v1136_v11 = vadd.f32 %v2498_v59, %v988_v62  ;;  %v1502_v52 = vadd.f32 %v1449_v28, %v2525_v16  ;;  %v1676_v42 = vadd.f32 %v2586_v38, %v1653_v6  ;;  %v1504_v45 = vadd.f32 %v2530_v24, %v1354_v3 }
  0xd3   : > { %v1690_v57 = vmax.f32 %v1674_v31, 0.0  ;;  %v2602_v4 = vunpack.i.h.bf16 %v2104_v7  ;;  %v3129_v59 = vrot.slane %v2429_v53, 1  ;;  %v3130_v41 = vrot.slane %v2437_v15, 1 }
  0xd4   : > { %v1652_v50 = vadd.f32 %v1599_v25, %v1502_v52  ;;  %v1692_v17 = vmax.f32 %v1676_v42, 0.0  ;;  %v3131_v60 = vrot.slane %v2442_v18, 2  ;;  %v1654_v13 = vadd.f32 %v2535_v58, %v1504_v45 }
  0xd5   : > { %v722_v16 = vsel %vm704_vm0, %v720_v54, %v3129_v59  ;;  %v1087_v24 = vsel %vm704_vm0, %v1085_v2, %v3130_v41  ;;  %v1982_v56 = vpack.c.bf16 %v1690_v57, %v1690_v57  ;;  %v1284_v53 = vadd.f32 %v2506_v49, %v1136_v11 }
  0xd6   : > { %v1135_v27 = vadd.f32 %v1087_v24, %v987_v39  ;;  %v1235_v48 = vsel %vm856_vm1, %v1233_v9, %v3131_v60  ;;  %v1675_v5 = vadd.f32 %v2586_v38, %v1652_v50  ;;  %v1984_v54 = vpack.c.bf16 %v1692_v17, %v1692_v17 }
  0xd7   : > { %v1381_v15 = vmul.f32 %v2110_v1, %v2359_v46  ;;  %v1677_v61 = vadd.f32 %v2586_v38, %v1654_v13  ;;  %1771 = vst.msk [vmem:[%s2607_s7] sm:$0xf] %vm1770_vm2, %v1982_v56  ;;  %v2626_v22 = vmul.f32 %v2110_v1, %v2315_v10  ;;  %v1531_v18 = vmul.f32 %v2110_v1, %v2372_v63 }
  0xd8   : > { %v1380_v58 = vmul.f32 %v2602_v4, %v2359_v46  ;;  %v1691_v47 = vmax.f32 %v1675_v5, 0.0  ;;  %1773 = vst.msk [vmem:[%s2607_s7 + $0x8] sm:$0xf] %vm1770_vm2, %v1984_v54  ;;  %v2634_v49 = vmul.f32 %v2110_v1, %v2320_v12  ;;  %v1324_v43 = vmul.f32 %v2602_v4, %v2346_v37 }
  0xd9   : > { %v1530_v29 = vmul.f32 %v2602_v4, %v2372_v63  ;;  %v1693_v36 = vmax.f32 %v1677_v61, 0.0  ;;  %v1458_v21 = vrot.slane %v1381_v15, 1  ;;  %v2105_v8 = vunpack.i.l.bf16 %v2104_v7  ;;  %v2114_v15 = vpop.permute.xlu0 %2113 }
  0xda   : > { %v1456_v44 = vrot.slane %v1380_v58, 1  ;;  %v1983_v33 = vpack.c.bf16 %v1691_v47, %v1691_v47  ;;  %v1608_v40 = vrot.slane %v1531_v18, 2  ;;  %v1356_v34 = vadd.f32 %v1324_v43, %v1284_v53 }
  0xdb   : > { %v1606_v0 = vrot.slane %v1530_v29, 2  ;;  %v2641_v23 = vadd.f32 %v722_v16, %v2547_v51  ;;  %v872_v39 = vrot.slane %v2553_v35, 2  ;;  %v1283_v2 = vadd.f32 %v1235_v48, %v1135_v27 }
  0xdc   : > { %v1985_v62 = vpack.c.bf16 %v1693_v36, %v1693_v36  ;;  %1772 = vst.msk [vmem:[%s2607_s7 + $0x4] sm:$0xf] %vm1770_vm2, %v1983_v33  ;;  %v2111_v6 = vunpack.i.h.bf16 %v2109_v55  ;;  %v728_v9 = vrot.slane %v2626_v22, 1  ;;  %v2648_v3 = vmul.f32 %v2110_v1, %v2331_v26 }
  0xdd   : > { %v2651_v7 = vmul.f32 %v2110_v1, %v2325_v19  ;;  %v880_v51 = vrot.slane %v2634_v49, 2  ;;  %v1459_v28 = vsel %vm704_vm0, %v1456_v44, %v1458_v21  ;;  %v1323_v31 = vmul.f32 %v2105_v8, %v2346_v37  ;;  %v2119_v1 = vpop.permute.xlu1 %2118 }
  0xde   : > { %1774 = vst.msk [vmem:[%s2607_s7 + $0xc] sm:$0xf] %vm1770_vm2, %v1985_v62  ;;  %v1379_v11 = vmul.f32 %v2105_v8, %v2359_v46  ;;  %v1609_v55 = vsel %vm856_vm1, %v1606_v0, %v1608_v40  ;;  %v2661_v52 = vmul.f32 %v2105_v8, %v2315_v10  ;;  %v1506_v42 = vadd.f32 %v1459_v28, %v1356_v34 }
  0xdf   : > { %v1529_v45 = vmul.f32 %v2105_v8, %v2372_v63  ;;  %v2665_v25 = vmul.f32 %v2105_v8, %v2320_v12  ;;  %v2668_v57 = vmul.f32 %v2105_v8, %v2331_v26  ;;  %v1355_v59 = vadd.f32 %v1323_v31, %v1283_v2 }
  0xe0   : > { %v1455_v16 = vrot.slane %v1379_v11, 1  ;;  %v1093_v41 = vrot.slane %v2648_v3, 1  ;;  %v1656_v17 = vadd.f32 %v1609_v55, %v1506_v42  ;;  %v2673_v27 = vmul.f32 %v2105_v8, %v2335_v30 }
  0xe1   : > { %v1605_v50 = vrot.slane %v1529_v45, 2  ;;  %v2676_v60 = vmul.f32 %v2105_v8, %v2325_v19  ;;  %v2679_v13 = vunpack.i.h.bf16 %v2119_v1  ;;  %v725_v56 = vrot.slane %v2661_v52, 1 }
  0xe2   : > { %v1457_v48 = vsel %vm704_vm0, %v1455_v16, %v1456_v44  ;;  %v2683_v53 = vmul.f32 %v2105_v8, %v2340_v32  ;;  %v1679_v54 = vadd.f32 %v2586_v38, %v1656_v17  ;;  %v877_v61 = vrot.slane %v2665_v25, 2 }
  0xe3   : > { %v1505_v5 = vadd.f32 %v1457_v48, %v1355_v59  ;;  %v1090_v18 = vrot.slane %v2668_v57, 1  ;;  %v1607_v58 = vsel %vm856_vm1, %v1605_v50, %v1606_v0  ;;  %v647_v47 = vmul.f32 %v2111_v6, %v2315_v10 }
  0xe4   : > { %v1695_v29 = vmax.f32 %v1679_v54, 0.0  ;;  %v2691_v36 = vmul.f32 %v2111_v6, %v2320_v12  ;;  %v2694_v21 = vmul.f32 %v2111_v6, %v2331_v26  ;;  %v2698_v8 = vmul.f32 %v2111_v6, %v2325_v19 }
  0xe5   : > { %v1655_v43 = vadd.f32 %v1607_v58, %v1505_v5  ;;  %v2701_v33 = vmul.f32 %v2111_v6, %v2359_v46  ;;  %v2116_v40 = vunpack.i.h.bf16 %v2114_v15  ;;  %v2704_v2 = vunpack.i.l.bf16 %v2119_v1 }
  0xe6   : > { %v1987_v34 = vpack.c.bf16 %v1695_v29, %v1695_v29  ;;  %v2707_v62 = vmul.f32 %v2111_v6, %v2372_v63  ;;  %v587_v28 = vmul.f32 %v2111_v6, %v2335_v30  ;;  %v730_v31 = vrot.slane %v647_v47, 1 }
  0xe7   : > { %v1678_v0 = vadd.f32 %v2586_v38, %v1655_v43  ;;  %v2711_v11 = vmul.f32 %v2111_v6, %v2340_v32  ;;  %v2713_v55 = vunpack.i.l.bf16 %v2114_v15  ;;  %v882_v42 = vrot.slane %v2691_v36, 2 }
  0xe8   : > { %1776 = vst.msk [vmem:[%s2607_s7 + $0x14] sm:$0xf] %vm1770_vm2, %v1987_v34  ;;  %v2720_v1 = vmul.f32 %v2111_v6, %v2346_v37  ;;  %v649_v50 = vmul.f32 %v2116_v40, %v2315_v10  ;;  %v586_v17 = vmul.f32 %v2602_v4, %v2335_v30  ;;  %v801_v54 = vmul.f32 %v2116_v40, %v2320_v12 }
  0xe9   : > { %v1694_v52 = vmax.f32 %v1678_v0, 0.0  ;;  %v645_v15 = vmul.f32 %v2602_v4, %v2315_v10  ;;  %v2732_v6 = vmul.f32 %v2116_v40, %v2331_v26  ;;  %v2735_v58 = vmul.f32 %v2116_v40, %v2325_v19 }
  0xea   : > { %v648_v47 = vmul.f32 %v2713_v55, %v2315_v10  ;;  %v797_v43 = vmul.f32 %v2602_v4, %v2320_v12  ;;  %v2744_v29 = vmul.f32 %v2116_v40, %v2359_v46  ;;  %v2747_v36 = vmul.f32 %v2116_v40, %v2372_v63 }
  0xeb   : > { %v1986_v48 = vpack.c.bf16 %v1694_v52, %v1694_v52  ;;  %v726_v0 = vrot.slane %v645_v15, 1  ;;  %v3132_v34 = vrot.slane %v2433_v14, 2  ;;  %v733_v59 = vrot.slane %v649_v50, 1 }
  0xec   : > { %v588_v5 = vmul.f32 %v2713_v55, %v2335_v30  ;;  %v731_v16 = vrot.slane %v648_v47, 1  ;;  %v800_v14 = vmul.f32 %v2713_v55, %v2320_v12  ;;  %v1013_v35 = vmul.f32 %v2602_v4, %v2331_v26 }
  0xed   : > { %1775 = vst.msk [vmem:[%s2607_s7 + $0x10] sm:$0xf] %vm1770_vm2, %v1986_v48  ;;  %v874_v52 = vsel %vm856_vm1, %v872_v39, %v3132_v34  ;;  %v727_v45 = vsel %vm704_vm0, %v725_v56, %v726_v0  ;;  %v729_v40 = vsel %vm704_vm0, %v726_v0, %v728_v9  ;;  %v885_v39 = vrot.slane %v801_v54, 2 }
  0xee   : > { %v919_v48 = vadd.f32 %v874_v52, %v2641_v23  ;;  %v1098_v50 = vrot.slane %v2732_v6, 1  ;;  %v878_v15 = vrot.slane %v797_v43, 2  ;;  %v958_v47 = vmul.f32 %v2602_v4, %v2340_v32 }
  0xef   : > { %v1463_v56 = vrot.slane %v2744_v29, 1  ;;  %v732_v22 = vsel %vm704_vm0, %v730_v31, %v731_v16  ;;  %v769_v9 = vadd.f32 %v727_v45, %v2673_v27  ;;  %v1613_v0 = vrot.slane %v2747_v36, 2 }
  0xf0   : > { %v770_v34 = vadd.f32 %v729_v40, %v586_v17  ;;  %v989_v52 = vadd.f32 %v2683_v53, %v919_v48  ;;  %v990_v54 = vadd.f32 %v958_v47, %v2527_v20  ;;  %v734_v6 = vsel %vm704_vm0, %v731_v16, %v733_v59  ;;  %v2129_v48 = vpop.permute.xlu1 %2128 }
  0xf1   : > { %v883_v43 = vrot.slane %v800_v14, 2  ;;  %v960_v24 = vmul.f32 %v2713_v55, %v2340_v32  ;;  %v1091_v23 = vrot.slane %v1013_v35, 1  ;;  %v771_v44 = vadd.f32 %v732_v22, %v587_v28 }
  0xf2   : > { %v879_v31 = vsel %vm856_vm1, %v877_v61, %v878_v15  ;;  %v1016_v27 = vmul.f32 %v2713_v55, %v2331_v26  ;;  %v1161_v53 = vmul.f32 %v2602_v4, %v2325_v19  ;;  %v881_v20 = vsel %vm856_vm1, %v878_v15, %v880_v51 }
  0xf3   : > { %v921_v45 = vadd.f32 %v879_v31, %v769_v9  ;;  %v1092_v59 = vsel %vm704_vm0, %v1090_v18, %v1091_v23  ;;  %v1094_v25 = vsel %vm704_vm0, %v1091_v23, %v1093_v41  ;;  %v922_v61 = vadd.f32 %v881_v20, %v770_v34 }
  0xf4   : > { %v1137_v28 = vadd.f32 %v1092_v59, %v989_v52  ;;  %v1138_v16 = vadd.f32 %v1094_v25, %v990_v54  ;;  %v1239_v17 = vrot.slane %v1161_v53, 2  ;;  %v772_v29 = vadd.f32 %v734_v6, %v588_v5 }
  0xf5   : > { %v884_v4 = vsel %vm856_vm1, %v882_v42, %v883_v43  ;;  %v1383_v49 = vmul.f32 %v2713_v55, %v2359_v46  ;;  %v1533_v51 = vmul.f32 %v2713_v55, %v2372_v63  ;;  %v1096_v57 = vrot.slane %v1016_v27, 1 }
  0xf6   : > { %v1164_v18 = vmul.f32 %v2713_v55, %v2325_v19  ;;  %v3133_v3 = vrot.slane %v2676_v60, 2  ;;  %v3134_v36 = vrot.slane %v2651_v7, 2  ;;  %v991_v42 = vadd.f32 %v2711_v11, %v921_v45 }
  0xf7   : > { %v1326_v35 = vmul.f32 %v2713_v55, %v2346_v37  ;;  %v886_v15 = vsel %vm856_vm1, %v883_v43, %v885_v39  ;;  %v992_v47 = vadd.f32 %v960_v24, %v922_v61  ;;  %v1461_v23 = vrot.slane %v1383_v49, 1 }
  0xf8   : > { %v1240_v41 = vsel %vm856_vm1, %v3133_v3, %v1239_v17  ;;  %v1242_v5 = vsel %vm856_vm1, %v1239_v17, %v3134_v36  ;;  %v1611_v22 = vrot.slane %v1533_v51, 2  ;;  %v2811_v60 = vadd.f32 %v884_v4, %v771_v44 }
  0xf9   : > { %v1285_v40 = vadd.f32 %v1240_v41, %v1137_v28  ;;  %v1286_v14 = vadd.f32 %v1242_v5, %v1138_v16  ;;  %v2131_v34 = vunpack.i.h.bf16 %v2129_v48  ;;  %v3135_v52 = vrot.slane %v2694_v21, 1 }
  0xfa   : > { %v1244_v54 = vrot.slane %v1164_v18, 2  ;;  %v3136_v6 = vrot.slane %v2701_v33, 1  ;;  %v1464_v39 = vsel %vm704_vm0, %v1461_v23, %v1463_v56  ;;  %v1099_v24 = vsel %vm704_vm0, %v1096_v57, %v1098_v50 }
  0xfb   : > { %v1357_v9 = vadd.f32 %v2720_v1, %v1285_v40  ;;  %v1358_v7 = vadd.f32 %v1326_v35, %v1286_v14  ;;  %v1097_v11 = vsel %vm704_vm0, %v3135_v52, %v1096_v57  ;;  %v1140_v27 = vadd.f32 %v1099_v24, %v992_v47 }
  0xfc   : > { %v1462_v55 = vsel %vm704_vm0, %v3136_v6, %v1461_v23  ;;  %v1139_v43 = vadd.f32 %v1097_v11, %v991_v42  ;;  %v3137_v1 = vrot.slane %v2707_v62, 2  ;;  %v1614_v21 = vsel %vm856_vm1, %v1611_v22, %v1613_v0 }
  0xfd   : > { %v1507_v44 = vadd.f32 %v1462_v55, %v1357_v9  ;;  %v1508_v31 = vadd.f32 %v1464_v39, %v1358_v7  ;;  %v2827_v20 = vmul.f32 %v2131_v34, %v2315_v10  ;;  %v2829_v33 = vadd.f32 %v886_v15, %v772_v29 }
  0xfe   : > { %v1612_v53 = vsel %vm856_vm1, %v3137_v1, %v1611_v22  ;;  %v2831_v56 = vunpack.i.l.bf16 %v2129_v48  ;;  %v3138_v50 = vrot.slane %v2698_v8, 2  ;;  %v3139_v61 = vrot.slane %v2735_v58, 2 }
  0xff   : > { %v1657_v45 = vadd.f32 %v1612_v53, %v1507_v44  ;;  %v1658_v59 = vadd.f32 %v1614_v21, %v1508_v31  ;;  %v2840_v28 = vmul.f32 %v2131_v34, %v2331_v26  ;;  %v2843_v0 = vmul.f32 %v2131_v34, %v2325_v19 }
 0x100   : > { %v1245_v25 = vsel %vm856_vm1, %v3138_v50, %v1244_v54  ;;  %v1247_v62 = vsel %vm856_vm1, %v1244_v54, %v3139_v61  ;;  %v2848_v29 = vmul.f32 %v2131_v34, %v2359_v46  ;;  %v2851_v8 = vmul.f32 %v2131_v34, %v2372_v63  ;;  %v2124_v54 = vpop.permute.xlu0 %2123 }
 0x101   : > { %v1680_v16 = vadd.f32 %v2586_v38, %v1657_v45  ;;  %v1681_v17 = vadd.f32 %v2586_v38, %v1658_v59  ;;  %v1287_v4 = vadd.f32 %v1245_v25, %v1139_v43  ;;  %v2853_v58 = vadd.f32 %v1247_v62, %v1140_v27 }
 0x102   : > { %v2857_v51 = vmul.f32 %v2131_v34, %v2320_v12  ;;  %v2861_v3 = vmul.f32 %v2831_v56, %v2331_v26  ;;  %v2865_v41 = vmul.f32 %v2831_v56, %v2359_v46  ;;  %v2871_v48 = vmul.f32 %v2831_v56, %v2372_v63 }
 0x103   : > { %v1696_v57 = vmax.f32 %v1680_v16, 0.0  ;;  %v1697_v18 = vmax.f32 %v1681_v17, 0.0  ;;  %v2875_v42 = vmul.f32 %v2679_v13, %v2315_v10  ;;  %v1473_v35 = vrot.slane %v2848_v29, 1 }
 0x104   : > { %v2881_v47 = vmul.f32 %v2679_v13, %v2335_v30  ;;  %v2885_v23 = vmul.f32 %v2679_v13, %v2320_v12  ;;  %v1018_v22 = vmul.f32 %v2704_v2, %v2331_v26  ;;  %v1019_v9 = vmul.f32 %v2679_v13, %v2331_v26 }
 0x105   : > { %v1988_v40 = vpack.c.bf16 %v1696_v57, %v1696_v57  ;;  %v1989_v14 = vpack.c.bf16 %v1697_v18, %v1697_v18  ;;  %v1471_v34 = vrot.slane %v2865_v41, 1  ;;  %v1166_v52 = vmul.f32 %v2704_v2, %v2325_v19 }
 0x106   : > { %v1167_v11 = vmul.f32 %v2679_v13, %v2325_v19  ;;  %v1621_v6 = vrot.slane %v2871_v48, 2  ;;  %v736_v55 = vrot.slane %v2875_v42, 1  ;;  %v961_v39 = vmul.f32 %v2704_v2, %v2340_v32 }
 0x107   : > { %1777 = vst.msk [vmem:[%s2607_s7 + $0x18] sm:$0xf] %vm1770_vm2, %v1988_v40  ;;  %1778 = vst.msk [vmem:[%s2607_s7 + $0x1c] sm:$0xf] %vm1770_vm2, %v1989_v14  ;;  %v1385_v24 = vmul.f32 %v2704_v2, %v2359_v46  ;;  %v1100_v43 = vrot.slane %v1018_v22, 1  ;;  %v1101_v44 = vrot.slane %v1019_v9, 1  ;;  %v1386_v31 = vmul.f32 %v2679_v13, %v2359_v46 }
 0x108   : > { %v1535_v27 = vmul.f32 %v2704_v2, %v2372_v63  ;;  %v1248_v1 = vrot.slane %v1166_v52, 2  ;;  %v1249_v53 = vrot.slane %v1167_v11, 2  ;;  %v1536_v21 = vmul.f32 %v2679_v13, %v2372_v63 }
 0x109   : > { %v2913_v45 = vunpack.i.h.bf16 %v2124_v54  ;;  %v962_v59 = vmul.f32 %v2679_v13, %v2340_v32  ;;  %v1465_v50 = vrot.slane %v1385_v24, 1  ;;  %v1466_v25 = vrot.slane %v1386_v31, 1 }
 0x10a   : > { %v2125_v61 = vunpack.i.l.bf16 %v2124_v54  ;;  %v1327_v62 = vmul.f32 %v2704_v2, %v2346_v37  ;;  %v1328_v16 = vmul.f32 %v2679_v13, %v2346_v37  ;;  %v1330_v17 = vmul.f32 %v2831_v56, %v2346_v37 }
 0x10b   : > { %v1388_v57 = vmul.f32 %v2913_v45, %v2359_v46  ;;  %v1615_v18 = vrot.slane %v1535_v27, 2  ;;  %v1616_v40 = vrot.slane %v1536_v21, 2  ;;  %v993_v22 = vadd.f32 %v961_v39, %v2811_v60 }
 0x10c   : > { %v652_v14 = vmul.f32 %v2125_v61, %v2315_v10  ;;  %v1102_v9 = vsel %vm704_vm0, %v1100_v43, %v1101_v44  ;;  %v1250_v52 = vsel %vm856_vm1, %v1248_v1, %v1249_v53  ;;  %v1329_v11 = vmul.f32 %v2913_v45, %v2346_v37 }
 0x10d   : > { %v1538_v13 = vmul.f32 %v2913_v45, %v2372_v63  ;;  %v1467_v54 = vsel %vm704_vm0, %v1465_v50, %v1466_v25  ;;  %v1470_v24 = vrot.slane %v1388_v57, 1  ;;  %v1020_v31 = vmul.f32 %v2125_v61, %v2331_v26 }
 0x10e   : > { %v1141_v27 = vadd.f32 %v1102_v9, %v993_v22  ;;  %v738_v21 = vrot.slane %v652_v14, 1  ;;  %v994_v49 = vadd.f32 %v962_v59, %v2829_v33  ;;  %v1168_v60 = vmul.f32 %v2125_v61, %v2325_v19 }
 0x10f   : > { %v1359_v39 = vadd.f32 %v1327_v62, %v1287_v4  ;;  %v1617_v43 = vsel %vm856_vm1, %v1615_v18, %v1616_v40  ;;  %v804_v1 = vmul.f32 %v2125_v61, %v2320_v12  ;;  %v1103_v5 = vrot.slane %v1020_v31, 1 }
 0x110   : > { %v1289_v7 = vadd.f32 %v1250_v52, %v1141_v27  ;;  %v1620_v36 = vrot.slane %v1538_v13, 2  ;;  %v1251_v15 = vrot.slane %v1168_v60, 2  ;;  %v1360_v50 = vadd.f32 %v1328_v16, %v2853_v58 }
 0x111   : > { %v1387_v57 = vmul.f32 %v2125_v61, %v2359_v46  ;;  %v1104_v22 = vsel %vm704_vm0, %v1101_v44, %v1103_v5  ;;  %v1509_v9 = vadd.f32 %v1467_v54, %v1359_v39  ;;  %v1537_v33 = vmul.f32 %v2125_v61, %v2372_v63 }
 0x112   : > { %v1361_v14 = vadd.f32 %v1329_v11, %v1289_v7  ;;  %v1472_v4 = vsel %vm704_vm0, %v1470_v24, %v1471_v34  ;;  %v739_v59 = vsel %vm704_vm0, %v736_v55, %v738_v21  ;;  %v1142_v62 = vadd.f32 %v1104_v22, %v994_v49 }
 0x113   : > { %v1468_v18 = vrot.slane %v1387_v57, 1  ;;  %v1252_v58 = vsel %vm856_vm1, %v1249_v53, %v1251_v15  ;;  %v1618_v52 = vrot.slane %v1537_v33, 2  ;;  %v1659_v13 = vadd.f32 %v1617_v43, %v1509_v9 }
 0x114   : > { %v1511_v16 = vadd.f32 %v1472_v4, %v1361_v14  ;;  %v1622_v5 = vsel %vm856_vm1, %v1620_v36, %v1621_v6  ;;  %v890_v7 = vrot.slane %v804_v1, 2  ;;  %v1290_v44 = vadd.f32 %v1252_v58, %v1142_v62 }
 0x115   : > { %v1469_v61 = vsel %vm704_vm0, %v1466_v25, %v1468_v18  ;;  %v774_v11 = vadd.f32 %v739_v59, %v2881_v47  ;;  %v1682_v49 = vadd.f32 %v2586_v38, %v1659_v13  ;;  %v1474_v15 = vsel %vm704_vm0, %v1471_v34, %v1473_v35  ;;  %v2134_v34 = vpop.permute.xlu0 %2133 }
 0x116   : > { %v1510_v54 = vadd.f32 %v1469_v61, %v1360_v50  ;;  %v1661_v24 = vadd.f32 %v1622_v5, %v1511_v16  ;;  %v888_v53 = vrot.slane %v2885_v23, 2  ;;  %v1362_v31 = vadd.f32 %v1330_v17, %v1290_v44 }
 0x117   : > { %v1619_v36 = vsel %vm856_vm1, %v1616_v40, %v1618_v52  ;;  %v3140_v27 = vrot.slane %v2851_v8, 2  ;;  %v1698_v60 = vmax.f32 %v1682_v49, 0.0  ;;  %v650_v35 = vmul.f32 %v2704_v2, %v2315_v10  ;;  %v945_v40 = vpop.permute.xlu1 %944 }
 0x118   : > { %v1660_v25 = vadd.f32 %v1619_v36, %v1510_v54  ;;  %v1684_v21 = vadd.f32 %v2586_v38, %v1661_v24  ;;  %v891_v29 = vsel %vm856_vm1, %v888_v53, %v890_v7  ;;  %v1512_v41 = vadd.f32 %v1474_v15, %v1362_v31 }
 0x119   : > { %v1624_v47 = vsel %vm856_vm1, %v1621_v6, %v3140_v27  ;;  %v802_v23 = vmul.f32 %v2704_v2, %v2320_v12  ;;  %v926_v8 = vadd.f32 %v891_v29, %v774_v11  ;;  %v1990_v6 = vpack.c.bf16 %v1698_v60, %v1698_v60 }
 0x11a   : > { %v1683_v48 = vadd.f32 %v2586_v38, %v1660_v25  ;;  %v1700_v17 = vmax.f32 %v1684_v21, 0.0  ;;  %v1662_v39 = vadd.f32 %v1624_v47, %v1512_v41  ;;  %v589_v43 = vmul.f32 %v2704_v2, %v2335_v30 }
 0x11b   : > { %v735_v1 = vrot.slane %v650_v35, 1  ;;  %v887_v50 = vrot.slane %v802_v23, 2  ;;  %1779 = vst.msk [vmem:[%s2607_s7 + $0x20] sm:$0xf] %vm1770_vm2, %v1990_v6  ;;  %v1170_v14 = vmul.f32 %v2831_v56, %v2325_v19  ;;  %v2981_v9 = vunpack.i.h.bf16 %v2134_v34 }
 0x11c   : > { %v1699_v57 = vmax.f32 %v1683_v48, 0.0  ;;  %v1992_v22 = vpack.c.bf16 %v1700_v17, %v1700_v17  ;;  %v3141_v33 = vrot.slane %v2840_v28, 1  ;;  %v3142_v4 = vrot.slane %v2861_v3, 1 }
 0x11d   : > { %v1685_v2 = vadd.f32 %v2586_v38, %v1662_v39  ;;  %v2990_v62 = vmul.f32 %v2331_v26, %v945_v40  ;;  %v737_v18 = vsel %vm704_vm0, %v735_v1, %v736_v55  ;;  %v889_v52 = vsel %vm856_vm1, %v887_v50, %v888_v53 }
 0x11e   : > { %v1109_v59 = vsel %vm704_vm0, %v3142_v4, %v3141_v33  ;;  %v1991_v58 = vpack.c.bf16 %v1699_v57, %v1699_v57  ;;  %1781 = vst.msk [vmem:[%s2607_s7 + $0x28] sm:$0xf] %vm1770_vm2, %v1992_v22  ;;  %v773_v16 = vadd.f32 %v737_v18, %v589_v43  ;;  %v964_v28 = vmul.f32 %v2831_v56, %v2340_v32 }
 0x11f   : > { %v1701_v13 = vmax.f32 %v1685_v2, 0.0  ;;  %v1254_v5 = vrot.slane %v1170_v14, 2  ;;  %v1392_v7 = vmul.f32 %v2981_v9, %v2359_v46  ;;  %v3002_v44 = vunpack.i.l.bf16 %v2134_v34 }
 0x120   : > { %1780 = vst.msk [vmem:[%s2607_s7 + $0x24] sm:$0xf] %vm1770_vm2, %v1991_v58  ;;  %v925_v42 = vadd.f32 %v889_v52, %v773_v16  ;;  %v963_v55 = vmul.f32 %v2913_v45, %v2340_v32  ;;  %v996_v61 = vadd.f32 %v964_v28, %v926_v8  ;;  %v1021_v11 = vmul.f32 %v2913_v45, %v2331_v26  ;;  %v2139_v52 = vpop.permute.xlu0 %2138 }
 0x121   : > { %v1993_v54 = vpack.c.bf16 %v1701_v13, %v1701_v13  ;;  %v1393_v24 = vmul.f32 %v2359_v46, %v945_v40  ;;  %v1542_v49 = vmul.f32 %v2981_v9, %v2372_v63  ;;  %v1169_v15 = vmul.f32 %v2913_v45, %v2325_v19 }
 0x122   : > { %v1543_v53 = vmul.f32 %v2372_v63, %v945_v40  ;;  %v995_v31 = vadd.f32 %v963_v55, %v925_v42  ;;  %v1105_v36 = vrot.slane %v1021_v11, 1  ;;  %v1144_v27 = vadd.f32 %v1109_v59, %v996_v61 }
 0x123   : > { %1782 = vst.msk [vmem:[%s2607_s7 + $0x2c] sm:$0xf] %vm1770_vm2, %v1993_v54  ;;  %v3143_v47 = vrot.slane %v2843_v0, 2  ;;  %v1476_v21 = vrot.slane %v1392_v7, 1  ;;  %v1253_v60 = vrot.slane %v1169_v15, 2  ;;  %v1391_v29 = vmul.f32 %v3002_v44, %v2359_v46 }
 0x124   : > { %v1332_v41 = vmul.f32 %v2981_v9, %v2346_v37  ;;  %v3144_v35 = vmov %v3142_v4  ;;  %v1541_v8 = vmul.f32 %v3002_v44, %v2372_v63  ;;  %v3031_v0 = vmul.f32 %v2325_v19, %v945_v40 }
 0x125   : > { %v1257_v25 = vsel %vm856_vm1, %v1254_v5, %v3143_v47  ;;  %v1107_v23 = vsel %vm704_vm0, %v1105_v36, %v3144_v35  ;;  %v1478_v48 = vrot.slane %v1393_v24, 1  ;;  %v1626_v17 = vrot.slane %v1542_v49, 2 }
 0x126   : > { %v1292_v34 = vadd.f32 %v1257_v25, %v1144_v27  ;;  %v1143_v6 = vadd.f32 %v1107_v23, %v995_v31  ;;  %v1628_v39 = vrot.slane %v1543_v53, 2  ;;  %v1255_v43 = vsel %vm856_vm1, %v1253_v60, %v1254_v5 }
 0x127   : > { %v1475_v50 = vrot.slane %v1391_v29, 1  ;;  %v1479_v57 = vsel %vm704_vm0, %v1476_v21, %v1478_v48  ;;  %v1331_v22 = vmul.f32 %v3002_v44, %v2346_v37  ;;  %v654_v14 = vmul.f32 %v2831_v56, %v2315_v10 }
 0x128   : > { %v1364_v1 = vadd.f32 %v1332_v41, %v1292_v34  ;;  %v1291_v3 = vadd.f32 %v1255_v43, %v1143_v6  ;;  %v895_v40 = vrot.slane %v2857_v51, 2  ;;  %v1625_v4 = vrot.slane %v1541_v8, 2  ;;  %v1313_v34 = vpop.permute.xlu1 %1312 }
 0x129   : > { %v806_v59 = vmul.f32 %v2831_v56, %v2320_v12  ;;  %v1113_v2 = vrot.slane %v2990_v62, 1  ;;  %v1629_v18 = vsel %vm856_vm1, %v1626_v17, %v1628_v39  ;;  %v741_v16 = vrot.slane %v654_v14, 1 }
 0x12a   : > { %v1514_v33 = vadd.f32 %v1479_v57, %v1364_v1  ;;  %v1363_v58 = vadd.f32 %v1331_v22, %v1291_v3  ;;  %v1477_v28 = vsel %vm704_vm0, %v1475_v50, %v1476_v21  ;;  %v592_v5 = vmul.f32 %v2831_v56, %v2335_v30 }
 0x12b   : > { %v893_v7 = vrot.slane %v806_v59, 2  ;;  %v1261_v51 = vrot.slane %v3031_v0, 2  ;;  %v3145_v55 = vrot.slane %v2827_v20, 1  ;;  %v653_v62 = vmul.f32 %v2913_v45, %v2315_v10 }
 0x12c   : > { %v1664_v13 = vadd.f32 %v1629_v18, %v1514_v33  ;;  %v1513_v42 = vadd.f32 %v1477_v28, %v1363_v58  ;;  %v1627_v11 = vsel %vm856_vm1, %v1625_v4, %v1626_v17  ;;  %v2141_v49 = vunpack.i.h.bf16 %v2139_v52 }
 0x12d   : > { %v744_v61 = vsel %vm704_vm0, %v741_v16, %v3145_v55  ;;  %v896_v56 = vsel %vm856_vm1, %v893_v7, %v895_v40  ;;  %v740_v53 = vrot.slane %v653_v62, 1  ;;  %v805_v31 = vmul.f32 %v2913_v45, %v2320_v12 }
 0x12e   : > { %v1687_v54 = vadd.f32 %v2586_v38, %v1664_v13  ;;  %v776_v24 = vadd.f32 %v744_v61, %v592_v5  ;;  %v1663_v15 = vadd.f32 %v1627_v11, %v1513_v42  ;;  %v2140_v27 = vunpack.i.l.bf16 %v2139_v52 }
 0x12f   : > { %v591_v10 = vmul.f32 %v2913_v45, %v2335_v30  ;;  %v742_v25 = vsel %vm704_vm0, %v740_v53, %v741_v16  ;;  %v892_v21 = vrot.slane %v805_v31, 2  ;;  %v965_v60 = vmul.f32 %v3002_v44, %v2340_v32 }
 0x130   : > { %v1703_v36 = vmax.f32 %v1687_v54, 0.0  ;;  %v928_v20 = vadd.f32 %v896_v56, %v776_v24  ;;  %v1686_v47 = vadd.f32 %v2586_v38, %v1663_v15  ;;  %v966_v12 = vmul.f32 %v2981_v9, %v2340_v32 }
 0x131   : > { %v775_v41 = vadd.f32 %v742_v25, %v591_v10  ;;  %v1024_v35 = vmul.f32 %v3002_v44, %v2331_v26  ;;  %v894_v30 = vsel %vm856_vm1, %v892_v21, %v893_v7  ;;  %v1025_v45 = vmul.f32 %v2981_v9, %v2331_v26 }
 0x132   : > { %v1995_v29 = vpack.c.bf16 %v1703_v36, %v1703_v36  ;;  %v1702_v23 = vmax.f32 %v1686_v47, 0.0  ;;  %v1172_v8 = vmul.f32 %v3002_v44, %v2325_v19  ;;  %v998_v48 = vadd.f32 %v966_v12, %v928_v20 }
 0x133   : > { %v927_v0 = vadd.f32 %v894_v30, %v775_v41  ;;  %v1110_v17 = vrot.slane %v1024_v35, 1  ;;  %v1173_v32 = vmul.f32 %v2981_v9, %v2325_v19  ;;  %v1395_v39 = vmul.f32 %v2141_v49, %v2359_v46 }
 0x134   : > { %1784 = vst.msk [vmem:[%s2607_s7 + $0x34] sm:$0xf] %vm1770_vm2, %v1995_v29  ;;  %v1994_v6 = vpack.c.bf16 %v1702_v23, %v1702_v23  ;;  %v1111_v43 = vrot.slane %v1025_v45, 1  ;;  %v1258_v1 = vrot.slane %v1172_v8, 2  ;;  %v1396_v50 = vmul.f32 %v2359_v46, %v1313_v34 }
 0x135   : > { %v997_v57 = vadd.f32 %v965_v60, %v927_v0  ;;  %v1259_v26 = vrot.slane %v1173_v32, 2  ;;  %v1394_v3 = vmul.f32 %v2140_v27, %v2359_v46  ;;  %v1545_v44 = vmul.f32 %v2141_v49, %v2372_v63 }
 0x136   : > { %1783 = vst.msk [vmem:[%s2607_s7 + $0x30] sm:$0xf] %vm1770_vm2, %v1994_v6  ;;  %v1112_v22 = vsel %vm704_vm0, %v1110_v17, %v1111_v43  ;;  %v1114_v14 = vsel %vm704_vm0, %v1111_v43, %v1113_v2  ;;  %v1544_v19 = vmul.f32 %v2140_v27, %v2372_v63  ;;  %v1546_v9 = vmul.f32 %v2372_v63, %v1313_v34 }
 0x137   : > { %v1145_v40 = vadd.f32 %v1112_v22, %v997_v57  ;;  %v1146_v33 = vadd.f32 %v1114_v14, %v998_v48  ;;  %v1481_v4 = vrot.slane %v1395_v39, 1  ;;  %v1260_v59 = vsel %vm856_vm1, %v1258_v1, %v1259_v26 }
 0x138   : > { %v1262_v18 = vsel %vm856_vm1, %v1259_v26, %v1261_v51  ;;  %v1480_v46 = vrot.slane %v1394_v3, 1  ;;  %v1334_v58 = vmul.f32 %v2141_v49, %v2346_v37  ;;  %v1333_v28 = vmul.f32 %v2140_v27, %v2346_v37 }
 0x139   : > { %v1293_v16 = vadd.f32 %v1260_v59, %v1145_v40  ;;  %v1294_v52 = vadd.f32 %v1262_v18, %v1146_v33  ;;  %v1483_v13 = vrot.slane %v1396_v50, 1  ;;  %v1631_v2 = vrot.slane %v1545_v44, 2 }
 0x13a   : > { %v1630_v5 = vrot.slane %v1544_v19, 2  ;;  %v1633_v63 = vrot.slane %v1546_v9, 2  ;;  %v1482_v61 = vsel %vm704_vm0, %v1480_v46, %v1481_v4 }
 0x13b   : > { %v1365_v7 = vadd.f32 %v1333_v28, %v1293_v16  ;;  %v1366_v42 = vadd.f32 %v1334_v58, %v1294_v52  ;;  %v1484_v55 = vsel %vm704_vm0, %v1481_v4, %v1483_v13 }
 0x13c   : > { %v1634_v11 = vsel %vm856_vm1, %v1631_v2, %v1633_v63  ;;  %v1632_v54 = vsel %vm856_vm1, %v1630_v5, %v1631_v2 }
 0x13d   : > { %v1515_v51 = vadd.f32 %v1482_v61, %v1365_v7  ;;  %v1516_v62 = vadd.f32 %v1484_v55, %v1366_v42 }
 0x13f   : > { %v1665_v24 = vadd.f32 %v1632_v54, %v1515_v51  ;;  %v1666_v37 = vadd.f32 %v1634_v11, %v1516_v62 }
 0x141   : > { %v1688_v49 = vadd.f32 %v2586_v38, %v1665_v24  ;;  %v1689_v15 = vadd.f32 %v2586_v38, %v1666_v37 }
 0x143   : > { %v1704_v56 = vmax.f32 %v1688_v49, 0.0  ;;  %v1705_v53 = vmax.f32 %v1689_v15, 0.0 }
 0x145   : > { %v1996_v31 = vpack.c.bf16 %v1704_v56, %v1704_v56  ;;  %v1997_v36 = vpack.c.bf16 %v1705_v53, %v1705_v53 }
 0x147   : > { %1785 = vst.msk [vmem:[%s2607_s7 + $0x38] sm:$0xf] %vm1770_vm2, %v1996_v31  ;;  %1786 = vst.msk [vmem:[%s2607_s7 + $0x3c] sm:$0xf] %vm1770_vm2, %v1997_v36 }
 0x148 PF: > { %s15_s22 = sadd.s32 1, %s2180_s22   ;;  %s3146_s18 = smov %s2172_s20 }
 0x149   : > { %p12_p10 = scmp.ge.s32.totalorder %s15_s22, 6   ;;  %s3147_s19 = smov %s2176_s21 }
 0x14a   : > { %s3148_s20 = smov %s3151_s23  ;;  %s3149_s21 = smov %s3155_s24 }
 0x14b   :  { %14 = sbr.rel (!%p12_p10) target bundleno = 3 (0x3), region = 78 }

// kernel: squeeze.1
= control target key start
LH: loop header
LB: loop body
LE: loop exit
PB: predicated region body
PF: predicated region fallthrough
CT: control target
= control target key end

     0   :  { %vm16_vm0 = vcmask 523264   ;;  %s61_s0 = inlined_call_operand.vmem [shape: f32[3,3,64], index: 0, kind: input, shape index: {}]   ;;  %s62_s1 = inlined_call_operand.vmem [shape: f32[9,64], index: 1, kind: output, shape index: {}]  }
   0x1   :  { %v29_v0 = vld [vmem:[%s61_s0 + $0x8] sm:$0xf]  ;;  %v30_v1 = vld [vmem:[%s61_s0 + $0x4] sm:$0xf]  ;;  %v13_v2 = vld [vmem:[%s61_s0] sm:$0xf] }
   0x2   :  { %8 = vst [vmem:[#allocation0 + $0x10] sm:$0xf] %v29_v0  ;;  %12 = vst [vmem:[#allocation0 + $0x8] sm:$0xf] %v30_v1 }
   0x3   :  { %14 = vst [vmem:[#allocation0] sm:$0xf] %v13_v2 }
   0x9   :  { %v19_v4 = vld [vmem:[#allocation0 + $0x8] sm:$0x7]   ;;  %v24_v5 = vld [vmem:[#allocation0 + $0x10] sm:$0x7]  }
   0xa   :  { %v15_v3 = vld [vmem:[#allocation0] sm:$0x7]   ;;  %31 = vst.msk [vmem:[%s62_s1 + $0x3] sm:$0x7] %vm16_vm0, %v19_v4   ;;  %32 = vst.msk [vmem:[%s62_s1 + $0x6] sm:$0x7] %vm16_vm0, %v24_v5  }
   0xb   :  { %17 = vst.msk [vmem:[%s62_s1] sm:$0x7] %vm16_vm0, %v15_v3  }

// kernel: l_net_forward.6
= control target key start
LH: loop header
LB: loop body
LE: loop exit
PB: predicated region body
PF: predicated region fallthrough
CT: control target
= control target key end

     0   :  { %s5074_s18 = smov 0   ;;  %s5076_s19 = smov 0   ;;  %s7283_s0 = inlined_call_operand.vmem [shape: bf16[2,18,18,64], index: 0, kind: input, shape index: {}, may-alias: {0,1,2}]   ;;  %s7284_s1 = inlined_call_operand.vmem [shape: bf16[2,18,18,64], index: 1, kind: input, shape index: {}, may-alias: {0,1,2}]   ;;  %s7285_s2 = inlined_call_operand.vmem [shape: bf16[2,18,18,64], index: 2, kind: input, shape index: {}, may-alias: {0,1,2}]   ;;  %s7286_s3 = inlined_call_operand.vmem [shape: bf16[3,192,64], index: 3, kind: input, shape index: {}]   ;;  %s7287_s4 = inlined_call_operand.vmem [shape: f32[1,64], index: 4, kind: input, shape index: {}]   ;;  %s7288_s5 = inlined_call_operand.vmem [shape: bf16[2,16,16,64], index: 5, kind: output, shape index: {}]  }
   0x1   :  { %s5078_s20 = smov 0   ;;  %s5080_s21 = smov 0  }
   0x2   :  { %s5082_s22 = smov 0  }
   0x3 LB: > { %s24_s23 = sadd.s32 1, %s5030_s20  ;;  %s27_s24 = sadd.s32 1, %s5034_s21  ;;  %s5038_s22 = sphi %s5082_s22, %s15_s22   ;;  %s5034_s21 = sphi %s5080_s21, %s7690_s21   ;;  %s5030_s20 = sphi %s5078_s20, %s7689_s20   ;;  %s5026_s19 = sphi %s5076_s19, %s7688_s19   ;;  %s5022_s18 = sphi %s5074_s18, %s7687_s18  }
   0x4   : > { %p25_p0 = scmp.ge.s32.totalorder %s24_s23, 2  ;;  %p4652_p1 = scmp.ge.s32.totalorder %s5038_s22, 1 }
   0x5   : > { %p271_p2 = scmp.lt.s32.totalorder %s5038_s22, 5 }
   0x6   : > { %s7692_s23 = smov (%p25_p0, %s24_s23), 0  ;;  %s7694_s24 = smov (!%p25_p0, %s27_s24), %s5034_s21 }
   0x7   : > { %p272_p3 = pnand %p4652_p1, %p271_p2  ;;  %p29_p4 = scmp.ge.s32.totalorder %s7694_s24, 2 }
   0x9   : > { %s7696_s24 = smov (%p29_p4, %s7694_s24), 0  ;;  %275 = sbr.rel (%p272_p3) target bundleno = 619 (0x26b), region = 40 }
  0x10   : > { %s5104_s25 = sshll.u32 %s5022_s18, 3  ;;  %p343_p5 = scmp.lt.s32.totalorder %s5026_s19, 1  ;;  %v4961_v0 = vld [vmem:[%s7286_s3] sm:$0xff]   ;;  %v5040_v1 = vmov 0   ;;  %v4963_v3 = vld [vmem:[%s7286_s3 + $0x8] sm:$0xff]   ;;  %v4965_v5 = vld [vmem:[%s7286_s3 + $0x10] sm:$0xff]  }
  0x11   : > { %p345_p6 = scmp.lt.s32.totalorder %s5104_s25, 17  ;;  %1851 = vmatprep.subr.bf16.mxu0 %v5040_v1  ;;  %2501 = vmatprep.subr.bf16.mxu1 %v5040_v1  ;;  %v4962_v2 = vld [vmem:[%s7286_s3 + $0x60] sm:$0xff]   ;;  %v4964_v4 = vld [vmem:[%s7286_s3 + $0x68] sm:$0xff]   ;;  %s5134_s15 = sadd.s32 8, %s5104_s25  ;;  %v4966_v6 = vld [vmem:[%s7286_s3 + $0x70] sm:$0xff]   ;;  %vm540_vm0 = vcmask 523264  }
  0x12   : > { %s7698_s19 = smov (!%p343_p5, %s5026_s19), 1  ;;  %1852 = vmatpush1.bf16.msra.mxu0 %v4961_v0  ;;  %2502 = vmatpush1.bf16.msra.mxu1 %v4962_v2  ;;  %v4967_v7 = vld [vmem:[%s7286_s3 + $0x18] sm:$0xff]   ;;  %p362_p7 = scmp.lt.s32.totalorder %s5134_s15, 17  ;;  %v4969_v20 = vld [vmem:[%s7286_s3 + $0x20] sm:$0xff]   ;;  %v4971_v27 = vld [vmem:[%s7286_s3 + $0x28] sm:$0xff]   ;;  %v610_v0 = vlaneseq  ;;  %vm2930_vm1 = vcmask 1040384  }
  0x13   : > { %s346_s30 = scalar_select %p345_p6, %s5104_s25, 17  ;;  %1853 = vmatprep.subr.bf16.mxu0 %v5040_v1  ;;  %2503 = vmatprep.subr.bf16.mxu1 %v5040_v1  ;;  %v4968_v10 = vld [vmem:[%s7286_s3 + $0x78] sm:$0xff]   ;;  %v4970_v22 = vld [vmem:[%s7286_s3 + $0x80] sm:$0xff]   ;;  %v4972_v30 = vld [vmem:[%s7286_s3 + $0x88] sm:$0xff]   ;;  %v5042_v62 = vmov 1966171168  }
  0x14   : > { %s5123_s8 = smul.u32 54, %s7698_s19  ;;  %s5041_s9 = smov 64   ;;  %v4973_v34 = vld [vmem:[%s7286_s3 + $0x30] sm:$0xff]   ;;  %v4976_v41 = vld [vmem:[%s7286_s3 + $0x38] sm:$0xff]   ;;  %v4979_v47 = vld [vmem:[%s7286_s3 + $0x40] sm:$0xff]   ;;  %v608_v63 = vunpack.c.l.s4 %v5042_v62  ;;  %vm2931_vm2 = vcmask 1042434  }
  0x15   : > { %s4897_s11 = smul.u32 3, %s346_s30  ;;  %v4974_v36 = vld [vmem:[%s7286_s3 + $0x90] sm:$0xff]   ;;  %v4977_v43 = vld [vmem:[%s7286_s3 + $0x98] sm:$0xff]   ;;  %v4980_v51 = vld [vmem:[%s7286_s3 + $0xa0] sm:$0xff]   ;;  %vm2933_vm4 = vcmask 1044484   ;;  %vm2935_vm5 = vcmask 1046534  }
  0x16   : > { %1854 = vmatpush1.bf16.msra.mxu0 %v4963_v3  ;;  %2504 = vmatpush1.bf16.msra.mxu1 %v4964_v4  ;;  %s5189_s10 = scalar_select %p362_p7, %s5134_s15, 17  ;;  %v4981_v54 = vld [vmem:[%s7286_s3 + $0x48] sm:$0xff]   ;;  %v4983_v57 = vld [vmem:[%s7286_s3 + $0x50] sm:$0xff]   ;;  %v4985_v60 = vld [vmem:[%s7286_s3 + $0x58] sm:$0xff]   ;;  %v609_v2 = vunpack.c.0.s8 %v608_v63  ;;  %v5363_v3 = vshrl.u32 %v610_v0, 7  ;;  %vm4486_vm8 = vcmask 519168  }
  0x17   : > { %s349_s14 = sadd.s32 %s5123_s8, %s4897_s11  ;;  %1855 = vmatprep.subr.bf16.mxu0 %v5040_v1  ;;  %2505 = vmatprep.subr.bf16.mxu1 %v5040_v1  ;;  %v4982_v55 = vld [vmem:[%s7286_s3 + $0xa8] sm:$0xff]   ;;  %v4984_v59 = vld [vmem:[%s7286_s3 + $0xb0] sm:$0xff]   ;;  %v4986_v61 = vld [vmem:[%s7286_s3 + $0xb8] sm:$0xff]   ;;  %p389_p9 = scmp.lt.s32.totalorder %s5104_s25, 15 }
  0x18   : > { %s4654_s16 = sshll.u32 %s349_s14, 2  ;;  %vm5883_vm3 = vmor %vm2930_vm1, %vm2931_vm2  ;;  %s4661_s27 = sshll.u32 %s7698_s19, 5 }
  0x19   : > { %s5143_s28 = scalar_lea.vmem %s7283_s0, %s4654_s16  ;;  %s4899_s16 = smul.u32 3, %s5189_s10  ;;  %vm2934_vm6 = vmor %vm5883_vm3, %vm2933_vm4 }
  0x1a   : > { %v5150_v8 = vld [vmem:[%s5143_s28 + $0xc] sm:$0xff]   ;;  %1856 = vmatpush1.bf16.msra.mxu0 %v4965_v5  ;;  %v5154_v9 = vld [vmem:[%s5143_s28 + $0x14] ss:$0 sps:$4 sm:$0x11]   ;;  %v5163_v11 = vld [vmem:[%s5143_s28 + $0x18] sm:$0xf]  ;;  %2506 = vmatpush1.bf16.msra.mxu1 %v4966_v6  ;;  %v5368_v6 = vsub.s32 %v609_v2, %v5363_v3 }
  0x1b   : > { %1857 = vmatprep.subr.bf16.mxu0 %v5040_v1  ;;  %500 = vrot.lane.b32.xlu0 %v5150_v8, %s5041_s9  ;;  %v405_v12 = vld [vmem:[%s5143_s28 + $0x1c] sm:$0xf]  ;;  %v5167_v13 = vld [vmem:[%s5143_s28 + $0x24] sm:$0xf]  ;;  %v408_v15 = vld [vmem:[%s5143_s28 + $0x28] sm:$0xf]  ;;  %s366_s29 = sadd.s32 %s4899_s16, %s5123_s8 }
  0x1c   : > { %502 = vrot.lane.b32.xlu1 %v5154_v9, %s5041_s9  ;;  %v5172_v14 = vcombine.low %v5163_v11, %v405_v12  ;;  %v5176_v16 = vld [vmem:[%s5143_s28 + $0x20] sm:$0x1]  ;;  %2507 = vmatprep.subr.bf16.mxu1 %v5040_v1  ;;  %v5180_v17 = vcombine.low %v5167_v13, %v408_v15  ;;  %v5183_v18 = vld [vmem:[%s5143_s28 + $0x30] sm:$0xf]  ;;  %v411_v19 = vld [vmem:[%s5143_s28 + $0x34] sm:$0xf] }
  0x1d   : > { %v5199_v21 = vcombine.low %v5176_v16, %v5176_v16  ;;  %v5207_v23 = vcombine.low %v5183_v18, %v411_v19  ;;  %v5210_v24 = vld [vmem:[%s5143_s28 + $0x2c] sm:$0x1]  ;;  %v5213_v25 = vld [vmem:[%s5143_s28 + $0x3c] sm:$0xf]  ;;  %v414_v26 = vld [vmem:[%s5143_s28 + $0x40] sm:$0xf] }
  0x1e   : > { %1858 = vmatpush1.bf16.msra.mxu0 %v4967_v7  ;;  %2508 = vmatpush1.bf16.msra.mxu1 %v4968_v10  ;;  %v5222_v28 = vld [vmem:[%s5143_s28 + $0x38] sm:$0x1]  ;;  %v5229_v29 = vcombine.low %v5210_v24, %v5210_v24  ;;  %v5237_v31 = vcombine.low %v5213_v25, %v414_v26  ;;  %v5240_v32 = vld [vmem:[%s5143_s28 + $0x48] sm:$0xf]  ;;  %v417_v33 = vld [vmem:[%s5143_s28 + $0x4c] sm:$0xf] }
  0x1f   : > { %1859 = vmatprep.subr.bf16.mxu0 %v5040_v1  ;;  %504 = vrot.lane.b32.xlu0 %v5172_v14, %s5041_s9  ;;  %v5249_v35 = vld [vmem:[%s5143_s28 + $0x44] sm:$0x1]  ;;  %v5259_v37 = vcombine.low %v5222_v28, %v5222_v28  ;;  %v5262_v38 = vld [vmem:[%s5143_s28 + $0x54] sm:$0xf]  ;;  %v420_v39 = vld [vmem:[%s5143_s28 + $0x58] sm:$0xf]  ;;  %v5268_v40 = vcombine.low %v5240_v32, %v417_v33 }
  0x20   : > { %508 = vrot.lane.b32.xlu1 %v5180_v17, %s5041_s9  ;;  %2509 = vmatprep.subr.bf16.mxu1 %v5040_v1  ;;  %s4656_s11 = sshll.u32 %s366_s29, 2  ;;  %v5275_v42 = vld [vmem:[%s5143_s28 + $0x50] sm:$0x1]  ;;  %v5285_v44 = vcombine.low %v5249_v35, %v5249_v35  ;;  %v5293_v45 = vcombine.low %v5262_v38, %v420_v39  ;;  %v5296_v46 = vld [vmem:[%s5143_s28 + $0x5c] sm:$0x1]  ;;  %v4975_v4 = vld [vmem:[%s5143_s28] sm:$0xff]  }
  0x21   : > { %s368_s26 = scalar_lea.vmem %s7284_s1, %s4656_s11  ;;  %v5309_v50 = vcombine.low %v5275_v42, %v5275_v42  ;;  %v5318_v52 = vcombine.low %v5296_v46, %v5296_v46  ;;  %v4978_v5 = vld [vmem:[%s5143_s28 + $0x8] ss:$0 sps:$4 sm:$0x11]   ;;  %vm5924_vm7 = vmor %vm2934_vm6, %vm2935_vm5  ;;  %s7702_s25 = smov (!%p389_p9, %s5104_s25), 15 }
  0x22   : > { %1860 = vmatpush1.bf16.msra.mxu0 %v4969_v20  ;;  %2510 = vmatpush1.bf16.msra.mxu1 %v4970_v22  ;;  %v5302_v48 = vld [vmem:[%s368_s26] sm:$0xf]  ;;  %v423_v49 = vld [vmem:[%s368_s26 + $0x4] sm:$0xf]  ;;  %v5320_v53 = vld [vmem:[%s368_s26 + $0x8] sm:$0x1] }
  0x23   : > { %1861 = vmatprep.subr.bf16.mxu0 %v5040_v1  ;;  %506 = vrot.lane.b32.xlu0 %v5199_v21, %s5041_s9  ;;  %v5333_v56 = vcombine.low %v5302_v48, %v423_v49  ;;  %v4680_v58 = vcombine.low %v5320_v53, %v5320_v53  ;;  %s4660_s26 = sshll.u32 %s7702_s25, 1 }
  0x24   : > { %512 = vrot.lane.b32.xlu1 %v5207_v23, %s5041_s9  ;;  %2511 = vmatprep.subr.bf16.mxu1 %v5040_v1  ;;  %s6660_s19 = sadd.s32 %s4661_s27, %s4660_s26 }
  0x25   : > { %s4662_s25 = sshll.u32 %s6660_s19, 2 }
  0x26   : > { %1862 = vmatpush1.bf16.msra.mxu0 %v4971_v27  ;;  %2512 = vmatpush1.bf16.msra.mxu1 %v4972_v30 }
  0x27   : > { %1863 = vmatprep.subr.bf16.mxu0 %v5040_v1  ;;  %510 = vrot.lane.b32.xlu0 %v5229_v29, %s5041_s9 }
  0x28   : > { %516 = vrot.lane.b32.xlu1 %v5237_v31, %s5041_s9  ;;  %2513 = vmatprep.subr.bf16.mxu1 %v5040_v1 }
  0x2a   : > { %1864 = vmatpush1.bf16.msra.mxu0 %v4973_v34  ;;  %2514 = vmatpush1.bf16.msra.mxu1 %v4974_v36 }
  0x2b   : > { %1865 = vmatprep.subr.bf16.mxu0 %v5040_v1  ;;  %514 = vrot.lane.b32.xlu0 %v5259_v37, %s5041_s9 }
  0x2c   : > { %520 = vrot.lane.b32.xlu1 %v5268_v40, %s5041_s9  ;;  %2515 = vmatprep.subr.bf16.mxu1 %v5040_v1 }
  0x2e   : > { %1866 = vmatpush1.bf16.msra.mxu0 %v4976_v41  ;;  %2516 = vmatpush1.bf16.msra.mxu1 %v4977_v43 }
  0x2f   : > { %1867 = vmatprep.subr.bf16.mxu0 %v5040_v1  ;;  %518 = vrot.lane.b32.xlu0 %v5285_v44, %s5041_s9 }
  0x30   : > { %524 = vrot.lane.b32.xlu1 %v5293_v45, %s5041_s9  ;;  %2517 = vmatprep.subr.bf16.mxu1 %v5040_v1 }
  0x32   : > { %1868 = vmatpush1.bf16.msra.mxu0 %v4979_v47  ;;  %2518 = vmatpush1.bf16.msra.mxu1 %v4980_v51 }
  0x33   : > { %1869 = vmatprep.subr.bf16.mxu0 %v5040_v1  ;;  %522 = vrot.lane.b32.xlu0 %v5309_v50, %s5041_s9 }
  0x34   : > { %526 = vrot.lane.b32.xlu1 %v5318_v52, %s5041_s9  ;;  %2519 = vmatprep.subr.bf16.mxu1 %v5040_v1 }
  0x36   : > { %1870 = vmatpush1.bf16.msra.mxu0 %v4981_v54  ;;  %2520 = vmatpush1.bf16.msra.mxu1 %v4982_v55 }
  0x37   : > { %1871 = vmatprep.subr.bf16.mxu0 %v5040_v1  ;;  %528 = vrot.lane.b32.xlu0 %v5333_v56, %s5041_s9 }
  0x38   : > { %530 = vrot.lane.b32.xlu1 %v4680_v58, %s5041_s9  ;;  %2521 = vmatprep.subr.bf16.mxu1 %v5040_v1  ;;  %s373_s9 = sadd.s32 1, %s5134_s15 }
  0x39   : > { %p376_p8 = scmp.lt.s32.totalorder %s373_s9, 17 }
  0x3a   : > { %1872 = vmatpush1.bf16.msra.mxu0 %v4983_v57  ;;  %2522 = vmatpush1.bf16.msra.mxu1 %v4984_v59 }
  0x3b   : > { %1873 = vmatprep.subr.bf16.mxu0 %v5040_v1  ;;  %2523 = vmatprep.subr.bf16.mxu1 %v5040_v1  ;;  %s7700_s9 = smov (!%p376_p8, %s373_s9), 17 }
  0x3c   : > { %s4900_s30 = smul.u32 3, %s7700_s9 }
  0x3e   : > { %1874 = vmatpush1.bf16.msra.mxu0 %v4985_v60  ;;  %2524 = vmatpush1.bf16.msra.mxu1 %v4986_v61  ;;  %s380_s6 = sadd.s32 %s4900_s30, %s5123_s8  ;;  %s6716_s30 = scalar_lea.vmem %s7288_s5, %s4662_s25 }
  0x3f   : > { %3362 = vmatprep.subr.bf16.mxu0 %v5040_v1  ;;  %4873 = vmatprep.subr.bf16.mxu1 %v5040_v1  ;;  %s4658_s8 = sshll.u32 %s380_s6, 2 }
  0x40   : > { %s5382_s7 = scalar_lea.vmem %s7285_s2, %s4658_s8 }
  0x41   : > { %v5395_v54 = vld [vmem:[%s5382_s7] sm:$0xf] }
  0x8d   : > { %v501_v7 = vpop.permute.xlu0 %500 }
  0x8e   : > { %v543_v10 = vsel %vm540_vm0, %v4975_v4, %v501_v7  ;;  %v503_v12 = vpop.permute.xlu1 %502 }
  0x8f   : > { %v4683_v15 = vcombine.low %v543_v10, %v5163_v11  ;;  %v606_v19 = vcombine.high %v543_v10, %v5172_v14  ;;  %v546_v20 = vsel %vm540_vm0, %v4978_v5, %v503_v12 }
  0x90   : > { %v4684_v22 = vcombine.low %v546_v20, %v5176_v16  ;;  %v5386_v16 = vld [vmem:[%s5382_s7 + $0x4] sm:$0xf] }
  0x91   : > { %v613_v26 = vrot.slane %v4683_v15, %v5368_v6  ;;  %v620_v27 = vrot.slane %v606_v19, %v5368_v6  ;;  %v505_v30 = vpop.permute.xlu0 %504  ;;  %v4681_v58 = vcombine.low %v5395_v54, %v5386_v16 }
  0x92   : > { %v549_v33 = vsel %vm540_vm0, %v5150_v8, %v505_v30  ;;  %v509_v34 = vpop.permute.xlu1 %508  ;;  %v662_v36 = vrot.slane %v4684_v22, %v5368_v6 }
  0x93   : > { %v621_v11 = vcombine.high %v613_v26, %v613_v26  ;;  %v4685_v39 = vcombine.low %v549_v33, %v5167_v13  ;;  %v671_v41 = vcombine.high %v549_v33, %v5180_v17  ;;  %v555_v8 = vsel %vm540_vm0, %v5172_v14, %v509_v34 }
  0x94   : > { %v622_v43 = vcombine.high %v620_v27, %v620_v27  ;;  %v4687_v47 = vcombine.low %v555_v8, %v5183_v18  ;;  %v736_v49 = vcombine.high %v555_v8, %v5207_v23  ;;  %v629_v14 = vrot.slane %v613_v26, %v5368_v6 }
  0x95   : > { %v507_v51 = vpop.permute.xlu0 %506  ;;  %v678_v55 = vrot.slane %v4685_v39, %v5368_v6  ;;  %v685_v57 = vrot.slane %v671_v41, %v5368_v6  ;;  %v636_v59 = vrot.slane %v620_v27, %v5368_v6  ;;  %v643_v18 = vrot.slane %v621_v11, %v5368_v6 }
  0x96   : > { %v552_v13 = vsel %vm540_vm0, %v5154_v9, %v507_v51  ;;  %v669_v60 = vrot.slane %v662_v36, %v5368_v6  ;;  %v650_v2 = vrot.slane %v622_v43, %v5368_v6  ;;  %v743_v9 = vrot.slane %v4687_v47, %v5368_v6  ;;  %v513_v19 = vpop.permute.xlu1 %512 }
  0x97   : > { %v686_v61 = vcombine.high %v678_v55, %v678_v55  ;;  %v687_v62 = vcombine.high %v685_v57, %v685_v57  ;;  %v694_v63 = vrot.slane %v678_v55, %v5368_v6  ;;  %v701_v0 = vrot.slane %v685_v57, %v5368_v6 }
  0x98   : > { %v750_v4 = vrot.slane %v736_v49, %v5368_v6  ;;  %v4686_v5 = vcombine.low %v552_v13, %v5210_v24  ;;  %v1149_v20 = vcombine.low %v629_v14, %v643_v18  ;;  %v751_v26 = vcombine.high %v743_v9, %v743_v9 }
  0x99   : > { %v708_v7 = vrot.slane %v686_v61, %v5368_v6  ;;  %v715_v10 = vrot.slane %v687_v62, %v5368_v6  ;;  %v716_v12 = vcombine.high %v694_v63, %v694_v63  ;;  %v717_v15 = vcombine.high %v701_v0, %v701_v0 }
  0x9a   : > { %v1215_v22 = vcombine.low %v669_v60, %v694_v63  ;;  %v752_v27 = vcombine.high %v750_v4, %v750_v4  ;;  %v759_v11 = vrot.slane %v743_v9, %v5368_v6  ;;  %v766_v36 = vrot.slane %v750_v4, %v5368_v6  ;;  %v511_v60 = vpop.permute.xlu0 %510 }
  0x9b   : > { %v718_v30 = vcombine.high %v708_v7, %v708_v7  ;;  %v1216_v33 = vcombine.low %v708_v7, %v716_v12  ;;  %v1218_v34 = vcombine.low %v715_v10, %v717_v15  ;;  %v773_v24 = vrot.slane %v751_v26, %v5368_v6 }
  0x9c   : > { %v780_v39 = vrot.slane %v752_v27, %v5368_v6  ;;  %v561_v41 = vsel %vm540_vm0, %v5180_v17, %v513_v19  ;;  %v4699_v8 = vcombine.high %v629_v14, %v643_v18  ;;  %v1151_v43 = vcombine.low %v636_v59, %v650_v2 }
  0x9d   : > { %v1217_v47 = vcombine.low %v718_v30, %v701_v0  ;;  %v727_v49 = vrot.slane %v4686_v5, %v5368_v6  ;;  %v4700_v51 = vcombine.high %v636_v59, %v650_v2  ;;  %v5423_v55 = vrot.slane %v1215_v22, %v5368_v6 }
  0x9e   : > { %v5426_v57 = vrot.slane %v1216_v33, %v5368_v6  ;;  %v719_v13 = vcombine.high %v715_v10, %v715_v10  ;;  %v5429_v61 = vrot.slane %v1218_v34, %v5368_v6  ;;  %v1282_v62 = vcombine.low %v759_v11, %v773_v24 }
  0x9f   : > { %v4689_v17 = vcombine.low %v561_v41, %v5213_v25  ;;  %v801_v14 = vcombine.high %v561_v41, %v5237_v31  ;;  %v5434_v18 = vrot.slane %v1217_v47, %v5368_v6  ;;  %v4701_v59 = vcombine.high %v759_v11, %v773_v24 }
  0xa0   : > { %v1284_v63 = vcombine.low %v766_v36, %v780_v39  ;;  %v4702_v0 = vcombine.high %v766_v36, %v780_v39  ;;  %v734_v2 = vrot.slane %v727_v49, %v5368_v6  ;;  %v558_v5 = vsel %vm540_vm0, %v5199_v21, %v511_v60  ;;  %v517_v36 = vpop.permute.xlu1 %516 }
  0xa1   : > { %v808_v9 = vrot.slane %v4689_v17, %v5368_v6  ;;  %v815_v4 = vrot.slane %v801_v14, %v5368_v6  ;;  %v4688_v7 = vcombine.low %v558_v5, %v5222_v28  ;;  %v1159_v25 = vrot.slane %v1149_v20, %v5368_v6 }
  0xa2   : > { %v1166_v10 = vrot.slane %v4699_v8, %v5368_v6  ;;  %v1173_v12 = vrot.slane %v1151_v43, %v5368_v6  ;;  %v5446_v15 = vrot.slane %v1282_v62, %v5368_v6  ;;  %v1180_v21 = vrot.slane %v4700_v51, %v5368_v6 }
  0xa3   : > { %v816_v19 = vcombine.high %v808_v9, %v808_v9  ;;  %v817_v22 = vcombine.high %v815_v4, %v815_v4  ;;  %v824_v26 = vrot.slane %v808_v9, %v5368_v6  ;;  %v831_v27 = vrot.slane %v815_v4, %v5368_v6 }
  0xa4   : > { %v792_v30 = vrot.slane %v4688_v7, %v5368_v6  ;;  %v1182_v28 = vcombine.high %v1159_v25, %v1166_v10  ;;  %v5453_v20 = vrot.slane %v4701_v59, %v5368_v6  ;;  %v1281_v33 = vcombine.low %v719_v13, %v734_v2 }
  0xa5   : > { %v838_v34 = vrot.slane %v816_v19, %v5368_v6  ;;  %v1181_v11 = vcombine.low %v1159_v25, %v1166_v10  ;;  %v846_v24 = vcombine.high %v824_v26, %v824_v26  ;;  %v847_v39 = vcombine.high %v831_v27, %v831_v27 }
  0xa6   : > { %v1184_v41 = vcombine.high %v1173_v12, %v1180_v21  ;;  %v1198_v8 = vrot.slane %v1182_v28, %v5368_v6  ;;  %v799_v47 = vrot.slane %v792_v30, %v5368_v6  ;;  %v1183_v49 = vcombine.low %v1173_v12, %v1180_v21  ;;  %v521_v28 = vpop.permute.xlu1 %520 }
  0xa7   : > { %v848_v43 = vcombine.high %v838_v34, %v838_v34  ;;  %v1191_v51 = vrot.slane %v1181_v11, %v5368_v6  ;;  %v5460_v60 = vrot.slane %v1284_v63, %v5368_v6  ;;  %v5463_v13 = vrot.slane %v817_v22, %v5368_v6  ;;  %v515_v63 = vpop.permute.xlu0 %514 }
  0xa8   : > { %v1212_v62 = vrot.slane %v1184_v41, %v5368_v6  ;;  %v567_v17 = vsel %vm540_vm0, %v5207_v23, %v517_v36  ;;  %v5469_v14 = vrot.slane %v4702_v0, %v5368_v6  ;;  %v5472_v59 = vrot.slane %v1281_v33, %v5368_v6  ;;  %v4987_v23 = vld [vmem:[%s7286_s3 + $0xc0] sm:$0xff]   ;;  %v4988_v36 = vld [vmem:[%s7286_s3 + $0xc8] sm:$0xff]  }
  0xa9   : > { %v1205_v2 = vrot.slane %v1183_v49, %v5368_v6  ;;  %v4691_v9 = vcombine.low %v567_v17, %v5240_v32  ;;  %v1349_v4 = vcombine.low %v838_v34, %v846_v24  ;;  %v1413_v5 = vcombine.low %v5463_v13, %v847_v39 }
  0xaa   : > { %v5477_v7 = vcombine.low %v1198_v8, %v1212_v62  ;;  %v866_v0 = vcombine.high %v567_v17, %v5268_v40  ;;  %v1350_v25 = vcombine.low %v848_v43, %v831_v27  ;;  %v1348_v10 = vcombine.low %v799_v47, %v824_v26 }
  0xab   : > { %v5483_v12 = vcombine.low %v1191_v51, %v1205_v2  ;;  %v873_v19 = vrot.slane %v4691_v9, %v5368_v6  ;;  %v564_v22 = vsel %vm540_vm0, %v5229_v29, %v515_v63  ;;  %v1248_v30 = vcombine.high %v5423_v55, %v5426_v57 }
  0xac   : > { %4719 = vmatprep.mubr.msk.bf16.mxu0 %vm540_vm0, %v5477_v7  ;;  %4764 = vmatprep.mubr.msk.bf16.mxu1 %vm540_vm0, %v5477_v7  ;;  %v880_v32 = vrot.slane %v866_v0, %v5368_v6  ;;  %v4690_v21 = vcombine.low %v564_v22, %v5249_v35  ;;  %v5502_v33 = vrot.slane %v1349_v4, %v5368_v6  ;;  %v525_v22 = vpop.permute.xlu1 %524 }
  0xad   : > { %1884 = vmatmul.mubr.bf16.vlgmr.msra.gmra.mrb[0].mxu0 %v5483_v12  ;;  %2534 = vmatmul.mubr.bf16.vlgmr.msra.gmra.mrb[0].mxu1 %v5483_v12  ;;  %v881_v26 = vcombine.high %v873_v19, %v873_v19  ;;  %v5498_v27 = vrot.slane %v873_v19, %v5368_v6  ;;  %v1250_v11 = vcombine.high %v5434_v18, %v5429_v61 }
  0xae   : > { %3363 = vmatpush1.bf16.msra.mxu0 %v4987_v23  ;;  %v882_v34 = vcombine.high %v880_v32, %v880_v32  ;;  %v5505_v29 = vrot.slane %v880_v32, %v5368_v6  ;;  %v857_v35 = vrot.slane %v4690_v21, %v5368_v6  ;;  %v1247_v39 = vcombine.low %v5423_v55, %v5426_v57 }
  0xaf   : > { %v5513_v24 = vrot.slane %v881_v26, %v5368_v6  ;;  %3364 = vmatprep.subr.bf16.mxu0 %v5040_v1  ;;  %v1249_v41 = vcombine.low %v5434_v18, %v5429_v61  ;;  %v1264_v43 = vrot.slane %v1248_v30, %v5368_v6  ;;  %v1278_v47 = vrot.slane %v1250_v11, %v5368_v6  ;;  %v4990_v11 = vld [vmem:[%s7286_s3 + $0xd8] sm:$0xff]  }
  0xb0   : > { %v5522_v8 = vrot.slane %v882_v34, %v5368_v6  ;;  %4885 = vmatpush1.bf16.msra.mxu1 %v4987_v23  ;;  %v573_v49 = vsel %vm540_vm0, %v5237_v31, %v521_v28  ;;  %v5529_v51 = vrot.slane %v1350_v25, %v5368_v6  ;;  %v5532_v62 = vrot.slane %v1413_v5, %v5368_v6  ;;  %v519_v5 = vpop.permute.xlu0 %518  ;;  %v4989_v23 = vld [vmem:[%s7286_s3 + $0xd0] sm:$0xff]  }
  0xb1   : > { %v5535_v55 = vrot.slane %v1348_v10, %v5368_v6  ;;  %v1415_v57 = vcombine.low %v5498_v27, %v5513_v24  ;;  %4874 = vmatprep.subr.bf16.mxu1 %v5040_v1  ;;  %v5540_v61 = vcombine.low %v1264_v43, %v1278_v47  ;;  %v1257_v18 = vrot.slane %v1247_v39, %v5368_v6 }
  0xb2   : > { %3365 = vmatpush1.bf16.msra.mxu0 %v4988_v36  ;;  %v1271_v31 = vrot.slane %v1249_v41, %v5368_v6  ;;  %v1314_v17 = vcombine.high %v5472_v59, %v5446_v15  ;;  %v4703_v2 = vcombine.high %v5498_v27, %v5513_v24  ;;  %v849_v9 = vcombine.high %v5463_v13, %v5463_v13 }
  0xb3   : > { %v864_v63 = vrot.slane %v857_v35, %v5368_v6  ;;  %v4693_v4 = vcombine.low %v573_v49, %v5262_v38  ;;  %3366 = vmatprep.subr.bf16.mxu0 %v5040_v1  ;;  %v1479_v0 = vcombine.low %v5505_v29, %v5522_v8  ;;  %v4704_v25 = vcombine.high %v5505_v29, %v5522_v8 }
  0xb4   : > { %4720 = vmatprep.mubr.msk.bf16.mxu0 %vm540_vm0, %v5540_v61  ;;  %4765 = vmatprep.mubr.msk.bf16.mxu1 %vm540_vm0, %v5540_v61  ;;  %v5564_v38 = vcombine.low %v1257_v18, %v1271_v31  ;;  %v5567_v13 = vrot.slane %v1415_v57, %v5368_v6  ;;  %v931_v10 = vcombine.high %v573_v49, %v5293_v45  ;;  %v4991_v57 = vld [vmem:[%s7286_s3 + $0xe0] sm:$0xff]  }
  0xb5   : > { %v938_v19 = vrot.slane %v4693_v4, %v5368_v6  ;;  %v1316_v32 = vcombine.high %v5453_v20, %v5460_v60  ;;  %4886 = vmatpush1.bf16.msra.mxu1 %v4988_v36  ;;  %v1330_v30 = vrot.slane %v1314_v17, %v5368_v6  ;;  %v570_v26 = vsel %vm540_vm0, %v5259_v37, %v519_v5 }
  0xb6   : > { %1892 = vmatmul.mubr.bf16.gmra.mrb[4].mxu0 %v5564_v38  ;;  %2542 = vmatmul.mubr.bf16.gmra.mrb[4].mxu1 %v5564_v38  ;;  %v1313_v27 = vcombine.low %v5472_v59, %v5446_v15  ;;  %v945_v21 = vrot.slane %v931_v10, %v5368_v6  ;;  %v4692_v36 = vcombine.low %v570_v26, %v5275_v42 }
  0xb7   : > { %v946_v28 = vcombine.high %v938_v19, %v938_v19  ;;  %v954_v34 = vrot.slane %v938_v19, %v5368_v6  ;;  %v1344_v29 = vrot.slane %v1316_v32, %v5368_v6  ;;  %3367 = vmatpush1.bf16.msra.mxu0 %v4989_v23  ;;  %v1315_v37 = vcombine.low %v5453_v20, %v5460_v60  ;;  %v5638_v32 = vld [vmem:[%s7286_s3 + $0xe8] sm:$0xff]  }
  0xb8   : > { %v1323_v24 = vrot.slane %v1313_v27, %v5368_v6  ;;  %v579_v15 = vsel %vm540_vm0, %v5268_v40, %v525_v22  ;;  %3368 = vmatprep.subr.bf16.mxu0 %v5040_v1  ;;  %v1414_v59 = vcombine.low %v849_v9, %v864_v63  ;;  %v947_v35 = vcombine.high %v945_v21, %v945_v21 }
  0xb9   : > { %v961_v39 = vrot.slane %v945_v21, %v5368_v6  ;;  %v968_v41 = vrot.slane %v946_v28, %v5368_v6  ;;  %4875 = vmatprep.subr.bf16.mxu1 %v5040_v1  ;;  %v5596_v8 = vcombine.low %v1330_v30, %v1344_v29  ;;  %v922_v42 = vrot.slane %v4692_v36, %v5368_v6 }
  0xba   : > { %v1337_v20 = vrot.slane %v1315_v37, %v5368_v6  ;;  %v4695_v60 = vcombine.low %v579_v15, %v5302_v48  ;;  %4887 = vmatpush1.bf16.msra.mxu1 %v4989_v23  ;;  %v5602_v40 = vrot.slane %v4703_v2, %v5368_v6  ;;  %v976_v43 = vcombine.high %v954_v34, %v954_v34  ;;  %v523_v23 = vpop.permute.xlu0 %522 }
  0xbb   : > { %v977_v47 = vcombine.high %v961_v39, %v961_v39  ;;  %v978_v49 = vcombine.high %v968_v41, %v968_v41  ;;  %3369 = vmatpush1.bf16.msra.mxu0 %v4990_v11  ;;  %4721 = vmatprep.mubr.msk.bf16.mxu0 %vm540_vm0, %v5596_v8  ;;  %v929_v48 = vrot.slane %v922_v42, %v5368_v6 }
  0xbc   : > { %4766 = vmatprep.mubr.msk.bf16.mxu1 %vm540_vm0, %v5596_v8  ;;  %v5612_v18 = vcombine.low %v1323_v24, %v1337_v20  ;;  %v996_v31 = vcombine.high %v579_v15, %v5333_v56  ;;  %v5616_v17 = vrot.slane %v1479_v0, %v5368_v6  ;;  %v5619_v2 = vrot.slane %v4704_v25, %v5368_v6 }
  0xbd   : > { %v5622_v9 = vrot.slane %v947_v35, %v5368_v6  ;;  %v1003_v63 = vrot.slane %v4695_v60, %v5368_v6  ;;  %3370 = vmatprep.subr.bf16.mxu0 %v5040_v1  ;;  %v5627_v4 = vrot.slane %v1414_v59, %v5368_v6  ;;  %v1380_v5 = vcombine.high %v5469_v14, %v5535_v55 }
  0xbe   : > { %1900 = vmatmul.mubr.bf16.gmra.mrb[8].mxu0 %v5612_v18  ;;  %2550 = vmatmul.mubr.bf16.gmra.mrb[8].mxu1 %v5612_v18  ;;  %v1010_v56 = vrot.slane %v996_v31, %v5368_v6  ;;  %v1482_v0 = vcombine.low %v968_v41, %v976_v43  ;;  %v1545_v25 = vcombine.low %v978_v49, %v961_v39  ;;  %v527_v41 = vpop.permute.xlu1 %526  ;;  %v529_v43 = vpop.permute.xlu0 %528 }
  0xbf   : > { %v1546_v10 = vcombine.low %v5622_v9, %v977_v47  ;;  %v1011_v19 = vcombine.high %v1003_v63, %v1003_v63  ;;  %3371 = vmatpush1.bf16.msra.mxu0 %v4991_v57  ;;  %v1481_v22 = vcombine.low %v929_v48, %v954_v34  ;;  %v5641_v26 = vrot.slane %v1003_v63, %v5368_v6 }
  0xc0   : > { %v1012_v30 = vcombine.high %v1010_v56, %v1010_v56  ;;  %v1382_v27 = vcombine.high %v5502_v33, %v5529_v51  ;;  %4876 = vmatprep.subr.bf16.mxu1 %v5040_v1  ;;  %v5647_v21 = vrot.slane %v1010_v56, %v5368_v6  ;;  %v1396_v29 = vrot.slane %v1380_v5, %v5368_v6 }
  0xc1   : > { %v5650_v28 = vrot.slane %v1011_v19, %v5368_v6  ;;  %v576_v34 = vsel %vm540_vm0, %v5285_v44, %v523_v23  ;;  %4888 = vmatpush1.bf16.msra.mxu1 %v4990_v11  ;;  %v1379_v15 = vcombine.low %v5469_v14, %v5535_v55  ;;  %3372 = vmatprep.subr.bf16.mxu0 %v5040_v1 }
  0xc2   : > { %v5656_v36 = vrot.slane %v1012_v30, %v5368_v6  ;;  %v1410_v37 = vrot.slane %v1382_v27, %v5368_v6  ;;  %v4694_v24 = vcombine.low %v576_v34, %v5296_v46  ;;  %v5664_v59 = vrot.slane %v1482_v0, %v5368_v6  ;;  %4877 = vmatprep.subr.bf16.mxu1 %v5040_v1 }
  0xc3   : > { %v5667_v35 = vrot.slane %v1545_v25, %v5368_v6  ;;  %v1381_v44 = vcombine.low %v5502_v33, %v5529_v51  ;;  %v1446_v11 = vcombine.high %v5532_v62, %v5627_v4  ;;  %3373 = vmatpush1.bf16.msra.mxu0 %v5638_v32  ;;  %v5675_v46 = vrot.slane %v1546_v10, %v5368_v6  ;;  %v5687_v33 = vld [vmem:[%s7286_s3 + $0xf0] sm:$0xff]   ;;  %v531_v10 = vpop.permute.xlu1 %530 }
  0xc4   : > { %v5678_v14 = vrot.slane %v1481_v22, %v5368_v6  ;;  %v5680_v55 = vcombine.low %v1396_v29, %v1410_v37  ;;  %v987_v39 = vrot.slane %v4694_v24, %v5368_v6  ;;  %v1548_v51 = vcombine.low %v5641_v26, %v5650_v28  ;;  %3374 = vmatprep.subr.bf16.mxu0 %v5040_v1  ;;  %v4995_v22 = vld [vmem:[%s7286_s3 + $0xf8] sm:$0xff]   ;;  %v427_v29 = vld [vmem:[%s5382_s7 + $0x8] sm:$0x1] }
  0xc5   : > { %v979_v42 = vcombine.high %v5622_v9, %v5622_v9  ;;  %v1389_v20 = vrot.slane %v1379_v15, %v5368_v6  ;;  %v1403_v60 = vrot.slane %v1381_v44, %v5368_v6  ;;  %4889 = vmatpush1.bf16.msra.mxu1 %v4991_v57  ;;  %v4705_v47 = vcombine.high %v5641_v26, %v5650_v28 }
  0xc6   : > { %v1612_v49 = vcombine.low %v5647_v21, %v5656_v36  ;;  %4722 = vmatprep.mubr.msk.bf16.mxu0 %vm540_vm0, %v5680_v55  ;;  %4767 = vmatprep.mubr.msk.bf16.mxu1 %vm540_vm0, %v5680_v55  ;;  %v994_v48 = vrot.slane %v987_v39, %v5368_v6  ;;  %v1448_v9 = vcombine.high %v5567_v13, %v5602_v40 }
  0xc7   : > { %v5704_v31 = vcombine.low %v1389_v20, %v1403_v60  ;;  %v1462_v57 = vrot.slane %v1446_v11, %v5368_v6  ;;  %v582_v63 = vsel %vm540_vm0, %v5309_v50, %v527_v41  ;;  %v4706_v56 = vcombine.high %v5647_v21, %v5656_v36  ;;  %3375 = vmatpush1.bf16.msra.mxu0 %v5687_v33  ;;  %v4996_v20 = vld [vmem:[%s7286_s3 + $0x100] sm:$0xff]  }
  0xc8   : > { %v4696_v5 = vcombine.low %v582_v63, %v5320_v53  ;;  %v585_v23 = vsel %vm540_vm0, %v5293_v45, %v529_v43  ;;  %v1445_v0 = vcombine.low %v5532_v62, %v5627_v4  ;;  %v1476_v50 = vrot.slane %v1448_v9, %v5368_v6  ;;  %4878 = vmatprep.subr.bf16.mxu1 %v5040_v1 }
  0xc9   : > { %1908 = vmatmul.mubr.bf16.gmra.mrb[12].mxu0 %v5704_v31  ;;  %2558 = vmatmul.mubr.bf16.gmra.mrb[12].mxu1 %v5704_v31  ;;  %v4697_v25 = vcombine.low %v585_v23, %v5395_v54  ;;  %v1061_v53 = vcombine.high %v585_v23, %v4681_v58  ;;  %v1547_v19 = vcombine.low %v979_v42, %v994_v48 }
  0xca   : > { %v1052_v45 = vrot.slane %v4696_v5, %v5368_v6  ;;  %v1447_v62 = vcombine.low %v5567_v13, %v5602_v40  ;;  %v1455_v4 = vrot.slane %v1445_v0, %v5368_v6  ;;  %v5735_v30 = vcombine.low %v1462_v57, %v1476_v50  ;;  %4890 = vmatpush1.bf16.msra.mxu1 %v5638_v32 }
  0xcb   : > { %v1068_v16 = vrot.slane %v4697_v25, %v5368_v6  ;;  %v1075_v54 = vrot.slane %v1061_v53, %v5368_v6  ;;  %v1512_v58 = vcombine.high %v5616_v17, %v5619_v2  ;;  %v1514_v26 = vcombine.high %v5678_v14, %v5664_v59  ;;  %3376 = vmatprep.subr.bf16.mxu0 %v5040_v1 }
  0xcc   : > { %v1059_v13 = vrot.slane %v1052_v45, %v5368_v6  ;;  %v1469_v40 = vrot.slane %v1447_v62, %v5368_v6  ;;  %v588_v27 = vsel %vm540_vm0, %v5318_v52, %v531_v10  ;;  %4723 = vmatprep.mubr.msk.bf16.mxu0 %vm540_vm0, %v5735_v30  ;;  %4768 = vmatprep.mubr.msk.bf16.mxu1 %vm540_vm0, %v5735_v30 }
  0xcd   : > { %v1076_v21 = vcombine.high %v1068_v16, %v1068_v16  ;;  %v1077_v32 = vcombine.high %v1075_v54, %v1075_v54  ;;  %v1084_v28 = vrot.slane %v1068_v16, %v5368_v6  ;;  %v5756_v34 = vrot.slane %v1548_v51, %v5368_v6  ;;  %3377 = vmatpush1.bf16.msra.mxu0 %v4995_v22 }
  0xce   : > { %v1091_v36 = vrot.slane %v1075_v54, %v5368_v6  ;;  %v1528_v52 = vrot.slane %v1512_v58, %v5368_v6  ;;  %v1542_v37 = vrot.slane %v1514_v26, %v5368_v6  ;;  %v1569_v24 = vrot.slane %v1547_v19, %v5368_v6  ;;  %4879 = vmatprep.subr.bf16.mxu1 %v5040_v1 }
  0xcf   : > { %v1098_v15 = vrot.slane %v1076_v21, %v5368_v6  ;;  %v1105_v44 = vrot.slane %v1077_v32, %v5368_v6  ;;  %v5764_v11 = vcombine.low %v1455_v4, %v1469_v40  ;;  %v1614_v39 = vcombine.low %v1059_v13, %v1084_v28  ;;  %4891 = vmatpush1.bf16.msra.mxu1 %v5687_v33 }
  0xd0   : > { %v5767_v41 = vcombine.low %v1528_v52, %v1542_v37  ;;  %v4698_v51 = vcombine.low %v588_v27, %v427_v29  ;;  %v1511_v42 = vcombine.low %v5616_v17, %v5619_v2  ;;  %v5776_v60 = vrot.slane %v4705_v47, %v5368_v6  ;;  %3378 = vmatprep.subr.bf16.mxu0 %v5040_v1 }
  0xd1   : > { %v5779_v43 = vrot.slane %v1612_v49, %v5368_v6  ;;  %v1106_v48 = vcombine.high %v1084_v28, %v1084_v28  ;;  %1916 = vmatmul.mubr.bf16.gmra.mrb[16].mxu0 %v5764_v11  ;;  %2566 = vmatmul.mubr.bf16.gmra.mrb[16].mxu1 %v5764_v11  ;;  %v1107_v9 = vcombine.high %v1091_v36, %v1091_v36  ;;  %v4999_v28 = vld [vmem:[%s7286_s3 + $0x118] sm:$0xff]  }
  0xd2   : > { %v1108_v57 = vcombine.high %v1098_v15, %v1098_v15  ;;  %4724 = vmatprep.mubr.msk.bf16.mxu0 %vm540_vm0, %v5767_v41  ;;  %4769 = vmatprep.mubr.msk.bf16.mxu1 %vm540_vm0, %v5767_v41  ;;  %v1117_v17 = vrot.slane %v4698_v51, %v5368_v6  ;;  %v5789_v2 = vrot.slane %v4706_v56, %v5368_v6  ;;  %v4997_v56 = vld [vmem:[%s7286_s3 + $0x108] sm:$0xff]  }
  0xd3   : > { %v1109_v33 = vcombine.high %v1105_v44, %v1105_v44  ;;  %v1513_v47 = vcombine.low %v5678_v14, %v5664_v59  ;;  %v1521_v49 = vrot.slane %v1511_v42, %v5368_v6  ;;  %v1642_v63 = vrot.slane %v1614_v39, %v5368_v6  ;;  %3379 = vmatpush1.bf16.msra.mxu0 %v4996_v20 }
  0xd4   : > { %v1124_v5 = vrot.slane %v1117_v17, %v5368_v6  ;;  %v1578_v23 = vcombine.high %v5667_v35, %v5675_v46  ;;  %v1580_v0 = vcombine.high %v1569_v24, %v5756_v34  ;;  %v1677_v50 = vcombine.low %v1098_v15, %v1106_v48  ;;  %4880 = vmatprep.subr.bf16.mxu1 %v5040_v1 }
  0xd5   : > { %v1535_v59 = vrot.slane %v1513_v47, %v5368_v6  ;;  %v1678_v14 = vcombine.low %v1108_v57, %v1091_v36  ;;  %v1679_v25 = vcombine.low %v1105_v44, %v1107_v9  ;;  %4892 = vmatpush1.bf16.msra.mxu1 %v4995_v22  ;;  %v1577_v62 = vcombine.low %v5667_v35, %v5675_v46  ;;  %v4998_v22 = vld [vmem:[%s7286_s3 + $0x110] sm:$0xff]  }
  0xd6   : > { %v1594_v53 = vrot.slane %v1578_v23, %v5368_v6  ;;  %v1608_v10 = vrot.slane %v1580_v0, %v5368_v6  ;;  %v1680_v19 = vcombine.low %v1109_v33, %v1124_v5  ;;  %v1579_v4 = vcombine.low %v1569_v24, %v5756_v34  ;;  %3380 = vmatprep.subr.bf16.mxu0 %v5040_v1 }
  0xd7   : > { %v5807_v45 = vcombine.low %v1521_v49, %v1535_v59  ;;  %v1644_v54 = vcombine.high %v5776_v60, %v5779_v43  ;;  %v1646_v58 = vcombine.high %v5789_v2, %v1642_v63  ;;  %3381 = vmatpush1.bf16.msra.mxu0 %v4997_v56  ;;  %4881 = vmatprep.subr.bf16.mxu1 %v5040_v1 }
  0xd8   : > { %v1610_v16 = vcombine.low %v1594_v53, %v1608_v10  ;;  %v1687_v35 = vrot.slane %v1677_v50, %v5368_v6  ;;  %v1701_v46 = vrot.slane %v1679_v25, %v5368_v6  ;;  %v1694_v13 = vrot.slane %v1678_v14, %v5368_v6  ;;  %3382 = vmatprep.subr.bf16.mxu0 %v5040_v1 }
  0xd9   : > { %1924 = vmatmul.mubr.bf16.gmra.mrb[20].mxu0 %v5807_v45  ;;  %2574 = vmatmul.mubr.bf16.gmra.mrb[20].mxu1 %v5807_v45  ;;  %v1587_v40 = vrot.slane %v1577_v62, %v5368_v6  ;;  %v1601_v26 = vrot.slane %v1579_v4, %v5368_v6  ;;  %v1708_v27 = vrot.slane %v1680_v19, %v5368_v6 }
  0xda   : > { %4725 = vmatprep.mubr.msk.bf16.mxu0 %vm540_vm0, %v1610_v16  ;;  %4770 = vmatprep.mubr.msk.bf16.mxu1 %vm540_vm0, %v1610_v16  ;;  %v1660_v21 = vrot.slane %v1644_v54, %v5368_v6  ;;  %v1674_v32 = vrot.slane %v1646_v58, %v5368_v6  ;;  %v1643_v34 = vcombine.low %v5776_v60, %v5779_v43 }
  0xdb   : > { %4893 = vmatpush1.bf16.msra.mxu1 %v4996_v20  ;;  %3383 = vmatpush1.bf16.msra.mxu0 %v4998_v22  ;;  %v1609_v29 = vcombine.low %v1587_v40, %v1601_v26  ;;  %v1645_v36 = vcombine.low %v5789_v2, %v1642_v63  ;;  %v1710_v37 = vcombine.high %v1687_v35, %v1694_v13 }
  0xdc   : > { %4882 = vmatprep.subr.bf16.mxu1 %v5040_v1  ;;  %3384 = vmatprep.subr.bf16.mxu0 %v5040_v1  ;;  %v1676_v52 = vcombine.low %v1660_v21, %v1674_v32  ;;  %v1712_v24 = vcombine.high %v1701_v46, %v1708_v27  ;;  %v1653_v15 = vrot.slane %v1643_v34, %v5368_v6 }
  0xdd   : > { %v1667_v44 = vrot.slane %v1645_v36, %v5368_v6  ;;  %v1726_v39 = vrot.slane %v1710_v37, %v5368_v6  ;;  %v1709_v20 = vcombine.low %v1687_v35, %v1694_v13  ;;  %v1711_v60 = vcombine.low %v1701_v46, %v1708_v27 }
  0xde   : > { %v1740_v51 = vrot.slane %v1712_v24, %v5368_v6 }
  0xdf   : > { %4894 = vmatpush1.bf16.msra.mxu1 %v4997_v56  ;;  %3385 = vmatpush1.bf16.msra.mxu0 %v4999_v28  ;;  %v1675_v42 = vcombine.low %v1653_v15, %v1667_v44  ;;  %v1719_v48 = vrot.slane %v1709_v20, %v5368_v6  ;;  %v1733_v9 = vrot.slane %v1711_v60, %v5368_v6 }
  0xe0   : > { %4883 = vmatprep.subr.bf16.mxu1 %v5040_v1  ;;  %v1742_v43 = vcombine.low %v1726_v39, %v1740_v51 }
  0xe1   : > { %1932 = vmatmul.mubr.bf16.gmra.mrb[24].mxu0 %v1609_v29  ;;  %2582 = vmatmul.mubr.bf16.gmra.mrb[24].mxu1 %v1609_v29  ;;  %v1741_v57 = vcombine.low %v1719_v48, %v1733_v9 }
  0xe2   : > { %4726 = vmatprep.mubr.msk.bf16.mxu0 %vm540_vm0, %v1676_v52  ;;  %4771 = vmatprep.mubr.msk.bf16.mxu1 %vm540_vm0, %v1676_v52 }
  0xe3   : > { %4895 = vmatpush1.bf16.msra.mxu1 %v4998_v22 }
  0xe4   : > { %4884 = vmatprep.subr.bf16.mxu1 %v5040_v1  ;;  %v5043_v1 = vmov 1983009808  }
  0xe5   : > { %v1976_v6 = vunpack.c.l.s4 %v5043_v1 }
  0xe7   : > { %4896 = vmatpush1.bf16.msra.mxu1 %v4999_v28 }
  0xe9   : > { %1940 = vmatmul.mubr.bf16.gmra.mrb[28].mxu0 %v1675_v42  ;;  %2590 = vmatmul.mubr.bf16.gmra.mrb[28].mxu1 %v1675_v42 }
  0xea   : > { %4727 = vmatprep.mubr.msk.bf16.mxu0 %vm540_vm0, %v1742_v43  ;;  %4772 = vmatprep.mubr.msk.bf16.mxu1 %vm540_vm0, %v1742_v43 }
  0xf1   : > { %1948 = vmatmul.mubr.bf16.gmra.mrb[32].mxu0 %v1741_v57  ;;  %2598 = vmatmul.mubr.bf16.gmra.mrb[32].mxu1 %v1741_v57 }
  0xf2   : > { %4817 = vmatprep.mubr.msk.bf16.mxu0 %vm540_vm0, %v5477_v7  ;;  %4822 = vmatprep.mubr.msk.bf16.mxu1 %vm540_vm0, %v5767_v41  ;;  %v1977_v7 = vunpack.c.0.s8 %v1976_v6 }
  0xf9   : > { %3395 = vmatmul.mubr.bf16.vlgmr.msra.gmra.mrb[36].mxu0 %v5483_v12  ;;  %3435 = vmatmul.mubr.bf16.vlgmr.msra.gmra.mrb[36].mxu1 %v5807_v45  ;;  %v4826_v12 = vld [vmem:[%s7287_s4] ss:$0 sm:$0xff] }
  0xfa   : > { %4818 = vmatprep.mubr.msk.bf16.mxu0 %vm540_vm0, %v5540_v61  ;;  %4823 = vmatprep.mubr.msk.bf16.mxu1 %vm540_vm0, %v1610_v16  ;;  %v3921_v61 = vcombine.high %v4826_v12, %v4826_v12 }
 0x101   : > { %3403 = vmatmul.mubr.bf16.gmra.mrb[40].mxu0 %v5564_v38  ;;  %3443 = vmatmul.mubr.bf16.gmra.mrb[40].mxu1 %v1609_v29  ;;  %v5878_v38 = vsub.s32 %v1977_v7, %v5363_v3 }
 0x102   : > { %4819 = vmatprep.mubr.msk.bf16.mxu0 %vm540_vm0, %v5596_v8  ;;  %4824 = vmatprep.mubr.msk.bf16.mxu1 %vm540_vm0, %v1676_v52 }
 0x103   : > { %v5881_v8 = vrot.slane %v4826_v12, %v5878_v38 }
 0x105   : > { %v5903_v50 = vcombine.high %v5881_v8, %v5881_v8 }
 0x109   : > { %3411 = vmatmul.mubr.bf16.gmra.mrb[44].mxu0 %v5612_v18  ;;  %3451 = vmatmul.mubr.bf16.gmra.mrb[44].mxu1 %v1675_v42 }
 0x10a   : > { %4820 = vmatprep.mubr.msk.bf16.mxu0 %vm540_vm0, %v5680_v55  ;;  %4825 = vmatprep.mubr.msk.bf16.mxu1 %vm540_vm0, %v1742_v43 }
 0x111   : > { %3419 = vmatmul.mubr.bf16.gmra.mrb[48].mxu0 %v5704_v31  ;;  %3459 = vmatmul.mubr.bf16.gmra.mrb[48].mxu1 %v1741_v57 }
 0x112   : > { %4821 = vmatprep.mubr.msk.bf16.mxu0 %vm540_vm0, %v5735_v30  ;;  %v5888_v30 = vrot.slane %v3921_v61, %v5878_v38 }
 0x114   : > { %v5910_v53 = vcombine.high %v5888_v30, %v5888_v30 }
 0x119   : > { %3427 = vmatmul.mubr.bf16.gmra.mrb[52].mxu0 %v5764_v11 }
 0x180   : > { %v1885_v18 = vpop.f32.mrb[0].mxu0  ;;  %v2535_v55 = vpop.f32.mrb[0].mxu1 }
 0x181   : > { %v1974_v11 = vcombine.high %v1885_v18, %v1885_v18  ;;  %v5891_v41 = vrot.slane %v1885_v18, %v5878_v38  ;;  %v2624_v3 = vcombine.high %v2535_v55, %v2535_v55  ;;  %v2631_v17 = vrot.slane %v2535_v55, %v5878_v38  ;;  %v1887_v2 = vpop.f32.mrb[1].mxu0  ;;  %v2537_v33 = vpop.f32.mrb[1].mxu1 }
 0x182   : > { %v1888_v47 = vpop.f32.mrb[2].mxu0  ;;  %v2538_v49 = vpop.f32.mrb[2].mxu1 }
 0x183   : > { %v5895_v63 = vrot.slane %v1974_v11, %v5878_v38  ;;  %v2638_v5 = vrot.slane %v2624_v3, %v5878_v38  ;;  %v2639_v23 = vcombine.high %v2631_v17, %v2631_v17  ;;  %v1890_v0 = vpop.f32.mrb[3].mxu0  ;;  %v2540_v56 = vpop.f32.mrb[3].mxu1  ;;  %v1991_v59 = vcombine.high %v1888_v47, %v1888_v47 }
 0x184   : > { %v5906_v14 = vrot.slane %v1888_v47, %v5878_v38  ;;  %v2641_v25 = vcombine.high %v2538_v49, %v2538_v49  ;;  %v1989_v10 = vcombine.high %v5891_v41, %v5891_v41  ;;  %v4773_v4 = vrot.slane %v2631_v17, 9 }
 0x185   : > { %v2640_v19 = vcombine.high %v2638_v5, %v2638_v5  ;;  %v2939_v45 = vrot.slane %v2639_v23, 7  ;;  %v2942_v62 = vrot.slane %v2638_v5, 7  ;;  %v5915_v16 = vrot.slane %v1991_v59, %v5878_v38 }
 0x186   : > { %v5918_v54 = vrot.slane %v2538_v49, %v5878_v38  ;;  %v5921_v58 = vrot.slane %v2641_v25, %v5878_v38  ;;  %v1990_v35 = vcombine.high %v5895_v63, %v5895_v63 }
 0x187   : > { %v2941_v46 = vrot.slane %v2939_v45, 2  ;;  %v5930_v13 = vrot.slane %v2942_v62, 2  ;;  %v5932_v40 = vrot.slane %v2640_v19, 7  ;;  %v2940_v37 = vsel %vm5924_vm7, %v4773_v4, %v2939_v45 }
 0x188   : > { %v2656_v27 = vcombine.high %v5918_v54, %v5918_v54  ;;  %v2657_v21 = vcombine.high %v5921_v58, %v5921_v58  ;;  %v2948_v32 = vrot.slane %v5918_v54, 7  ;;  %v2954_v34 = vrot.slane %v5921_v58, 7 }
 0x189   : > { %v2947_v28 = vrot.slane %v5932_v40, 2  ;;  %v1893_v36 = vpop.f32.mrb[4].mxu0  ;;  %v2543_v52 = vpop.f32.mrb[4].mxu1  ;;  %v5953_v42 = vsel %vm5924_vm7, %v2941_v46, %v2942_v62  ;;  %v2946_v57 = vsel %vm5924_vm7, %v5930_v13, %v5932_v40  ;;  %v6006_v19 = vadd.f32 %v2940_v37, %v5891_v41 }
 0x18a   : > { %v5947_v24 = vrot.slane %v2656_v27, 7  ;;  %v5949_v15 = vrot.slane %v2657_v21, 7  ;;  %v2008_v44 = vcombine.high %v1893_v36, %v1893_v36  ;;  %v1895_v39 = vpop.f32.mrb[5].mxu0  ;;  %v2545_v51 = vpop.f32.mrb[5].mxu1  ;;  %v5956_v20 = vrot.slane %v1893_v36, %v5878_v38 }
 0x18b   : > { %v2658_v60 = vcombine.high %v2543_v52, %v2543_v52  ;;  %v5959_v43 = vrot.slane %v2543_v52, %v5878_v38  ;;  %v1896_v48 = vpop.f32.mrb[6].mxu0  ;;  %v2546_v9 = vpop.f32.mrb[6].mxu1  ;;  %v5967_v1 = vrot.slane %v2948_v32, 2  ;;  %v5971_v6 = vrot.slane %v2954_v34, 2 }
 0x18c   : > { %v5974_v7 = vrot.slane %v2008_v44, %v5878_v38  ;;  %v2025_v12 = vcombine.high %v1896_v48, %v1896_v48  ;;  %v1898_v61 = vpop.f32.mrb[7].mxu0  ;;  %v2548_v18 = vpop.f32.mrb[7].mxu1  ;;  %v2953_v55 = vrot.slane %v5947_v24, 2  ;;  %v5986_v2 = vrot.slane %v1896_v48, %v5878_v38 }
 0x18d   : > { %v5979_v11 = vrot.slane %v2658_v60, %v5878_v38  ;;  %v2673_v3 = vcombine.high %v5959_v43, %v5959_v43  ;;  %v2675_v47 = vcombine.high %v2546_v9, %v2546_v9  ;;  %v5996_v0 = vrot.slane %v2546_v9, %v5878_v38 }
 0x18e   : > { %7401 = vst [vmem:[#allocation2_spill] sm:$0xff] %v5986_v2  ;;  %v5989_v33 = vrot.slane %v2025_v12, %v5878_v38  ;;  %v2949_v41 = vsel %vm5924_vm7, %v2947_v28, %v2948_v32 }
 0x18f   : > { %v2674_v49 = vcombine.high %v5979_v11, %v5979_v11  ;;  %v7292_v23 = vrot.slane %v5979_v11, 7  ;;  %7403 = vst [vmem:[#allocation4_spill] sm:$0xff] %v5996_v0  ;;  %v6000_v59 = vrot.slane %v2673_v3, 9  ;;  %v6003_v25 = vrot.slane %v2675_v47, %v5878_v38 }
 0x190   : > { %7402 = vst [vmem:[#allocation3_spill] sm:$0xff] %v5989_v33  ;;  %v2690_v4 = vcombine.high %v5996_v0, %v5996_v0  ;;  %v7290_v46 = vrot.slane %v5996_v0, 7 }
 0x191   : > { %7404 = vst [vmem:[#allocation5_spill] sm:$0xff] %v6003_v25  ;;  %v6008_v45 = vrot.slane %v2674_v49, 7  ;;  %v6015_v27 = vpop.f32.mrb[8].mxu0  ;;  %v2551_v21 = vpop.f32.mrb[8].mxu1  ;;  %v2691_v52 = vcombine.high %v6003_v25, %v6003_v25  ;;  %v7289_v37 = vrot.slane %v6003_v25, 7  ;;  %v6026_v60 = vrot.slane %v7292_v23, 2 }
 0x192   : > { %7405 = vst [vmem:[#allocation6_spill] sm:$0xff] %v6015_v27  ;;  %v2042_v44 = vcombine.high %v6015_v27, %v6015_v27  ;;  %v1903_v39 = vpop.f32.mrb[9].mxu0  ;;  %v2553_v51 = vpop.f32.mrb[9].mxu1  ;;  %v6028_v48 = vrot.slane %v2690_v4, 7  ;;  %v2692_v12 = vcombine.high %v2551_v21, %v2551_v21  ;;  %v6043_v4 = vrot.slane %v7290_v46, 2 }
 0x193   : > { %v1904_v61 = vpop.f32.mrb[10].mxu0  ;;  %v2554_v18 = vpop.f32.mrb[10].mxu1  ;;  %v6033_v47 = vrot.slane %v2691_v52, 7  ;;  %v6039_v39 = vrot.slane %v2551_v21, %v5878_v38 }
 0x194   : > { %7406 = vst [vmem:[#allocation7_spill] sm:$0xff] %v6028_v48  ;;  %v6036_v49 = vrot.slane %v2042_v44, %v5878_v38  ;;  %v1906_v51 = vpop.f32.mrb[11].mxu0  ;;  %v2556_v36 = vpop.f32.mrb[11].mxu1  ;;  %7410 = vst [vmem:[#allocation11_spill] sm:$0xff] %v6043_v4  ;;  %v6046_v9 = vrot.slane %v2692_v12, %v5878_v38  ;;  %v2058_v62 = vcombine.high %v1904_v61, %v1904_v61  ;;  %v6054_v44 = vrot.slane %v7289_v37, 2 }
 0x195   : > { %7407 = vst [vmem:[#allocation8_spill] sm:$0xff] %v6033_v47  ;;  %7409 = vst [vmem:[#allocation10_spill] sm:$0xff] %v6039_v39  ;;  %v6049_v56 = vrot.slane %v1904_v61, %v5878_v38  ;;  %v7291_v36 = vrot.slane %v6039_v39, 7  ;;  %v2707_v12 = vcombine.high %v6039_v39, %v6039_v39  ;;  %v2709_v21 = vcombine.high %v2554_v18, %v2554_v18 }
 0x196   : > { %7408 = vst [vmem:[#allocation9_spill] sm:$0xff] %v6036_v49  ;;  %7411 = vst [vmem:[#allocation12_spill] sm:$0xff] %v6046_v9  ;;  %v2708_v61 = vcombine.high %v6046_v9, %v6046_v9  ;;  %v6065_v3 = vrot.slane %v2058_v62, %v5878_v38  ;;  %v6071_v46 = vrot.slane %v2554_v18, %v5878_v38 }
 0x197   : > { %7412 = vst [vmem:[#allocation13_spill] sm:$0xff] %v6049_v56  ;;  %7413 = vst [vmem:[#allocation14_spill] sm:$0xff] %v6054_v44  ;;  %v6075_v51 = vrot.slane %v7291_v36, 2  ;;  %v6083_v62 = vadd.f32 %v5953_v42, %v1989_v10  ;;  %v6091_v18 = vadd.f32 %v2946_v57, %v5895_v63  ;;  %v6094_v37 = vrot.slane %v2709_v21, %v5878_v38 }
 0x198   : > { %7414 = vst [vmem:[#allocation15_spill] sm:$0xff] %v6065_v3  ;;  %7415 = vst [vmem:[#allocation16_spill] sm:$0xff] %v6071_v46  ;;  %v6077_v17 = vrot.slane %v2708_v61, 7  ;;  %v2724_v61 = vcombine.high %v6071_v46, %v6071_v46  ;;  %v7293_v52 = vrot.slane %v6071_v46, 7  ;;  %v6105_v10 = vrot.slane %v2707_v12, 7 }
 0x199   : > { %7416 = vst [vmem:[#allocation17_spill] sm:$0xff] %v6075_v51  ;;  %7418 = vst [vmem:[#allocation19_spill] sm:$0xff] %v6094_v37  ;;  %v2952_v57 = vsel %vm5924_vm7, %v5967_v1, %v5947_v24  ;;  %v2725_v54 = vcombine.high %v6094_v37, %v6094_v37  ;;  %v7294_v40 = vrot.slane %v6094_v37, 7  ;;  %v2955_v12 = vsel %vm5924_vm7, %v2953_v55, %v2954_v34 }
 0x19a   : > { %7417 = vst [vmem:[#allocation18_spill] sm:$0xff] %v6077_v17  ;;  %7419 = vst [vmem:[#allocation20_spill] sm:$0xff] %v6105_v10  ;;  %v6116_v21 = vrot.slane %v2724_v61, 7  ;;  %v6133_v23 = vrot.slane %v7293_v52, 2  ;;  %v2958_v34 = vsel %vm5924_vm7, %v5971_v6, %v5949_v15  ;;  %v6144_v55 = vadd.f32 %v2949_v41, %v1990_v35 }
 0x19b   : > { %v6135_v58 = vrot.slane %v2725_v54, 7  ;;  %v6157_v6 = vrot.slane %v7294_v40, 2 }
 0x19c   : > { %7420 = vst [vmem:[#allocation21_spill] sm:$0xff] %v6116_v21  ;;  %v1909_v32 = vpop.f32.mrb[12].mxu0  ;;  %v2559_v28 = vpop.f32.mrb[12].mxu1  ;;  %7423 = vst [vmem:[#allocation24_spill] sm:$0xff] %v6133_v23 }
 0x19d   : > { %v2075_v42 = vcombine.high %v1909_v32, %v1909_v32  ;;  %v6126_v13 = vrot.slane %v1909_v32, %v5878_v38  ;;  %v2726_v1 = vcombine.high %v2559_v28, %v2559_v28  ;;  %v6129_v36 = vrot.slane %v2559_v28, %v5878_v38  ;;  %v1911_v61 = vpop.f32.mrb[13].mxu0  ;;  %v2561_v29 = vpop.f32.mrb[13].mxu1  ;;  %7424 = vst [vmem:[#allocation25_spill] sm:$0xff] %v6135_v58 }
 0x19e   : > { %v1912_v24 = vpop.f32.mrb[14].mxu0  ;;  %v2562_v31 = vpop.f32.mrb[14].mxu1  ;;  %7427 = vst [vmem:[#allocation28_spill] sm:$0xff] %v6157_v6 }
 0x19f   : > { %7421 = vst [vmem:[#allocation22_spill] sm:$0xff] %v6126_v13  ;;  %7422 = vst [vmem:[#allocation23_spill] sm:$0xff] %v6129_v36  ;;  %v6148_v32 = vrot.slane %v2075_v42, %v5878_v38  ;;  %v6151_v54 = vrot.slane %v2726_v1, %v5878_v38  ;;  %v2741_v28 = vcombine.high %v6129_v36, %v6129_v36  ;;  %v1914_v61 = vpop.f32.mrb[15].mxu0  ;;  %v2564_v52 = vpop.f32.mrb[15].mxu1  ;;  %v7295_v63 = vrot.slane %v6129_v36, 7 }
 0x1a0   : > { %v2092_v35 = vcombine.high %v1912_v24, %v1912_v24  ;;  %v6161_v41 = vrot.slane %v1912_v24, %v5878_v38  ;;  %v2743_v5 = vcombine.high %v2562_v31, %v2562_v31  ;;  %v6183_v29 = vrot.slane %v2562_v31, %v5878_v38 }
 0x1a1   : > { %7425 = vst [vmem:[#allocation26_spill] sm:$0xff] %v6148_v32  ;;  %7426 = vst [vmem:[#allocation27_spill] sm:$0xff] %v6151_v54  ;;  %v6168_v61 = vrot.slane %v2741_v28, 7  ;;  %v2742_v52 = vcombine.high %v6151_v54, %v6151_v54  ;;  %v6174_v40 = vrot.slane %v7295_v63, 2  ;;  %v6186_v28 = vadd.f32 %v2952_v57, %v5906_v14 }
 0x1a2   : > { %7428 = vst [vmem:[#allocation29_spill] sm:$0xff] %v6161_v41  ;;  %v6178_v42 = vrot.slane %v2092_v35, %v5878_v38  ;;  %7432 = vst [vmem:[#allocation33_spill] sm:$0xff] %v6183_v29  ;;  %v6190_v63 = vrot.slane %v2743_v5, %v5878_v38  ;;  %v7434_v35 = vcombine.high %v5906_v14, %v5906_v14 }
 0x1a3   : > { %7429 = vst [vmem:[#allocation30_spill] sm:$0xff] %v6168_v61  ;;  %7430 = vst [vmem:[#allocation31_spill] sm:$0xff] %v6174_v40  ;;  %v6198_v1 = vadd.f32 %v2958_v34, %v5915_v16  ;;  %v2758_v31 = vcombine.high %v6183_v29, %v6183_v29  ;;  %v6212_v36 = vrot.slane %v2742_v52, 9 }
 0x1a4   : > { %7431 = vst [vmem:[#allocation32_spill] sm:$0xff] %v6178_v42  ;;  %7433 = vst [vmem:[#allocation34_spill] sm:$0xff] %v6190_v63  ;;  %v1917_v32 = vpop.f32.mrb[16].mxu0  ;;  %v2567_v24 = vpop.f32.mrb[16].mxu1  ;;  %v6195_v13 = vadd.f32 %v2955_v12, %v7434_v35  ;;  %v2759_v40 = vcombine.high %v6190_v63, %v6190_v63 }
 0x1a5   : > { %v2109_v41 = vcombine.high %v1917_v32, %v1917_v32  ;;  %v6204_v26 = vrot.slane %v1917_v32, %v5878_v38  ;;  %v1919_v5 = vpop.f32.mrb[17].mxu0  ;;  %v2569_v54 = vpop.f32.mrb[17].mxu1  ;;  %v2760_v12 = vcombine.high %v2567_v24, %v2567_v24  ;;  %v6210_v34 = vrot.slane %v2567_v24, %v5878_v38  ;;  %7437 = vst [vmem:[#allocation37_spill] sm:$0xff] %v6212_v36 }
 0x1a6   : > { %v1920_v35 = vpop.f32.mrb[18].mxu0  ;;  %v2570_v61 = vpop.f32.mrb[18].mxu1  ;;  %v7438_v32 = vrot.slane %v6183_v29, 7  ;;  %v6220_v54 = vrot.slane %v2758_v31, 7  ;;  %v6222_v14 = vrot.slane %v2759_v40, 7 }
 0x1a7   : > { %7435 = vst [vmem:[#allocation35_spill] sm:$0xff] %v6204_v26  ;;  %7436 = vst [vmem:[#allocation36_spill] sm:$0xff] %v6210_v34  ;;  %v1922_v3 = vpop.f32.mrb[19].mxu0  ;;  %v2572_v56 = vpop.f32.mrb[19].mxu1  ;;  %v6225_v24 = vrot.slane %v2109_v41, %v5878_v38  ;;  %v6228_v6 = vrot.slane %v2760_v12, %v5878_v38  ;;  %v2775_v52 = vcombine.high %v6210_v34, %v6210_v34  ;;  %v7449_v26 = vrot.slane %v6210_v34, 7 }
 0x1a8   : > { %v6218_v5 = vrot.slane %v7438_v32, 2  ;;  %7440 = vst [vmem:[#allocation39_spill] sm:$0xff] %v6220_v54  ;;  %7441 = vst [vmem:[#allocation40_spill] sm:$0xff] %v6222_v14  ;;  %v2125_v31 = vcombine.high %v1920_v35, %v1920_v35  ;;  %v6236_v3 = vrot.slane %v1920_v35, %v5878_v38  ;;  %v7445_v56 = vrot.slane %v6190_v63, 7 }
 0x1a9   : > { %7442 = vst [vmem:[#allocation41_spill] sm:$0xff] %v6225_v24  ;;  %7443 = vst [vmem:[#allocation42_spill] sm:$0xff] %v6228_v6  ;;  %v2776_v41 = vcombine.high %v6228_v6, %v6228_v6  ;;  %v6244_v12 = vrot.slane %v2775_v52, 7  ;;  %v2777_v35 = vcombine.high %v2570_v61, %v2570_v61  ;;  %v6254_v63 = vrot.slane %v7449_v26, 2 }
 0x1aa   : > { %7439 = vst [vmem:[#allocation38_spill] sm:$0xff] %v6218_v5  ;;  %7444 = vst [vmem:[#allocation43_spill] sm:$0xff] %v6236_v3  ;;  %v6240_v40 = vrot.slane %v7445_v56, 2  ;;  %v6250_v32 = vrot.slane %v2125_v31, %v5878_v38  ;;  %v7452_v57 = vrot.slane %v6228_v6, 7 }
 0x1ab   : > { %7447 = vst [vmem:[#allocation45_spill] sm:$0xff] %v6244_v12  ;;  %7450 = vst [vmem:[#allocation47_spill] sm:$0xff] %v6254_v63  ;;  %v6267_v31 = vrot.slane %v2777_v35, %v5878_v38  ;;  %v6272_v12 = vrot.slane %v2776_v41, 7 }
 0x1ac   : > { %7446 = vst [vmem:[#allocation44_spill] sm:$0xff] %v6240_v40  ;;  %7448 = vst [vmem:[#allocation46_spill] sm:$0xff] %v6250_v32  ;;  %v6260_v40 = vrot.slane %v2570_v61, %v5878_v38  ;;  %v1925_v24 = vpop.f32.mrb[20].mxu0  ;;  %v2575_v42 = vpop.f32.mrb[20].mxu1  ;;  %v6264_v14 = vrot.slane %v7452_v57, 2 }
 0x1ad   : > { %7454 = vst [vmem:[#allocation50_spill] sm:$0xff] %v6267_v31  ;;  %v2142_v34 = vcombine.high %v1925_v24, %v1925_v24  ;;  %v6270_v26 = vrot.slane %v1925_v24, %v5878_v38  ;;  %v1927_v56 = vpop.f32.mrb[21].mxu0  ;;  %v2577_v63 = vpop.f32.mrb[21].mxu1  ;;  %7455 = vst [vmem:[#allocation51_spill] sm:$0xff] %v6272_v12  ;;  %v2794_v52 = vcombine.high %v2575_v42, %v2575_v42 }
 0x1ae   : > { %7451 = vst [vmem:[#allocation48_spill] sm:$0xff] %v6260_v40  ;;  %7453 = vst [vmem:[#allocation49_spill] sm:$0xff] %v6264_v14  ;;  %v2792_v61 = vcombine.high %v6260_v40, %v6260_v40  ;;  %v6277_v3 = vrot.slane %v2575_v42, %v5878_v38  ;;  %v1928_v57 = vpop.f32.mrb[22].mxu0  ;;  %v2578_v14 = vpop.f32.mrb[22].mxu1  ;;  %v2793_v24 = vcombine.high %v6267_v31, %v6267_v31 }
 0x1af   : > { %v6285_v63 = vrot.slane %v2142_v34, %v5878_v38  ;;  %v1930_v41 = vpop.f32.mrb[23].mxu0  ;;  %v2580_v12 = vpop.f32.mrb[23].mxu1  ;;  %v6290_v42 = vrot.slane %v2794_v52, %v5878_v38  ;;  %v2159_v56 = vcombine.high %v1928_v57, %v1928_v57  ;;  %v6313_v35 = vrot.slane %v1928_v57, %v5878_v38 }
 0x1b0   : > { %v6287_v6 = vrot.slane %v2792_v61, 7  ;;  %v2809_v5 = vcombine.high %v6277_v3, %v6277_v3  ;;  %v6296_v36 = vrot.slane %v2793_v24, 7  ;;  %v7458_v12 = vrot.slane %v6267_v31, 7 }
 0x1b1   : > { %v2810_v41 = vcombine.high %v6290_v42, %v6290_v42  ;;  %v6316_v34 = vrot.slane %v2159_v56, %v5878_v38  ;;  %v2811_v31 = vcombine.high %v2578_v14, %v2578_v14 }
 0x1b2   : > { %7456 = vst [vmem:[#allocation52_spill] sm:$0xff] %v6287_v6  ;;  %7457 = vst [vmem:[#allocation53_spill] sm:$0xff] %v6296_v36  ;;  %v6302_v61 = vrot.slane %v7458_v12, 2  ;;  %v6308_v29 = vrot.slane %v2809_v5, 7  ;;  %v7460_v12 = vrot.slane %v6277_v3, 7  ;;  %v6325_v5 = vrot.slane %v2578_v14, %v5878_v38 }
 0x1b3   : > { %v6322_v52 = vrot.slane %v2810_v41, 7  ;;  %v7461_v6 = vrot.slane %v6290_v42, 7  ;;  %v6338_v23 = vrot.slane %v2811_v31, %v5878_v38 }
 0x1b4   : > { %7459 = vst [vmem:[#allocation54_spill] sm:$0xff] %v6302_v61  ;;  %v6320_v61 = vrot.slane %v7460_v12, 2  ;;  %v1933_v40 = vpop.f32.mrb[24].mxu0  ;;  %v2583_v54 = vpop.f32.mrb[24].mxu1  ;;  %v2826_v24 = vcombine.high %v6325_v5, %v6325_v5 }
 0x1b5   : > { %v6331_v56 = vrot.slane %v7461_v6, 2  ;;  %v2176_v58 = vcombine.high %v1933_v40, %v1933_v40  ;;  %v1935_v37 = vpop.f32.mrb[25].mxu0  ;;  %v2585_v12 = vpop.f32.mrb[25].mxu1  ;;  %v6345_v6 = vrot.slane %v1933_v40, %v5878_v38  ;;  %v6351_v41 = vrot.slane %v2583_v54, %v5878_v38 }
 0x1b6   : > { %v6342_v57 = vpop.f32.mrb[26].mxu0  ;;  %v2586_v21 = vpop.f32.mrb[26].mxu1  ;;  %v2828_v12 = vcombine.high %v2583_v54, %v2583_v54  ;;  %v2827_v49 = vcombine.high %v6338_v23, %v6338_v23 }
 0x1b7   : > { %7462 = vst [vmem:[#allocation55_spill] sm:$0xff] %v6342_v57  ;;  %7463 = vst [vmem:[#allocation56_spill] sm:$0xff] %v6345_v6  ;;  %v6348_v37 = vrot.slane %v2176_v58, %v5878_v38  ;;  %v1938_v14 = vpop.f32.mrb[27].mxu0  ;;  %v2588_v46 = vpop.f32.mrb[27].mxu1  ;;  %v2193_v40 = vcombine.high %v6342_v57, %v6342_v57  ;;  %v6360_v58 = vrot.slane %v2826_v24, 9  ;;  %v2845_v31 = vcombine.high %v2586_v21, %v2586_v21 }
 0x1b8   : > { %v6363_v17 = vrot.slane %v2828_v12, %v5878_v38  ;;  %v2843_v46 = vcombine.high %v6351_v41, %v6351_v41  ;;  %v6367_v54 = vrot.slane %v2827_v49, 7  ;;  %v7467_v49 = vrot.slane %v6338_v23, 7 }
 0x1b9   : > { %7464 = vst [vmem:[#allocation57_spill] sm:$0xff] %v6348_v37  ;;  %v6380_v51 = vrot.slane %v2193_v40, %v5878_v38  ;;  %v6389_v27 = vrot.slane %v2586_v21, %v5878_v38  ;;  %v7469_v12 = vrot.slane %v6351_v41, 7  ;;  %v6400_v14 = vrot.slane %v2845_v31, %v5878_v38 }
 0x1ba   : > { %7465 = vst [vmem:[#allocation58_spill] sm:$0xff] %v6363_v17  ;;  %v2844_v24 = vcombine.high %v6363_v17, %v6363_v17  ;;  %v6376_v9 = vrot.slane %v2843_v46, 7  ;;  %v6384_v10 = vrot.slane %v7467_v49, 2 }
 0x1bb   : > { %7466 = vst [vmem:[#allocation59_spill] sm:$0xff] %v6380_v51  ;;  %7468 = vst [vmem:[#allocation60_spill] sm:$0xff] %v6389_v27  ;;  %v6394_v2 = vrot.slane %v7469_v12, 2  ;;  %v2860_v21 = vcombine.high %v6389_v27, %v6389_v27  ;;  %v7472_v12 = vrot.slane %v6363_v17, 7  ;;  %v2861_v57 = vcombine.high %v6400_v14, %v6400_v14 }
 0x1bc   : > { %v1941_v39 = vpop.f32.mrb[28].mxu0  ;;  %v2591_v33 = vpop.f32.mrb[28].mxu1  ;;  %v6397_v44 = vrot.slane %v2844_v24, 7  ;;  %7471 = vst [vmem:[#allocation62_spill] sm:$0xff] %v6400_v14  ;;  %v7475_v37 = vrot.slane %v6389_v27, 7 }
 0x1bd   : > { %v1943_v49 = vpop.f32.mrb[29].mxu0  ;;  %v2593_v47 = vpop.f32.mrb[29].mxu1  ;;  %v2209_v25 = vcombine.high %v1941_v39, %v1941_v39  ;;  %v6407_v48 = vrot.slane %v7472_v12, 2  ;;  %v6422_v12 = vrot.slane %v1941_v39, %v5878_v38 }
 0x1be   : > { %7470 = vst [vmem:[#allocation61_spill] sm:$0xff] %v6397_v44  ;;  %v1944_v46 = vpop.f32.mrb[30].mxu0  ;;  %v2594_v4 = vpop.f32.mrb[30].mxu1  ;;  %v2862_v49 = vcombine.high %v2591_v33, %v2591_v33  ;;  %v6412_v47 = vrot.slane %v2591_v33, %v5878_v38  ;;  %v6419_v6 = vrot.slane %v7475_v37, 2 }
 0x1bf   : > { %7473 = vst [vmem:[#allocation63_spill] sm:$0xff] %v6407_v48  ;;  %v1946_v31 = vpop.f32.mrb[31].mxu0  ;;  %v2596_v40 = vpop.f32.mrb[31].mxu1  ;;  %7477 = vst [vmem:[#allocation66_spill] sm:$0xff] %v6422_v12  ;;  %v6424_v48 = vrot.slane %v2860_v21, 7  ;;  %v6427_v24 = vrot.slane %v2209_v25, %v5878_v38  ;;  %v2226_v37 = vcombine.high %v1944_v46, %v1944_v46  ;;  %v6438_v51 = vrot.slane %v1944_v46, %v5878_v38 }
 0x1c0   : > { %7474 = vst [vmem:[#allocation64_spill] sm:$0xff] %v6412_v47  ;;  %7476 = vst [vmem:[#allocation65_spill] sm:$0xff] %v6419_v6  ;;  %v6430_v33 = vrot.slane %v2862_v49, %v5878_v38  ;;  %v2877_v40 = vcombine.high %v6412_v47, %v6412_v47  ;;  %v6434_v31 = vrot.slane %v2861_v57, 7  ;;  %v7485_v14 = vrot.slane %v6412_v47, 7 }
 0x1c1   : > { %7478 = vst [vmem:[#allocation67_spill] sm:$0xff] %v6424_v48  ;;  %7479 = vst [vmem:[#allocation68_spill] sm:$0xff] %v6427_v24  ;;  %v6452_v46 = vrot.slane %v2226_v37, %v5878_v38  ;;  %v2879_v49 = vcombine.high %v2594_v4, %v2594_v4  ;;  %v6464_v0 = vrot.slane %v2594_v4, %v5878_v38 }
 0x1c2   : > { %7480 = vst [vmem:[#allocation69_spill] sm:$0xff] %v6430_v33  ;;  %7481 = vst [vmem:[#allocation70_spill] sm:$0xff] %v6434_v31  ;;  %v2878_v25 = vcombine.high %v6430_v33, %v6430_v33  ;;  %v6443_v21 = vrot.slane %v2877_v40, 7  ;;  %v6456_v27 = vrot.slane %v7485_v14, 2 }
 0x1c3   : > { %7482 = vst [vmem:[#allocation71_spill] sm:$0xff] %v6438_v51  ;;  %7484 = vst [vmem:[#allocation73_spill] sm:$0xff] %v6452_v46  ;;  %v6474_v6 = vrot.slane %v2879_v49, %v5878_v38  ;;  %v7496_v49 = vrot.slane %v6464_v0, 7 }
 0x1c4   : > { %7483 = vst [vmem:[#allocation72_spill] sm:$0xff] %v6443_v21  ;;  %v1949_v48 = vpop.f32.mrb[32].mxu0  ;;  %v2599_v39 = vpop.f32.mrb[32].mxu1  ;;  %7486 = vst [vmem:[#allocation74_spill] sm:$0xff] %v6456_v27  ;;  %v6458_v40 = vrot.slane %v2878_v25, 7  ;;  %v7490_v25 = vrot.slane %v6430_v33, 7 }
 0x1c5   : > { %v1951_v31 = vpop.f32.mrb[33].mxu0  ;;  %v2601_v57 = vpop.f32.mrb[33].mxu1  ;;  %7488 = vst [vmem:[#allocation76_spill] sm:$0xff] %v6464_v0  ;;  %v2243_v37 = vcombine.high %v1949_v48, %v1949_v48  ;;  %v6467_v24 = vrot.slane %v1949_v48, %v5878_v38  ;;  %7492 = vst [vmem:[#allocation79_spill] sm:$0xff] %v6474_v6  ;;  %v2894_v48 = vcombine.high %v6464_v0, %v6464_v0  ;;  %v6503_v46 = vrot.slane %v7496_v49, 2 }
 0x1c6   : > { %7487 = vst [vmem:[#allocation75_spill] sm:$0xff] %v6458_v40  ;;  %v1952_v47 = vpop.f32.mrb[34].mxu0  ;;  %v2602_v14 = vpop.f32.mrb[34].mxu1  ;;  %v6471_v27 = vrot.slane %v7490_v25, 2  ;;  %v2896_v31 = vcombine.high %v2599_v39, %v2599_v39  ;;  %v6477_v57 = vrot.slane %v2599_v39, %v5878_v38 }
 0x1c7   : > { %7489 = vst [vmem:[#allocation77_spill] sm:$0xff] %v6467_v24  ;;  %v1954_v12 = vpop.f32.mrb[35].mxu0  ;;  %v2604_v4 = vpop.f32.mrb[35].mxu1  ;;  %v6485_v25 = vrot.slane %v2243_v37, %v5878_v38  ;;  %7497 = vst [vmem:[#allocation83_spill] sm:$0xff] %v6503_v46  ;;  %v6515_v21 = vrot.slane %v1952_v47, %v5878_v38  ;;  %v2913_v33 = vcombine.high %v2602_v14, %v2602_v14 }
 0x1c8   : > { %7491 = vst [vmem:[#allocation78_spill] sm:$0xff] %v6471_v27  ;;  %v2895_v27 = vcombine.high %v6474_v6, %v6474_v6  ;;  %v6491_v39 = vrot.slane %v2896_v31, %v5878_v38  ;;  %v2911_v12 = vcombine.high %v6477_v57, %v6477_v57  ;;  %v6495_v4 = vrot.slane %v2894_v48, 7 }
 0x1c9   : > { %7493 = vst [vmem:[#allocation80_spill] sm:$0xff] %v6485_v25  ;;  %v2260_v6 = vcombine.high %v1952_v47, %v1952_v47  ;;  %7499 = vst [vmem:[#allocation85_spill] sm:$0xff] %v6515_v21  ;;  %v7500_v46 = vrot.slane %v6477_v57, 7  ;;  %v6530_v47 = vrot.slane %v2602_v14, %v5878_v38 }
 0x1ca   : > { %7494 = vst [vmem:[#allocation81_spill] sm:$0xff] %v6491_v39  ;;  %7495 = vst [vmem:[#allocation82_spill] sm:$0xff] %v6495_v4  ;;  %v2912_v31 = vcombine.high %v6491_v39, %v6491_v39  ;;  %v6507_v40 = vrot.slane %v2911_v12, 7  ;;  %v6510_v48 = vrot.slane %v2895_v27, 9  ;;  %v7501_v51 = vrot.slane %v6491_v39, 7 }
 0x1cb   : > { %v6520_v0 = vrot.slane %v7500_v46, 2  ;;  %7503 = vst [vmem:[#allocation87_spill] sm:$0xff] %v6530_v47  ;;  %v6535_v46 = vrot.slane %v2260_v6, %v5878_v38  ;;  %v2928_v6 = vcombine.high %v6530_v47, %v6530_v47  ;;  %v7508_v39 = vrot.slane %v6290_v42, 7 }
 0x1cc   : > { %7498 = vst [vmem:[#allocation84_spill] sm:$0xff] %v6510_v48  ;;  %v3396_v37 = vpop.f32.mrb[36].mxu0  ;;  %v3436_v24 = vpop.f32.mrb[36].mxu1  ;;  %v6522_v12 = vrot.slane %v2912_v31, 7  ;;  %v6527_v25 = vrot.slane %v7501_v51, 2  ;;  %v6538_v31 = vrot.slane %v2913_v33, %v5878_v38  ;;  %v7507_v51 = vrot.slane %v6296_v36, 2 }
 0x1cd   : > { %v3398_v27 = vpop.f32.mrb[37].mxu0  ;;  %v3438_v48 = vpop.f32.mrb[37].mxu1  ;;  %v3485_v17 = vcombine.high %v3396_v37, %v3396_v37  ;;  %7504 = vst [vmem:[#allocation88_spill] sm:$0xff] %v6535_v46  ;;  %v7391_v33 = vrot.slane %v6530_v47, 7 }
 0x1ce   : > { %7502 = vst [vmem:[#allocation86_spill] sm:$0xff] %v6527_v25  ;;  %v3399_v49 = vpop.f32.mrb[38].mxu0  ;;  %v6532_v4 = vpop.f32.mrb[38].mxu1  ;;  %7505 = vst [vmem:[#allocation89_spill] sm:$0xff] %v6538_v31  ;;  %v3492_v48 = vrot.slane %v3396_v37, %v5878_v38  ;;  %v7506_v27 = vrot.slane %v6277_v3, 7  ;;  %v6572_v3 = vrot.slane %v2928_v6, 7 }
 0x1cf   : > { %v3401_v44 = vpop.f32.mrb[39].mxu0  ;;  %v3441_v25 = vpop.f32.mrb[39].mxu1  ;;  %v3499_v46 = vrot.slane %v3485_v17, %v5878_v38  ;;  %v7509_v17 = vrot.slane %v6308_v29, 2  ;;  %v7511_v42 = vrot.slane %v6538_v31, 7 }
 0x1d0   : > { %v3049_v14 = vsel %vm5924_vm7, %v7507_v51, %v7506_v27  ;;  %v3500_v36 = vcombine.high %v3492_v48, %v3492_v48  ;;  %v3052_v44 = vsel %vm5924_vm7, %v6320_v61, %v6308_v29  ;;  %v2929_v25 = vcombine.high %v6538_v31, %v6538_v31 }
 0x1d1   : > { %v3501_v27 = vcombine.high %v3499_v46, %v3499_v46  ;;  %v3852_v51 = vadd.f32 %v3499_v46, %v6083_v62  ;;  %v3055_v37 = vsel %vm5924_vm7, %v7509_v17, %v7508_v39  ;;  %v6570_v48 = vrot.slane %v7391_v33, 2 }
 0x1d2   : > { %v3851_v61 = vadd.f32 %v3500_v36, %v6006_v19  ;;  %v3058_v62 = vsel %vm5924_vm7, %v6331_v56, %v6322_v52  ;;  %v6581_v29 = vrot.slane %v7511_v42, 2  ;;  %v7513_v17 = vcombine.high %v6250_v32, %v6250_v32 }
 0x1d3   : > { %7510 = vst [vmem:[#allocation90_spill] sm:$0xff] %v6570_v48  ;;  %v3853_v46 = vadd.f32 %v3501_v27, %v6091_v18  ;;  %v3943_v39 = vadd.f32 %v5903_v50, %v3852_v51  ;;  %v3237_v56 = vadd.f32 %v3052_v44, %v6270_v26  ;;  %v7514_v42 = vcombine.high %v6270_v26, %v6270_v26 }
 0x1d4   : > { %7512 = vst [vmem:[#allocation91_spill] sm:$0xff] %v6581_v29  ;;  %v3236_v6 = vadd.f32 %v3049_v14, %v7513_v17  ;;  %v6588_v33 = vpop.f32.mrb[40].mxu0  ;;  %v6590_v19 = vpop.f32.mrb[40].mxu1  ;;  %v3942_v36 = vadd.f32 %v5881_v8, %v3851_v61  ;;  %v3239_v18 = vadd.f32 %v3058_v62, %v6285_v63  ;;  %v3653_v17 = vcombine.high %v3436_v24, %v3436_v24 }
 0x1d5   : > { %v3238_v21 = vadd.f32 %v3055_v37, %v7514_v42  ;;  %v3406_v27 = vpop.f32.mrb[41].mxu0  ;;  %v3446_v51 = vpop.f32.mrb[41].mxu1  ;;  %v3944_v32 = vadd.f32 %v5888_v30, %v3853_v46  ;;  %v4007_v14 = vmax.f32 %v3943_v39, 0.0  ;;  %v3660_v29 = vrot.slane %v3436_v24, %v5878_v38 }
 0x1d6   : > { %v6601_v61 = vpop.f32.mrb[42].mxu0  ;;  %v6603_v44 = vpop.f32.mrb[42].mxu1  ;;  %v4006_v31 = vmax.f32 %v3942_v36, 0.0  ;;  %v3502_v26 = vcombine.high %v3399_v49, %v3399_v49  ;;  %v3509_v37 = vrot.slane %v3399_v49, %v5878_v38  ;;  %v7515_v62 = vrot.slane %v6325_v5, 7 }
 0x1d7   : > { %v7516_v42 = vrot.slane %v6322_v52, 2  ;;  %v3409_v39 = vpop.f32.mrb[43].mxu0  ;;  %v3449_v27 = vpop.f32.mrb[43].mxu1  ;;  %v6612_v51 = vrot.slane %v2929_v25, 7  ;;  %v3667_v24 = vrot.slane %v3653_v17, %v5878_v38  ;;  %v3668_v48 = vcombine.high %v3660_v29, %v3660_v29 }
 0x1d8   : > { %v6615_v47 = vadd.f32 %v3660_v29, %v3236_v6  ;;  %v6617_v36 = vcombine.low %v4006_v31, %v4007_v14  ;;  %v3516_v5 = vrot.slane %v3502_v26, %v5878_v38  ;;  %v3517_v52 = vcombine.high %v3509_v37, %v3509_v37 }
 0x1d9   : > { %v3061_v46 = vsel %vm5924_vm7, %v7516_v42, %v7515_v62  ;;  %v3854_v49 = vadd.f32 %v3509_v37, %v6144_v55  ;;  %v3669_v62 = vcombine.high %v3667_v24, %v3667_v24  ;;  %v3887_v42 = vadd.f32 %v3668_v48, %v3237_v56 }
 0x1da   : > { %v3888_v17 = vadd.f32 %v3667_v24, %v3238_v21  ;;  %v3518_v39 = vcombine.high %v3516_v5, %v3516_v5  ;;  %v3855_v29 = vadd.f32 %v3517_v52, %v6186_v28  ;;  %v3856_v31 = vadd.f32 %v3516_v5, %v6195_v13 }
 0x1db   : > { %v4008_v6 = vmax.f32 %v3944_v32, 0.0  ;;  %v4142_v14 = vrot.slane %v6617_v36, %v5878_v38  ;;  %v3889_v26 = vadd.f32 %v3669_v62, %v3239_v18  ;;  %v3978_v27 = vadd.f32 %v5881_v8, %v3887_v42 }
 0x1dc   : > { %v3979_v55 = vadd.f32 %v5903_v50, %v3888_v17  ;;  %v6633_v37 = vpop.f32.mrb[44].mxu0  ;;  %v6635_v25 = vpop.f32.mrb[44].mxu1  ;;  %v3857_v21 = vadd.f32 %v3518_v39, %v6198_v1  ;;  %v3945_v28 = vadd.f32 %v5910_v53, %v3854_v49  ;;  %v3946_v13 = vadd.f32 %v5881_v8, %v3855_v29 }
 0x1dd   : > { %v3947_v32 = vadd.f32 %v5903_v50, %v3856_v31  ;;  %v3414_v48 = vpop.f32.mrb[45].mxu0  ;;  %v3454_v56 = vpop.f32.mrb[45].mxu1  ;;  %v6644_v18 = vadd.f32 %v5888_v30, %v3889_v26  ;;  %v4042_v24 = vmax.f32 %v3978_v27, 0.0  ;;  %v7517_v5 = vrot.slane %v6338_v23, 7 }
 0x1de   : > { %v4043_v36 = vmax.f32 %v3979_v55, 0.0  ;;  %v6651_v52 = vpop.f32.mrb[46].mxu0  ;;  %v6653_v49 = vpop.f32.mrb[46].mxu1  ;;  %v6656_v62 = vadd.f32 %v5888_v30, %v3857_v21  ;;  %v4009_v42 = vmax.f32 %v3945_v28, 0.0  ;;  %v4010_v17 = vmax.f32 %v3946_v13, 0.0 }
 0x1df   : > { %v3065_v1 = vsel %vm5924_vm7, %v6360_v58, %v7517_v5  ;;  %v4011_v39 = vmax.f32 %v3947_v32, 0.0  ;;  %v3417_v29 = vpop.f32.mrb[47].mxu0  ;;  %v3457_v31 = vpop.f32.mrb[47].mxu1  ;;  %v3068_v23 = vsel %vm5924_vm7, %v6384_v10, %v6367_v54  ;;  %v7518_v58 = vcombine.high %v6285_v63, %v6285_v63 }
 0x1e0   : > { %v6658_v26 = vcombine.low %v4042_v24, %v4043_v36  ;;  %v7519_v55 = vcombine.high %v6313_v35, %v6313_v35  ;;  %v4135_v28 = vcombine.low %v4008_v6, %v4009_v42  ;;  %v3242_v32 = vadd.f32 %v3068_v23, %v6316_v34 }
 0x1e1   : > { %v3240_v27 = vadd.f32 %v3061_v46, %v7518_v58  ;;  %v6672_v13 = vcombine.low %v4010_v17, %v4011_v39  ;;  %v3670_v48 = vcombine.high %v6532_v4, %v6532_v4  ;;  %v3677_v10 = vrot.slane %v6532_v4, %v5878_v38 }
 0x1e2   : > { %v3241_v21 = vadd.f32 %v3065_v1, %v7519_v55  ;;  %v4295_v56 = vrot.slane %v6658_v26, %v5878_v38  ;;  %v4044_v63 = vmax.f32 %v6644_v18, 0.0  ;;  %v7520_v46 = vrot.slane %v5959_v43, 7 }
 0x1e3   : > { %v7521_v35 = vrot.slane %v5949_v15, 2  ;;  %v4149_v24 = vrot.slane %v4135_v28, %v5878_v38  ;;  %v4159_v36 = vrot.slane %v6672_v13, %v5878_v38  ;;  %v3684_v5 = vrot.slane %v3670_v48, %v5878_v38 }
 0x1e4   : > { %v7522_v1 = vrot.slane %v5979_v11, 7  ;;  %v3890_v43 = vadd.f32 %v3677_v10, %v3240_v27  ;;  %v2968_v15 = vsel %vm5924_vm7, %v6026_v60, %v6008_v45  ;;  %v7523_v18 = vcombine.high %v5915_v16, %v5915_v16  ;;  %v6708_v29 = vpop.f32.mrb[48].mxu0  ;;  %v6710_v11 = vpop.f32.mrb[48].mxu1 }
 0x1e5   : > { %v2961_v6 = vsel %vm5924_vm7, %v7521_v35, %v7520_v46  ;;  %v7524_v17 = vcombine.high %v5956_v20, %v5956_v20  ;;  %v4150_v31 = vcombine.low %v4142_v14, %v4149_v24  ;;  %v3891_v26 = vadd.f32 %v3684_v5, %v3241_v21  ;;  %v3422_v58 = vpop.f32.mrb[49].mxu0  ;;  %v3462_v27 = vpop.f32.mrb[49].mxu1 }
 0x1e6   : > { %v2965_v4 = vsel %vm5924_vm7, %v6000_v59, %v7522_v1  ;;  %v3208_v42 = vadd.f32 %v2961_v6, %v7523_v18  ;;  %v3685_v59 = vcombine.high %v3684_v5, %v3684_v5  ;;  %v3210_v23 = vadd.f32 %v2968_v15, %v5974_v7  ;;  %v6724_v55 = vpop.f32.mrb[50].mxu0  ;;  %v6726_v21 = vpop.f32.mrb[50].mxu1 }
 0x1e7   : > { %v3209_v39 = vadd.f32 %v2965_v4, %v7524_v17  ;;  %v3981_v16 = vadd.f32 %v5910_v53, %v3890_v43  ;;  %v3519_v20 = vcombine.high %v6588_v33, %v6588_v33  ;;  %v3526_v60 = vrot.slane %v6588_v33, %v5878_v38  ;;  %v3425_v24 = vpop.f32.mrb[51].mxu0  ;;  %v3465_v5 = vpop.f32.mrb[51].mxu1  ;;  %v7530_v17 = vld [vmem:[#allocation61_spill] sm:$0xff] }
 0x1e8   : > { %v4012_v14 = vmax.f32 %v6656_v62, 0.0  ;;  %v4857_v28 = vpack.c.bf16 %v4150_v31, %v4150_v31  ;;  %v3892_v48 = vadd.f32 %v3685_v59, %v3242_v32  ;;  %v3982_v10 = vadd.f32 %v5881_v8, %v3891_v26  ;;  %v7531_v31 = vld [vmem:[#allocation63_spill] sm:$0xff]  ;;  %v7535_v5 = vld [vmem:[#allocation57_spill] sm:$0xff] }
 0x1e9   : > { %v7525_v46 = vrot.slane %v6351_v41, 7  ;;  %v7526_v35 = vrot.slane %v6367_v54, 2  ;;  %v4045_v33 = vmax.f32 %v3981_v16, 0.0  ;;  %v3533_v62 = vrot.slane %v3519_v20, %v5878_v38  ;;  %v7527_v54 = vld [vmem:[#allocation58_spill] sm:$0xff] }
 0x1ea   : > { %v3858_v1 = vadd.f32 %v3526_v60, %v3208_v42  ;;  %v3074_v32 = vsel %vm5924_vm7, %v6394_v2, %v6376_v9  ;;  %4487 = vst.msk [vmem:[%s6716_s30] sm:$0xf] %vm4486_vm8, %v4857_v28  ;;  %v3983_v41 = vadd.f32 %v5903_v50, %v3892_v48  ;;  %v4046_v4 = vmax.f32 %v3982_v10, 0.0  ;;  %v7533_v60 = vld [vmem:[#allocation56_spill] sm:$0xff] }
 0x1eb   : > { %v3071_v6 = vsel %vm5924_vm7, %v7526_v35, %v7525_v46  ;;  %v7528_v43 = vrot.slane %v7527_v54, 7  ;;  %v7529_v15 = vrot.slane %v6376_v9, 2  ;;  %v3080_v42 = vsel %vm5924_vm7, %v7531_v31, %v7530_v17 }
 0x1ec   : > { %v4288_v59 = vcombine.low %v4044_v63, %v4045_v33  ;;  %v3534_v26 = vcombine.high %v3533_v62, %v3533_v62  ;;  %v3859_v2 = vadd.f32 %v3533_v62, %v3209_v39  ;;  %v3949_v58 = vadd.f32 %v5910_v53, %v3858_v1  ;;  %v6763_v39 = vpop.f32.mrb[52].mxu0 }
 0x1ed   : > { %v3077_v18 = vsel %vm5924_vm7, %v7529_v15, %v7528_v43  ;;  %v4047_v27 = vmax.f32 %v3983_v41, 0.0  ;;  %v7532_v16 = vcombine.high %v6316_v34, %v6316_v34  ;;  %v3244_v9 = vadd.f32 %v3074_v32, %v7533_v60  ;;  %v3430_v62 = vpop.f32.mrb[53].mxu0 }
 0x1ee   : > { %v7534_v28 = vcombine.high %v7533_v60, %v7533_v60  ;;  %v4302_v10 = vrot.slane %v4288_v59, %v5878_v38  ;;  %v3860_v46 = vadd.f32 %v3534_v26, %v3210_v23  ;;  %v3950_v63 = vadd.f32 %v5881_v8, %v3859_v2  ;;  %v6771_v54 = vpop.f32.mrb[54].mxu0  ;;  %v7536_v26 = vld [vmem:[#allocation4_spill] sm:$0xff] }
 0x1ef   : > { %v3243_v20 = vadd.f32 %v3071_v6, %v7532_v16  ;;  %v4013_v35 = vmax.f32 %v3949_v58, 0.0  ;;  %v4304_v24 = vcombine.low %v4046_v4, %v4047_v27  ;;  %v3246_v33 = vadd.f32 %v3080_v42, %v7535_v5  ;;  %v3433_v31 = vpop.f32.mrb[55].mxu0 }
 0x1f0   : > { %v3245_v48 = vadd.f32 %v3077_v18, %v7534_v28  ;;  %v3686_v34 = vcombine.high %v6590_v19, %v6590_v19  ;;  %v3693_v6 = vrot.slane %v6590_v19, %v5878_v38  ;;  %v4303_v1 = vcombine.low %v4295_v56, %v4302_v10  ;;  %v7539_v10 = vld [vmem:[#allocation7_spill] sm:$0xff]  ;;  %v7547_v31 = vld [vmem:[#allocation2_spill] sm:$0xff] }
 0x1f1   : > { %v3951_v32 = vadd.f32 %v5903_v50, %v3860_v46  ;;  %v4014_v41 = vmax.f32 %v3950_v63, 0.0  ;;  %v4152_v23 = vcombine.low %v4012_v14, %v4013_v35  ;;  %v4312_v43 = vrot.slane %v4304_v24, %v5878_v38  ;;  %v7540_v46 = vld [vmem:[#allocation11_spill] sm:$0xff]  ;;  %v7541_v63 = vld [vmem:[#allocation5_spill] sm:$0xff] }
 0x1f2   : > { %v3700_v4 = vrot.slane %v3686_v34, %v5878_v38  ;;  %v3701_v15 = vcombine.high %v3693_v6, %v3693_v6  ;;  %v3893_v18 = vadd.f32 %v3693_v6, %v3243_v20  ;;  %v4866_v42 = vpack.c.bf16 %v4303_v1, %v4303_v1  ;;  %v7544_v1 = vld [vmem:[#allocation8_spill] sm:$0xff] }
 0x1f3   : > { %v4015_v59 = vmax.f32 %v3951_v32, 0.0  ;;  %v4166_v19 = vrot.slane %v4152_v23, %v5878_v38  ;;  %v7537_v56 = vrot.slane %v7536_v26, 7  ;;  %v7538_v2 = vrot.slane %v6008_v45, 2  ;;  %v7545_v32 = vld [vmem:[#allocation14_spill] sm:$0xff]  ;;  %v7549_v26 = vld [vmem:[#allocation3_spill] sm:$0xff] }
 0x1f4   : > { %v3702_v58 = vcombine.high %v3700_v4, %v3700_v4  ;;  %v3894_v27 = vadd.f32 %v3701_v15, %v3244_v9  ;;  %v3895_v16 = vadd.f32 %v3700_v4, %v3245_v48  ;;  %v3984_v60 = vadd.f32 %v5888_v30, %v3893_v18  ;;  %4496 = vst.msk [vmem:[%s6716_s30 + $0x24] sm:$0xf] %vm4486_vm8, %v4866_v42 }
 0x1f5   : > { %v2971_v14 = vsel %vm5924_vm7, %v7538_v2, %v7537_v56  ;;  %v4167_v20 = vcombine.low %v4159_v36, %v4166_v19  ;;  %v6788_v28 = vcombine.low %v4014_v41, %v4015_v59  ;;  %v2974_v45 = vsel %vm5924_vm7, %v7540_v46, %v7539_v10  ;;  %v7554_v46 = vld [vmem:[#allocation65_spill] sm:$0xff] }
 0x1f6   : > { %v7542_v35 = vrot.slane %v7541_v63, 7  ;;  %v7543_v9 = vrot.slane %v7539_v10, 2  ;;  %v3896_v24 = vadd.f32 %v3702_v58, %v3246_v33  ;;  %v3985_v34 = vadd.f32 %v5910_v53, %v3894_v27  ;;  %v7550_v27 = vld [vmem:[#allocation60_spill] sm:$0xff]  ;;  %v7553_v10 = vld [vmem:[#allocation67_spill] sm:$0xff] }
 0x1f7   : > { %v3986_v13 = vadd.f32 %v5881_v8, %v3895_v16  ;;  %v4048_v36 = vmax.f32 %v3984_v60, 0.0  ;;  %v4176_v6 = vrot.slane %v6788_v28, %v5878_v38  ;;  %v4858_v62 = vpack.c.bf16 %v4167_v20, %v4167_v20  ;;  %v7579_v28 = vld [vmem:[#allocation69_spill] sm:$0xff] }
 0x1f8   : > { %v2977_v48 = vsel %vm5924_vm7, %v7543_v9, %v7542_v35  ;;  %v2980_v41 = vsel %vm5924_vm7, %v7545_v32, %v7544_v1  ;;  %v7546_v23 = vcombine.high %v5974_v7, %v5974_v7  ;;  %v3987_v33 = vadd.f32 %v5903_v50, %v3896_v24  ;;  %v7559_v32 = vld [vmem:[#allocation55_spill] sm:$0xff] }
 0x1f9   : > { %v4049_v15 = vmax.f32 %v3985_v34, 0.0  ;;  %v4050_v18 = vmax.f32 %v3986_v13, 0.0  ;;  %v3212_v42 = vadd.f32 %v2974_v45, %v7547_v31  ;;  %4488 = vst.msk [vmem:[%s6716_s30 + $0x4] sm:$0xf] %vm4486_vm8, %v4858_v62  ;;  %v7548_v59 = vcombine.high %v7547_v31, %v7547_v31 }
 0x1fa   : > { %v3211_v4 = vadd.f32 %v2971_v14, %v7546_v23  ;;  %v3214_v56 = vadd.f32 %v2980_v41, %v7549_v26  ;;  %v3535_v2 = vcombine.high %v6601_v61, %v6601_v61  ;;  %v3542_v7 = vrot.slane %v6601_v61, %v5878_v38  ;;  %v7556_v61 = vld [vmem:[#allocation62_spill] sm:$0xff] }
 0x1fb   : > { %v3213_v19 = vadd.f32 %v2977_v48, %v7548_v59  ;;  %v4051_v14 = vmax.f32 %v3987_v33, 0.0  ;;  %v4305_v58 = vcombine.low %v4048_v36, %v4049_v15  ;;  %v7551_v16 = vrot.slane %v7550_v27, 7  ;;  %v7555_v48 = vld [vmem:[#allocation70_spill] sm:$0xff] }
 0x1fc   : > { %v7552_v60 = vrot.slane %v7530_v17, 2  ;;  %v3086_v45 = vsel %vm5924_vm7, %v7554_v46, %v7553_v10  ;;  %v3549_v63 = vrot.slane %v3535_v2, %v5878_v38  ;;  %v3550_v35 = vcombine.high %v3542_v7, %v3542_v7 }
 0x1fd   : > { %v3861_v9 = vadd.f32 %v3542_v7, %v3211_v4  ;;  %v7557_v24 = vrot.slane %v7556_v61, 9  ;;  %v4319_v17 = vrot.slane %v4305_v58, %v5878_v38  ;;  %v6840_v13 = vcombine.low %v4050_v18, %v4051_v14  ;;  %v7561_v18 = vld [vmem:[#allocation59_spill] sm:$0xff] }
 0x1fe   : > { %v3083_v20 = vsel %vm5924_vm7, %v7552_v60, %v7551_v16  ;;  %v7558_v36 = vcombine.high %v7535_v5, %v7535_v5  ;;  %v7560_v41 = vrot.slane %v7559_v32, %v5878_v38  ;;  %v3551_v33 = vcombine.high %v3549_v63, %v3549_v63  ;;  %v7562_v60 = vld [vmem:[#allocation10_spill] sm:$0xff] }
 0x1ff   : > { %v3090_v34 = vsel %vm5924_vm7, %v7557_v24, %v7555_v48  ;;  %v3862_v4 = vadd.f32 %v3550_v35, %v3212_v42  ;;  %v3863_v15 = vadd.f32 %v3549_v63, %v3213_v19  ;;  %v3952_v31 = vadd.f32 %v5888_v30, %v3861_v9  ;;  %v7565_v35 = vld [vmem:[#allocation20_spill] sm:$0xff]  ;;  %v7566_v9 = vld [vmem:[#allocation17_spill] sm:$0xff] }
 0x200   : > { %v3247_v62 = vadd.f32 %v3083_v20, %v7558_v36  ;;  %v3248_v23 = vadd.f32 %v3086_v45, %v7560_v41  ;;  %v4320_v59 = vcombine.low %v4312_v43, %v4319_v17  ;;  %v4329_v2 = vrot.slane %v6840_v13, %v5878_v38  ;;  %v7567_v17 = vld [vmem:[#allocation18_spill] sm:$0xff]  ;;  %v7568_v36 = vld [vmem:[#allocation12_spill] sm:$0xff] }
 0x201   : > { %v3249_v7 = vadd.f32 %v3090_v34, %v7561_v18  ;;  %v3703_v5 = vcombine.high %v6603_v44, %v6603_v44  ;;  %v3864_v14 = vadd.f32 %v3551_v33, %v3214_v56  ;;  %v3953_v58 = vadd.f32 %v5910_v53, %v3862_v4 }
 0x202   : > { %v3954_v27 = vadd.f32 %v5881_v8, %v3863_v15  ;;  %v4016_v16 = vmax.f32 %v3952_v31, 0.0  ;;  %v4867_v42 = vpack.c.bf16 %v4320_v59, %v4320_v59  ;;  %v3710_v19 = vrot.slane %v6603_v44, %v5878_v38  ;;  %v7571_v31 = vld [vmem:[#allocation6_spill] sm:$0xff] }
 0x203   : > { %v3717_v43 = vrot.slane %v3703_v5, %v5878_v38  ;;  %v7563_v20 = vrot.slane %v7562_v60, 7  ;;  %v7564_v10 = vrot.slane %v7544_v1, 2  ;;  %v3955_v56 = vadd.f32 %v5903_v50, %v3864_v14 }
 0x204   : > { %v4017_v45 = vmax.f32 %v3953_v58, 0.0  ;;  %v4018_v63 = vmax.f32 %v3954_v27, 0.0  ;;  %v2986_v61 = vsel %vm5924_vm7, %v7566_v9, %v7565_v35  ;;  %4497 = vst.msk [vmem:[%s6716_s30 + $0x28] sm:$0xf] %vm4486_vm8, %v4867_v42  ;;  %v3718_v44 = vcombine.high %v3710_v19, %v3710_v19  ;;  %v7573_v27 = vld [vmem:[#allocation9_spill] sm:$0xff] }
 0x205   : > { %v2983_v46 = vsel %vm5924_vm7, %v7564_v10, %v7563_v20  ;;  %v3719_v24 = vcombine.high %v3717_v43, %v3717_v43  ;;  %v3897_v34 = vadd.f32 %v3710_v19, %v3247_v62  ;;  %v7569_v1 = vrot.slane %v7568_v36, 9 }
 0x206   : > { %v4019_v41 = vmax.f32 %v3955_v56, 0.0  ;;  %v4169_v33 = vcombine.low %v4016_v16, %v4017_v45  ;;  %v7570_v4 = vcombine.high %v7549_v26, %v7549_v26  ;;  %v7572_v59 = vrot.slane %v7571_v31, %v5878_v38 }
 0x207   : > { %v2990_v32 = vsel %vm5924_vm7, %v7569_v1, %v7567_v17  ;;  %v3898_v14 = vadd.f32 %v3718_v44, %v3248_v23  ;;  %v3899_v58 = vadd.f32 %v3719_v24, %v3249_v7  ;;  %v3988_v62 = vadd.f32 %v5888_v30, %v3897_v34  ;;  %v7574_v7 = vld [vmem:[#allocation64_spill] sm:$0xff]  ;;  %v7578_v34 = vld [vmem:[#allocation74_spill] sm:$0xff] }
 0x208   : > { %v3215_v15 = vadd.f32 %v2983_v46, %v7570_v4  ;;  %v3216_v5 = vadd.f32 %v2986_v61, %v7572_v59  ;;  %v3217_v42 = vadd.f32 %v2990_v32, %v7573_v27  ;;  %v4183_v19 = vrot.slane %v4169_v33, %v5878_v38  ;;  %v7577_v24 = vld [vmem:[#allocation72_spill] sm:$0xff]  ;;  %v7582_v59 = vld [vmem:[#allocation75_spill] sm:$0xff] }
 0x209   : > { %v4185_v43 = vcombine.low %v4018_v63, %v4019_v41  ;;  %v3552_v16 = vcombine.high %v6633_v37, %v6633_v37  ;;  %v3559_v26 = vrot.slane %v6633_v37, %v5878_v38  ;;  %v3989_v60 = vadd.f32 %v5910_v53, %v3898_v14 }
 0x20a   : > { %v6892_v20 = vadd.f32 %v5881_v8, %v3899_v58  ;;  %v4052_v23 = vmax.f32 %v3988_v62, 0.0  ;;  %v7575_v10 = vrot.slane %v7574_v7, 7  ;;  %v7576_v46 = vrot.slane %v7555_v48, 2  ;;  %v7587_v7 = vld [vmem:[#allocation68_spill] sm:$0xff] }
 0x20b   : > { %v4184_v45 = vcombine.low %v4176_v6, %v4183_v19  ;;  %v4193_v37 = vrot.slane %v4185_v43, %v5878_v38  ;;  %v3566_v63 = vrot.slane %v3552_v16, %v5878_v38  ;;  %v3567_v35 = vcombine.high %v3559_v26, %v3559_v26  ;;  %v7585_v43 = vld [vmem:[#allocation66_spill] sm:$0xff] }
 0x20c   : > { %v3093_v56 = vsel %vm5924_vm7, %v7576_v46, %v7575_v10  ;;  %v4053_v9 = vmax.f32 %v3989_v60, 0.0  ;;  %v4054_v61 = vmax.f32 %v6892_v20, 0.0  ;;  %v3865_v44 = vadd.f32 %v3559_v26, %v3215_v15  ;;  %v7583_v15 = vld [vmem:[#allocation78_spill] sm:$0xff] }
 0x20d   : > { %v3096_v48 = vsel %vm5924_vm7, %v7578_v34, %v7577_v24  ;;  %v4859_v36 = vpack.c.bf16 %v4184_v45, %v4184_v45  ;;  %v3568_v1 = vcombine.high %v3566_v63, %v3566_v63  ;;  %v3866_v32 = vadd.f32 %v3567_v35, %v3216_v5  ;;  %v7588_v45 = vld [vmem:[#allocation16_spill] sm:$0xff]  ;;  %v7591_v34 = vld [vmem:[#allocation21_spill] sm:$0xff] }
 0x20e   : > { %v7580_v6 = vrot.slane %v7579_v28, 7  ;;  %v7581_v41 = vrot.slane %v7577_v24, 2  ;;  %v4322_v4 = vcombine.low %v4052_v23, %v4053_v9  ;;  %v3956_v31 = vadd.f32 %v5888_v30, %v3865_v44 }
 0x20f   : > { %v3102_v14 = vsel %vm5924_vm7, %v7583_v15, %v7582_v59  ;;  %v7584_v58 = vcombine.high %v7561_v18, %v7561_v18  ;;  %4489 = vst.msk [vmem:[%s6716_s30 + $0x8] sm:$0xf] %vm4486_vm8, %v4859_v36  ;;  %v3867_v5 = vadd.f32 %v3568_v1, %v3217_v42  ;;  %v3957_v19 = vadd.f32 %v5910_v53, %v3866_v32  ;;  %v7597_v15 = vld [vmem:[#allocation28_spill] sm:$0xff] }
 0x210   : > { %v3099_v33 = vsel %vm5924_vm7, %v7581_v41, %v7580_v6  ;;  %v3251_v16 = vadd.f32 %v3096_v48, %v7585_v43  ;;  %v7586_v26 = vcombine.high %v7585_v43, %v7585_v43  ;;  %v4336_v20 = vrot.slane %v4322_v4, %v5878_v38  ;;  %v7592_v48 = vld [vmem:[#allocation24_spill] sm:$0xff] }
 0x211   : > { %v3250_v62 = vadd.f32 %v3093_v56, %v7584_v58  ;;  %v4020_v23 = vmax.f32 %v3956_v31, 0.0  ;;  %v3253_v10 = vadd.f32 %v3102_v14, %v7587_v7  ;;  %v3720_v18 = vcombine.high %v6635_v25, %v6635_v25  ;;  %v7596_v31 = vld [vmem:[#allocation25_spill] sm:$0xff] }
 0x212   : > { %v3252_v60 = vadd.f32 %v3099_v33, %v7586_v26  ;;  %v6936_v46 = vadd.f32 %v5881_v8, %v3867_v5  ;;  %v4021_v42 = vmax.f32 %v3957_v19, 0.0  ;;  %v3727_v56 = vrot.slane %v6635_v25, %v5878_v38  ;;  %v7593_v25 = vld [vmem:[#allocation19_spill] sm:$0xff] }
 0x213   : > { %v7589_v63 = vrot.slane %v7588_v45, 7  ;;  %v7590_v35 = vrot.slane %v7567_v17, 2  ;;  %v4337_v44 = vcombine.low %v4329_v2, %v4336_v20  ;;  %v3734_v24 = vrot.slane %v3720_v18, %v5878_v38  ;;  %v7601_v45 = vld [vmem:[#allocation15_spill] sm:$0xff] }
 0x214   : > { %v2996_v36 = vsel %vm5924_vm7, %v7592_v48, %v7591_v34  ;;  %v7594_v1 = vrot.slane %v7593_v25, 7  ;;  %v7595_v32 = vrot.slane %v7591_v34, 2  ;;  %v4022_v28 = vmax.f32 %v6936_v46, 0.0 }
 0x215   : > { %v2993_v9 = vsel %vm5924_vm7, %v7590_v35, %v7589_v63  ;;  %v4186_v6 = vcombine.low %v4020_v23, %v4021_v42  ;;  %v3735_v13 = vcombine.high %v3727_v56, %v3727_v56  ;;  %v3900_v2 = vadd.f32 %v3727_v56, %v3250_v62 }
 0x216   : > { %v2999_v17 = vsel %vm5924_vm7, %v7595_v32, %v7594_v1  ;;  %v4868_v41 = vpack.c.bf16 %v4337_v44, %v4337_v44  ;;  %v3736_v33 = vcombine.high %v3734_v24, %v3734_v24  ;;  %v3902_v4 = vadd.f32 %v3734_v24, %v3252_v60  ;;  %v7599_v60 = vld [vmem:[#allocation13_spill] sm:$0xff] }
 0x217   : > { %v3002_v14 = vsel %vm5924_vm7, %v7597_v15, %v7596_v31  ;;  %v4200_v58 = vrot.slane %v4186_v6, %v5878_v38  ;;  %v3901_v5 = vadd.f32 %v3735_v13, %v3251_v16  ;;  %v3991_v19 = vadd.f32 %v5903_v50, %v3900_v2  ;;  %v7605_v6 = vld [vmem:[#allocation82_spill] sm:$0xff]  ;;  %v7606_v13 = vld [vmem:[#allocation83_spill] sm:$0xff] }
 0x218   : > { %v7598_v43 = vcombine.high %v7573_v27, %v7573_v27  ;;  %4498 = vst.msk [vmem:[%s6716_s30 + $0x2c] sm:$0xf] %vm4486_vm8, %v4868_v41  ;;  %v3903_v62 = vadd.f32 %v3736_v33, %v3253_v10  ;;  %v3993_v20 = vadd.f32 %v5910_v53, %v3902_v4  ;;  %v3219_v23 = vadd.f32 %v2996_v36, %v7599_v60  ;;  %v7607_v41 = vld [vmem:[#allocation79_spill] sm:$0xff] }
 0x219   : > { %v7600_v18 = vcombine.high %v7599_v60, %v7599_v60  ;;  %v4201_v42 = vcombine.low %v4193_v37, %v4200_v58  ;;  %v3992_v16 = vadd.f32 %v5888_v30, %v3901_v5  ;;  %v4055_v56 = vmax.f32 %v3991_v19, 0.0  ;;  %v7602_v37 = vld [vmem:[#allocation76_spill] sm:$0xff] }
 0x21a   : > { %v3218_v26 = vadd.f32 %v2993_v9, %v7598_v43  ;;  %v3221_v63 = vadd.f32 %v3002_v14, %v7601_v45  ;;  %v6980_v27 = vadd.f32 %v5881_v8, %v3903_v62  ;;  %v4057_v35 = vmax.f32 %v3993_v20, 0.0  ;;  %v7611_v62 = vld [vmem:[#allocation71_spill] sm:$0xff] }
 0x21b   : > { %v3220_v46 = vadd.f32 %v2999_v17, %v7600_v18  ;;  %v3569_v10 = vcombine.high %v6651_v52, %v6651_v52  ;;  %v3576_v9 = vrot.slane %v6651_v52, %v5878_v38  ;;  %v4860_v44 = vpack.c.bf16 %v4201_v42, %v4201_v42 }
 0x21c   : > { %v4056_v24 = vmax.f32 %v3992_v16, 0.0  ;;  %v4338_v34 = vcombine.low %v4054_v61, %v4055_v56  ;;  %v7603_v48 = vrot.slane %v7602_v37, 7  ;;  %v7604_v36 = vrot.slane %v7582_v59, 2 }
 0x21d   : > { %v3583_v1 = vrot.slane %v3569_v10, %v5878_v38  ;;  %v3584_v32 = vcombine.high %v3576_v9, %v3576_v9  ;;  %v3868_v17 = vadd.f32 %v3576_v9, %v3218_v26  ;;  %v3108_v2 = vsel %vm5924_vm7, %v7606_v13, %v7605_v6  ;;  %4490 = vst.msk [vmem:[%s6716_s30 + $0xc] sm:$0xf] %vm4486_vm8, %v4860_v44 }
 0x21e   : > { %v3105_v25 = vsel %vm5924_vm7, %v7604_v36, %v7603_v48  ;;  %v4339_v52 = vcombine.low %v4056_v24, %v4057_v35  ;;  %v4346_v61 = vrot.slane %v4338_v34, %v5878_v38  ;;  %v7608_v33 = vrot.slane %v7607_v41, 7 }
 0x21f   : > { %v7609_v59 = vrot.slane %v7605_v6, 2  ;;  %v7610_v15 = vcombine.high %v7587_v7, %v7587_v7  ;;  %v3585_v58 = vcombine.high %v3583_v1, %v3583_v1  ;;  %v3869_v5 = vadd.f32 %v3584_v32, %v3219_v23 }
 0x220   : > { %v3870_v19 = vadd.f32 %v3583_v1, %v3220_v46  ;;  %v3959_v43 = vadd.f32 %v5903_v50, %v3868_v17  ;;  %v4353_v26 = vrot.slane %v4339_v52, %v5878_v38  ;;  %v3255_v20 = vadd.f32 %v3108_v2, %v7611_v62  ;;  %v7613_v17 = vld [vmem:[#allocation23_spill] sm:$0xff] }
 0x221   : > { %v3111_v4 = vsel %vm5924_vm7, %v7609_v59, %v7608_v33  ;;  %v3254_v14 = vadd.f32 %v3105_v25, %v7610_v15  ;;  %v7612_v60 = vcombine.high %v7611_v62, %v7611_v62  ;;  %v3737_v42 = vcombine.high %v6653_v49, %v6653_v49  ;;  %v7617_v2 = vld [vmem:[#allocation31_spill] sm:$0xff] }
 0x222   : > { %v3871_v16 = vadd.f32 %v3585_v58, %v3221_v63  ;;  %v3960_v7 = vadd.f32 %v5888_v30, %v3869_v5  ;;  %v3961_v56 = vadd.f32 %v5910_v53, %v3870_v19  ;;  %v4023_v23 = vmax.f32 %v3959_v43, 0.0  ;;  %v7618_v33 = vld [vmem:[#allocation27_spill] sm:$0xff]  ;;  %v7622_v5 = vld [vmem:[#allocation22_spill] sm:$0xff] }
 0x223   : > { %v3256_v18 = vadd.f32 %v3111_v4, %v7612_v60  ;;  %v4354_v46 = vcombine.low %v4346_v61, %v4353_v26  ;;  %v3744_v35 = vrot.slane %v6653_v49, %v5878_v38  ;;  %v3751_v10 = vrot.slane %v3737_v42, %v5878_v38 }
 0x224   : > { %v4058_v9 = vmax.f32 %v6980_v27, 0.0  ;;  %v3962_v44 = vadd.f32 %v5881_v8, %v3871_v16  ;;  %v4024_v24 = vmax.f32 %v3960_v7, 0.0  ;;  %v4025_v34 = vmax.f32 %v3961_v56, 0.0  ;;  %v7616_v27 = vld [vmem:[#allocation30_spill] sm:$0xff]  ;;  %v7625_v56 = vld [vmem:[#allocation84_spill] sm:$0xff] }
 0x225   : > { %v4202_v37 = vcombine.low %v4022_v28, %v4023_v23  ;;  %v4869_v63 = vpack.c.bf16 %v4354_v46, %v4354_v46  ;;  %v3752_v48 = vcombine.high %v3744_v35, %v3744_v35  ;;  %v3904_v36 = vadd.f32 %v3744_v35, %v3254_v14 }
 0x226   : > { %v3906_v25 = vadd.f32 %v3751_v10, %v3256_v18  ;;  %v4203_v1 = vcombine.low %v4024_v24, %v4025_v34  ;;  %v7614_v6 = vrot.slane %v7613_v17, 7  ;;  %v7615_v49 = vrot.slane %v7596_v31, 2 }
 0x227   : > { %v4210_v32 = vrot.slane %v4202_v37, %v5878_v38  ;;  %v3008_v52 = vsel %vm5924_vm7, %v7617_v2, %v7616_v27  ;;  %4499 = vst.msk [vmem:[%s6716_s30 + $0x30] sm:$0xf] %vm4486_vm8, %v4869_v63  ;;  %v3905_v28 = vadd.f32 %v3752_v48, %v3255_v20  ;;  %v3995_v61 = vadd.f32 %v5903_v50, %v3904_v36 }
 0x228   : > { %v3005_v13 = vsel %vm5924_vm7, %v7615_v49, %v7614_v6  ;;  %v3997_v41 = vadd.f32 %v5910_v53, %v3906_v25  ;;  %v7619_v59 = vrot.slane %v7618_v33, 7  ;;  %v7620_v4 = vrot.slane %v7616_v27, 2  ;;  %v7630_v6 = vld [vmem:[#allocation73_spill] sm:$0xff] }
 0x229   : > { %v4217_v15 = vrot.slane %v4203_v1, %v5878_v38  ;;  %v7621_v14 = vcombine.high %v7601_v45, %v7601_v45  ;;  %v3223_v19 = vadd.f32 %v3008_v52, %v7622_v5  ;;  %v7623_v43 = vcombine.high %v7622_v5, %v7622_v5  ;;  %v7629_v1 = vld [vmem:[#allocation86_spill] sm:$0xff]  ;;  %v7635_v5 = vld [vmem:[#allocation33_spill] sm:$0xff] }
 0x22a   : > { %v3011_v31 = vsel %vm5924_vm7, %v7620_v4, %v7619_v59  ;;  %v3996_v62 = vadd.f32 %v5888_v30, %v3905_v28  ;;  %v4059_v20 = vmax.f32 %v3995_v61, 0.0  ;;  %v4061_v60 = vmax.f32 %v3997_v41, 0.0  ;;  %v7634_v41 = vld [vmem:[#allocation80_spill] sm:$0xff] }
 0x22b   : > { %v3222_v58 = vadd.f32 %v3005_v13, %v7621_v14  ;;  %v3224_v26 = vadd.f32 %v3011_v31, %v7623_v43  ;;  %v3586_v18 = vcombine.high %v6708_v29, %v6708_v29  ;;  %v4218_v42 = vcombine.low %v4210_v32, %v4217_v15  ;;  %v7632_v13 = vld [vmem:[#allocation77_spill] sm:$0xff] }
 0x22c   : > { %v3593_v16 = vrot.slane %v6708_v29, %v5878_v38  ;;  %v4026_v45 = vmax.f32 %v3962_v44, 0.0  ;;  %v7624_v7 = vrot.slane %v6477_v57, 7  ;;  %v4060_v46 = vmax.f32 %v3996_v62, 0.0  ;;  %v7626_v29 = vld [vmem:[#allocation81_spill] sm:$0xff]  ;;  %v7638_v62 = vld [vmem:[#allocation39_spill] sm:$0xff] }
 0x22d   : > { %v4355_v35 = vcombine.low %v4058_v9, %v4059_v20  ;;  %v3600_v10 = vrot.slane %v3586_v18, %v5878_v38  ;;  %v3118_v24 = vsel %vm5924_vm7, %v6520_v0, %v6507_v40  ;;  %v4861_v34 = vpack.c.bf16 %v4218_v42, %v4218_v42  ;;  %v7637_v43 = vld [vmem:[#allocation37_spill] sm:$0xff]  ;;  %v7639_v20 = vld [vmem:[#allocation38_spill] sm:$0xff] }
 0x22e   : > { %v3115_v23 = vsel %vm5924_vm7, %v7625_v56, %v7624_v7  ;;  %v3601_v37 = vcombine.high %v3593_v16, %v3593_v16  ;;  %v3872_v63 = vadd.f32 %v3593_v16, %v3222_v58  ;;  %v7627_v44 = vrot.slane %v7626_v29, 7 }
 0x22f   : > { %v7628_v57 = vrot.slane %v6507_v40, 2  ;;  %v4356_v36 = vcombine.low %v4060_v46, %v4061_v60  ;;  %v4363_v9 = vrot.slane %v4355_v35, %v5878_v38  ;;  %v3874_v25 = vadd.f32 %v3600_v10, %v3224_v26  ;;  %4491 = vst.msk [vmem:[%s6716_s30 + $0x10] sm:$0xf] %vm4486_vm8, %v4861_v34  ;;  %v7644_v34 = vld [vmem:[#allocation44_spill] sm:$0xff] }
 0x230   : > { %v3124_v32 = vsel %vm5924_vm7, %v7629_v1, %v6522_v12  ;;  %v3873_v0 = vadd.f32 %v3601_v37, %v3223_v19  ;;  %v3963_v17 = vadd.f32 %v5903_v50, %v3872_v63  ;;  %v7631_v40 = vcombine.high %v7630_v6, %v7630_v6  ;;  %v7647_v1 = vld [vmem:[#allocation29_spill] sm:$0xff] }
 0x231   : > { %v3121_v48 = vsel %vm5924_vm7, %v7628_v57, %v7627_v44  ;;  %v3258_v27 = vadd.f32 %v3118_v24, %v7632_v13  ;;  %v4370_v2 = vrot.slane %v4356_v36, %v5878_v38  ;;  %v3965_v52 = vadd.f32 %v5910_v53, %v3874_v25  ;;  %v7643_v24 = vld [vmem:[#allocation40_spill] sm:$0xff]  ;;  %v7645_v36 = vld [vmem:[#allocation26_spill] sm:$0xff] }
 0x232   : > { %v3257_v49 = vadd.f32 %v3115_v23, %v7631_v40  ;;  %v7633_v28 = vcombine.high %v7632_v13, %v7632_v13  ;;  %v3260_v33 = vadd.f32 %v3124_v32, %v7634_v41  ;;  %v3964_v59 = vadd.f32 %v5888_v30, %v3873_v0  ;;  %v7640_v23 = vld [vmem:[#allocation34_spill] sm:$0xff] }
 0x233   : > { %v4027_v4 = vmax.f32 %v3963_v17, 0.0  ;;  %v3753_v31 = vcombine.high %v6710_v11, %v6710_v11  ;;  %v3760_v15 = vrot.slane %v6710_v11, %v5878_v38  ;;  %v4371_v14 = vcombine.low %v4363_v9, %v4370_v2  ;;  %v7649_v2 = vld [vmem:[#allocation32_spill] sm:$0xff] }
 0x234   : > { %v3259_v61 = vadd.f32 %v3121_v48, %v7633_v28  ;;  %v4029_v58 = vmax.f32 %v3965_v52, 0.0  ;;  %v7636_v19 = vrot.slane %v7635_v5, 7  ;;  %v3018_v60 = vsel %vm5924_vm7, %v7639_v20, %v7638_v62 }
 0x235   : > { %v4028_v18 = vmax.f32 %v3964_v59, 0.0  ;;  %v4219_v42 = vcombine.low %v4026_v45, %v4027_v4  ;;  %v3767_v16 = vrot.slane %v3753_v31, %v5878_v38  ;;  %v3768_v7 = vcombine.high %v3760_v15, %v3760_v15 }
 0x236   : > { %v3015_v26 = vsel %vm5924_vm7, %v7637_v43, %v7636_v19  ;;  %v4870_v11 = vpack.c.bf16 %v4371_v14, %v4371_v14  ;;  %v3907_v56 = vadd.f32 %v3760_v15, %v3257_v49  ;;  %v7641_v46 = vrot.slane %v7640_v23, 7  ;;  %v7650_v14 = vld [vmem:[#allocation87_spill] sm:$0xff]  ;;  %v7653_v43 = vld [vmem:[#allocation90_spill] sm:$0xff] }
 0x237   : > { %v7642_v35 = vrot.slane %v7638_v62, 2  ;;  %v3024_v37 = vsel %vm5924_vm7, %v7644_v34, %v7643_v24  ;;  %v4220_v63 = vcombine.low %v4028_v18, %v4029_v58  ;;  %v4227_v45 = vrot.slane %v4219_v42, %v5878_v38 }
 0x238   : > { %v3769_v29 = vcombine.high %v3767_v16, %v3767_v16  ;;  %v3908_v44 = vadd.f32 %v3768_v7, %v3258_v27  ;;  %4500 = vst.msk [vmem:[%s6716_s30 + $0x34] sm:$0xf] %vm4486_vm8, %v4870_v11  ;;  %v3909_v57 = vadd.f32 %v3767_v16, %v3259_v61  ;;  %v3998_v48 = vadd.f32 %v5881_v8, %v3907_v56  ;;  %v7654_v7 = vld [vmem:[#allocation89_spill] sm:$0xff] }
 0x239   : > { %v3021_v10 = vsel %vm5924_vm7, %v7642_v35, %v7641_v46  ;;  %v7646_v9 = vcombine.high %v7645_v36, %v7645_v36  ;;  %v3226_v32 = vadd.f32 %v3018_v60, %v7647_v1  ;;  %v4234_v0 = vrot.slane %v4220_v63, %v5878_v38 }
 0x23a   : > { %v3910_v17 = vadd.f32 %v3769_v29, %v3260_v33  ;;  %v3999_v6 = vadd.f32 %v5903_v50, %v3908_v44  ;;  %v7648_v40 = vcombine.high %v7647_v1, %v7647_v1  ;;  %v4000_v13 = vadd.f32 %v5888_v30, %v3909_v57 }
 0x23b   : > { %v3225_v25 = vadd.f32 %v3015_v26, %v7646_v9  ;;  %v4062_v27 = vmax.f32 %v3998_v48, 0.0  ;;  %v3228_v52 = vadd.f32 %v3024_v37, %v7649_v2  ;;  %v3602_v28 = vcombine.high %v6724_v55, %v6724_v55  ;;  %v7659_v48 = vld [vmem:[#allocation85_spill] sm:$0xff] }
 0x23c   : > { %v3227_v49 = vadd.f32 %v3021_v10, %v7648_v40  ;;  %v4235_v61 = vcombine.low %v4227_v45, %v4234_v0  ;;  %v4001_v59 = vadd.f32 %v5910_v53, %v3910_v17  ;;  %v4063_v4 = vmax.f32 %v3999_v6, 0.0  ;;  %v7657_v10 = vld [vmem:[#allocation91_spill] sm:$0xff]  ;;  %v7661_v0 = vld [vmem:[#allocation88_spill] sm:$0xff] }
 0x23d   : > { %v3609_v33 = vrot.slane %v6724_v55, %v5878_v38  ;;  %v4064_v31 = vmax.f32 %v4000_v13, 0.0  ;;  %v3616_v15 = vrot.slane %v3602_v28, %v5878_v38  ;;  %v7651_v58 = vrot.slane %v7650_v14, 7 }
 0x23e   : > { %v7652_v5 = vrot.slane %v6522_v12, 2  ;;  %v3130_v26 = vsel %vm5924_vm7, %v7653_v43, %v6572_v3  ;;  %v4862_v62 = vpack.c.bf16 %v4235_v61, %v4235_v61  ;;  %v4065_v20 = vmax.f32 %v4001_v59, 0.0  ;;  %v7665_v59 = vld [vmem:[#allocation45_spill] sm:$0xff] }
 0x23f   : > { %v4372_v60 = vcombine.low %v4062_v27, %v4063_v4  ;;  %v3617_v18 = vcombine.high %v3609_v33, %v3609_v33  ;;  %v3618_v55 = vcombine.high %v3616_v15, %v3616_v15  ;;  %v3875_v42 = vadd.f32 %v3609_v33, %v3225_v25  ;;  %v7662_v27 = vld [vmem:[#allocation36_spill] sm:$0xff]  ;;  %v7666_v4 = vld [vmem:[#allocation47_spill] sm:$0xff] }
 0x240   : > { %v3127_v19 = vsel %vm5924_vm7, %v7652_v5, %v7651_v58  ;;  %v3877_v16 = vadd.f32 %v3616_v15, %v3227_v49  ;;  %v7655_v11 = vrot.slane %v7654_v7, 7  ;;  %v7656_v56 = vrot.slane %v6572_v3, 2  ;;  %4492 = vst.msk [vmem:[%s6716_s30 + $0x14] sm:$0xf] %vm4486_vm8, %v4862_v62  ;;  %v7670_v62 = vld [vmem:[#allocation51_spill] sm:$0xff] }
 0x241   : > { %v4373_v23 = vcombine.low %v4064_v31, %v4065_v20  ;;  %v4380_v46 = vrot.slane %v4372_v60, %v5878_v38  ;;  %v3876_v35 = vadd.f32 %v3617_v18, %v3226_v32  ;;  %v3136_v34 = vsel %vm5924_vm7, %v7657_v10, %v6612_v51  ;;  %v7667_v31 = vld [vmem:[#allocation42_spill] sm:$0xff]  ;;  %v7671_v20 = vld [vmem:[#allocation49_spill] sm:$0xff] }
 0x242   : > { %v3133_v12 = vsel %vm5924_vm7, %v7656_v56, %v7655_v11  ;;  %v3878_v37 = vadd.f32 %v3618_v55, %v3228_v52  ;;  %v3966_v63 = vadd.f32 %v5881_v8, %v3875_v42  ;;  %v3968_v45 = vadd.f32 %v5888_v30, %v3877_v16 }
 0x243   : > { %v7658_v3 = vcombine.high %v7634_v41, %v7634_v41  ;;  %v4387_v44 = vrot.slane %v4373_v23, %v5878_v38  ;;  %v3967_v57 = vadd.f32 %v5903_v50, %v3876_v35  ;;  %v3262_v36 = vadd.f32 %v3130_v26, %v7659_v48  ;;  %v7673_v23 = vld [vmem:[#allocation35_spill] sm:$0xff] }
 0x244   : > { %v7660_v9 = vcombine.high %v7659_v48, %v7659_v48  ;;  %v3969_v51 = vadd.f32 %v5910_v53, %v3878_v37  ;;  %v4030_v1 = vmax.f32 %v3966_v63, 0.0  ;;  %v4032_v32 = vmax.f32 %v3968_v45, 0.0  ;;  %v7675_v63 = vld [vmem:[#allocation41_spill] sm:$0xff] }
 0x245   : > { %v3261_v29 = vadd.f32 %v3127_v19, %v7658_v3  ;;  %v3264_v17 = vadd.f32 %v3136_v34, %v7661_v0  ;;  %v4388_v6 = vcombine.low %v4380_v46, %v4387_v44  ;;  %v4031_v41 = vmax.f32 %v3967_v57, 0.0 }
 0x246   : > { %v3263_v25 = vadd.f32 %v3133_v12, %v7660_v9  ;;  %v3770_v40 = vcombine.high %v6726_v21, %v6726_v21  ;;  %v3777_v49 = vrot.slane %v6726_v21, %v5878_v38  ;;  %v4033_v13 = vmax.f32 %v3969_v51, 0.0  ;;  %v7677_v51 = vld [vmem:[#allocation48_spill] sm:$0xff] }
 0x247   : > { %v7663_v52 = vrot.slane %v7662_v27, 7  ;;  %v7664_v28 = vrot.slane %v7643_v24, 2  ;;  %v3030_v33 = vsel %vm5924_vm7, %v7666_v4, %v7665_v59  ;;  %v7668_v15 = vrot.slane %v7667_v31, 7 }
 0x248   : > { %v7669_v14 = vrot.slane %v7665_v59, 2  ;;  %v4871_v58 = vpack.c.bf16 %v4388_v6, %v4388_v6  ;;  %v4236_v5 = vcombine.low %v4030_v1, %v4031_v41  ;;  %v3784_v19 = vrot.slane %v3770_v40, %v5878_v38 }
 0x249   : > { %v3027_v61 = vsel %vm5924_vm7, %v7664_v28, %v7663_v52  ;;  %v3785_v24 = vcombine.high %v3777_v49, %v3777_v49  ;;  %v4237_v43 = vcombine.low %v4032_v32, %v4033_v13  ;;  %v3911_v26 = vadd.f32 %v3777_v49, %v3261_v29  ;;  %v7679_v13 = vld [vmem:[#allocation50_spill] sm:$0xff]  ;;  %v7682_v28 = vld [vmem:[#allocation53_spill] sm:$0xff] }
 0x24a   : > { %v3033_v21 = vsel %vm5924_vm7, %v7669_v14, %v7668_v15  ;;  %v3036_v60 = vsel %vm5924_vm7, %v7671_v20, %v7670_v62  ;;  %v7672_v18 = vcombine.high %v7649_v2, %v7649_v2  ;;  %4501 = vst.msk [vmem:[%s6716_s30 + $0x38] sm:$0xf] %vm4486_vm8, %v4871_v58  ;;  %v4244_v42 = vrot.slane %v4236_v5, %v5878_v38  ;;  %v7686_v20 = vld [vmem:[#allocation46_spill] sm:$0xff] }
 0x24b   : > { %v3786_v16 = vcombine.high %v3784_v19, %v3784_v19  ;;  %v3912_v7 = vadd.f32 %v3785_v24, %v3262_v36  ;;  %v3913_v11 = vadd.f32 %v3784_v19, %v3263_v25  ;;  %v4251_v56 = vrot.slane %v4237_v43, %v5878_v38  ;;  %v7676_v25 = vld [vmem:[#allocation52_spill] sm:$0xff] }
 0x24c   : > { %v3229_v55 = vadd.f32 %v3027_v61, %v7672_v18  ;;  %v4002_v12 = vadd.f32 %v5881_v8, %v3911_v26  ;;  %v3230_v46 = vadd.f32 %v3030_v33, %v7673_v23  ;;  %v7674_v35 = vcombine.high %v7673_v23, %v7673_v23  ;;  %v7683_v61 = vld [vmem:[#allocation54_spill] sm:$0xff] }
 0x24d   : > { %v3914_v34 = vadd.f32 %v3786_v16, %v3264_v17  ;;  %v4003_v2 = vadd.f32 %v5903_v50, %v3912_v7  ;;  %v4004_v37 = vadd.f32 %v5888_v30, %v3913_v11  ;;  %v3232_v45 = vadd.f32 %v3036_v60, %v7675_v63 }
 0x24e   : > { %v3231_v10 = vadd.f32 %v3033_v21, %v7674_v35  ;;  %v4252_v3 = vcombine.low %v4244_v42, %v4251_v56  ;;  %v4066_v29 = vmax.f32 %v4002_v12, 0.0  ;;  %v3619_v44 = vcombine.high %v6763_v39, %v6763_v39  ;;  %v7684_v21 = vld [vmem:[#allocation43_spill] sm:$0xff] }
 0x24f   : > { %v3626_v57 = vrot.slane %v6763_v39, %v5878_v38  ;;  %v4005_v48 = vadd.f32 %v5910_v53, %v3914_v34  ;;  %v4067_v36 = vmax.f32 %v4003_v2, 0.0  ;;  %v4068_v9 = vmax.f32 %v4004_v37, 0.0 }
 0x250   : > { %v7678_v1 = vrot.slane %v7677_v51, 9  ;;  %v4863_v0 = vpack.c.bf16 %v4252_v3, %v4252_v3  ;;  %v3633_v17 = vrot.slane %v3619_v44, %v5878_v38  ;;  %v7680_v27 = vrot.slane %v7679_v13, 7 }
 0x251   : > { %v3634_v6 = vcombine.high %v3626_v57, %v3626_v57  ;;  %v3879_v41 = vadd.f32 %v3626_v57, %v3229_v55  ;;  %v4069_v40 = vmax.f32 %v4005_v48, 0.0  ;;  %v4389_v49 = vcombine.low %v4066_v29, %v4067_v36 }
 0x252   : > { %v3040_v32 = vsel %vm5924_vm7, %v7678_v1, %v7676_v25  ;;  %v7681_v39 = vrot.slane %v7676_v25, 2  ;;  %v3046_v59 = vsel %vm5924_vm7, %v7683_v61, %v7682_v28  ;;  %4493 = vst.msk [vmem:[%s6716_s30 + $0x18] sm:$0xf] %vm4486_vm8, %v4863_v0  ;;  %v3635_v4 = vcombine.high %v3633_v17, %v3633_v17 }
 0x253   : > { %v3880_v33 = vadd.f32 %v3634_v6, %v3230_v46  ;;  %v3881_v31 = vadd.f32 %v3633_v17, %v3231_v10  ;;  %v3970_v15 = vadd.f32 %v5881_v8, %v3879_v41  ;;  %v4390_v14 = vcombine.low %v4068_v9, %v4069_v40 }
 0x254   : > { %v3043_v52 = vsel %vm5924_vm7, %v7681_v39, %v7680_v27  ;;  %v3233_v58 = vadd.f32 %v3040_v32, %v7684_v21  ;;  %v7685_v5 = vcombine.high %v7684_v21, %v7684_v21  ;;  %v4397_v24 = vrot.slane %v4389_v49, %v5878_v38 }
 0x255   : > { %v3882_v43 = vadd.f32 %v3635_v4, %v3232_v45  ;;  %v3971_v22 = vadd.f32 %v5903_v50, %v3880_v33  ;;  %v3972_v26 = vadd.f32 %v5888_v30, %v3881_v31  ;;  %v4404_v62 = vrot.slane %v4390_v14, %v5878_v38 }
 0x256   : > { %v3234_v19 = vadd.f32 %v3043_v52, %v7685_v5  ;;  %v3235_v60 = vadd.f32 %v3046_v59, %v7686_v20  ;;  %v3636_v18 = vcombine.high %v6771_v54, %v6771_v54  ;;  %v3643_v55 = vrot.slane %v6771_v54, %v5878_v38 }
 0x257   : > { %v3973_v42 = vadd.f32 %v5910_v53, %v3882_v43  ;;  %v4034_v16 = vmax.f32 %v3970_v15, 0.0  ;;  %v4035_v7 = vmax.f32 %v3971_v22, 0.0  ;;  %v4405_v11 = vcombine.low %v4397_v24, %v4404_v62 }
 0x258   : > { %v3650_v56 = vrot.slane %v3636_v18, %v5878_v38  ;;  %v3651_v12 = vcombine.high %v3643_v55, %v3643_v55  ;;  %v4036_v23 = vmax.f32 %v3972_v26, 0.0  ;;  %v3977_v54 = vadd.f32 %v5910_v53, %v6615_v47 }
 0x259   : > { %v4037_v46 = vmax.f32 %v3973_v42, 0.0  ;;  %v4253_v35 = vcombine.low %v4034_v16, %v4035_v7  ;;  %v4872_v10 = vpack.c.bf16 %v4405_v11, %v4405_v11 }
 0x25a   : > { %v3652_v34 = vcombine.high %v3650_v56, %v3650_v56  ;;  %v3883_v2 = vadd.f32 %v3651_v12, %v3233_v58  ;;  %v3884_v37 = vadd.f32 %v3650_v56, %v3234_v19  ;;  %v4041_v51 = vmax.f32 %v3977_v54, 0.0 }
 0x25b   : > { %v4254_v63 = vcombine.low %v4036_v23, %v4037_v46  ;;  %4502 = vst.msk [vmem:[%s6716_s30 + $0x3c] sm:$0xf] %vm4486_vm8, %v4872_v10  ;;  %v4261_v44 = vrot.slane %v4253_v35, %v5878_v38 }
 0x25c   : > { %v3885_v45 = vadd.f32 %v3652_v34, %v3235_v60  ;;  %v3974_v3 = vadd.f32 %v5881_v8, %v3883_v2  ;;  %v3975_v29 = vadd.f32 %v5903_v50, %v3884_v37 }
 0x25d   : > { %v4268_v57 = vrot.slane %v4254_v63, %v5878_v38 }
 0x25e   : > { %v3976_v48 = vadd.f32 %v5888_v30, %v3885_v45  ;;  %v4038_v36 = vmax.f32 %v3974_v3, 0.0  ;;  %v4039_v9 = vmax.f32 %v3975_v29, 0.0 }
 0x25f   : > { %v4269_v25 = vcombine.low %v4261_v44, %v4268_v57 }
 0x260   : > { %v4040_v53 = vmax.f32 %v3976_v48, 0.0  ;;  %v4270_v47 = vcombine.low %v4038_v36, %v4039_v9 }
 0x261   : > { %v4864_v1 = vpack.c.bf16 %v4269_v25, %v4269_v25 }
 0x262   : > { %v4271_v32 = vcombine.low %v4040_v53, %v4041_v51  ;;  %v4278_v8 = vrot.slane %v4270_v47, %v5878_v38 }
 0x263   : > { %4494 = vst.msk [vmem:[%s6716_s30 + $0x1c] sm:$0xf] %vm4486_vm8, %v4864_v1 }
 0x264   : > { %v4285_v50 = vrot.slane %v4271_v32, %v5878_v38 }
 0x266   : > { %v4286_v0 = vcombine.low %v4278_v8, %v4285_v50 }
 0x268   : > { %v4865_v17 = vpack.c.bf16 %v4286_v0, %v4286_v0 }
 0x26a   : > { %4495 = vst.msk [vmem:[%s6716_s30 + $0x20] sm:$0xf] %vm4486_vm8, %v4865_v17 }
 0x26b PF: > { %s15_s22 = sadd.s32 1, %s5038_s22   ;;  %s7687_s18 = smov %s5030_s20 }
 0x26c   : > { %p12_p10 = scmp.ge.s32.totalorder %s15_s22, 6   ;;  %s7688_s19 = smov %s5034_s21 }
 0x26d   : > { %s7689_s20 = smov %s7692_s23  ;;  %s7690_s21 = smov %s7696_s24 }
 0x26e   :  { %14 = sbr.rel (!%p12_p10) target bundleno = 3 (0x3), region = 78 }

// kernel: l_net_forward.9
= control target key start
LH: loop header
LB: loop body
LE: loop exit
PB: predicated region body
PF: predicated region fallthrough
CT: control target
= control target key end

     0   :  { %s4052_s0 = inlined_call_operand.vmem [shape: bf16[2,18,18,64], index: 0, kind: input, shape index: {}, may-alias: {0,1,2}]   ;;  %s4053_s1 = inlined_call_operand.vmem [shape: bf16[2,18,18,64], index: 1, kind: input, shape index: {}, may-alias: {0,1,2}]   ;;  %s4054_s2 = inlined_call_operand.vmem [shape: bf16[2,18,18,64], index: 2, kind: input, shape index: {}, may-alias: {0,1,2}]   ;;  %s4055_s3 = inlined_call_operand.vmem [shape: f32[9,64], index: 3, kind: input, shape index: {}]   ;;  %s4056_s4 = inlined_call_operand.<no memory space> [shape: f32[1,1], index: 4, kind: input, shape index: {}]   ;;  %s4057_s5 = inlined_call_operand.hbm [shape: f32[2,16,16], index: 5, kind: output, shape index: {}]  }
   0x1   :  { %v10_v0 = vstv %s4056_s4 }
   0x2   :  { %11 = vst [vmem:[#allocation2] sm:$0x1] %v10_v0 }
   0x3   :  { %12 = vsyncpa [#allocation4], 0 }
   0x4   :  { %14 = vsyncpa [#allocation4 + $0x1], 0  ;;  %s2664_s20 = smov 0   ;;  %s2666_s21 = smov 0  }
   0x5   :  { %s2668_s22 = smov 0   ;;  %s2670_s23 = smov 0  }
   0x6   :  { %s2672_s24 = smov 0   ;;  %s2674_s25 = smov 0  }
   0x7   :  { %s2676_s26 = smov 0   ;;  %s2678_s27 = smov 0  }
   0x8 LB: > { %s2305_s4 = sadd.s32 4294967295, %s2627_s27   ;;  %s2306_s28 = sadd.s32 4294967294, %s2627_s27   ;;  %s2627_s27 = sphi %s2678_s27, %s20_s27   ;;  %s2623_s26 = sphi %s2676_s26, %s4066_s26   ;;  %s2619_s25 = sphi %s2674_s25, %s4065_s25   ;;  %s2615_s24 = sphi %s2672_s24, %s4064_s24   ;;  %s2611_s23 = sphi %s2670_s23, %s4063_s23   ;;  %s2607_s22 = sphi %s2668_s22, %s4062_s22   ;;  %s2603_s21 = sphi %s2666_s21, %s4061_s21   ;;  %s2599_s20 = sphi %s2664_s20, %s4060_s20  }
   0x9   : > { %s29_s29 = sadd.s32 1, %s2619_s25  ;;  %s32_s30 = sadd.s32 1, %s2623_s26 }
   0xa   : > { %p30_p0 = scmp.ge.s32.totalorder %s29_s29, 2  ;;  %p187_p1 = scmp.ne.s32.totalorder %s2607_s22, %s2603_s21 }
   0xb   : > { %p188_p2 = scmp.eq.s32.totalorder %s2305_s4, 3  ;;  %p193_p5 = scmp.ne.s32.totalorder %s2603_s21, %s2599_s20 }
   0xc   : > { %s4068_s29 = smov (%p30_p0, %s29_s29), 0  ;;  %s4070_s30 = smov (!%p30_p0, %s32_s30), %s2623_s26 }
   0xd   : > { %s173_s6 = ssub.s32 %s2619_s25, %s4068_s29  ;;  %p2715_p3 = por %p188_p2, %p187_p1 }
   0xe   : > { %p34_p4 = scmp.ge.s32.totalorder %s4070_s30, 2  ;;  %p194_p6 = scmp.eq.s32.totalorder %s2306_s28, 3 }
   0xf   : > { %p2313_p7 = scmp.ge.s32.totalorder %s2627_s27, 1  ;;  %p276_p9 = scmp.lt.s32.totalorder %s2627_s27, 5 }
  0x10   : > { %s4072_s30 = smov (%p34_p4, %s4070_s30), 0  ;;  %p2724_p8 = por %p194_p6, %p193_p5 }
  0x11   : > { %s172_s9 = ssub.s32 %s2623_s26, %s4072_s30  ;;  %s177_s10 = sadd.s32 1, %s2607_s22 }
  0x12   : > { %s174_s11 = sor.u32 %s173_s6, %s172_s9  ;;  %p277_p10 = pnand %p2313_p7, %p276_p9 }
  0x13   : > { %p175_p11 = scmp.eq.s32.totalorder %s174_s11, 0  ;;  %s2736_s13 = sshll.u32 (!%p277_p10), %s2611_s23, 3  ;;  %v2753_v1 = vld [vmem:[%s4055_s3] ss:$0 sm:$0xff] (!%p277_p10)  ;;  %vm461_vm0 = vcmask (!%p277_p10), 523264   ;;  %vm561_vm1 = vcmask (!%p277_p10), 517120  }
  0x14   : > { %280 = sbr.rel (%p277_p10) target bundleno = 790 (0x316), region = 40  ;;  %p343_p12 = scmp.lt.s32.totalorder (!%p277_p10), %s2615_s24, 1  ;;  %v2847_v57 = vld [vmem:[%s4055_s3 + $0x1] ss:$0 sm:$0xff] (!%p277_p10)  ;;  %vm652_vm2 = vcmask (!%p277_p10), 1046528   ;;  %vm850_vm3 = vcmask (!%p277_p10), 1045504  }
  0x15   : > { %s2733_s12 = scalar_select %p175_p11, %s2607_s22, %s177_s10  }
  0x16   : > { %p345_p13 = scmp.lt.s32.totalorder (!%p277_p10), %s2736_s13, 17  ;;  %s3028_s4 = sadd.s32 (!%p277_p10), 8, %s2736_s13  ;;  %vm2084_vm4 = vcmask (!%p277_p10), 130112   ;;  %vm2149_vm5 = vcmask (!%p277_p10), 1041409   ;;  %vm2151_vm6 = vcmask (!%p277_p10), 1042434   ;;  %vm2153_vm7 = vcmask (!%p277_p10), 1043459  }
  0x17   : > { %p362_p0 = scmp.lt.s32.totalorder (!%p277_p10), %s3028_s4, 17  ;;  %vm2155_vm8 = vcmask (!%p277_p10), 1044484   ;;  %vm2157_vm9 = vcmask (!%p277_p10), 1045509   ;;  %vm2159_vm10 = vcmask (!%p277_p10), 1046534   ;;  %vm2161_vm11 = vcmask (!%p277_p10), 1047559  }
  0x18   : > { %vm2164_vm12 = vcmask (!%p277_p10), 130048  }
  0x1b   : > { %s344_s14 = scalar_select %p343_p12, %s2615_s24, 1 }
  0x1c   : > { %s346_s15 = scalar_select %p345_p13, %s2736_s13, 17 }
  0x1d   : > { %s2742_s16 = smul.u32 54, %s344_s14 }
  0x1e   : > { %s2391_s17 = smul.u32 3, %s346_s15 }
  0x1f   : > { %s363_s13 = scalar_select %p362_p0, %s3028_s4, 17 }
  0x20   : > { %s349_s18 = sadd.s32 %s2742_s16, %s2391_s17  ;;  %s2630_s17 = smov [#allocation3]  }
  0x21   : > { %s2316_s19 = sshll.u32 %s349_s18, 2  ;;  %s2393_s28 = smul.u32 3, %s363_s13 }
  0x22   : > { %s2748_s6 = scalar_lea.vmem %s4052_s0, %s2316_s19  ;;  %s334_s13 = sand.u32 1, %s2603_s21  }
  0x23   : > { %v389_v2 = vld [vmem:[%s2748_s6 + $0xc] sm:$0xff]   ;;  %v2365_v3 = vld [vmem:[%s2748_s6] sm:$0xff]   ;;  %v2388_v4 = vld [vmem:[%s2748_s6 + $0x18] sm:$0xff]   ;;  %s2537_s18 = sshll.u32 %s2630_s17, 4  ;;  %s2538_s18 = int_to_ptr.vmem [resolvable:$false] %s2537_s18 }
  0x24   : > { %v2758_v5 = vunpack.c.l.bf16 %v389_v2  ;;  %v2760_v6 = vunpack.c.l.bf16 %v2365_v3  ;;  %v2762_v7 = vunpack.c.h.bf16 %v389_v2  ;;  %v2764_v8 = vunpack.c.h.bf16 %v2365_v3  ;;  %v396_v15 = vld [vmem:[%s2748_s6 + $0x24] sm:$0xff]   ;;  %v2389_v24 = vld [vmem:[%s2748_s6 + $0x30] sm:$0xff]   ;;  %v402_v31 = vld [vmem:[%s2748_s6 + $0x3c] sm:$0xff]   ;;  %s2539_s19 = scalar_lea.vmem %s2538_s18, 256 }
  0x25   : > { %v2766_v9 = vunpack.c.h.bf16 %v2388_v4  ;;  %v2768_v10 = vunpack.c.l.bf16 %v2388_v4  ;;  %v2781_v18 = vunpack.c.h.bf16 %v396_v15  ;;  %v2783_v19 = vunpack.c.l.bf16 %v396_v15  ;;  %v2390_v38 = vld [vmem:[%s2748_s6 + $0x48] sm:$0xff]   ;;  %v408_v45 = vld [vmem:[%s2748_s6 + $0x54] sm:$0xff]   ;;  %v394_v15 = vld [vmem:[%s2748_s6 + $0x20] sm:$0x1] }
  0x26   : > { %v447_v11 = vmul.f32 %v2753_v1, %v2758_v5  ;;  %v445_v12 = vmul.f32 %v2760_v6, %v2753_v1  ;;  %v448_v13 = vmul.f32 %v2753_v1, %v2762_v7  ;;  %v446_v14 = vmul.f32 %v2764_v8, %v2753_v1  ;;  %v2842_v56 = vld [vmem:[%s2748_s6 + $0x8] sm:$0x1]  ;;  %v391_v63 = vld [vmem:[%s2748_s6 + $0x14] sm:$0x1] }
  0x27   : > { %v450_v22 = vmul.f32 %v2766_v9, %v2753_v1  ;;  %v449_v23 = vmul.f32 %v2768_v10, %v2753_v1  ;;  %v452_v25 = vmul.f32 %v2753_v1, %v2781_v18  ;;  %v451_v26 = vmul.f32 %v2753_v1, %v2783_v19 }
  0x28   : > { %v468_v16 = vsel %vm461_vm0, %v447_v11, 0.0  ;;  %v462_v17 = vsel %vm461_vm0, %v445_v12, 0.0  ;;  %v471_v20 = vsel %vm461_vm0, %v448_v13, 0.0  ;;  %v465_v21 = vsel %vm461_vm0, %v446_v14, 0.0 }
  0x29   : > { %469 = vadd.xlane.f32.xlu1 %v468_v16  ;;  %463 = vadd.xlane.f32.xlu0 %v462_v17  ;;  %v477_v27 = vsel %vm461_vm0, %v450_v22, 0.0  ;;  %v474_v28 = vsel %vm461_vm0, %v449_v23, 0.0  ;;  %v2798_v29 = vunpack.c.h.bf16 %v2389_v24  ;;  %v2800_v30 = vunpack.c.l.bf16 %v2389_v24  ;;  %v397_v23 = vld [vmem:[%s2748_s6 + $0x2c] sm:$0x1] }
  0x2a   : > { %v483_v32 = vsel %vm461_vm0, %v452_v25, 0.0  ;;  %v480_v33 = vsel %vm461_vm0, %v451_v26, 0.0  ;;  %v2809_v36 = vunpack.c.h.bf16 %v402_v31  ;;  %v2811_v37 = vunpack.c.l.bf16 %v402_v31 }
  0x2b   : > { %v454_v34 = vmul.f32 %v2798_v29, %v2753_v1  ;;  %v453_v35 = vmul.f32 %v2800_v30, %v2753_v1  ;;  %v2814_v39 = vunpack.c.h.bf16 %v2390_v38  ;;  %v2816_v40 = vunpack.c.l.bf16 %v2390_v38 }
  0x2c   : > { %v456_v43 = vmul.f32 %v2753_v1, %v2809_v36  ;;  %v455_v44 = vmul.f32 %v2753_v1, %v2811_v37  ;;  %v2825_v46 = vunpack.c.h.bf16 %v408_v45  ;;  %v2827_v47 = vunpack.c.l.bf16 %v408_v45  ;;  %v403_v45 = vld [vmem:[%s2748_s6 + $0x44] sm:$0x1] }
  0x2d   : > { %472 = vadd.xlane.f32.xlu1 %v471_v20  ;;  %466 = vadd.xlane.f32.xlu0 %v465_v21  ;;  %v489_v41 = vsel %vm461_vm0, %v454_v34, 0.0  ;;  %v486_v42 = vsel %vm461_vm0, %v453_v35, 0.0  ;;  %v458_v50 = vmul.f32 %v2814_v39, %v2753_v1  ;;  %v457_v51 = vmul.f32 %v2816_v40, %v2753_v1  ;;  %v400_v35 = vld [vmem:[%s2748_s6 + $0x38] sm:$0x1] }
  0x2e   : > { %v495_v48 = vsel %vm461_vm0, %v456_v43, 0.0  ;;  %v492_v49 = vsel %vm461_vm0, %v455_v44, 0.0  ;;  %v460_v54 = vmul.f32 %v2753_v1, %v2825_v46  ;;  %v459_v55 = vmul.f32 %v2753_v1, %v2827_v47 }
  0x2f   : > { %v501_v52 = vsel %vm461_vm0, %v458_v50, 0.0  ;;  %v498_v53 = vsel %vm461_vm0, %v457_v51, 0.0  ;;  %v418_v58 = vunpack.c.l.bf16 %v2842_v56  ;;  %v532_v61 = vmul.f32 %v2764_v8, %v2847_v57 }
  0x30   : > { %v507_v59 = vsel %vm461_vm0, %v460_v54, 0.0  ;;  %v504_v60 = vsel %vm461_vm0, %v459_v55, 0.0  ;;  %v531_v62 = vmul.f32 %v2760_v6, %v2847_v57  ;;  %v534_v0 = vmul.f32 %v2847_v57, %v2758_v5 }
  0x31   : > { %478 = vadd.xlane.f32.xlu1 %v477_v27  ;;  %475 = vadd.xlane.f32.xlu0 %v474_v28  ;;  %v558_v1 = vsel %vm461_vm0, %v532_v61, 0.0  ;;  %v533_v3 = vmul.f32 %v2847_v57, %v418_v58  ;;  %v2864_v4 = vunpack.c.l.bf16 %v391_v63  ;;  %v535_v14 = vmul.f32 %v2847_v57, %v2762_v7 }
  0x32   : > { %v555_v2 = vsel %vm461_vm0, %v531_v62, 0.0  ;;  %v565_v11 = vsel %vm461_vm0, %v534_v0, 0.0  ;;  %v538_v16 = vmul.f32 %v2766_v9, %v2847_v57  ;;  %v537_v21 = vmul.f32 %v2768_v10, %v2847_v57 }
  0x33   : > { %v562_v12 = vsel %vm561_vm1, %v533_v3, 0.0  ;;  %v536_v13 = vmul.f32 %v2847_v57, %v2864_v4  ;;  %v568_v20 = vsel %vm461_vm0, %v535_v14, 0.0  ;;  %v2879_v22 = vunpack.c.l.bf16 %v394_v15 }
  0x34   : > { %v577_v24 = vsel %vm461_vm0, %v538_v16, 0.0  ;;  %v574_v25 = vsel %vm461_vm0, %v537_v21, 0.0  ;;  %v540_v26 = vmul.f32 %v2847_v57, %v2783_v19  ;;  %v2888_v28 = vunpack.c.l.bf16 %v397_v23  ;;  %v2947_v21 = vld [vmem:[%s4055_s3 + $0x2] ss:$0 sm:$0xff] }
  0x35   : > { %484 = vadd.xlane.f32.xlu1 %v483_v32  ;;  %481 = vadd.xlane.f32.xlu0 %v480_v33  ;;  %v571_v17 = vsel %vm561_vm1, %v536_v13, 0.0  ;;  %v539_v27 = vmul.f32 %v2847_v57, %v2879_v22  ;;  %v541_v34 = vmul.f32 %v2847_v57, %v2781_v18  ;;  %v544_v38 = vmul.f32 %v2798_v29, %v2847_v57 }
  0x36   : > { %v583_v31 = vsel %vm461_vm0, %v540_v26, 0.0  ;;  %v542_v33 = vmul.f32 %v2847_v57, %v2888_v28  ;;  %v543_v43 = vmul.f32 %v2800_v30, %v2847_v57  ;;  %v2903_v44 = vunpack.c.l.bf16 %v400_v35 }
  0x37   : > { %v580_v32 = vsel %vm561_vm1, %v539_v27, 0.0  ;;  %v546_v50 = vmul.f32 %v2847_v57, %v2811_v37  ;;  %v550_v61 = vmul.f32 %v2814_v39, %v2847_v57  ;;  %v549_v0 = vmul.f32 %v2816_v40, %v2847_v57 }
  0x38   : > { %v545_v51 = vmul.f32 %v2847_v57, %v2903_v44  ;;  %v552_v3 = vmul.f32 %v2847_v57, %v2827_v47  ;;  %v730_v26 = vmul.f32 %v2760_v6, %v2947_v21  ;;  %v735_v6 = vmul.f32 %v2947_v21, %v2864_v4 }
  0x39   : > { %490 = vadd.xlane.f32.xlu1 %v489_v41  ;;  %487 = vadd.xlane.f32.xlu0 %v486_v42  ;;  %v589_v41 = vsel %vm561_vm1, %v542_v33, 0.0  ;;  %v586_v42 = vsel %vm461_vm0, %v541_v34, 0.0  ;;  %v734_v34 = vmul.f32 %v2947_v21, %v2762_v7 }
  0x3a   : > { %v598_v54 = vsel %vm561_vm1, %v545_v51, 0.0  ;;  %v619_v15 = vsel %vm461_vm0, %v552_v3, 0.0  ;;  %v754_v27 = vsel %vm461_vm0, %v730_v26, 0.0  ;;  %v769_v35 = vsel %vm561_vm1, %v735_v6, 0.0 }
  0x3b   : > { %v766_v56 = vsel %vm461_vm0, %v734_v34, 0.0  ;;  %v740_v51 = vmul.f32 %v2947_v21, %v2781_v18 }
  0x3d   : > { %496 = vadd.xlane.f32.xlu1 %v495_v48  ;;  %493 = vadd.xlane.f32.xlu0 %v492_v49  ;;  %v595_v48 = vsel %vm461_vm0, %v544_v38, 0.0  ;;  %v592_v49 = vsel %vm461_vm0, %v543_v43, 0.0  ;;  %v736_v38 = vmul.f32 %v2768_v10, %v2947_v21  ;;  %v739_v43 = vmul.f32 %v2947_v21, %v2783_v19 }
  0x41   : > { %502 = vadd.xlane.f32.xlu1 %v501_v52  ;;  %499 = vadd.xlane.f32.xlu0 %v498_v53  ;;  %v2912_v52 = vunpack.c.l.bf16 %v403_v45  ;;  %v601_v53 = vsel %vm461_vm0, %v546_v50, 0.0  ;;  %v738_v45 = vmul.f32 %v2947_v21, %v2879_v22  ;;  %v741_v50 = vmul.f32 %v2947_v21, %v2888_v28 }
  0x43   : > { %v548_v55 = vmul.f32 %v2847_v57, %v2912_v52  ;;  %v747_v3 = vmul.f32 %v2947_v21, %v2912_v52 }
  0x45   : > { %508 = vadd.xlane.f32.xlu1 %v507_v59  ;;  %505 = vadd.xlane.f32.xlu0 %v504_v60  ;;  %v547_v59 = vmul.f32 %v2847_v57, %v2809_v36  ;;  %v406_v60 = vld [vmem:[%s2748_s6 + $0x50] sm:$0x1]  ;;  %v607_v62 = vsel %vm561_vm1, %v548_v55, 0.0  ;;  %v743_v55 = vmul.f32 %v2798_v29, %v2947_v21 }
  0x47   : > { %v604_v63 = vsel %vm461_vm0, %v547_v59, 0.0  ;;  %v742_v59 = vmul.f32 %v2800_v30, %v2947_v21 }
  0x49   : > { %559 = vadd.xlane.f32.xlu1 %v558_v1  ;;  %556 = vadd.xlane.f32.xlu0 %v555_v2  ;;  %v2927_v1 = vunpack.c.l.bf16 %v406_v60  ;;  %v409_v2 = vld [vmem:[%s2748_s6 + $0x5c] sm:$0x1]  ;;  %v793_v60 = vsel %vm461_vm0, %v743_v55, 0.0  ;;  %s366_s6 = sadd.s32 %s2393_s28, %s2742_s16  ;;  %s3980_s28 = sshll.u32 %s334_s13, 3 }
  0x4a   : > { %v2936_v14 = vunpack.c.l.bf16 %v409_v2  ;;  %s2318_s9 = sshll.u32 %s366_s6, 2  ;;  %s373_s6 = sadd.s32 1, %s3028_s4 }
  0x4b   : > { %v551_v13 = vmul.f32 %v2847_v57, %v2927_v1  ;;  %s3066_s14 = scalar_lea.vmem %s4053_s1, %s2318_s9  ;;  %p376_p1 = scmp.lt.s32.totalorder %s373_s6, 17 }
  0x4d   : > { %566 = vadd.xlane.f32.xlu1 %v565_v11  ;;  %563 = vadd.xlane.f32.xlu0 %v562_v12  ;;  %v613_v11 = vsel %vm461_vm0, %v550_v61, 0.0  ;;  %v610_v12 = vsel %vm461_vm0, %v549_v0, 0.0  ;;  %v616_v16 = vsel %vm561_vm1, %v551_v13, 0.0  ;;  %v790_v61 = vsel %vm461_vm0, %v742_v59, 0.0  ;;  %s4074_s6 = smov (!%p376_p1, %s373_s6), 17 }
  0x4e   : > { %s2394_s4 = smul.u32 3, %s4074_s6  ;;  %s2348_s6 = sshll.u32 %s2615_s24, 1 }
  0x50   : > { %s380_s9 = sadd.s32 %s2394_s4, %s2742_s16  ;;  %s2178_s4 = sadd.s32 %s2611_s23, %s2348_s6 }
  0x51   : > { %572 = vadd.xlane.f32.xlu1 %v571_v17  ;;  %569 = vadd.xlane.f32.xlu0 %v568_v20  ;;  %v554_v17 = vmul.f32 %v2847_v57, %v2936_v14  ;;  %v553_v20 = vmul.f32 %v2847_v57, %v2825_v46  ;;  %s2320_s10 = sshll.u32 %s380_s9, 2  ;;  %s2349_s24 = sshll.u32 %s2178_s4, 7 }
  0x52   : > { %s336_s9 = scalar_lea.vmem [#allocation3], %s3980_s28  ;;  %s3997_s11 = scalar_lea.hbm %s4057_s5, %s2349_s24 }
  0x53   : > { %v625_v23 = vsel %vm561_vm1, %v554_v17, 0.0  ;;  %s2182_s23 = sshll.u32 %s336_s9, 4  ;;  %s3999_s23 = int_to_ptr.vmem [resolvable:$true] %s2182_s23 }
  0x54   : > { %s2533_s15 = scalar_lea.vmem %s3999_s23, 128  ;;  %p2540_p6 = scmp.lt.s32.totalorder %s3999_s23, %s2538_s18 }
  0x55   : > { %578 = vadd.xlane.f32.xlu1 %v577_v24  ;;  %575 = vadd.xlane.f32.xlu0 %v574_v25  ;;  %v622_v24 = vsel %vm461_vm0, %v553_v20, 0.0  ;;  %v731_v25 = vmul.f32 %v2764_v8, %v2947_v21  ;;  %p2534_p2 = scmp.ne.s32.totalorder %s3999_s23, %s2533_s15  ;;  %p2541_p7 = scmp.lt.s32.totalorder %s2539_s19, %s2533_s15 }
  0x57   : > { %v757_v57 = vsel %vm461_vm0, %v731_v25, 0.0  ;;  %p2535_p4 = pnand %p2534_p2, %p2715_p3  ;;  %p2542_p9 = por %p2541_p7, %p2540_p6 }
  0x59   : > { %584 = vadd.xlane.f32.xlu1 %v583_v31  ;;  %581 = vadd.xlane.f32.xlu0 %v580_v32  ;;  %v733_v31 = vmul.f32 %v2947_v21, %v2758_v5  ;;  %v732_v32 = vmul.f32 %v2947_v21, %v418_v58  ;;  %v737_v58 = vmul.f32 %v2766_v9, %v2947_v21  ;;  %p2536_p5 = pneg %p2535_p4 }
  0x5b   : > { %v763_v8 = vsel %vm461_vm0, %v733_v31, 0.0  ;;  %v760_v33 = vsel %vm561_vm1, %v732_v32, 0.0  ;;  %v3025_v31 = vld [vmem:[%s4055_s3 + $0x3] ss:$0 sm:$0xff]  ;;  %p2543_p10 = pnand %p2542_p9, %p2536_p5 }
  0x5c   : > { %v942_v55 = vmul.f32 %v2814_v39, %v3025_v31 }
  0x5d   : > { %590 = vadd.xlane.f32.xlu1 %v589_v41  ;;  %587 = vadd.xlane.f32.xlu0 %v586_v42  ;;  %v775_v41 = vsel %vm461_vm0, %v737_v58, 0.0  ;;  %v772_v42 = vsel %vm461_vm0, %v736_v38, 0.0 }
  0x61   : > { %596 = vadd.xlane.f32.xlu1 %v595_v48  ;;  %593 = vadd.xlane.f32.xlu0 %v592_v49  ;;  %v781_v48 = vsel %vm461_vm0, %v739_v43, 0.0  ;;  %v778_v49 = vsel %vm561_vm1, %v738_v45, 0.0 }
  0x65   : > { %602 = vadd.xlane.f32.xlu1 %v601_v53  ;;  %599 = vadd.xlane.f32.xlu0 %v598_v54  ;;  %v787_v53 = vsel %vm561_vm1, %v741_v50, 0.0  ;;  %v784_v54 = vsel %vm461_vm0, %v740_v51, 0.0 }
  0x69   : > { %608 = vadd.xlane.f32.xlu1 %v607_v62  ;;  %605 = vadd.xlane.f32.xlu0 %v604_v63  ;;  %v745_v62 = vmul.f32 %v2947_v21, %v2811_v37  ;;  %v744_v63 = vmul.f32 %v2947_v21, %v2903_v44 }
  0x6b   : > { %v799_v0 = vsel %vm461_vm0, %v745_v62, 0.0  ;;  %v796_v2 = vsel %vm561_vm1, %v744_v63, 0.0  ;;  %v941_v63 = vmul.f32 %v2816_v40, %v3025_v31 }
  0x6d   : > { %614 = vadd.xlane.f32.xlu1 %v613_v11  ;;  %611 = vadd.xlane.f32.xlu0 %v610_v12  ;;  %v746_v11 = vmul.f32 %v2947_v21, %v2809_v36  ;;  %v805_v12 = vsel %vm561_vm1, %v747_v3, 0.0  ;;  %v944_v3 = vmul.f32 %v3025_v31, %v2825_v46 }
  0x6f   : > { %v802_v13 = vsel %vm461_vm0, %v746_v11, 0.0 }
  0x71   : > { %620 = vadd.xlane.f32.xlu1 %v619_v15  ;;  %617 = vadd.xlane.f32.xlu0 %v616_v16  ;;  %v749_v15 = vmul.f32 %v2814_v39, %v2947_v21  ;;  %v748_v16 = vmul.f32 %v2816_v40, %v2947_v21 }
  0x73   : > { %v811_v17 = vsel %vm461_vm0, %v749_v15, 0.0  ;;  %v808_v20 = vsel %vm461_vm0, %v748_v16, 0.0  ;;  %v943_v15 = vmul.f32 %v3025_v31, %v2827_v47 }
  0x75   : > { %626 = vadd.xlane.f32.xlu1 %v625_v23  ;;  %623 = vadd.xlane.f32.xlu0 %v622_v24  ;;  %v751_v23 = vmul.f32 %v2947_v21, %v2827_v47  ;;  %v750_v24 = vmul.f32 %v2947_v21, %v2927_v1 }
  0x77   : > { %v817_v25 = vsel %vm461_vm0, %v751_v23, 0.0  ;;  %v814_v26 = vsel %vm561_vm1, %v750_v24, 0.0  ;;  %v986_v24 = vsel %vm461_vm0, %v944_v3, 0.0 }
  0x79   : > { %758 = vadd.xlane.f32.xlu1 %v757_v57  ;;  %755 = vadd.xlane.f32.xlu0 %v754_v27  ;;  %v753_v57 = vmul.f32 %v2947_v21, %v2936_v14  ;;  %v752_v27 = vmul.f32 %v2947_v21, %v2825_v46  ;;  %v931_v21 = vmul.f32 %v3025_v31, %v2758_v5 }
  0x7b   : > { %v823_v32 = vsel %vm561_vm1, %v753_v57, 0.0  ;;  %v947_v34 = vsel %vm461_vm0, %v931_v21, 0.0 }
  0x7d   : > { %764 = vadd.xlane.f32.xlu1 %v763_v8  ;;  %761 = vadd.xlane.f32.xlu0 %v760_v33  ;;  %v820_v8 = vsel %vm461_vm0, %v752_v27, 0.0  ;;  %v932_v33 = vmul.f32 %v3025_v31, %v2762_v7  ;;  %v3106_v27 = vld [vmem:[%s4055_s3 + $0x4] ss:$0 sm:$0xff] }
  0x7f   : > { %v950_v6 = vsel %vm461_vm0, %v932_v33, 0.0 }
  0x81   : > { %770 = vadd.xlane.f32.xlu1 %v769_v35  ;;  %767 = vadd.xlane.f32.xlu0 %v766_v56  ;;  %v934_v35 = vmul.f32 %v2766_v9, %v3025_v31  ;;  %v933_v56 = vmul.f32 %v2768_v10, %v3025_v31 }
  0x83   : > { %v956_v58 = vsel %vm461_vm0, %v934_v35, 0.0  ;;  %v953_v38 = vsel %vm461_vm0, %v933_v56, 0.0 }
  0x85   : > { %776 = vadd.xlane.f32.xlu1 %v775_v41  ;;  %773 = vadd.xlane.f32.xlu0 %v772_v42  ;;  %v936_v41 = vmul.f32 %v3025_v31, %v2781_v18  ;;  %v935_v42 = vmul.f32 %v3025_v31, %v2783_v19 }
  0x87   : > { %v962_v43 = vsel %vm461_vm0, %v936_v41, 0.0  ;;  %v959_v45 = vsel %vm461_vm0, %v935_v42, 0.0  ;;  %v1018_v41 = vmul.f32 %v3106_v27, %v2864_v4 }
  0x89   : > { %782 = vadd.xlane.f32.xlu1 %v781_v48  ;;  %779 = vadd.xlane.f32.xlu0 %v778_v49  ;;  %v938_v48 = vmul.f32 %v2798_v29, %v3025_v31  ;;  %v937_v49 = vmul.f32 %v2800_v30, %v3025_v31 }
  0x8b   : > { %v968_v50 = vsel %vm461_vm0, %v938_v48, 0.0  ;;  %v965_v51 = vsel %vm461_vm0, %v937_v49, 0.0  ;;  %v1046_v48 = vsel %vm561_vm1, %v1018_v41, 0.0  ;;  %v1021_v49 = vmul.f32 %v3106_v27, %v2879_v22 }
  0x8d   : > { %788 = vadd.xlane.f32.xlu1 %v787_v53  ;;  %785 = vadd.xlane.f32.xlu0 %v784_v54  ;;  %v940_v53 = vmul.f32 %v3025_v31, %v2809_v36  ;;  %v939_v54 = vmul.f32 %v3025_v31, %v2811_v37 }
  0x8f   : > { %v971_v62 = vsel %vm461_vm0, %v939_v54, 0.0  ;;  %v1055_v54 = vsel %vm561_vm1, %v1021_v49, 0.0  ;;  %v1028_v49 = vmul.f32 %v3106_v27, %v2811_v37 }
  0x91   : > { %794 = vadd.xlane.f32.xlu1 %v793_v60  ;;  %791 = vadd.xlane.f32.xlu0 %v790_v61  ;;  %v974_v61 = vsel %vm461_vm0, %v940_v53, 0.0 }
  0x95   : > { %800 = vadd.xlane.f32.xlu1 %v799_v0  ;;  %797 = vadd.xlane.f32.xlu0 %v796_v2  ;;  %v2381_v0 = vld [vmem:[%s3066_s14] sm:$0xff]   ;;  %v980_v2 = vsel %vm461_vm0, %v942_v55, 0.0 }
  0x96   : > { %v3089_v16 = vunpack.c.h.bf16 %v2381_v0 }
  0x99   : > { %806 = vadd.xlane.f32.xlu1 %v805_v12  ;;  %803 = vadd.xlane.f32.xlu0 %v802_v13  ;;  %v977_v13 = vsel %vm461_vm0, %v941_v63, 0.0 }
  0x9d   : > { %812 = vadd.xlane.f32.xlu1 %v811_v17  ;;  %809 = vadd.xlane.f32.xlu0 %v808_v20  ;;  %v3091_v17 = vunpack.c.l.bf16 %v2381_v0 }
  0x9f   : > { %v945_v57 = vmul.f32 %v3091_v17, %v3025_v31 }
  0xa1   : > { %818 = vadd.xlane.f32.xlu1 %v817_v25  ;;  %815 = vadd.xlane.f32.xlu0 %v814_v26  ;;  %v983_v25 = vsel %vm461_vm0, %v943_v15, 0.0  ;;  %v946_v26 = vmul.f32 %v3089_v16, %v3025_v31  ;;  %v989_v21 = vsel %vm461_vm0, %v945_v57, 0.0  ;;  %v1016_v31 = vmul.f32 %v3106_v27, %v2758_v5 }
  0xa2   : > { %v1024_v15 = vmul.f32 %v3106_v27, %v2888_v28 }
  0xa3   : > { %v992_v33 = vsel %vm461_vm0, %v946_v26, 0.0 }
  0xa5   : > { %824 = vadd.xlane.f32.xlu1 %v823_v32  ;;  %821 = vadd.xlane.f32.xlu0 %v820_v8 }
  0xa9   : > { %951 = vadd.xlane.f32.xlu1 %v950_v6  ;;  %948 = vadd.xlane.f32.xlu0 %v947_v34  ;;  %v1017_v6 = vmul.f32 %v3106_v27, %v2762_v7 }
  0xab   : > { %v1043_v56 = vsel %vm461_vm0, %v1017_v6, 0.0 }
  0xad   : > { %957 = vadd.xlane.f32.xlu1 %v956_v58  ;;  %954 = vadd.xlane.f32.xlu0 %v953_v38  ;;  %v1040_v58 = vsel %vm461_vm0, %v1016_v31, 0.0  ;;  %v1019_v38 = vmul.f32 %v2768_v10, %v3106_v27 }
  0xb1   : > { %963 = vadd.xlane.f32.xlu1 %v962_v43  ;;  %960 = vadd.xlane.f32.xlu0 %v959_v45  ;;  %v1049_v45 = vsel %vm461_vm0, %v1019_v38, 0.0 }
  0xb5   : > { %969 = vadd.xlane.f32.xlu1 %v968_v50  ;;  %966 = vadd.xlane.f32.xlu0 %v965_v51  ;;  %v1020_v50 = vmul.f32 %v2766_v9, %v3106_v27 }
  0xb6   : > { %v3070_v59 = vpop.xlane.xlu1 %469  ;;  %v3072_v60 = vpop.xlane.xlu0 %463 }
  0xb7   : > { %v1052_v55 = vsel %vm461_vm0, %v1020_v50, 0.0 }
  0xb9   : > { %975 = vadd.xlane.f32.xlu1 %v974_v61  ;;  %972 = vadd.xlane.f32.xlu0 %v971_v62  ;;  %v1023_v61 = vmul.f32 %v3106_v27, %v2781_v18  ;;  %v1022_v62 = vmul.f32 %v3106_v27, %v2783_v19 }
  0xba   : > { %v3082_v11 = vpop.xlane.xlu1 %472  ;;  %v3084_v12 = vpop.xlane.xlu0 %466 }
  0xbb   : > { %v1058_v3 = vsel %vm461_vm0, %v1022_v62, 0.0  ;;  %v1031_v62 = vmul.f32 %v2816_v40, %v3106_v27 }
  0xbd   : > { %981 = vadd.xlane.f32.xlu1 %v980_v2  ;;  %978 = vadd.xlane.f32.xlu0 %v977_v13  ;;  %v1061_v2 = vsel %vm461_vm0, %v1023_v61, 0.0  ;;  %v1025_v13 = vmul.f32 %v2800_v30, %v3106_v27 }
  0xbe   : > { %v3093_v20 = vpop.xlane.xlu1 %478  ;;  %v3095_v23 = vpop.xlane.xlu0 %475 }
  0xbf   : > { %v1067_v57 = vsel %vm461_vm0, %v1025_v13, 0.0 }
  0xc1   : > { %987 = vadd.xlane.f32.xlu1 %v986_v24  ;;  %984 = vadd.xlane.f32.xlu0 %v983_v25  ;;  %v1027_v24 = vmul.f32 %v3106_v27, %v2903_v44 }
  0xc2   : > { %v3108_v32 = vpop.xlane.xlu1 %484  ;;  %v3110_v8 = vpop.xlane.xlu0 %481 }
  0xc5   : > { %993 = vadd.xlane.f32.xlu1 %v992_v33  ;;  %990 = vadd.xlane.f32.xlu0 %v989_v21  ;;  %v1064_v33 = vsel %vm561_vm1, %v1024_v15, 0.0  ;;  %v1026_v21 = vmul.f32 %v2798_v29, %v3106_v27  ;;  %v1076_v15 = vsel %vm461_vm0, %v1028_v49, 0.0 }
  0xc6   : > { %v3118_v34 = vpop.xlane.xlu1 %490  ;;  %v3120_v35 = vpop.xlane.xlu0 %487 }
  0xc9   : > { %1044 = vadd.xlane.f32.xlu1 %v1043_v56  ;;  %1041 = vadd.xlane.f32.xlu0 %v1040_v58  ;;  %v1073_v58 = vsel %vm561_vm1, %v1027_v24, 0.0  ;;  %v1030_v24 = vmul.f32 %v3106_v27, %v2912_v52 }
  0xca   : > { %v3128_v42 = vpop.xlane.xlu1 %496  ;;  %v3130_v43 = vpop.xlane.xlu0 %493 }
  0xcd   : > { %1050 = vadd.xlane.f32.xlu1 %v1049_v45  ;;  %1047 = vadd.xlane.f32.xlu0 %v1046_v48  ;;  %v1070_v45 = vsel %vm461_vm0, %v1026_v21, 0.0  ;;  %v1029_v48 = vmul.f32 %v3106_v27, %v2809_v36  ;;  %v1085_v21 = vsel %vm461_vm0, %v1031_v62, 0.0 }
  0xce   : > { %v3138_v51 = vpop.xlane.xlu1 %502  ;;  %v3140_v53 = vpop.xlane.xlu0 %499 }
  0xcf   : > { %v1079_v13 = vsel %vm461_vm0, %v1029_v48, 0.0 }
  0xd1   : > { %1056 = vadd.xlane.f32.xlu1 %v1055_v54  ;;  %1053 = vadd.xlane.f32.xlu0 %v1052_v55 }
  0xd2   : > { %v3148_v63 = vpop.xlane.xlu1 %508  ;;  %v3150_v0 = vpop.xlane.xlu0 %505 }
  0xd5   : > { %1062 = vadd.xlane.f32.xlu1 %v1061_v2  ;;  %1059 = vadd.xlane.f32.xlu0 %v1058_v3 }
  0xd6   : > { %v560_v25 = vpop.xlane.xlu1 %559  ;;  %v557_v26 = vpop.xlane.xlu0 %556 }
  0xd7   : > { %v654_v6 = vrot.slane %v560_v25, 1  ;;  %v653_v31 = vrot.slane %v557_v26, 1 }
  0xd9   : > { %v655_v56 = vsel %vm652_vm2, %v653_v31, %v654_v6  ;;  %1068 = vadd.xlane.f32.xlu1 %v1067_v57  ;;  %1065 = vadd.xlane.f32.xlu0 %v1064_v33 }
  0xda   : > { %v567_v38 = vpop.xlane.xlu1 %566  ;;  %v564_v41 = vpop.xlane.xlu0 %563  ;;  %v3172_v50 = vadd.f32 %v655_v56, %v3072_v60 }
  0xdb   : > { %v656_v54 = vrot.slane %v564_v41, 1  ;;  %v658_v55 = vrot.slane %v567_v38, 1 }
  0xdd   : > { %v657_v61 = vsel %vm652_vm2, %v654_v6, %v656_v54  ;;  %1074 = vadd.xlane.f32.xlu1 %v1073_v58  ;;  %1071 = vadd.xlane.f32.xlu0 %v1070_v45  ;;  %v1033_v6 = vmul.f32 %v3106_v27, %v2927_v1  ;;  %v1082_v58 = vsel %vm561_vm1, %v1030_v24, 0.0 }
  0xde   : > { %v573_v2 = vpop.xlane.xlu1 %572  ;;  %v570_v3 = vpop.xlane.xlu0 %569  ;;  %v3182_v60 = vadd.f32 %v657_v61, %v3084_v12  ;;  %v1032_v12 = vmul.f32 %v2814_v39, %v3106_v27 }
  0xdf   : > { %v661_v25 = vrot.slane %v573_v2, 1  ;;  %v659_v26 = vrot.slane %v570_v3, 1  ;;  %v1091_v54 = vsel %vm561_vm1, %v1033_v6, 0.0  ;;  %v1035_v2 = vmul.f32 %v3106_v27, %v2825_v46 }
  0xe0   : > { %v1088_v62 = vsel %vm461_vm0, %v1032_v12, 0.0 }
  0xe1   : > { %v660_v57 = vsel %vm652_vm2, %v658_v55, %v659_v26  ;;  %v662_v33 = vsel %vm652_vm2, %v659_v26, %v661_v25  ;;  %1080 = vadd.xlane.f32.xlu1 %v1079_v13  ;;  %1077 = vadd.xlane.f32.xlu0 %v1076_v15  ;;  %v1037_v25 = vmul.f32 %v3091_v17, %v3106_v27 }
  0xe2   : > { %v579_v31 = vpop.xlane.xlu1 %578  ;;  %v576_v56 = vpop.xlane.xlu0 %575  ;;  %v3193_v38 = vadd.f32 %v662_v33, %v3082_v11  ;;  %v3196_v41 = vadd.f32 %v660_v57, %v3070_v59  ;;  %v1034_v11 = vmul.f32 %v3106_v27, %v2827_v47  ;;  %v412_v59 = vld [vmem:[%s3066_s14 + $0x8] sm:$0x1]  ;;  %s3445_s14 = scalar_lea.vmem %s4054_s2, %s2320_s10 }
  0xe3   : > { %v664_v45 = vrot.slane %v579_v31, 1  ;;  %v663_v48 = vrot.slane %v576_v56, 1  ;;  %v3212_v26 = vunpack.c.l.bf16 %v412_v59 }
  0xe4   : > { %v1094_v6 = vsel %vm461_vm0, %v1034_v11, 0.0 }
  0xe5   : > { %v665_v49 = vsel %vm652_vm2, %v663_v48, %v664_v45  ;;  %1086 = vadd.xlane.f32.xlu1 %v1085_v21  ;;  %1083 = vadd.xlane.f32.xlu0 %v1082_v58  ;;  %v1097_v21 = vsel %vm461_vm0, %v1035_v2, 0.0  ;;  %v1103_v48 = vsel %vm461_vm0, %v1037_v25, 0.0 }
  0xe6   : > { %v585_v55 = vpop.xlane.xlu1 %584  ;;  %v582_v61 = vpop.xlane.xlu0 %581  ;;  %v3207_v3 = vadd.f32 %v665_v49, %v3095_v23  ;;  %v1036_v23 = vmul.f32 %v3106_v27, %v2936_v14  ;;  %v1039_v49 = vmul.f32 %v3106_v27, %v3212_v26 }
  0xe7   : > { %v666_v13 = vrot.slane %v582_v61, 1  ;;  %v668_v15 = vrot.slane %v585_v55, 1 }
  0xe8   : > { %v1100_v61 = vsel %vm561_vm1, %v1036_v23, 0.0 }
  0xe9   : > { %v667_v24 = vsel %vm652_vm2, %v664_v45, %v666_v13  ;;  %1092 = vadd.xlane.f32.xlu1 %v1091_v54  ;;  %1089 = vadd.xlane.f32.xlu0 %v1088_v62  ;;  %v3238_v13 = vld [vmem:[%s4055_s3 + $0x5] ss:$0 sm:$0xff] }
  0xea   : > { %v591_v57 = vpop.xlane.xlu1 %590  ;;  %v588_v33 = vpop.xlane.xlu0 %587  ;;  %v3219_v31 = vadd.f32 %v667_v24, %v3093_v20  ;;  %v1038_v20 = vmul.f32 %v3089_v16, %v3106_v27  ;;  %v1109_v24 = vsel %vm561_vm1, %v1039_v49, 0.0 }
  0xeb   : > { %v671_v56 = vrot.slane %v591_v57, 1  ;;  %v669_v58 = vrot.slane %v588_v33, 1  ;;  %v1213_v57 = vmul.f32 %v3238_v13, %v2758_v5  ;;  %v1215_v5 = vmul.f32 %v3238_v13, %v2864_v4 }
  0xed   : > { %v670_v12 = vsel %vm652_vm2, %v668_v15, %v669_v58  ;;  %v672_v45 = vsel %vm652_vm2, %v669_v58, %v671_v56  ;;  %1098 = vadd.xlane.f32.xlu1 %v1097_v21  ;;  %1095 = vadd.xlane.f32.xlu0 %v1094_v6  ;;  %v1216_v56 = vmul.f32 %v2768_v10, %v3238_v13  ;;  %v1243_v4 = vsel %vm561_vm1, %v1215_v5, 0.0 }
  0xee   : > { %v597_v54 = vpop.xlane.xlu1 %596  ;;  %v594_v55 = vpop.xlane.xlu0 %593  ;;  %v3230_v62 = vadd.f32 %v672_v45, %v3108_v32  ;;  %v3233_v2 = vadd.f32 %v670_v12, %v3110_v8  ;;  %v1106_v32 = vsel %vm461_vm0, %v1038_v20, 0.0  ;;  %v1214_v8 = vmul.f32 %v3238_v13, %v2762_v7 }
  0xef   : > { %v674_v11 = vrot.slane %v597_v54, 1  ;;  %v673_v59 = vrot.slane %v594_v55, 1  ;;  %v1237_v7 = vsel %vm461_vm0, %v1213_v57, 0.0  ;;  %v1218_v20 = vmul.f32 %v3238_v13, %v2879_v22 }
  0xf0   : > { %v1240_v45 = vsel %vm461_vm0, %v1214_v8, 0.0 }
  0xf1   : > { %v675_v15 = vsel %vm652_vm2, %v673_v59, %v674_v11  ;;  %1104 = vadd.xlane.f32.xlu1 %v1103_v48  ;;  %1101 = vadd.xlane.f32.xlu0 %v1100_v61  ;;  %v1246_v61 = vsel %vm461_vm0, %v1216_v56, 0.0  ;;  %v1252_v8 = vsel %vm561_vm1, %v1218_v20, 0.0 }
  0xf2   : > { %v603_v27 = vpop.xlane.xlu1 %602  ;;  %v600_v25 = vpop.xlane.xlu0 %599  ;;  %v3248_v33 = vadd.f32 %v675_v15, %v3120_v35 }
  0xf3   : > { %v676_v21 = vrot.slane %v600_v25, 1  ;;  %v678_v6 = vrot.slane %v603_v27, 1 }
  0xf5   : > { %v677_v23 = vsel %vm652_vm2, %v674_v11, %v676_v21  ;;  %1110 = vadd.xlane.f32.xlu1 %v1109_v24  ;;  %1107 = vadd.xlane.f32.xlu0 %v1106_v32 }
  0xf6   : > { %v609_v58 = vpop.xlane.xlu1 %608  ;;  %v606_v12 = vpop.xlane.xlu0 %605  ;;  %v3258_v35 = vadd.f32 %v677_v23, %v3118_v34  ;;  %v1217_v34 = vmul.f32 %v2766_v9, %v3238_v13  ;;  %v1220_v23 = vmul.f32 %v3238_v13, %v2781_v18 }
  0xf7   : > { %v681_v48 = vrot.slane %v609_v58, 1  ;;  %v679_v49 = vrot.slane %v606_v12, 1  ;;  %v1222_v58 = vmul.f32 %v2800_v30, %v3238_v13 }
  0xf9   : > { %v680_v54 = vsel %vm652_vm2, %v678_v6, %v679_v49  ;;  %v682_v55 = vsel %vm652_vm2, %v679_v49, %v681_v48  ;;  %1241 = vadd.xlane.f32.xlu1 %v1240_v45  ;;  %1238 = vadd.xlane.f32.xlu0 %v1237_v7  ;;  %v1249_v6 = vsel %vm461_vm0, %v1217_v34, 0.0  ;;  %v1221_v7 = vmul.f32 %v3238_v13, %v2888_v28 }
  0xfa   : > { %v615_v11 = vpop.xlane.xlu1 %614  ;;  %v612_v59 = vpop.xlane.xlu0 %611  ;;  %v3269_v15 = vadd.f32 %v682_v55, %v3128_v42  ;;  %v3272_v24 = vadd.f32 %v680_v54, %v3130_v43  ;;  %v1219_v42 = vmul.f32 %v3238_v13, %v2783_v19  ;;  %v1258_v49 = vsel %vm461_vm0, %v1220_v23, 0.0 }
  0xfb   : > { %v684_v27 = vrot.slane %v615_v11, 1  ;;  %v683_v25 = vrot.slane %v612_v59, 1  ;;  %v1264_v20 = vsel %vm461_vm0, %v1222_v58, 0.0  ;;  %v1224_v34 = vmul.f32 %v3238_v13, %v2903_v44 }
  0xfc   : > { %v1255_v54 = vsel %vm461_vm0, %v1219_v42, 0.0 }
  0xfd   : > { %v685_v32 = vsel %vm652_vm2, %v683_v25, %v684_v27  ;;  %1247 = vadd.xlane.f32.xlu1 %v1246_v61  ;;  %1244 = vadd.xlane.f32.xlu0 %v1243_v4  ;;  %v1261_v4 = vsel %vm561_vm1, %v1221_v7, 0.0 }
  0xfe   : > { %v621_v57 = vpop.xlane.xlu1 %620  ;;  %v618_v21 = vpop.xlane.xlu0 %617  ;;  %v3282_v43 = vadd.f32 %v685_v32, %v3140_v53 }
  0xff   : > { %v686_v56 = vrot.slane %v618_v21, 1  ;;  %v688_v12 = vrot.slane %v621_v57, 1 }
 0x101   : > { %v687_v45 = vsel %vm652_vm2, %v684_v27, %v686_v56  ;;  %1253 = vadd.xlane.f32.xlu1 %v1252_v8  ;;  %1250 = vadd.xlane.f32.xlu0 %v1249_v6  ;;  %v1270_v6 = vsel %vm561_vm1, %v1224_v34, 0.0  ;;  %v1230_v34 = vmul.f32 %v3238_v13, %v2927_v1 }
 0x102   : > { %v627_v5 = vpop.xlane.xlu1 %626  ;;  %v624_v48 = vpop.xlane.xlu0 %623  ;;  %v3292_v53 = vadd.f32 %v687_v45, %v3138_v51  ;;  %v1223_v51 = vmul.f32 %v2798_v29, %v3238_v13 }
 0x103   : > { %v691_v55 = vrot.slane %v627_v5, 1  ;;  %v689_v61 = vrot.slane %v624_v48, 1  ;;  %v1228_v5 = vmul.f32 %v2816_v40, %v3238_v13 }
 0x104   : > { %v1267_v58 = vsel %vm461_vm0, %v1223_v51, 0.0 }
 0x105   : > { %v690_v11 = vsel %vm652_vm2, %v688_v12, %v689_v61  ;;  %v692_v59 = vsel %vm652_vm2, %v689_v61, %v691_v55  ;;  %1259 = vadd.xlane.f32.xlu1 %v1258_v49  ;;  %1256 = vadd.xlane.f32.xlu0 %v1255_v54  ;;  %v1226_v12 = vmul.f32 %v3238_v13, %v2809_v36 }
 0x106   : > { %v759_v27 = vpop.xlane.xlu1 %758  ;;  %v756_v25 = vpop.xlane.xlu0 %755  ;;  %v3303_v32 = vadd.f32 %v692_v59, %v3148_v63  ;;  %v3306_v8 = vadd.f32 %v690_v11, %v3150_v0  ;;  %v1225_v63 = vmul.f32 %v3238_v13, %v2811_v37 }
 0x107   : > { %v852_v57 = vrot.slane %v759_v27, 2  ;;  %v851_v21 = vrot.slane %v756_v25, 2  ;;  %v1276_v55 = vsel %vm461_vm0, %v1226_v12, 0.0 }
 0x108   : > { %v1273_v61 = vsel %vm461_vm0, %v1225_v63, 0.0 }
 0x109   : > { %1265 = vadd.xlane.f32.xlu1 %v1264_v20  ;;  %1262 = vadd.xlane.f32.xlu0 %v1261_v4  ;;  %v853_v23 = vsel %vm850_vm3, %v851_v21, %v852_v57  ;;  %v1227_v20 = vmul.f32 %v3238_v13, %v2912_v52  ;;  %v1282_v4 = vsel %vm461_vm0, %v1228_v5, 0.0  ;;  %v1232_v5 = vmul.f32 %v3238_v13, %v2825_v46 }
 0x10a   : > { %v765_v42 = vpop.xlane.xlu1 %764  ;;  %v762_v56 = vpop.xlane.xlu0 %761  ;;  %v3316_v0 = vadd.f32 %v853_v23, %v3172_v50 }
 0x10b   : > { %v854_v45 = vrot.slane %v762_v56, 2  ;;  %v856_v7 = vrot.slane %v765_v42, 2  ;;  %v1279_v21 = vsel %vm561_vm1, %v1227_v20, 0.0 }
 0x10d   : > { %1271 = vadd.xlane.f32.xlu1 %v1270_v6  ;;  %1268 = vadd.xlane.f32.xlu0 %v1267_v58  ;;  %v855_v48 = vsel %vm850_vm3, %v852_v57, %v854_v45  ;;  %v1288_v58 = vsel %vm561_vm1, %v1230_v34, 0.0 }
 0x10e   : > { %v771_v49 = vpop.xlane.xlu1 %770  ;;  %v768_v54 = vpop.xlane.xlu0 %767  ;;  %v3326_v50 = vadd.f32 %v855_v48, %v3182_v60  ;;  %v1229_v60 = vmul.f32 %v2814_v39, %v3238_v13 }
 0x10f   : > { %v859_v11 = vrot.slane %v771_v49, 2  ;;  %v857_v59 = vrot.slane %v768_v54, 2  ;;  %v1234_v54 = vmul.f32 %v3091_v17, %v3238_v13 }
 0x111   : > { %1277 = vadd.xlane.f32.xlu1 %v1276_v55  ;;  %1274 = vadd.xlane.f32.xlu0 %v1273_v61  ;;  %v860_v27 = vsel %vm850_vm3, %v857_v59, %v859_v11  ;;  %v858_v25 = vsel %vm850_vm3, %v856_v7, %v857_v59  ;;  %v1285_v7 = vsel %vm461_vm0, %v1229_v60, 0.0  ;;  %v1294_v11 = vsel %vm461_vm0, %v1232_v5, 0.0 }
 0x112   : > { %v777_v51 = vpop.xlane.xlu1 %776  ;;  %v774_v57 = vpop.xlane.xlu0 %773  ;;  %v3337_v6 = vadd.f32 %v860_v27, %v3193_v38  ;;  %v3340_v23 = vadd.f32 %v858_v25, %v3196_v41  ;;  %v1231_v38 = vmul.f32 %v3238_v13, %v2827_v47  ;;  %v1300_v25 = vsel %vm461_vm0, %v1234_v54, 0.0 }
 0x113   : > { %v862_v42 = vrot.slane %v777_v51, 2  ;;  %v861_v56 = vrot.slane %v774_v57, 2  ;;  %v1236_v51 = vmul.f32 %v3238_v13, %v3212_v26 }
 0x114   : > { %v1291_v59 = vsel %vm461_vm0, %v1231_v38, 0.0 }
 0x115   : > { %1283 = vadd.xlane.f32.xlu1 %v1282_v4  ;;  %1280 = vadd.xlane.f32.xlu0 %v1279_v21  ;;  %v863_v12 = vsel %vm850_vm3, %v861_v56, %v862_v42  ;;  %v1233_v4 = vmul.f32 %v3238_v13, %v2936_v14  ;;  %v1306_v5 = vsel %vm561_vm1, %v1236_v51, 0.0 }
 0x116   : > { %v783_v63 = vpop.xlane.xlu1 %782  ;;  %v780_v45 = vpop.xlane.xlu0 %779  ;;  %v3350_v41 = vadd.f32 %v863_v12, %v3207_v3 }
 0x117   : > { %v864_v48 = vrot.slane %v780_v45, 2  ;;  %v866_v49 = vrot.slane %v783_v63, 2  ;;  %v1297_v56 = vsel %vm561_vm1, %v1233_v4, 0.0 }
 0x119   : > { %1289 = vadd.xlane.f32.xlu1 %v1288_v58  ;;  %1286 = vadd.xlane.f32.xlu0 %v1285_v7  ;;  %v865_v55 = vsel %vm850_vm3, %v862_v42, %v864_v48  ;;  %v3379_v7 = vld [vmem:[%s4055_s3 + $0x6] ss:$0 sm:$0xff] }
 0x11a   : > { %v789_v61 = vpop.xlane.xlu1 %788  ;;  %v786_v20 = vpop.xlane.xlu0 %785  ;;  %v3360_v3 = vadd.f32 %v865_v55, %v3219_v31  ;;  %v1235_v31 = vmul.f32 %v3089_v16, %v3238_v13 }
 0x11b   : > { %v869_v34 = vrot.slane %v789_v61, 2  ;;  %v867_v27 = vrot.slane %v786_v20, 2  ;;  %v1416_v20 = vmul.f32 %v3379_v7, %v2781_v18 }
 0x11c   : > { %v1303_v48 = vsel %vm461_vm0, %v1235_v31, 0.0 }
 0x11d   : > { %1295 = vadd.xlane.f32.xlu1 %v1294_v11  ;;  %1292 = vadd.xlane.f32.xlu0 %v1291_v59  ;;  %v870_v57 = vsel %vm850_vm3, %v867_v27, %v869_v34  ;;  %v868_v21 = vsel %vm850_vm3, %v866_v49, %v867_v27  ;;  %v1413_v49 = vmul.f32 %v2768_v10, %v3379_v7 }
 0x11e   : > { %v795_v60 = vpop.xlane.xlu1 %794  ;;  %v792_v42 = vpop.xlane.xlu0 %791  ;;  %v3371_v58 = vadd.f32 %v870_v57, %v3230_v62  ;;  %v3374_v12 = vadd.f32 %v868_v21, %v3233_v2  ;;  %v1414_v2 = vmul.f32 %v2766_v9, %v3379_v7  ;;  %v1415_v11 = vmul.f32 %v3379_v7, %v2783_v19 }
 0x11f   : > { %v872_v63 = vrot.slane %v795_v60, 2  ;;  %v871_v45 = vrot.slane %v792_v42, 2  ;;  %v1438_v21 = vsel %vm461_vm0, %v1416_v20, 0.0 }
 0x120   : > { %v1432_v27 = vsel %vm461_vm0, %v1414_v2, 0.0  ;;  %v1435_v60 = vsel %vm461_vm0, %v1415_v11, 0.0 }
 0x121   : > { %1301 = vadd.xlane.f32.xlu1 %v1300_v25  ;;  %1298 = vadd.xlane.f32.xlu0 %v1297_v56  ;;  %v873_v13 = vsel %vm850_vm3, %v871_v45, %v872_v63  ;;  %v1429_v25 = vsel %vm461_vm0, %v1413_v49, 0.0  ;;  %v1418_v45 = vmul.f32 %v2798_v29, %v3379_v7 }
 0x122   : > { %v801_v38 = vpop.xlane.xlu1 %800  ;;  %v798_v62 = vpop.xlane.xlu0 %797  ;;  %v3390_v54 = vadd.f32 %v873_v13, %v3248_v33 }
 0x123   : > { %v874_v55 = vrot.slane %v798_v62, 2  ;;  %v876_v61 = vrot.slane %v801_v38, 2 }
 0x125   : > { %1307 = vadd.xlane.f32.xlu1 %v1306_v5  ;;  %1304 = vadd.xlane.f32.xlu0 %v1303_v48  ;;  %v875_v59 = vsel %vm850_vm3, %v872_v63, %v874_v55  ;;  %v1420_v48 = vmul.f32 %v3379_v7, %v2809_v36 }
 0x126   : > { %v807_v4 = vpop.xlane.xlu1 %806  ;;  %v804_v34 = vpop.xlane.xlu0 %803  ;;  %v3402_v33 = vadd.f32 %v875_v59, %v3258_v35  ;;  %v1417_v35 = vmul.f32 %v2800_v30, %v3379_v7 }
 0x127   : > { %v879_v51 = vrot.slane %v807_v4, 2  ;;  %v877_v57 = vrot.slane %v804_v34, 2  ;;  %v1450_v4 = vsel %vm461_vm0, %v1420_v48, 0.0 }
 0x128   : > { %v1441_v20 = vsel %vm461_vm0, %v1417_v35, 0.0 }
 0x129   : > { %1433 = vadd.xlane.f32.xlu1 %v1432_v27  ;;  %1430 = vadd.xlane.f32.xlu0 %v1429_v25  ;;  %v880_v42 = vsel %vm850_vm3, %v877_v57, %v879_v51  ;;  %v878_v56 = vsel %vm850_vm3, %v876_v61, %v877_v57  ;;  %v1444_v61 = vsel %vm461_vm0, %v1418_v45, 0.0  ;;  %v1422_v57 = vmul.f32 %v2814_v39, %v3379_v7 }
 0x12a   : > { %v813_v31 = vpop.xlane.xlu1 %812  ;;  %v810_v63 = vpop.xlane.xlu0 %809  ;;  %v3414_v5 = vadd.f32 %v880_v42, %v3269_v15  ;;  %v3417_v13 = vadd.f32 %v878_v56, %v3272_v24  ;;  %v1419_v15 = vmul.f32 %v3379_v7, %v2811_v37  ;;  %v1424_v56 = vmul.f32 %v3379_v7, %v2825_v46 }
 0x12b   : > { %v882_v38 = vrot.slane %v813_v31, 2  ;;  %v881_v62 = vrot.slane %v810_v63, 2  ;;  %v1423_v31 = vmul.f32 %v3379_v7, %v2827_v47 }
 0x12c   : > { %v1447_v51 = vsel %vm461_vm0, %v1419_v15, 0.0  ;;  %v1462_v15 = vsel %vm461_vm0, %v1424_v56, 0.0  ;;  %v3497_v56 = vld [vmem:[%s4055_s3 + $0x7] ss:$0 sm:$0xff] }
 0x12d   : > { %1439 = vadd.xlane.f32.xlu1 %v1438_v21  ;;  %1436 = vadd.xlane.f32.xlu0 %v1435_v60  ;;  %v883_v2 = vsel %vm850_vm3, %v881_v62, %v882_v38 }
 0x12e   : > { %v819_v49 = vpop.xlane.xlu1 %818  ;;  %v816_v55 = vpop.xlane.xlu0 %815  ;;  %v3428_v24 = vadd.f32 %v883_v2, %v3282_v43  ;;  %v1421_v43 = vmul.f32 %v2816_v40, %v3379_v7 }
 0x12f   : > { %v884_v11 = vrot.slane %v816_v55, 2  ;;  %v886_v59 = vrot.slane %v819_v49, 2 }
 0x130   : > { %v1453_v62 = vsel %vm461_vm0, %v1421_v43, 0.0 }
 0x131   : > { %1445 = vadd.xlane.f32.xlu1 %v1444_v61  ;;  %1442 = vadd.xlane.f32.xlu0 %v1441_v20  ;;  %v885_v34 = vsel %vm850_vm3, %v882_v38, %v884_v11  ;;  %v1456_v38 = vsel %vm461_vm0, %v1422_v57, 0.0  ;;  %v2385_v61 = vld [vmem:[%s3445_s14] sm:$0xff]   ;;  %v2629_v20 = vmov 0  }
 0x132   : > { %v825_v27 = vpop.xlane.xlu1 %824  ;;  %v822_v25 = vpop.xlane.xlu0 %821  ;;  %v3438_v21 = vadd.f32 %v885_v34, %v3292_v53  ;;  %2467 = vset.pattern.permute.xlu0 %v2629_v20  ;;  %2468 = vset.pattern.permute.xlu1 %v2629_v20 }
 0x133   : > { %v889_v60 = vrot.slane %v825_v27, 2  ;;  %v887_v42 = vrot.slane %v822_v25, 2 }
 0x135   : > { %1451 = vadd.xlane.f32.xlu1 %v1450_v4  ;;  %1448 = vadd.xlane.f32.xlu0 %v1447_v51  ;;  %v890_v63 = vsel %vm850_vm3, %v887_v42, %v889_v60  ;;  %v888_v53 = vsel %vm850_vm3, %v886_v59, %v887_v42  ;;  %v3474_v4 = vunpack.c.l.bf16 %v2385_v61 }
 0x136   : > { %v952_v45 = vpop.xlane.xlu1 %951  ;;  %v949_v35 = vpop.xlane.xlu0 %948  ;;  %v3454_v48 = vadd.f32 %v890_v63, %v3303_v32  ;;  %v3457_v2 = vadd.f32 %v888_v53, %v3306_v8  ;;  %v1459_v32 = vsel %vm461_vm0, %v1423_v31, 0.0  ;;  %v1426_v8 = vmul.f32 %v3089_v16, %v3379_v7 }
 0x137   : > { %v3460_v49 = vadd.f32 %v952_v45, %v3326_v50  ;;  %v3463_v55 = vadd.f32 %v949_v35, %v3316_v0  ;;  %v1425_v50 = vmul.f32 %v3091_v17, %v3379_v7  ;;  %v3472_v0 = vunpack.c.h.bf16 %v2385_v61 }
 0x138   : > { %v1468_v57 = vsel %vm461_vm0, %v1426_v8, 0.0  ;;  %v1427_v42 = vmul.f32 %v3474_v4, %v3379_v7 }
 0x139   : > { %1457 = vadd.xlane.f32.xlu1 %v1456_v38  ;;  %1454 = vadd.xlane.f32.xlu0 %v1453_v62  ;;  %v1465_v43 = vsel %vm461_vm0, %v1425_v50, 0.0  ;;  %v1428_v60 = vmul.f32 %v3472_v0, %v3379_v7 }
 0x13a   : > { %v958_v11 = vpop.xlane.xlu1 %957  ;;  %v955_v59 = vpop.xlane.xlu0 %954  ;;  %v1471_v45 = vsel %vm461_vm0, %v1427_v42, 0.0 }
 0x13b   : > { %v3477_v34 = vadd.f32 %v958_v11, %v3337_v6  ;;  %v3480_v27 = vadd.f32 %v955_v59, %v3340_v23  ;;  %v1474_v53 = vsel %vm461_vm0, %v1428_v60, 0.0 }
 0x13d   : > { %1463 = vadd.xlane.f32.xlu1 %v1462_v15  ;;  %1460 = vadd.xlane.f32.xlu0 %v1459_v32  ;;  %v1501_v15 = vmul.f32 %v3497_v56, %v2783_v19  ;;  %v1500_v32 = vmul.f32 %v3497_v56, %v2879_v22 }
 0x13e   : > { %v964_v25 = vpop.xlane.xlu1 %963  ;;  %v961_v51 = vpop.xlane.xlu0 %960 }
 0x13f   : > { %v3489_v6 = vadd.f32 %v964_v25, %v3360_v3  ;;  %v3492_v23 = vadd.f32 %v961_v51, %v3350_v41  ;;  %v1499_v3 = vmul.f32 %v2766_v9, %v3497_v56  ;;  %v1498_v41 = vmul.f32 %v2768_v10, %v3497_v56 }
 0x140   : > { %v1531_v8 = vsel %vm461_vm0, %v1501_v15, 0.0  ;;  %v1528_v50 = vsel %vm561_vm1, %v1500_v32, 0.0  ;;  %v1503_v25 = vmul.f32 %v3497_v56, %v2888_v28  ;;  %v1502_v51 = vmul.f32 %v3497_v56, %v2781_v18 }
 0x141   : > { %1469 = vadd.xlane.f32.xlu1 %v1468_v57  ;;  %1466 = vadd.xlane.f32.xlu0 %v1465_v43  ;;  %v1525_v61 = vsel %vm461_vm0, %v1499_v3, 0.0  ;;  %v1522_v20 = vsel %vm461_vm0, %v1498_v41, 0.0 }
 0x142   : > { %v970_v31 = vpop.xlane.xlu1 %969  ;;  %v967_v63 = vpop.xlane.xlu0 %966  ;;  %v1537_v60 = vsel %vm561_vm1, %v1503_v25, 0.0  ;;  %v1534_v42 = vsel %vm461_vm0, %v1502_v51, 0.0 }
 0x143   : > { %v3506_v7 = vadd.f32 %v970_v31, %v3371_v58  ;;  %v3509_v35 = vadd.f32 %v967_v63, %v3374_v12  ;;  %v1505_v31 = vmul.f32 %v2798_v29, %v3497_v56  ;;  %v1504_v63 = vmul.f32 %v2800_v30, %v3497_v56 }
 0x145   : > { %1475 = vadd.xlane.f32.xlu1 %v1474_v53  ;;  %1472 = vadd.xlane.f32.xlu0 %v1471_v45  ;;  %v1543_v3 = vsel %vm461_vm0, %v1505_v31, 0.0  ;;  %v1540_v41 = vsel %vm461_vm0, %v1504_v63, 0.0 }
 0x146   : > { %v976_v38 = vpop.xlane.xlu1 %975  ;;  %v973_v62 = vpop.xlane.xlu0 %972 }
 0x147   : > { %v3518_v58 = vadd.f32 %v976_v38, %v3402_v33  ;;  %v3521_v12 = vadd.f32 %v973_v62, %v3390_v54  ;;  %v1507_v38 = vmul.f32 %v3497_v56, %v2811_v37  ;;  %v1506_v62 = vmul.f32 %v3497_v56, %v2903_v44 }
 0x149   : > { %1526 = vadd.xlane.f32.xlu1 %v1525_v61  ;;  %1523 = vadd.xlane.f32.xlu0 %v1522_v20  ;;  %v1509_v61 = vmul.f32 %v3497_v56, %v2912_v52  ;;  %v1549_v32 = vsel %vm461_vm0, %v1507_v38, 0.0 }
 0x14a   : > { %v982_v11 = vpop.xlane.xlu1 %981  ;;  %v979_v59 = vpop.xlane.xlu0 %978 }
 0x14b   : > { %v3530_v33 = vadd.f32 %v982_v11, %v3414_v5  ;;  %v3533_v54 = vadd.f32 %v979_v59, %v3417_v13  ;;  %v1546_v11 = vsel %vm561_vm1, %v1506_v62, 0.0  ;;  %v1508_v59 = vmul.f32 %v3497_v56, %v2809_v36 }
 0x14d   : > { %1532 = vadd.xlane.f32.xlu1 %v1531_v8  ;;  %1529 = vadd.xlane.f32.xlu0 %v1528_v50  ;;  %v1555_v50 = vsel %vm561_vm1, %v1509_v61, 0.0 }
 0x14e   : > { %v988_v57 = vpop.xlane.xlu1 %987  ;;  %v985_v43 = vpop.xlane.xlu0 %984 }
 0x14f   : > { %v3542_v5 = vadd.f32 %v988_v57, %v3438_v21  ;;  %v3545_v13 = vadd.f32 %v985_v43, %v3428_v24  ;;  %v1552_v43 = vsel %vm461_vm0, %v1508_v59, 0.0 }
 0x151   : > { %1538 = vadd.xlane.f32.xlu1 %v1537_v60  ;;  %1535 = vadd.xlane.f32.xlu0 %v1534_v42 }
 0x152   : > { %v994_v53 = vpop.xlane.xlu1 %993  ;;  %v991_v45 = vpop.xlane.xlu0 %990 }
 0x153   : > { %v3554_v21 = vadd.f32 %v994_v53, %v3454_v48  ;;  %v3557_v24 = vadd.f32 %v991_v45, %v3457_v2  ;;  %v3568_v2 = vld [vmem:[%s4055_s3 + $0x8] ss:$0 sm:$0xff] }
 0x154   : > { %v1696_v60 = vmul.f32 %v2766_v9, %v3568_v2  ;;  %v1695_v42 = vmul.f32 %v2768_v10, %v3568_v2  ;;  %v1698_v45 = vmul.f32 %v3568_v2, %v2783_v19  ;;  %v1697_v10 = vmul.f32 %v3568_v2, %v2879_v22 }
 0x155   : > { %1544 = vadd.xlane.f32.xlu1 %v1543_v3  ;;  %1541 = vadd.xlane.f32.xlu0 %v1540_v41 }
 0x156   : > { %v1045_v20 = vpop.xlane.xlu1 %1044  ;;  %v1042_v15 = vpop.xlane.xlu0 %1041  ;;  %v1722_v62 = vsel %vm461_vm0, %v1696_v60, 0.0  ;;  %v1719_v9 = vsel %vm461_vm0, %v1695_v42, 0.0  ;;  %v1728_v19 = vsel %vm461_vm0, %v1698_v45, 0.0  ;;  %v1725_v22 = vsel %vm561_vm1, %v1697_v10, 0.0 }
 0x157   : > { %v1137_v8 = vrot.slane %v1045_v20, 1  ;;  %v1136_v48 = vrot.slane %v1042_v15, 1  ;;  %v1700_v15 = vmul.f32 %v3568_v2, %v2888_v28  ;;  %v1701_v45 = vmul.f32 %v2800_v30, %v3568_v2 }
 0x159   : > { %1550 = vadd.xlane.f32.xlu1 %v1549_v32  ;;  %1547 = vadd.xlane.f32.xlu0 %v1546_v11  ;;  %v1138_v25 = vsel %vm652_vm2, %v1136_v48, %v1137_v8  ;;  %v1734_v28 = vsel %vm561_vm1, %v1700_v15, 0.0  ;;  %v1737_v30 = vsel %vm461_vm0, %v1701_v45, 0.0 }
 0x15a   : > { %v1051_v51 = vpop.xlane.xlu1 %1050  ;;  %v1048_v57 = vpop.xlane.xlu0 %1047  ;;  %v3578_v31 = vadd.f32 %v1138_v25, %v3463_v55 }
 0x15b   : > { %v1139_v63 = vrot.slane %v1048_v57, 1  ;;  %v1141_v53 = vrot.slane %v1051_v51, 1 }
 0x15d   : > { %1556 = vadd.xlane.f32.xlu1 %v1555_v50  ;;  %1553 = vadd.xlane.f32.xlu0 %v1552_v43  ;;  %v1140_v3 = vsel %vm652_vm2, %v1137_v8, %v1139_v63 }
 0x15e   : > { %v1057_v41 = vpop.xlane.xlu1 %1056  ;;  %v1054_v38 = vpop.xlane.xlu0 %1053  ;;  %v3588_v55 = vadd.f32 %v1140_v3, %v3460_v49  ;;  %v1699_v49 = vmul.f32 %v3568_v2, %v2781_v18  ;;  %v1511_v18 = vmul.f32 %v2814_v39, %v3497_v56  ;;  %v1512_v3 = vmul.f32 %v3497_v56, %v2927_v1 }
 0x15f   : > { %v1144_v61 = vrot.slane %v1057_v41, 1  ;;  %v1142_v20 = vrot.slane %v1054_v38, 1 }
 0x160   : > { %v1731_v42 = vsel %vm461_vm0, %v1699_v49, 0.0 }
 0x161   : > { %1723 = vadd.xlane.f32.xlu1 %v1722_v62  ;;  %1720 = vadd.xlane.f32.xlu0 %v1719_v9  ;;  %v1145_v32 = vsel %vm652_vm2, %v1142_v20, %v1144_v61  ;;  %v1143_v11 = vsel %vm652_vm2, %v1141_v53, %v1142_v20  ;;  %v1561_v9 = vsel %vm461_vm0, %v1511_v18, 0.0 }
 0x162   : > { %v1063_v59 = vpop.xlane.xlu1 %1062  ;;  %v1060_v8 = vpop.xlane.xlu0 %1059  ;;  %v3599_v48 = vadd.f32 %v1145_v32, %v3477_v34  ;;  %v3602_v50 = vadd.f32 %v1143_v11, %v3480_v27  ;;  %v1510_v34 = vmul.f32 %v2816_v40, %v3497_v56 }
 0x163   : > { %v1147_v25 = vrot.slane %v1063_v59, 1  ;;  %v1146_v51 = vrot.slane %v1060_v8, 1  ;;  %v1703_v8 = vmul.f32 %v3568_v2, %v2903_v44 }
 0x164   : > { %v1558_v10 = vsel %vm461_vm0, %v1510_v34, 0.0 }
 0x165   : > { %1729 = vadd.xlane.f32.xlu1 %v1728_v19  ;;  %1726 = vadd.xlane.f32.xlu0 %v1725_v22  ;;  %v1148_v57 = vsel %vm652_vm2, %v1146_v51, %v1147_v25  ;;  %v1564_v19 = vsel %vm561_vm1, %v1512_v3, 0.0  ;;  %v1704_v3 = vmul.f32 %v3568_v2, %v2811_v37  ;;  %v1705_v37 = vmul.f32 %v3568_v2, %v2809_v36 }
 0x166   : > { %v1069_v43 = vpop.xlane.xlu1 %1068  ;;  %v1066_v60 = vpop.xlane.xlu0 %1065  ;;  %v3612_v27 = vadd.f32 %v1148_v57, %v3492_v23 }
 0x167   : > { %v1149_v63 = vrot.slane %v1066_v60, 1  ;;  %v1151_v53 = vrot.slane %v1069_v43, 1 }
 0x169   : > { %1735 = vadd.xlane.f32.xlu1 %v1734_v28  ;;  %1732 = vadd.xlane.f32.xlu0 %v1731_v42  ;;  %v1150_v41 = vsel %vm652_vm2, %v1147_v25, %v1149_v63  ;;  %v1514_v28 = vmul.f32 %v3497_v56, %v2825_v46 }
 0x16a   : > { %v1075_v38 = vpop.xlane.xlu1 %1074  ;;  %v1072_v62 = vpop.xlane.xlu0 %1071  ;;  %v3622_v23 = vadd.f32 %v1150_v41, %v3489_v6  ;;  %v1702_v6 = vmul.f32 %v2798_v29, %v3568_v2  ;;  %v1743_v29 = vsel %vm561_vm1, %v1703_v8, 0.0  ;;  %v1707_v8 = vmul.f32 %v2816_v40, %v3568_v2  ;;  %v3701_v40 = vld [vmem:[%s3445_s14 + $0x8] sm:$0x1]  ;;  %s2167_s14 = scalar_lea.sflag [#allocation4], %s334_s13 }
 0x16b   : > { %v1154_v61 = vrot.slane %v1075_v38, 1  ;;  %v1152_v20 = vrot.slane %v1072_v62, 1  ;;  %v1570_v18 = vsel %vm461_vm0, %v1514_v28, 0.0 }
 0x16d   : > { %1562 = vadd.xlane.f32.xlu1 %v1561_v9  ;;  %1559 = vadd.xlane.f32.xlu0 %v1558_v10  ;;  %v1155_v15 = vsel %vm652_vm2, %v1152_v20, %v1154_v61  ;;  %v1153_v32 = vsel %vm652_vm2, %v1151_v53, %v1152_v20  ;;  %v1746_v9 = vsel %vm461_vm0, %v1704_v3, 0.0  ;;  %v1706_v61 = vmul.f32 %v3568_v2, %v2912_v52 }
 0x16e   : > { %v1081_v11 = vpop.xlane.xlu1 %1080  ;;  %v1078_v59 = vpop.xlane.xlu0 %1077  ;;  %v3633_v22 = vadd.f32 %v1155_v15, %v3506_v7  ;;  %v3636_v49 = vadd.f32 %v1153_v32, %v3509_v35  ;;  %v1740_v7 = vsel %vm461_vm0, %v1702_v6, 0.0  ;;  %v1513_v35 = vmul.f32 %v3497_v56, %v2827_v47 }
 0x16f   : > { %v1157_v25 = vrot.slane %v1081_v11, 1  ;;  %v1156_v51 = vrot.slane %v1078_v59, 1  ;;  %v1517_v15 = vmul.f32 %v3089_v16, %v3497_v56  ;;  %v1516_v32 = vmul.f32 %v3091_v17, %v3497_v56 }
 0x170   : > { %v1567_v45 = vsel %vm461_vm0, %v1513_v35, 0.0  ;;  %v1518_v6 = vmul.f32 %v3497_v56, %v3212_v26  ;;  %v1519_v3 = vmul.f32 %v3474_v4, %v3497_v56 }
 0x171   : > { %1738 = vadd.xlane.f32.xlu1 %v1737_v30  ;;  %1565 = vadd.xlane.f32.xlu0 %v1564_v19  ;;  %v1158_v57 = vsel %vm652_vm2, %v1156_v51, %v1157_v25  ;;  %v1752_v30 = vsel %vm561_vm1, %v1706_v61, 0.0  ;;  %v1749_v19 = vsel %vm461_vm0, %v1705_v37, 0.0  ;;  %v1579_v11 = vsel %vm461_vm0, %v1517_v15, 0.0 }
 0x172   : > { %v3641_v43 = vpop.xlane.xlu1 %1086  ;;  %v1084_v44 = vpop.xlane.xlu0 %1083  ;;  %v3648_v60 = vadd.f32 %v1158_v57, %v3521_v12  ;;  %v1515_v12 = vmul.f32 %v3497_v56, %v2936_v14  ;;  %v1576_v59 = vsel %vm461_vm0, %v1516_v32, 0.0  ;;  %v1708_v51 = vmul.f32 %v2814_v39, %v3568_v2 }
 0x173   : > { %v1159_v42 = vrot.slane %v1084_v44, 1  ;;  %v1755_v44 = vsel %vm461_vm0, %v1707_v8, 0.0  ;;  %v1710_v37 = vmul.f32 %v3568_v2, %v2827_v47  ;;  %v1712_v47 = vmul.f32 %v3568_v2, %v2936_v14 }
 0x174   : > { %v1573_v10 = vsel %vm561_vm1, %v1515_v12, 0.0  ;;  %v1407_v12 = vunpack.c.l.bf16 %v3701_v40 }
 0x175   : > { %1744 = vadd.xlane.f32.xlu1 %v1743_v29  ;;  %1741 = vadd.xlane.f32.xlu0 %v1740_v7  ;;  %v1160_v34 = vsel %vm652_vm2, %v1157_v25, %v1159_v42  ;;  %v1709_v25 = vmul.f32 %v3568_v2, %v2927_v1  ;;  %v1582_v29 = vsel %vm561_vm1, %v1518_v6, 0.0  ;;  %v1770_v14 = vsel %vm561_vm1, %v1712_v47, 0.0 }
 0x176   : > { %v3652_v63 = vpop.xlane.xlu1 %1092  ;;  %v3654_v53 = vpop.xlane.xlu0 %1089  ;;  %v3662_v41 = vadd.f32 %v1160_v34, %v3518_v58 }
 0x177   : > { %v1761_v42 = vsel %vm561_vm1, %v1709_v25, 0.0  ;;  %v1764_v25 = vsel %vm461_vm0, %v1710_v37, 0.0 }
 0x179   : > { %1571 = vadd.xlane.f32.xlu1 %v1570_v18  ;;  %1568 = vadd.xlane.f32.xlu0 %v1567_v45  ;;  %v1758_v18 = vsel %vm461_vm0, %v1708_v51, 0.0  ;;  %v1520_v45 = vmul.f32 %v3472_v0, %v3497_v56 }
 0x17a   : > { %v3664_v38 = vpop.xlane.xlu1 %1098  ;;  %v3666_v62 = vpop.xlane.xlu0 %1095 }
 0x17b   : > { %v1588_v32 = vsel %vm461_vm0, %v1520_v45, 0.0 }
 0x17d   : > { %1747 = vadd.xlane.f32.xlu1 %v1746_v9  ;;  %1574 = vadd.xlane.f32.xlu0 %v1573_v10 }
 0x17e   : > { %v3674_v58 = vpop.xlane.xlu1 %1104  ;;  %v3676_v20 = vpop.xlane.xlu0 %1101 }
 0x181   : > { %1753 = vadd.xlane.f32.xlu1 %v1752_v30  ;;  %1750 = vadd.xlane.f32.xlu0 %v1749_v19 }
 0x182   : > { %v3684_v52 = vpop.xlane.xlu1 %1110  ;;  %v3686_v36 = vpop.xlane.xlu0 %1107 }
 0x185   : > { %1580 = vadd.xlane.f32.xlu1 %v1579_v11  ;;  %1577 = vadd.xlane.f32.xlu0 %v1576_v59  ;;  %v1585_v11 = vsel %vm461_vm0, %v1519_v3, 0.0  ;;  %v1521_v59 = vmul.f32 %v3497_v56, %v1407_v12  ;;  %v1716_v3 = vmul.f32 %v3474_v4, %v3568_v2 }
 0x186   : > { %v1242_v28 = vpop.xlane.xlu1 %1241  ;;  %v1239_v57 = vpop.xlane.xlu0 %1238 }
 0x187   : > { %v1334_v7 = vrot.slane %v1242_v28, 2  ;;  %v1333_v35 = vrot.slane %v1239_v57, 2  ;;  %v1591_v56 = vsel %vm561_vm1, %v1521_v59, 0.0  ;;  %v1782_v4 = vsel %vm461_vm0, %v1716_v3, 0.0 }
 0x189   : > { %1756 = vadd.xlane.f32.xlu1 %v1755_v44  ;;  %1583 = vadd.xlane.f32.xlu0 %v1582_v29  ;;  %v1335_v1 = vsel %vm850_vm3, %v1333_v35, %v1334_v7 }
 0x18a   : > { %v1248_v34 = vpop.xlane.xlu1 %1247  ;;  %v1245_v39 = vpop.xlane.xlu0 %1244  ;;  %v3712_v9 = vadd.f32 %v1335_v1, %v3578_v31 }
 0x18b   : > { %v1336_v10 = vrot.slane %v1245_v39, 2  ;;  %v1338_v61 = vrot.slane %v1248_v34, 2 }
 0x18d   : > { %1762 = vadd.xlane.f32.xlu1 %v1761_v42  ;;  %1759 = vadd.xlane.f32.xlu0 %v1758_v18  ;;  %v1337_v30 = vsel %vm850_vm3, %v1334_v7, %v1336_v10  ;;  %v1715_v10 = vmul.f32 %v3568_v2, %v3212_v26 }
 0x18e   : > { %v1254_v19 = vpop.xlane.xlu1 %1253  ;;  %v1251_v15 = vpop.xlane.xlu0 %1250  ;;  %v3721_v31 = vadd.f32 %v1337_v30, %v3588_v55  ;;  %v1711_v55 = vmul.f32 %v3568_v2, %v2825_v46  ;;  %v1714_v46 = vmul.f32 %v3089_v16, %v3568_v2 }
 0x18f   : > { %v1341_v8 = vrot.slane %v1254_v19, 2  ;;  %v1339_v6 = vrot.slane %v1251_v15, 2 }
 0x190   : > { %v1767_v34 = vsel %vm461_vm0, %v1711_v55, 0.0  ;;  %v1776_v30 = vsel %vm461_vm0, %v1714_v46, 0.0 }
 0x191   : > { %1589 = vadd.xlane.f32.xlu1 %v1588_v32  ;;  %1586 = vadd.xlane.f32.xlu0 %v1585_v11  ;;  %v1342_v51 = vsel %vm850_vm3, %v1339_v6, %v1341_v8  ;;  %v1340_v28 = vsel %vm850_vm3, %v1338_v61, %v1339_v6  ;;  %v1779_v32 = vsel %vm561_vm1, %v1715_v10, 0.0  ;;  %v1718_v6 = vmul.f32 %v3568_v2, %v1407_v12 }
 0x192   : > { %v1260_v57 = vpop.xlane.xlu1 %1259  ;;  %v1257_v44 = vpop.xlane.xlu0 %1256  ;;  %v3732_v29 = vadd.f32 %v1342_v51, %v3599_v48  ;;  %v3735_v7 = vadd.f32 %v1340_v28, %v3602_v50  ;;  %v1713_v48 = vmul.f32 %v3091_v17, %v3568_v2 }
 0x193   : > { %v1344_v35 = vrot.slane %v1260_v57, 2  ;;  %v1343_v40 = vrot.slane %v1257_v44, 2  ;;  %v1161_v57 = vrot.slane %v3641_v43, 1  ;;  %v1164_v44 = vrot.slane %v3652_v63, 1 }
 0x194   : > { %v1773_v17 = vsel %vm461_vm0, %v1713_v48, 0.0 }
 0x195   : > { %1765 = vadd.xlane.f32.xlu1 %v1764_v25  ;;  %1592 = vadd.xlane.f32.xlu0 %v1591_v56  ;;  %v1345_v42 = vsel %vm850_vm3, %v1343_v40, %v1344_v35  ;;  %v1162_v56 = vrot.slane %v3654_v53, 1  ;;  %v1167_v53 = vrot.slane %v3664_v38, 1  ;;  %v1166_v40 = vrot.slane %v3666_v62, 1 }
 0x196   : > { %v1266_v18 = vpop.xlane.xlu1 %1265  ;;  %v1263_v1 = vpop.xlane.xlu0 %1262  ;;  %v3745_v50 = vadd.f32 %v1345_v42, %v3612_v27 }
 0x197   : > { %v1346_v39 = vrot.slane %v1263_v1, 2  ;;  %v1348_v45 = vrot.slane %v1266_v18, 2  ;;  %v1165_v43 = vsel %vm652_vm2, %v1162_v56, %v1164_v44  ;;  %v1163_v63 = vsel %vm652_vm2, %v1161_v57, %v1162_v56 }
 0x198   : > { %v1203_v48 = vadd.f32 %v1165_v43, %v3530_v33  ;;  %v1168_v3 = vsel %vm652_vm2, %v1166_v40, %v1167_v53  ;;  %v2330_v43 = vld [vmem:[#allocation2] ss:$0 sm:$0xff] }
 0x199   : > { %1771 = vadd.xlane.f32.xlu1 %v1770_v14  ;;  %1768 = vadd.xlane.f32.xlu0 %v1767_v34  ;;  %v1347_v61 = vsel %vm850_vm3, %v1344_v35, %v1346_v39  ;;  %v1202_v39 = vadd.f32 %v1163_v63, %v3533_v54  ;;  %v1204_v33 = vadd.f32 %v1168_v3, %v3545_v13  ;;  %v1174_v54 = vrot.slane %v3684_v52, 1 }
 0x19a   : > { %v1272_v37 = vpop.xlane.xlu1 %1271  ;;  %v1269_v16 = vpop.xlane.xlu0 %1268  ;;  %v3755_v27 = vadd.f32 %v1347_v61, %v3622_v23  ;;  %v1717_v23 = vmul.f32 %v3472_v0, %v3568_v2  ;;  %v1788_v2 = vsel %vm561_vm1, %v1718_v6, 0.0 }
 0x19b   : > { %v1351_v19 = vrot.slane %v1272_v37, 2  ;;  %v1349_v15 = vrot.slane %v1269_v16, 2 }
 0x19d   : > { %1777 = vadd.xlane.f32.xlu1 %v1776_v30  ;;  %1774 = vadd.xlane.f32.xlu0 %v1773_v17  ;;  %v1352_v26 = vsel %vm850_vm3, %v1349_v15, %v1351_v19  ;;  %v1350_v11 = vsel %vm850_vm3, %v1348_v45, %v1349_v15  ;;  %v1169_v45 = vrot.slane %v3676_v20, 1  ;;  %v1171_v17 = vrot.slane %v3674_v58, 1 }
 0x19e   : > { %v1278_v59 = vpop.xlane.xlu1 %1277  ;;  %v1275_v8 = vpop.xlane.xlu0 %1274  ;;  %v3765_v25 = vadd.f32 %v1352_v26, %v3633_v22  ;;  %v3768_v47 = vadd.f32 %v1350_v11, %v3636_v49  ;;  %v1785_v22 = vsel %vm461_vm0, %v1717_v23, 0.0  ;;  %v1172_v20 = vrot.slane %v3686_v36, 1 }
 0x19f   : > { %v1354_v51 = vrot.slane %v1278_v59, 2  ;;  %v1353_v28 = vrot.slane %v1275_v8, 2  ;;  %v1170_v19 = vsel %vm652_vm2, %v1167_v53, %v1169_v45 }
 0x1a0   : > { %v1205_v59 = vadd.f32 %v1170_v19, %v3542_v5  ;;  %v1175_v58 = vsel %vm652_vm2, %v1172_v20, %v1174_v54  ;;  %v1173_v13 = vsel %vm652_vm2, %v1171_v17, %v1172_v20 }
 0x1a1   : > { %1783 = vadd.xlane.f32.xlu1 %v1782_v4  ;;  %1780 = vadd.xlane.f32.xlu0 %v1779_v32  ;;  %v1355_v12 = vsel %vm850_vm3, %v1353_v28, %v1354_v51  ;;  %v1207_v57 = vadd.f32 %v1175_v58, %v3554_v21  ;;  %v1206_v44 = vadd.f32 %v1173_v13, %v3557_v24 }
 0x1a2   : > { %v1284_v55 = vpop.xlane.xlu1 %1283  ;;  %v1281_v0 = vpop.xlane.xlu0 %1280  ;;  %v3777_v49 = vadd.f32 %v1355_v12, %v3648_v60 }
 0x1a3   : > { %v1356_v35 = vrot.slane %v1281_v0, 2  ;;  %v1358_v14 = vrot.slane %v1284_v55, 2 }
 0x1a5   : > { %1789 = vadd.xlane.f32.xlu1 %v1788_v2  ;;  %1786 = vadd.xlane.f32.xlu0 %v1785_v22  ;;  %v1357_v42 = vsel %vm850_vm3, %v1354_v51, %v1356_v35 }
 0x1a6   : > { %v1290_v18 = vpop.xlane.xlu1 %1289  ;;  %v1287_v1 = vpop.xlane.xlu0 %1286  ;;  %v1398_v34 = vadd.f32 %v1357_v42, %v3662_v41 }
 0x1a7   : > { %v1361_v60 = vrot.slane %v1290_v18, 2  ;;  %v1359_v46 = vrot.slane %v1287_v1, 2 }
 0x1a9   : > { %v1362_v38 = vsel %vm850_vm3, %v1359_v46, %v1361_v60  ;;  %v1360_v62 = vsel %vm850_vm3, %v1358_v14, %v1359_v46 }
 0x1aa   : > { %v1296_v10 = vpop.xlane.xlu1 %1295  ;;  %v1293_v61 = vpop.xlane.xlu0 %1292  ;;  %v1400_v37 = vadd.f32 %v1362_v38, %v1203_v48  ;;  %v1399_v16 = vadd.f32 %v1360_v62, %v1202_v39 }
 0x1ab   : > { %v1364_v30 = vrot.slane %v1296_v10, 2  ;;  %v1363_v41 = vrot.slane %v1293_v61, 2 }
 0x1ad   : > { %v1365_v15 = vsel %vm850_vm3, %v1363_v41, %v1364_v30 }
 0x1ae   : > { %v1302_v4 = vpop.xlane.xlu1 %1301  ;;  %v1299_v32 = vpop.xlane.xlu0 %1298  ;;  %v1401_v26 = vadd.f32 %v1365_v15, %v1204_v33 }
 0x1af   : > { %v1366_v11 = vrot.slane %v1299_v32, 2  ;;  %v1368_v8 = vrot.slane %v1302_v4, 2 }
 0x1b1   : > { %v1367_v6 = vsel %vm850_vm3, %v1364_v30, %v1366_v11 }
 0x1b2   : > { %v1308_v52 = vpop.xlane.xlu1 %1307  ;;  %v1305_v23 = vpop.xlane.xlu0 %1304  ;;  %v1402_v36 = vadd.f32 %v1367_v6, %v1205_v59 }
 0x1b3   : > { %v1371_v51 = vrot.slane %v1308_v52, 2  ;;  %v1369_v28 = vrot.slane %v1305_v23, 2 }
 0x1b5   : > { %v1372_v56 = vsel %vm850_vm3, %v1369_v28, %v1371_v51  ;;  %v1370_v5 = vsel %vm850_vm3, %v1368_v8, %v1369_v28 }
 0x1b6   : > { %v1434_v12 = vpop.xlane.xlu1 %1433  ;;  %v1431_v55 = vpop.xlane.xlu0 %1430  ;;  %v1404_v0 = vadd.f32 %v1372_v56, %v1207_v57  ;;  %v1403_v2 = vadd.f32 %v1370_v5, %v1206_v44 }
 0x1b7   : > { %v1478_v22 = vadd.f32 %v1434_v12, %v3721_v31  ;;  %v1477_v35 = vadd.f32 %v1431_v55, %v3712_v9 }
 0x1ba   : > { %v1440_v63 = vpop.xlane.xlu1 %1439  ;;  %v1437_v53 = vpop.xlane.xlu0 %1436 }
 0x1bb   : > { %v1480_v40 = vadd.f32 %v1440_v63, %v3732_v29  ;;  %v1479_v21 = vadd.f32 %v1437_v53, %v3735_v7  ;;  %1894 = vperm.xlu0 %2467, %v2330_v43  }
 0x1be   : > { %v1446_v24 = vpop.xlane.xlu1 %1445  ;;  %v1443_v14 = vpop.xlane.xlu0 %1442 }
 0x1bf   : > { %v1482_v42 = vadd.f32 %v1446_v24, %v3755_v27  ;;  %v1481_v18 = vadd.f32 %v1443_v14, %v3745_v50 }
 0x1c2   : > { %v1452_v1 = vpop.xlane.xlu1 %1451  ;;  %v1449_v60 = vpop.xlane.xlu0 %1448 }
 0x1c3   : > { %v1484_v31 = vadd.f32 %v1452_v1, %v3765_v25  ;;  %v1483_v9 = vadd.f32 %v1449_v60, %v3768_v47 }
 0x1c6   : > { %v1458_v46 = vpop.xlane.xlu1 %1457  ;;  %v1455_v48 = vpop.xlane.xlu0 %1454 }
 0x1c7   : > { %v3813_v39 = vadd.f32 %v1458_v46, %v1398_v34  ;;  %v3816_v29 = vadd.f32 %v1455_v48, %v3777_v49 }
 0x1ca   : > { %v1464_v7 = vpop.xlane.xlu1 %1463  ;;  %v1461_v45 = vpop.xlane.xlu0 %1460 }
 0x1cb   : > { %v3818_v38 = vadd.f32 %v1464_v7, %v1400_v37  ;;  %v3820_v27 = vadd.f32 %v1461_v45, %v1399_v16 }
 0x1ce   : > { %v1470_v50 = vpop.xlane.xlu1 %1469  ;;  %v1467_v62 = vpop.xlane.xlu0 %1466 }
 0x1cf   : > { %v3822_v3 = vadd.f32 %v1470_v50, %v1402_v36  ;;  %v3824_v25 = vadd.f32 %v1467_v62, %v1401_v26 }
 0x1d2   : > { %v1476_v47 = vpop.xlane.xlu1 %1475  ;;  %v1473_v10 = vpop.xlane.xlu0 %1472 }
 0x1d3   : > { %v3826_v61 = vadd.f32 %v1476_v47, %v1404_v0  ;;  %v3828_v34 = vadd.f32 %v1473_v10, %v1403_v2 }
 0x1d6   : > { %v1527_v49 = vpop.xlane.xlu1 %1526  ;;  %v1524_v30 = vpop.xlane.xlu0 %1523 }
 0x1d7   : > { %v1619_v41 = vrot.slane %v1527_v49, 1  ;;  %v1618_v17 = vrot.slane %v1524_v30, 1 }
 0x1d9   : > { %v1620_v37 = vsel %vm652_vm2, %v1618_v17, %v1619_v41 }
 0x1da   : > { %v1674_v16 = vadd.f32 %v1620_v37, %v1477_v35  ;;  %v1533_v33 = vpop.xlane.xlu1 %1532  ;;  %v1530_v54 = vpop.xlane.xlu0 %1529 }
 0x1db   : > { %v1621_v20 = vrot.slane %v1530_v54, 1  ;;  %v1623_v19 = vrot.slane %v1533_v33, 1 }
 0x1dd   : > { %v1622_v15 = vsel %vm652_vm2, %v1619_v41, %v1621_v20 }
 0x1de   : > { %v1675_v4 = vadd.f32 %v1622_v15, %v1478_v22  ;;  %v1539_v32 = vpop.xlane.xlu1 %1538  ;;  %v1536_v26 = vpop.xlane.xlu0 %1535 }
 0x1df   : > { %v1626_v11 = vrot.slane %v1539_v32, 1  ;;  %v1624_v59 = vrot.slane %v1536_v26, 1 }
 0x1e1   : > { %v1625_v8 = vsel %vm652_vm2, %v1623_v19, %v1624_v59  ;;  %v1627_v6 = vsel %vm652_vm2, %v1624_v59, %v1626_v11 }
 0x1e2   : > { %v1676_v58 = vadd.f32 %v1625_v8, %v1479_v21  ;;  %v1677_v13 = vadd.f32 %v1627_v6, %v1480_v40  ;;  %v1545_v52 = vpop.xlane.xlu1 %1544  ;;  %v1542_v23 = vpop.xlane.xlu0 %1541 }
 0x1e3   : > { %v1629_v36 = vrot.slane %v1545_v52, 1  ;;  %v1628_v51 = vrot.slane %v1542_v23, 1 }
 0x1e5   : > { %v1630_v28 = vsel %vm652_vm2, %v1628_v51, %v1629_v36 }
 0x1e6   : > { %v1678_v57 = vadd.f32 %v1630_v28, %v1481_v18  ;;  %v1551_v44 = vpop.xlane.xlu1 %1550  ;;  %v1548_v56 = vpop.xlane.xlu0 %1547 }
 0x1e7   : > { %v1631_v5 = vrot.slane %v1548_v56, 1  ;;  %v1633_v12 = vrot.slane %v1551_v44, 1 }
 0x1e9   : > { %v1632_v55 = vsel %vm652_vm2, %v1629_v36, %v1631_v5 }
 0x1ea   : > { %v1679_v0 = vadd.f32 %v1632_v55, %v1482_v42  ;;  %v1557_v2 = vpop.xlane.xlu1 %1556  ;;  %v1554_v22 = vpop.xlane.xlu0 %1553 }
 0x1eb   : > { %v1636_v35 = vrot.slane %v1557_v2, 1  ;;  %v1634_v43 = vrot.slane %v1554_v22, 1 }
 0x1ed   : > { %v1635_v63 = vsel %vm652_vm2, %v1633_v12, %v1634_v43  ;;  %v1637_v53 = vsel %vm652_vm2, %v1634_v43, %v1636_v35 }
 0x1ee   : > { %v3838_v40 = vadd.f32 %v1635_v63, %v1483_v9  ;;  %v3840_v21 = vadd.f32 %v1637_v53, %v1484_v31  ;;  %v1724_v24 = vpop.xlane.xlu1 %1723  ;;  %v1721_v14 = vpop.xlane.xlu0 %1720 }
 0x1ef   : > { %v1816_v18 = vrot.slane %v1724_v24, 2  ;;  %v1815_v1 = vrot.slane %v1721_v14, 2 }
 0x1f1   : > { %v1817_v60 = vsel %vm850_vm3, %v1815_v1, %v1816_v18 }
 0x1f2   : > { %v3843_v46 = vadd.f32 %v1817_v60, %v1674_v16  ;;  %v1730_v42 = vpop.xlane.xlu1 %1729  ;;  %v1727_v48 = vpop.xlane.xlu0 %1726 }
 0x1f3   : > { %v1818_v7 = vrot.slane %v1727_v48, 2  ;;  %v1820_v45 = vrot.slane %v1730_v42, 2 }
 0x1f5   : > { %v1819_v50 = vsel %vm850_vm3, %v1816_v18, %v1818_v7 }
 0x1f6   : > { %v3846_v62 = vadd.f32 %v1819_v50, %v1675_v4  ;;  %v1736_v9 = vpop.xlane.xlu1 %1735  ;;  %v1733_v47 = vpop.xlane.xlu0 %1732 }
 0x1f7   : > { %v1823_v31 = vrot.slane %v1736_v9, 2  ;;  %v1821_v10 = vrot.slane %v1733_v47, 2 }
 0x1f9   : > { %v1822_v49 = vsel %vm850_vm3, %v1820_v45, %v1821_v10  ;;  %v1824_v30 = vsel %vm850_vm3, %v1821_v10, %v1823_v31 }
 0x1fa   : > { %v3850_v41 = vadd.f32 %v1822_v49, %v1676_v58  ;;  %v3852_v17 = vadd.f32 %v1824_v30, %v1677_v13  ;;  %v1563_v37 = vpop.xlane.xlu1 %1562  ;;  %v1560_v16 = vpop.xlane.xlu0 %1559 }
 0x1fb   : > { %v1639_v20 = vrot.slane %v1563_v37, 1 }
 0x1fe   : > { %v1739_v33 = vpop.xlane.xlu1 %1738  ;;  %v1566_v54 = vpop.xlane.xlu0 %1565 }
 0x1ff   : > { %v1641_v19 = vrot.slane %v1566_v54, 1  ;;  %v1825_v15 = vrot.slane %v1739_v33, 2 }
 0x201   : > { %v1642_v4 = vsel %vm652_vm2, %v1639_v20, %v1641_v19 }
 0x202   : > { %v3856_v32 = vadd.f32 %v1642_v4, %v3813_v39  ;;  %v1745_v26 = vpop.xlane.xlu1 %1744  ;;  %v1742_v11 = vpop.xlane.xlu0 %1741 }
 0x203   : > { %v1828_v59 = vrot.slane %v1745_v26, 2  ;;  %v1826_v8 = vrot.slane %v1742_v11, 2 }
 0x205   : > { %v1827_v6 = vsel %vm850_vm3, %v1825_v15, %v1826_v8  ;;  %v1829_v58 = vsel %vm850_vm3, %v1826_v8, %v1828_v59 }
 0x206   : > { %v3860_v13 = vadd.f32 %v1827_v6, %v1678_v57  ;;  %v3862_v52 = vadd.f32 %v1829_v58, %v1679_v0  ;;  %v1572_v23 = vpop.xlane.xlu1 %1571  ;;  %v1569_v36 = vpop.xlane.xlu0 %1568 }
 0x207   : > { %v1644_v44 = vrot.slane %v1572_v23, 1  ;;  %v1643_v9 = vrot.slane %v1569_v36, 1 }
 0x20a   : > { %v3864_v51 = vpop.xlane.xlu1 %1747  ;;  %v1575_v28 = vpop.xlane.xlu0 %1574 }
 0x20b   : > { %v1646_v39 = vrot.slane %v1575_v28, 1 }
 0x20d   : > { %v1647_v56 = vsel %vm652_vm2, %v1644_v44, %v1646_v39 }
 0x20e   : > { %v3868_v5 = vadd.f32 %v1647_v56, %v3818_v38  ;;  %v3870_v12 = vpop.xlane.xlu1 %1753  ;;  %v3872_v55 = vpop.xlane.xlu0 %1750 }
 0x212   : > { %v1581_v57 = vpop.xlane.xlu1 %1580  ;;  %v1578_v2 = vpop.xlane.xlu0 %1577 }
 0x213   : > { %v1649_v35 = vrot.slane %v1581_v57, 1  ;;  %v1648_v47 = vrot.slane %v1578_v2, 1 }
 0x215   : > { %v1650_v26 = vsel %vm652_vm2, %v1648_v47, %v1649_v35 }
 0x216   : > { %v1757_v0 = vpop.xlane.xlu1 %1756  ;;  %v1584_v22 = vpop.xlane.xlu0 %1583 }
 0x217   : > { %v1651_v43 = vrot.slane %v1584_v22, 1  ;;  %v1835_v31 = vrot.slane %v1757_v0, 2 }
 0x219   : > { %v1652_v63 = vsel %vm652_vm2, %v1649_v35, %v1651_v43 }
 0x21a   : > { %v3876_v53 = vadd.f32 %v1652_v63, %v3822_v3  ;;  %v3878_v24 = vpop.xlane.xlu1 %1762  ;;  %v3880_v14 = vpop.xlane.xlu0 %1759  ;;  %v1638_v3 = vrot.slane %v1560_v16, 1  ;;  %v1645_v16 = vsel %vm652_vm2, %v1643_v9, %v1644_v44  ;;  %v1686_v44 = vadd.f32 %v1650_v26, %v3824_v25 }
 0x21b   : > { %v1836_v10 = vrot.slane %v3880_v14, 2 }
 0x21c   : > { %v1640_v4 = vsel %vm652_vm2, %v1638_v3, %v1639_v20  ;;  %v1684_v20 = vadd.f32 %v1645_v16, %v3820_v27 }
 0x21d   : > { %v1837_v59 = vsel %vm850_vm3, %v1835_v31, %v1836_v10  ;;  %v1682_v23 = vadd.f32 %v1640_v4, %v3816_v29  ;;  %v1833_v4 = vrot.slane %v3870_v12, 2 }
 0x21e   : > { %v3882_v38 = vpop.xlane.xlu1 %1589  ;;  %v1587_v18 = vpop.xlane.xlu0 %1586 }
 0x21f   : > { %v1654_v37 = vrot.slane %v3882_v38, 1  ;;  %v1653_v33 = vrot.slane %v1587_v18, 1  ;;  %v1879_v39 = vadd.f32 %v1837_v59, %v1682_v23 }
 0x221   : > { %v1655_v36 = vsel %vm652_vm2, %v1653_v33, %v1654_v37 }
 0x222   : > { %v3884_v1 = vpop.xlane.xlu0 %1592  ;;  %v1766_v60 = vpop.xlane.xlu1 %1765  ;;  %v1688_v57 = vadd.f32 %v1655_v36, %v3828_v34 }
 0x223   : > { %v1840_v49 = vrot.slane %v1766_v60, 2 }
 0x226   : > { %v3886_v42 = vpop.xlane.xlu0 %1768  ;;  %v3888_v48 = vpop.xlane.xlu1 %1771 }
 0x227   : > { %v1841_v30 = vrot.slane %v3886_v42, 2 }
 0x229   : > { %v1842_v8 = vsel %vm850_vm3, %v1840_v49, %v1841_v30  ;;  %v1831_v49 = vrot.slane %v3872_v55, 2 }
 0x22a   : > { %v1775_v7 = vpop.xlane.xlu0 %1774  ;;  %v3892_v50 = vpop.xlane.xlu1 %1777  ;;  %v1881_v56 = vadd.f32 %v1842_v8, %v1684_v20 }
 0x22b   : > { %v1846_v54 = vrot.slane %v3892_v50, 2  ;;  %v1845_v19 = vrot.slane %v1775_v7, 2  ;;  %v1834_v59 = vsel %vm850_vm3, %v1831_v49, %v1833_v4 }
 0x22d   : > { %v1847_v28 = vsel %vm850_vm3, %v1845_v19, %v1846_v54 }
 0x22e   : > { %v3890_v45 = vpop.xlane.xlu0 %1780  ;;  %v1784_v11 = vpop.xlane.xlu1 %1783  ;;  %v1883_v2 = vadd.f32 %v1847_v28, %v1686_v44  ;;  %v1878_v44 = vadd.f32 %v1834_v59, %v3840_v21 }
 0x22f   : > { %v1850_v6 = vrot.slane %v1784_v11, 2 }
 0x232   : > { %v3898_v15 = vpop.xlane.xlu0 %1786 }
 0x233   : > { %v1851_v58 = vrot.slane %v3898_v15, 2 }
 0x235   : > { %v1852_v29 = vsel %vm850_vm3, %v1850_v6, %v1851_v58 }
 0x236   : > { %v1885_v63 = vadd.f32 %v1852_v29, %v1688_v57 }
 0x23a   : > { %v3923_v27 = vpop.permute.xlu0 %1894 }
 0x23b   : > { %v1905_v0 = vadd.f32 %v3923_v27, %v1879_v39  ;;  %v1897_v22 = vadd.f32 %v3923_v27, %v3843_v46  ;;  %v1907_v35 = vadd.f32 %v3923_v27, %v1881_v56  ;;  %v1898_v25 = vadd.f32 %v3923_v27, %v3846_v62 }
 0x23c   : > { %v1909_v43 = vadd.f32 %v3923_v27, %v1883_v2  ;;  %v1899_v34 = vadd.f32 %v3923_v27, %v3850_v41  ;;  %v1911_v47 = vadd.f32 %v3923_v27, %v1885_v63  ;;  %v1900_v31 = vadd.f32 %v3923_v27, %v3852_v17 }
 0x23d   : > { %v2339_v18 = vmul.f32 -1.442695, %v1905_v0  ;;  %v2331_v60 = vmul.f32 -1.442695, %v1897_v22  ;;  %v2341_v7 = vmul.f32 -1.442695, %v1907_v35  ;;  %v1901_v33 = vadd.f32 %v3923_v27, %v3860_v13 }
 0x23e   : > { %v2332_v3 = vmul.f32 -1.442695, %v1898_v25  ;;  %v2343_v9 = vmul.f32 -1.442695, %v1909_v43  ;;  %v2333_v46 = vmul.f32 -1.442695, %v1899_v34  ;;  %v1902_v17 = vadd.f32 %v3923_v27, %v3862_v52  ;;  %v1790_v25 = vpop.xlane.xlu1 %1789 }
 0x23f   : > { %2469 = vpow2.f32 %v2339_v18  ;;  %v1830_v62 = vrot.slane %v3864_v51, 2  ;;  %v2345_v41 = vmul.f32 -1.442695, %v1911_v47  ;;  %v2334_v19 = vmul.f32 -1.442695, %v1900_v31 }
 0x240   : > { %2471 = vpow2.f32 %v2331_v60  ;;  %v2335_v26 = vmul.f32 -1.442695, %v1901_v33  ;;  %v1838_v13 = vrot.slane %v3878_v24, 2  ;;  %v2336_v12 = vmul.f32 -1.442695, %v1902_v17 }
 0x241   : > { %2473 = vpow2.f32 %v2341_v7  ;;  %v1832_v16 = vsel %vm850_vm3, %v1830_v62, %v1831_v49  ;;  %v1843_v56 = vrot.slane %v3888_v48, 2  ;;  %v1904_v2 = vadd.f32 %v3923_v27, %v1878_v44 }
 0x242   : > { %2475 = vpow2.f32 %v2332_v3  ;;  %v1877_v55 = vadd.f32 %v1832_v16, %v3838_v40  ;;  %v1839_v24 = vsel %vm850_vm3, %v1836_v10, %v1838_v13  ;;  %v1848_v10 = vrot.slane %v3890_v45, 2 }
 0x243   : > { %2477 = vpow2.f32 %v2343_v9  ;;  %v1880_v21 = vadd.f32 %v1839_v24, %v3856_v32  ;;  %v1844_v14 = vsel %vm850_vm3, %v1841_v30, %v1843_v56  ;;  %v2338_v48 = vmul.f32 -1.442695, %v1904_v2 }
 0x244   : > { %2479 = vpow2.f32 %v2333_v46  ;;  %v1903_v20 = vadd.f32 %v3923_v27, %v1877_v55  ;;  %v1656_v18 = vrot.slane %v3884_v1, 1  ;;  %v1882_v32 = vadd.f32 %v1844_v14, %v3868_v5 }
 0x245   : > { %2481 = vpow2.f32 %v2345_v41  ;;  %v1906_v34 = vadd.f32 %v3923_v27, %v1880_v21  ;;  %v1849_v45 = vsel %vm850_vm3, %v1846_v54, %v1848_v10  ;;  %v1853_v30 = vrot.slane %v1790_v25, 2 }
 0x246   : > { %2483 = vpow2.f32 %v2334_v19  ;;  %v2337_v57 = vmul.f32 -1.442695, %v1903_v20  ;;  %v1908_v9 = vadd.f32 %v3923_v27, %v1882_v32  ;;  %v1657_v1 = vsel %vm652_vm2, %v1654_v37, %v1656_v18 }
 0x247   : > { %2485 = vpow2.f32 %v2335_v26  ;;  %v2340_v3 = vmul.f32 -1.442695, %v1906_v34  ;;  %v1884_v50 = vadd.f32 %v1849_v45, %v3876_v53  ;;  %v1854_v54 = vsel %vm850_vm3, %v1851_v58, %v1853_v30 }
 0x248   : > { %v1689_v62 = vadd.f32 %v1657_v1, %v3826_v61  ;;  %v2342_v49 = vmul.f32 -1.442695, %v1908_v9 }
 0x249   : > { %v2470_v51 = vpop.eup %2469  ;;  %v1910_v38 = vadd.f32 %v3923_v27, %v1884_v50 }
 0x24a   : > { %v2472_v11 = vpop.eup %2471  ;;  %v1969_v8 = vadd.f32 1.0, %v2470_v51  ;;  %v1886_v19 = vadd.f32 %v1854_v54, %v1689_v62 }
 0x24b   : > { %v2474_v6 = vpop.eup %2473  ;;  %v1961_v23 = vadd.f32 1.0, %v2472_v11  ;;  %v2344_v53 = vmul.f32 -1.442695, %v1910_v38 }
 0x24c   : > { %v2476_v36 = vpop.eup %2475  ;;  %2487 = vrcp.f32 %v1969_v8  ;;  %v1971_v28 = vadd.f32 1.0, %v2474_v6  ;;  %v1912_v15 = vadd.f32 %v3923_v27, %v1886_v19 }
 0x24d   : > { %v2478_v52 = vpop.eup %2477  ;;  %2489 = vrcp.f32 %v1961_v23  ;;  %v1962_v40 = vadd.f32 1.0, %v2476_v36 }
 0x24e   : > { %v2480_v39 = vpop.eup %2479  ;;  %2491 = vpow2.f32 %v2336_v12  ;;  %v1973_v29 = vadd.f32 1.0, %v2478_v52  ;;  %v2346_v17 = vmul.f32 -1.442695, %v1912_v15 }
 0x24f   : > { %2493 = vrcp.f32 %v1971_v28  ;;  %v2482_v0 = vpop.eup %2481  ;;  %v1963_v22 = vadd.f32 1.0, %v2480_v39 }
 0x250   : > { %2495 = vrcp.f32 %v1962_v40  ;;  %v2484_v35 = vpop.eup %2483  ;;  %v1975_v43 = vadd.f32 1.0, %v2482_v0 }
 0x251   : > { %2497 = vpow2.f32 %v2337_v57  ;;  %v2486_v63 = vpop.eup %2485  ;;  %v1964_v60 = vadd.f32 1.0, %v2484_v35 }
 0x252   : > { %2499 = vrcp.f32 %v1973_v29  ;;  %v1965_v5 = vadd.f32 1.0, %v2486_v63 }
 0x253   : > { %2501 = vrcp.f32 %v1963_v22  ;;  %v2073_v22 = vlaneseq }
 0x254   : > { %2503 = vpow2.f32 %v2338_v48 }
 0x255   : > { %2505 = vrcp.f32 %v1975_v43  ;;  %v2074_v14 = vand.u32 127, %v2073_v22  ;;  %v2076_v43 = vshrl.u32 %v2073_v22, 7 }
 0x256   : > { %v2488_v7 = vpop.eup %2487  ;;  %2507 = vrcp.f32 %v1964_v60 }
 0x257   : > { %v2490_v42 = vpop.eup %2489  ;;  %2050 = vperm.xlu0 %2467, %v2488_v7   ;;  %2509 = vpow2.f32 %v2340_v3  ;;  %v2079_v48 = vadd.s32 4294967288, %v2074_v14  ;;  %v2077_v18 = vsub.s32 %v2074_v14, %v2076_v43 }
 0x258   : > { %2026 = vperm.xlu1 %2468, %v2490_v42   ;;  %v2492_v47 = vpop.eup %2491  ;;  %2511 = vrcp.f32 %v1965_v5 }
 0x259   : > { %v2494_v46 = vpop.eup %2493  ;;  %v1966_v37 = vadd.f32 1.0, %v2492_v47  ;;  %2513 = vpow2.f32 %v2342_v49  ;;  %v2082_v63 = vsub.s32 %v2079_v48, %v2076_v43 }
 0x25a   : > { %v2496_v31 = vpop.eup %2495 }
 0x25b   : > { %2056 = vperm.xlu0 %2467, %v2494_v46   ;;  %v2498_v41 = vpop.eup %2497  ;;  %2515 = vrcp.f32 %v1966_v37 }
 0x25c   : > { %2029 = vperm.xlu1 %2468, %v2496_v31   ;;  %v2500_v33 = vpop.eup %2499  ;;  %v1967_v61 = vadd.f32 1.0, %v2498_v41  ;;  %2517 = vpow2.f32 %v2344_v53 }
 0x25d   : > { %v2502_v4 = vpop.eup %2501 }
 0x25e   : > { %v2504_v58 = vpop.eup %2503  ;;  %2519 = vrcp.f32 %v1967_v61 }
 0x25f   : > { %2062 = vperm.xlu0 %2467, %v2500_v33   ;;  %v2506_v16 = vpop.eup %2505  ;;  %v1968_v51 = vadd.f32 1.0, %v2504_v58  ;;  %2521 = vpow2.f32 %v2346_v17 }
 0x260   : > { %2032 = vperm.xlu1 %2468, %v2502_v4   ;;  %v2508_v26 = vpop.eup %2507 }
 0x261   : > { %v2510_v55 = vpop.eup %2509  ;;  %2523 = vrcp.f32 %v1968_v51 }
 0x262   : > { %v2512_v11 = vpop.eup %2511  ;;  %v1970_v59 = vadd.f32 1.0, %v2510_v55 }
 0x263   : > { %2068 = vperm.xlu0 %2467, %v2506_v16   ;;  %v2514_v13 = vpop.eup %2513 }
 0x264   : > { %2035 = vperm.xlu1 %2468, %v2508_v26   ;;  %2525 = vrcp.f32 %v1970_v59  ;;  %v1972_v27 = vadd.f32 1.0, %v2514_v13 }
 0x265   : > { %v2516_v8 = vpop.eup %2515 }
 0x266   : > { %v2518_v6 = vpop.eup %2517  ;;  %2527 = vrcp.f32 %v1972_v27 }
 0x267   : > { %v1974_v12 = vadd.f32 1.0, %v2518_v6 }
 0x268   : > { %2038 = vperm.xlu1 %2468, %v2512_v11   ;;  %v2520_v23 = vpop.eup %2519 }
 0x269   : > { %v2522_v20 = vpop.eup %2521  ;;  %2529 = vrcp.f32 %v1974_v12 }
 0x26a   : > { %v1976_v28 = vadd.f32 1.0, %v2522_v20 }
 0x26b   : > { %v2524_v36 = vpop.eup %2523 }
 0x26c   : > { %2041 = vperm.xlu1 %2468, %v2516_v8   ;;  %2531 = vrcp.f32 %v1976_v28 }
 0x26e   : > { %v2526_v52 = vpop.eup %2525 }
 0x270   : > { %2044 = vperm.xlu1 %2468, %v2520_v23   ;;  %v2528_v44 = vpop.eup %2527 }
 0x273   : > { %v2530_v40 = vpop.eup %2529 }
 0x274   : > { %2047 = vperm.xlu1 %2468, %v2524_v36  }
 0x276   : > { %v2532_v39 = vpop.eup %2531 }
 0x278   : > { %2053 = vperm.xlu1 %2468, %v2526_v52  }
 0x27c   : > { %2059 = vperm.xlu1 %2468, %v2528_v44  }
 0x280   : > { %2065 = vperm.xlu1 %2468, %v2530_v40  }
 0x284   : > { %2071 = vperm.xlu1 %2468, %v2532_v39  }
 0x2d6   : > { %v2051_v35 = vpop.permute.xlu0 %2050 }
 0x2d7   : > { %v2027_v24 = vpop.permute.xlu1 %2026  ;;  %v2116_v31 = vrot.slane %v2051_v35, %v2077_v18 }
 0x2d8   : > { %v2078_v1 = vrot.slane %v2027_v24, %v2077_v18 }
 0x2da   : > { %v2057_v25 = vpop.permute.xlu0 %2056 }
 0x2db   : > { %v2030_v56 = vpop.permute.xlu1 %2029  ;;  %v2125_v49 = vrot.slane %v2057_v25, %v2077_v18 }
 0x2dc   : > { %v2083_v45 = vrot.slane %v2030_v56, %v2082_v63 }
 0x2de   : > { %v2063_v7 = vpop.permute.xlu0 %2062  ;;  %v2085_v38 = vsel %vm2084_vm4, %v2083_v45, %v2078_v1 }
 0x2df   : > { %v2033_v57 = vpop.permute.xlu1 %2032  ;;  %v2134_v33 = vrot.slane %v2063_v7, %v2077_v18 }
 0x2e0   : > { %v2089_v30 = vrot.slane %v2033_v57, %v2077_v18 }
 0x2e2   : > { %v2069_v19 = vpop.permute.xlu0 %2068 }
 0x2e3   : > { %v2036_v2 = vpop.permute.xlu1 %2035  ;;  %v2143_v17 = vrot.slane %v2069_v19, %v2077_v18 }
 0x2e4   : > { %v2093_v60 = vrot.slane %v2036_v2, %v2082_v63 }
 0x2e6   : > { %v2094_v5 = vsel %vm2084_vm4, %v2093_v60, %v2089_v30 }
 0x2e7   : > { %v2039_v29 = vpop.permute.xlu1 %2038  ;;  %v2150_v4 = vsel %vm2149_vm5, %v2094_v5, %v2085_v38 }
 0x2e8   : > { %v2098_v9 = vrot.slane %v2039_v29, %v2077_v18 }
 0x2eb   : > { %v2042_v0 = vpop.permute.xlu1 %2041 }
 0x2ec   : > { %v2102_v32 = vrot.slane %v2042_v0, %v2082_v63 }
 0x2ee   : > { %v2103_v54 = vsel %vm2084_vm4, %v2102_v32, %v2098_v9 }
 0x2ef   : > { %v2045_v21 = vpop.permute.xlu1 %2044  ;;  %v2152_v15 = vsel %vm2151_vm6, %v2103_v54, %v2150_v4 }
 0x2f0   : > { %v2107_v46 = vrot.slane %v2045_v21, %v2077_v18 }
 0x2f3   : > { %v2048_v10 = vpop.permute.xlu1 %2047 }
 0x2f4   : > { %v2111_v3 = vrot.slane %v2048_v10, %v2082_v63 }
 0x2f6   : > { %v2112_v41 = vsel %vm2084_vm4, %v2111_v3, %v2107_v46 }
 0x2f7   : > { %v2054_v34 = vpop.permute.xlu1 %2053  ;;  %v2154_v61 = vsel %vm2153_vm7, %v2112_v41, %v2152_v15 }
 0x2f8   : > { %v2120_v47 = vrot.slane %v2054_v34, %v2082_v63 }
 0x2fa   : > { %v2121_v53 = vsel %vm2084_vm4, %v2120_v47, %v2116_v31 }
 0x2fb   : > { %v2060_v42 = vpop.permute.xlu1 %2059  ;;  %v2156_v51 = vsel %vm2155_vm8, %v2121_v53, %v2154_v61 }
 0x2fc   : > { %v2129_v50 = vrot.slane %v2060_v42, %v2082_v63 }
 0x2fe   : > { %v2130_v58 = vsel %vm2084_vm4, %v2129_v50, %v2125_v49 }
 0x2ff   : > { %v2066_v62 = vpop.permute.xlu1 %2065  ;;  %v2158_v11 = vsel %vm2157_vm9, %v2130_v58, %v2156_v51 }
 0x300   : > { %v2138_v37 = vrot.slane %v2066_v62, %v2082_v63 }
 0x302   : > { %v2139_v16 = vsel %vm2084_vm4, %v2138_v37, %v2134_v33 }
 0x303   : > { %v2072_v26 = vpop.permute.xlu1 %2071  ;;  %v2160_v59 = vsel %vm2159_vm10, %v2139_v16, %v2158_v11 }
 0x304   : > { %v2147_v55 = vrot.slane %v2072_v26, %v2082_v63 }
 0x306   : > { %v2148_v13 = vsel %vm2084_vm4, %v2147_v55, %v2143_v17 }
 0x307   : > { %v2162_v8 = vsel %vm2161_vm11, %v2148_v13, %v2160_v59 }
 0x308   : > { %2165 = vst.msk [vmem:[%s336_s9] sm:$0xff] %vm2164_vm12, %v2162_v8 }
 0x309   : > { %2546 = shalt.err (!%p2543_p10)
}
 0x30a   : > { %s2547_s13 = scalar_lea.hbm %s3997_s11, 128  ;;  %s2551_s4 = scalar_lea.hbm %s4057_s5, 512 }
 0x30b   : > { %p2548_p11 = scmp.ne.s32.totalorder %s3997_s11, %s2547_s13  ;;  %p2552_p0 = scmp.lt.u32.totalorder %s3997_s11, %s4057_s5 }
 0x30c   : > { %p2553_p1 = scmp.lt.u32.totalorder %s2551_s4, %s2547_s13  ;;  %p2555_p4 = scmp.lt.u32.totalorder %s2547_s13, %s3997_s11 }
 0x30d   : > { %p2549_p12 = pnand %p2548_p11, %p2715_p3 }
 0x30e   : > { %p2554_p2 = por %p2553_p1, %p2552_p0 }
 0x30f   : > { %p2550_p13 = pneg %p2549_p12 }
 0x310   : > { %p2556_p5 = por %p2555_p4, %p2554_p2 }
 0x312   : > { %p2557_p6 = pnand %p2556_p5, %p2550_p13 }
 0x314   : > { %2560 = shalt.err (!%p2557_p6)
}
 0x315   : > { %2395 = dma.vmem_to_hbm [thread:$0]  (%p2715_p3), %s3999_s23, 128, %s3997_s11, %s2167_s14  }
 0x316 PF: > { %p2401_p7 = scmp.ge.s32.totalorder %s2627_s27, 2  ;;  %s2194_s10 = sand.u32 1, %s2599_s20  }
 0x317   : > { %s2195_s16 = scalar_lea.sflag [#allocation4], %s2194_s10 }
 0x318   : > { %p2398_p9 = pnand %p2401_p7, %p2724_p8 }
 0x31a   : > { %2594 = dma.done.wait (!%p2398_p9), %s2195_s16, 128  }
 0x31b   : > { %2596 = vsyncadd (!%p2398_p9), %s2195_s16, 4294967168  ;;  %s20_s27 = sadd.s32 1, %s2627_s27   ;;  %s4060_s20 = smov %s2603_s21 }
 0x31c   : > { %p17_p10 = scmp.ge.s32.totalorder %s20_s27, 6   ;;  %s4061_s21 = smov %s2607_s22 }
 0x31d   : > { %s4062_s22 = smov %s2733_s12  ;;  %s4063_s23 = smov %s2619_s25 }
 0x31e   : > { %s4064_s24 = smov %s2623_s26  ;;  %s4065_s25 = smov %s4068_s29 }
 0x31f   : > { %s4066_s26 = smov %s4072_s30  ;;  %19 = sbr.rel (!%p17_p10) target bundleno = 8 (0x8), region = 81 }
 0x326   :  { %2200 = vsyncpa [#allocation4], 1 }
 0x327   :  { %2202 = vsyncpa [#allocation4 + $0x1], 1 }

</bundles_post_ra>
